<compile_context>
chip_gen: v6e
topology: v6e:2x2x1
jax: 0.10.0
libtpu: 0.0.40
codegen_flags: <defaults>
</compile_context>

<pallas_src>
import functools
import math

import jax
import jax.numpy as jnp
from jax.experimental import pallas as pl
from jax.experimental.pallas import tpu as pltpu


# ----------------------------------------------------------------------------
# Pallas kernel
# ----------------------------------------------------------------------------
def _lact_block_kernel(
    x_ref,
    n1w_ref, n1b_ref, n2w_ref, n2b_ref, n3w_ref, n3b_ref,
    ain_w_ref, ain_b_ref, aout_w_ref, aout_b_ref,
    W1_ref, W2_ref, W3_ref,
    wq_w_ref, wq_b_ref, wk_w_ref, wk_b_ref, wv_w_ref, wv_b_ref,
    f1w_ref, f1b_ref, f2w_ref, f2b_ref,
    o_ref,
    k_scr, v_scr, q_scr, tbuf,
    W1s, W2s, W3s, v1s, v2s, v3s, W1b, W2b, W3b,
    *, n_head, window_size, chunk_size, attn_tile, fast_lr, momentum, eps,
):
    bf16 = jnp.bfloat16
    x = x_ref[0]                      # (T, D) float32
    T, D = x.shape
    H = n_head
    hd = D // H
    C = chunk_size
    TQ = attn_tile

    def mm(a, b, ca, cb):
        # bf16 operands (MXU fast path), f32 accumulation.  astype is a no-op
        # when the operand is already bf16 (hoisted casts stay hoisted).
        return jax.lax.dot_general(
            a.astype(bf16), b.astype(bf16),
            (((ca,), (cb,)), ((), ())),
            preferred_element_type=jnp.float32)

    def layernorm(v, w_ref, b_ref):
        mu = jnp.mean(v, axis=-1, keepdims=True)
        var = jnp.mean((v - mu) ** 2, axis=-1, keepdims=True)
        return (v - mu) * jax.lax.rsqrt(var + eps) * w_ref[...] + b_ref[...]

    def erf(z):
        # Abramowitz & Stegun 7.1.26 rational approx, |err| < 1.5e-7 (~f32 eps)
        # -> matches PyTorch's exact (erf) GELU within f32.
        a1, a2, a3, a4, a5 = (0.254829592, -0.284496736, 1.421413741,
                              -1.453152027, 1.061405429)
        pconst = 0.3275911
        sgn = jnp.where(z >= 0.0, 1.0, -1.0)
        az = jnp.abs(z)
        t = 1.0 / (1.0 + pconst * az)
        poly = ((((a5 * t + a4) * t + a3) * t + a2) * t + a1) * t
        return sgn * (1.0 - poly * jnp.exp(-az * az))

    # ---------------- 1. banded local window multi-head attention -----------
    xn1 = layernorm(x, n1w_ref, n1b_ref)
    qkv = mm(xn1, ain_w_ref[...], 1, 1) + ain_b_ref[...]         # (T, 3D) f32
    scale = 1.0 / math.sqrt(hd)
    # Head-major (H, T, hd) bf16, built once per batch step so the stripe-loop
    # einsums are leading-batch dots (no per-stripe relayouts from einsum).
    qhm = jnp.transpose((qkv[:, :D] * scale).astype(bf16).reshape(T, H, hd),
                        (1, 0, 2))
    khm = jnp.transpose(qkv[:, D:2 * D].astype(bf16).reshape(T, H, hd),
                        (1, 0, 2))
    vhm = jnp.transpose(qkv[:, 2 * D:].astype(bf16).reshape(T, H, hd),
                        (1, 0, 2))

    for qi in range(T // TQ):                                    # static stripes
        qs = qi * TQ
        k_lo = (max(0, qs - window_size) // 8) * 8               # sublane align
        k_hi = min(T, ((qs + TQ + window_size + 7) // 8) * 8)
        KB = k_hi - k_lo
        qb = qhm[:, qs:qs + TQ, :]                               # (H, TQ, hd)
        kb = khm[:, k_lo:k_hi, :]                                # (H, KB, hd)
        vb = vhm[:, k_lo:k_hi, :]
        scores = jnp.einsum('hqd,hkd->hqk', qb, kb,
                            preferred_element_type=jnp.float32)  # (H, TQ, KB)
        # Band mask from small per-stripe iotas; skipped when fully allowed.
        if max(qs + TQ - 1 - k_lo, k_hi - 1 - qs) > window_size:
            qi_idx = qs + jax.lax.broadcasted_iota(jnp.int32, (TQ, KB), 0)
            kj_idx = k_lo + jax.lax.broadcasted_iota(jnp.int32, (TQ, KB), 1)
            diff = qi_idx - kj_idx
            allowed = (diff <= window_size) & (diff >= -window_size)
            scores = jnp.where(allowed[None, :, :], scores, -1e30)
        m = jnp.max(scores, axis=-1, keepdims=True)
        e = jnp.exp(scores - m)
        probs = e * pl.reciprocal(jnp.sum(e, axis=-1, keepdims=True),
                                  approx=True)
        ctx = jnp.einsum('hqk,hkd->hqd', probs.astype(bf16), vb,
                         preferred_element_type=jnp.float32)     # (H, TQ, hd)
        attn_blk = jnp.transpose(ctx, (1, 0, 2)).reshape(TQ, D)
        tbuf[qs:qs + TQ, :] = (mm(attn_blk, aout_w_ref[...], 1, 1)
                               + aout_b_ref[...])

    # WindowAttention returns (its input + attn); the block adds another residual.
    x = x + xn1 + tbuf[...]

    # ---------------- 2. large-chunk TTT fast-weight layer ------------------
    # TODO(synk): pad_mask (data-dependent valid length) not implemented;
    #             kernel reproduces the pad_mask=None path exactly.
    xn2 = layernorm(x, n2w_ref, n2b_ref)
    q_scr[...] = (mm(xn2, wq_w_ref[...], 1, 1) + wq_b_ref[...]).astype(bf16)
    k_scr[...] = (mm(xn2, wk_w_ref[...], 1, 1) + wk_b_ref[...]).astype(bf16)
    v_scr[...] = (mm(xn2, wv_w_ref[...], 1, 1) + wv_b_ref[...]).astype(bf16)

    # Fast-weight masters + momentum stay f32 in scratch, updated in place;
    # bf16 shadows refreshed once per chunk and reused by all consumers.
    W1s[...] = W1_ref[...]
    W2s[...] = W2_ref[...]
    W3s[...] = W3_ref[...]
    v1s[...] = jnp.zeros_like(v1s)
    v2s[...] = jnp.zeros_like(v2s)
    v3s[...] = jnp.zeros_like(v3s)
    W1b[...] = W1_ref[...].astype(bf16)
    W2b[...] = W2_ref[...].astype(bf16)
    W3b[...] = W3_ref[...].astype(bf16)

    def chunk_body(ci, carry):
        s = pl.multiple_of(ci * C, C)                            # aligned start
        Kc = k_scr[pl.ds(s, C), :]                               # bf16 (C, D)
        Vc = v_scr[pl.ds(s, C), :]
        Qc = q_scr[pl.ds(s, C), :]
        W1c = W1b[...]                                           # bf16 shadows
        W2c = W2b[...]
        W3c = W3b[...]

        # ---- update (manual backward through the SwiGLU fast net) ----
        A = mm(Kc, W1c, 1, 1)                                    # (C, Hid)
        Bm = mm(Kc, W3c, 1, 1)
        sigA = jax.nn.sigmoid(A)
        S = sigA * A
        U = S * Bm
        gO = -Vc                                                 # bf16 (C, D)
        gW2 = mm(gO, U, 0, 0)                                    # (D, Hid)
        gU = mm(gO, W2c, 1, 0)                                   # (C, Hid)
        gS = gU * Bm
        gB = gU * S
        gA = gS * (sigA * (1.0 + A * (1.0 - sigA)))
        gW1 = mm(gA, Kc, 0, 0)                                   # (Hid, D)
        gW3 = mm(gB, Kc, 0, 0)

        v1n = momentum * v1s[...] + gW1
        v2n = momentum * v2s[...] + gW2
        v3n = momentum * v3s[...] + gW3
        v1s[...] = v1n
        v2s[...] = v2n
        v3s[...] = v3n
        W1n = W1s[...] - fast_lr * v1n
        W2n = W2s[...] - fast_lr * v2n
        W3n = W3s[...] - fast_lr * v3n
        W1s[...] = W1n
        W2s[...] = W2n
        W3s[...] = W3n
        W1nb = W1n.astype(bf16)                                  # one cast per
        W2nb = W2n.astype(bf16)                                  # weight per chunk
        W3nb = W3n.astype(bf16)
        W1b[...] = W1nb
        W2b[...] = W2nb
        W3b[...] = W3nb

        # ---- apply updated fast weights to this chunk's queries ----
        Aq = mm(Qc, W1nb, 1, 1)
        Bq = mm(Qc, W3nb, 1, 1)
        Uq = Aq * jax.nn.sigmoid(Aq) * Bq                        # silu(Aq)*Bq
        tbuf[pl.ds(s, C), :] = mm(Uq, W2nb, 1, 1)                # (C, D)
        return carry

    jax.lax.fori_loop(0, T // C, chunk_body, 0)
    x = x + tbuf[...]

    # ---------------- 3. FFN with exact (erf) GELU, striped over T ----------
    xn3 = layernorm(x, n3w_ref, n3b_ref)
    for ti in range(T // TQ):
        s = ti * TQ
        hpre = mm(xn3[s:s + TQ, :], f1w_ref[...], 1, 1) + f1b_ref[...]  # (TQ,4D)
        hact = 0.5 * hpre * (1.0 + erf(hpre * (1.0 / math.sqrt(2.0))))
        y3 = mm(hact, f2w_ref[...], 1, 1) + f2b_ref[...]                # (TQ, D)
        o_ref[0, s:s + TQ, :] = x[s:s + TQ, :] + y3


# ----------------------------------------------------------------------------
# Wrapper
# ----------------------------------------------------------------------------
PARAM_ORDER = [
    "n1_w", "n1_b", "n2_w", "n2_b", "n3_w", "n3_b",
    "attn_in_w", "attn_in_b", "attn_out_w", "attn_out_b",
    "W1", "W2", "W3",
    "wq_w", "wq_b", "wk_w", "wk_b", "wv_w", "wv_b",
    "ffn1_w", "ffn1_b", "ffn2_w", "ffn2_b",
]

# Matmul-only weights stored bf16 at the boundary (halves their VMEM footprint);
# layernorm params, biases and fast-weight init stay f32.
BF16_PARAMS = {"attn_in_w", "attn_out_w", "wq_w", "wk_w", "wv_w",
               "ffn1_w", "ffn2_w"}


def lact_encoder_block(x, params, *, n_head, window_size, chunk_size,
                       attn_tile=None, fast_lr=1.0, momentum=0.9, eps=1e-5):
    B, T, D = x.shape
    assert D % n_head == 0
    assert T % chunk_size == 0, "T must be a multiple of chunk_size"
    assert chunk_size % 16 == 0, "chunk_size must be a multiple of 16 (bf16 sublane)"
    if attn_tile is None:
        attn_tile = 128 if T % 128 == 0 else T
    assert T % attn_tile == 0 and attn_tile % 8 == 0

    hid = params["W1"].shape[0]

    weights = []
    for name in PARAM_ORDER:
        dt = jnp.bfloat16 if name in BF16_PARAMS else jnp.float32
        w = jnp.asarray(params[name], dt)
        if w.ndim == 1:
            w = w.reshape(1, -1)
        weights.append(w)

    in_specs = [pl.BlockSpec((1, T, D), lambda b: (b, 0, 0))]
    # TODO(synk): weight inputs are grid-invariant; single-buffer them
    #             (pipeline_mode=pl.Buffered(1)) to halve their VMEM on v7x.
    in_specs += [pl.BlockSpec(w.shape, lambda b: (0, 0)) for w in weights]

    scratch_shapes = [
        pltpu.VMEM((T, D), jnp.bfloat16),    # K  (TTT, bf16 matmul operand)
        pltpu.VMEM((T, D), jnp.bfloat16),    # V
        pltpu.VMEM((T, D), jnp.bfloat16),    # Q
        pltpu.VMEM((T, D), jnp.float32),     # tbuf: attn out, then TTT out
        pltpu.VMEM((hid, D), jnp.float32),   # W1 master
        pltpu.VMEM((D, hid), jnp.float32),   # W2 master
        pltpu.VMEM((hid, D), jnp.float32),   # W3 master
        pltpu.VMEM((hid, D), jnp.float32),   # momentum v1
        pltpu.VMEM((D, hid), jnp.float32),   # momentum v2
        pltpu.VMEM((hid, D), jnp.float32),   # momentum v3
        pltpu.VMEM((hid, D), jnp.bfloat16),  # W1 bf16 shadow
        pltpu.VMEM((D, hid), jnp.bfloat16),  # W2 bf16 shadow
        pltpu.VMEM((hid, D), jnp.bfloat16),  # W3 bf16 shadow
    ]

    kernel = functools.partial(
        _lact_block_kernel, n_head=n_head, window_size=window_size,
        chunk_size=chunk_size, attn_tile=attn_tile,
        fast_lr=fast_lr, momentum=momentum, eps=eps)

    # TODO(synk): if B < number of TensorCores (v7x, small batch), split the
    #             attention/FFN stages into a second pallas_call gridded over
    #             (B, T/attn_tile) so both cores stay busy; the sequential TTT
    #             chunk loop stays per-batch.
    return pl.pallas_call(
        kernel,
        out_shape=jax.ShapeDtypeStruct((B, T, D), jnp.float32),
        grid=(B,),
        in_specs=in_specs,
        out_specs=pl.BlockSpec((1, T, D), lambda b: (b, 0, 0)),
        scratch_shapes=scratch_shapes,
        compiler_params=pltpu.CompilerParams(
            dimension_semantics=("parallel",),      # batch across TCs
            vmem_limit_bytes=40 * 1024 * 1024),     # v7x-safe budget
    )(x.astype(jnp.float32), *weights)


# ----------------------------------------------------------------------------
# Pure-JAX reference (mirrors the PyTorch forward, pad_mask=None)
# ----------------------------------------------------------------------------
def ref_forward(x, p, *, n_head, window_size, chunk_size,
                fast_lr=1.0, momentum=0.9, eps=1e-5):
    B, T, D = x.shape
    hd = D // n_head

    def ln(v, w, b):
        mu = v.mean(-1, keepdims=True)
        var = ((v - mu) ** 2).mean(-1, keepdims=True)
        return (v - mu) / jnp.sqrt(var + eps) * w + b

    # window attention
    xn1 = ln(x, p["n1_w"], p["n1_b"])
    qkv = xn1 @ p["attn_in_w"].T + p["attn_in_b"]
    q, k, v = qkv[..., :D], qkv[..., D:2 * D], qkv[..., 2 * D:]
    qh = q.reshape(B, T, n_head, hd).transpose(0, 2, 1, 3)
    kh = k.reshape(B, T, n_head, hd).transpose(0, 2, 1, 3)
    vh = v.reshape(B, T, n_head, hd).transpose(0, 2, 1, 3)
    scores = (qh / math.sqrt(hd)) @ kh.transpose(0, 1, 3, 2)
    idx = jnp.arange(T)
    diff = idx[:, None] - idx[None, :]
    allowed = (diff <= window_size) & (diff >= -window_size)
    scores = jnp.where(allowed, scores, -1e30)
    attn = jax.nn.softmax(scores, axis=-1) @ vh
    attn = attn.transpose(0, 2, 1, 3).reshape(B, T, D)
    attn = attn @ p["attn_out_w"].T + p["attn_out_b"]
    x = x + (xn1 + attn)

    # TTT fast-weight layer
    xn2 = ln(x, p["n2_w"], p["n2_b"])
    Q = xn2 @ p["wq_w"].T + p["wq_b"]
    K = xn2 @ p["wk_w"].T + p["wk_b"]
    V = xn2 @ p["wv_w"].T + p["wv_b"]
    y2 = jnp.zeros_like(Q)
    for b in range(B):
        W1f, W2f, W3f = p["W1"], p["W2"], p["W3"]
        v1 = jnp.zeros_like(W1f)
        v2 = jnp.zeros_like(W2f)
        v3 = jnp.zeros_like(W3f)
        outs = []
        for s in range(0, T, chunk_size):
            Kc, Vc, Qc = (K[b, s:s + chunk_size], V[b, s:s + chunk_size],
                          Q[b, s:s + chunk_size])
            A = Kc @ W1f.T
            Bm = Kc @ W3f.T
            sigA = jax.nn.sigmoid(A)
            S = sigA * A
            U = S * Bm
            gO = -Vc
            gW2 = gO.T @ U
            gU = gO @ W2f
            gS = gU * Bm
            gB = gU * S
            gA = gS * (sigA * (1 + A * (1 - sigA)))
            gW1 = gA.T @ Kc
            gW3 = gB.T @ Kc
            v1 = momentum * v1 + gW1
            v2 = momentum * v2 + gW2
            v3 = momentum * v3 + gW3
            W1f = W1f - fast_lr * v1
            W2f = W2f - fast_lr * v2
            W3f = W3f - fast_lr * v3
            Aq = Qc @ W1f.T
            Bq = Qc @ W3f.T
            Sq = Aq * jax.nn.sigmoid(Aq)
            outs.append((Sq * Bq) @ W2f.T)
        y2 = y2.at[b].set(jnp.concatenate(outs, axis=0))
    x = x + y2

    # FFN
    xn3 = ln(x, p["n3_w"], p["n3_b"])
    h = xn3 @ p["ffn1_w"].T + p["ffn1_b"]
    h = jax.nn.gelu(h, approximate=False)
    y3 = h @ p["ffn2_w"].T + p["ffn2_b"]
    return x + y3


# ----------------------------------------------------------------------------
# Main
# ----------------------------------------------------------------------------
if __name__ == "__main__":
    # D=128 -> lane-dense blocks; chunk_size multiple of 16 for bf16 tiles.
    # (Production would use T>=2048, chunk_size>=128, attn_tile=128/256.)
    B, T, D = 2, 32, 128
    n_head, window_size, chunk_size, attn_tile = 4, 4, 16, 16
    hidden, ffn = 2 * D, 4 * D

    key = jax.random.PRNGKey(0)
    keys = iter(jax.random.split(key, 32))

    def rnd(shape, scale):
        return jax.random.normal(next(keys), shape, jnp.float32) * scale

    params = {
        "n1_w": jnp.ones((D,), jnp.float32), "n1_b": jnp.zeros((D,), jnp.float32),
        "n2_w": jnp.ones((D,), jnp.float32), "n2_b": jnp.zeros((D,), jnp.float32),
        "n3_w": jnp.ones((D,), jnp.float32), "n3_b": jnp.zeros((D,), jnp.float32),
        "attn_in_w": rnd((3 * D, D), 0.08), "attn_in_b": rnd((3 * D,), 0.02),
        "attn_out_w": rnd((D, D), 0.08), "attn_out_b": rnd((D,), 0.02),
        "W1": rnd((hidden, D), 1.0 / math.sqrt(D)),
        "W2": rnd((D, hidden), 1.0 / math.sqrt(hidden)),
        "W3": rnd((hidden, D), 1.0 / math.sqrt(D)),
        "wq_w": rnd((D, D), 0.02), "wq_b": rnd((D,), 0.01),
        "wk_w": rnd((D, D), 0.02), "wk_b": rnd((D,), 0.01),
        "wv_w": rnd((D, D), 0.02), "wv_b": rnd((D,), 0.01),
        "ffn1_w": rnd((ffn, D), 1.0 / math.sqrt(D)), "ffn1_b": rnd((ffn,), 0.02),
        "ffn2_w": rnd((D, ffn), 1.0 / math.sqrt(ffn)), "ffn2_b": rnd((D,), 0.02),
    }
    x = jax.random.normal(next(keys), (B, T, D), jnp.float32)

    out = lact_encoder_block(x, params, n_head=n_head, window_size=window_size,
                             chunk_size=chunk_size, attn_tile=attn_tile)
    out = jax.block_until_ready(out)

    ref = ref_forward(x, params, n_head=n_head, window_size=window_size,
                      chunk_size=chunk_size)
    rel = float(jnp.max(jnp.abs(out - ref)) / (jnp.max(jnp.abs(ref)) + 1e-6))
    assert rel < 2e-2, f"kernel/reference mismatch, rel={rel}"
    print("KERNEL_OK")
</pallas_src>

<mosaic_0001>
module attributes {stable_mosaic.version = 11 : i64} {
  func.func @_lact_block_kernel(%arg0: i32, %arg1: memref<1x32x128xf32, #tpu.memory_space<vmem>>, %arg2: memref<1x128xf32, #tpu.memory_space<vmem>>, %arg3: memref<1x128xf32, #tpu.memory_space<vmem>>, %arg4: memref<1x128xf32, #tpu.memory_space<vmem>>, %arg5: memref<1x128xf32, #tpu.memory_space<vmem>>, %arg6: memref<1x128xf32, #tpu.memory_space<vmem>>, %arg7: memref<1x128xf32, #tpu.memory_space<vmem>>, %arg8: memref<384x128xbf16, #tpu.memory_space<vmem>>, %arg9: memref<1x384xf32, #tpu.memory_space<vmem>>, %arg10: memref<128x128xbf16, #tpu.memory_space<vmem>>, %arg11: memref<1x128xf32, #tpu.memory_space<vmem>>, %arg12: memref<256x128xf32, #tpu.memory_space<vmem>>, %arg13: memref<128x256xf32, #tpu.memory_space<vmem>>, %arg14: memref<256x128xf32, #tpu.memory_space<vmem>>, %arg15: memref<128x128xbf16, #tpu.memory_space<vmem>>, %arg16: memref<1x128xf32, #tpu.memory_space<vmem>>, %arg17: memref<128x128xbf16, #tpu.memory_space<vmem>>, %arg18: memref<1x128xf32, #tpu.memory_space<vmem>>, %arg19: memref<128x128xbf16, #tpu.memory_space<vmem>>, %arg20: memref<1x128xf32, #tpu.memory_space<vmem>>, %arg21: memref<512x128xbf16, #tpu.memory_space<vmem>>, %arg22: memref<1x512xf32, #tpu.memory_space<vmem>>, %arg23: memref<128x512xbf16, #tpu.memory_space<vmem>>, %arg24: memref<1x128xf32, #tpu.memory_space<vmem>>, %arg25: memref<1x32x128xf32, #tpu.memory_space<vmem>>, %arg26: memref<32x128xbf16, #tpu.memory_space<vmem>>, %arg27: memref<32x128xbf16, #tpu.memory_space<vmem>>, %arg28: memref<32x128xbf16, #tpu.memory_space<vmem>>, %arg29: memref<32x128xf32, #tpu.memory_space<vmem>>, %arg30: memref<256x128xf32, #tpu.memory_space<vmem>>, %arg31: memref<128x256xf32, #tpu.memory_space<vmem>>, %arg32: memref<256x128xf32, #tpu.memory_space<vmem>>, %arg33: memref<256x128xf32, #tpu.memory_space<vmem>>, %arg34: memref<128x256xf32, #tpu.memory_space<vmem>>, %arg35: memref<256x128xf32, #tpu.memory_space<vmem>>, %arg36: memref<256x128xbf16, #tpu.memory_space<vmem>>, %arg37: memref<128x256xbf16, #tpu.memory_space<vmem>>, %arg38: memref<256x128xbf16, #tpu.memory_space<vmem>>) attributes {dimension_semantics = [#tpu.dimension_semantics<parallel>], iteration_bounds = array<i64: 2>, scalar_prefetch = 0 : i64, scratch_operands = 13 : i64, tpu.core_type = #tpu.core_type<tc>, window_params = [{transform_indices = @transform_0, window_bounds = array<i64: 1, 32, 128>}, {pipeline_mode = #tpu.pipeline_mode<synchronous>, transform_indices = @transform_1, window_bounds = array<i64: 1, 128>}, {pipeline_mode = #tpu.pipeline_mode<synchronous>, transform_indices = @transform_2, window_bounds = array<i64: 1, 128>}, {pipeline_mode = #tpu.pipeline_mode<synchronous>, transform_indices = @transform_3, window_bounds = array<i64: 1, 128>}, {pipeline_mode = #tpu.pipeline_mode<synchronous>, transform_indices = @transform_4, window_bounds = array<i64: 1, 128>}, {pipeline_mode = #tpu.pipeline_mode<synchronous>, transform_indices = @transform_5, window_bounds = array<i64: 1, 128>}, {pipeline_mode = #tpu.pipeline_mode<synchronous>, transform_indices = @transform_6, window_bounds = array<i64: 1, 128>}, {pipeline_mode = #tpu.pipeline_mode<synchronous>, transform_indices = @transform_7, window_bounds = array<i64: 384, 128>}, {pipeline_mode = #tpu.pipeline_mode<synchronous>, transform_indices = @transform_8, window_bounds = array<i64: 1, 384>}, {pipeline_mode = #tpu.pipeline_mode<synchronous>, transform_indices = @transform_9, window_bounds = array<i64: 128, 128>}, {pipeline_mode = #tpu.pipeline_mode<synchronous>, transform_indices = @transform_10, window_bounds = array<i64: 1, 128>}, {pipeline_mode = #tpu.pipeline_mode<synchronous>, transform_indices = @transform_11, window_bounds = array<i64: 256, 128>}, {pipeline_mode = #tpu.pipeline_mode<synchronous>, transform_indices = @transform_12, window_bounds = array<i64: 128, 256>}, {pipeline_mode = #tpu.pipeline_mode<synchronous>, transform_indices = @transform_13, window_bounds = array<i64: 256, 128>}, {pipeline_mode = #tpu.pipeline_mode<synchronous>, transform_indices = @transform_14, window_bounds = array<i64: 128, 128>}, {pipeline_mode = #tpu.pipeline_mode<synchronous>, transform_indices = @transform_15, window_bounds = array<i64: 1, 128>}, {pipeline_mode = #tpu.pipeline_mode<synchronous>, transform_indices = @transform_16, window_bounds = array<i64: 128, 128>}, {pipeline_mode = #tpu.pipeline_mode<synchronous>, transform_indices = @transform_17, window_bounds = array<i64: 1, 128>}, {pipeline_mode = #tpu.pipeline_mode<synchronous>, transform_indices = @transform_18, window_bounds = array<i64: 128, 128>}, {pipeline_mode = #tpu.pipeline_mode<synchronous>, transform_indices = @transform_19, window_bounds = array<i64: 1, 128>}, {pipeline_mode = #tpu.pipeline_mode<synchronous>, transform_indices = @transform_20, window_bounds = array<i64: 512, 128>}, {pipeline_mode = #tpu.pipeline_mode<synchronous>, transform_indices = @transform_21, window_bounds = array<i64: 1, 512>}, {pipeline_mode = #tpu.pipeline_mode<synchronous>, transform_indices = @transform_22, window_bounds = array<i64: 128, 512>}, {pipeline_mode = #tpu.pipeline_mode<synchronous>, transform_indices = @transform_23, window_bounds = array<i64: 1, 128>}, {transform_indices = @transform_24, window_bounds = array<i64: 1, 32, 128>}]} {
    %c0 = arith.constant 0 : index
    %c0_0 = arith.constant 0 : index
    %c0_1 = arith.constant 0 : index
    %0 = vector.load %arg1[%c0, %c0_0, %c0_1] : memref<1x32x128xf32, #tpu.memory_space<vmem>>, vector<1x32x128xf32>
    %1 = vector.shape_cast %0 : vector<1x32x128xf32> to vector<32x128xf32>
    %cst = arith.constant dense<0.000000e+00> : vector<32xf32>
    %2 = vector.multi_reduction <add>, %1, %cst [1] : vector<32x128xf32> to vector<32xf32>
    %3 = vector.shape_cast %2 : vector<32xf32> to vector<32x1xf32>
    %cst_2 = arith.constant 1.280000e+02 : f32
    %4 = vector.broadcast %cst_2 : f32 to vector<32x1xf32>
    %5 = arith.divf %3, %4 : vector<32x1xf32>
    %6 = vector.broadcast %5 : vector<32x1xf32> to vector<32x128xf32>
    %7 = arith.subf %1, %6 : vector<32x128xf32>
    %8 = arith.mulf %7, %7 : vector<32x128xf32>
    %cst_3 = arith.constant dense<0.000000e+00> : vector<32xf32>
    %9 = vector.multi_reduction <add>, %8, %cst_3 [1] : vector<32x128xf32> to vector<32xf32>
    %10 = vector.shape_cast %9 : vector<32xf32> to vector<32x1xf32>
    %cst_4 = arith.constant 1.280000e+02 : f32
    %11 = vector.broadcast %cst_4 : f32 to vector<32x1xf32>
    %12 = arith.divf %10, %11 : vector<32x1xf32>
    %13 = vector.broadcast %5 : vector<32x1xf32> to vector<32x128xf32>
    %14 = arith.subf %1, %13 : vector<32x128xf32>
    %cst_5 = arith.constant 9.99999974E-6 : f32
    %15 = vector.broadcast %cst_5 : f32 to vector<32x1xf32>
    %16 = arith.addf %12, %15 : vector<32x1xf32>
    %17 = math.rsqrt %16 : vector<32x1xf32>
    %18 = vector.broadcast %17 : vector<32x1xf32> to vector<32x128xf32>
    %19 = arith.mulf %14, %18 : vector<32x128xf32>
    %c0_6 = arith.constant 0 : index
    %c0_7 = arith.constant 0 : index
    %20 = vector.load %arg2[%c0_6, %c0_7] : memref<1x128xf32, #tpu.memory_space<vmem>>, vector<1x128xf32>
    %21 = vector.broadcast %20 : vector<1x128xf32> to vector<32x128xf32>
    %22 = arith.mulf %19, %21 : vector<32x128xf32>
    %c0_8 = arith.constant 0 : index
    %c0_9 = arith.constant 0 : index
    %23 = vector.load %arg3[%c0_8, %c0_9] : memref<1x128xf32, #tpu.memory_space<vmem>>, vector<1x128xf32>
    %24 = vector.broadcast %23 : vector<1x128xf32> to vector<32x128xf32>
    %25 = arith.addf %22, %24 : vector<32x128xf32>
    %c0_10 = arith.constant 0 : index
    %c0_11 = arith.constant 0 : index
    %26 = vector.load %arg8[%c0_10, %c0_11] : memref<384x128xbf16, #tpu.memory_space<vmem>>, vector<384x128xbf16>
    %27 = arith.truncf %25 : vector<32x128xf32> to vector<32x128xbf16>
    %cst_12 = arith.constant dense<0.000000e+00> : vector<32x384xf32>
    %28 = tpu.matmul %27, %26, %cst_12 {dimension_numbers = #tpu.dot_dimension_numbers<[1], [1], [0], [0], [0, 0, 1, 0], [], []>} : vector<32x128xbf16>, vector<384x128xbf16>, vector<32x384xf32> -> vector<32x384xf32>
    %c0_13 = arith.constant 0 : index
    %c0_14 = arith.constant 0 : index
    %29 = vector.load %arg9[%c0_13, %c0_14] : memref<1x384xf32, #tpu.memory_space<vmem>>, vector<1x384xf32>
    %30 = vector.broadcast %29 : vector<1x384xf32> to vector<32x384xf32>
    %31 = arith.addf %28, %30 : vector<32x384xf32>
    %32 = vector.extract_strided_slice %31 {offsets = [0, 0], sizes = [32, 128], strides = [1, 1]} : vector<32x384xf32> to vector<32x128xf32>
    %cst_15 = arith.constant 0.176776692 : f32
    %33 = vector.broadcast %cst_15 : f32 to vector<32x128xf32>
    %34 = arith.mulf %32, %33 : vector<32x128xf32>
    %35 = arith.truncf %34 : vector<32x128xf32> to vector<32x128xbf16>
    %36 = vector.shape_cast %35 : vector<32x128xbf16> to vector<32x4x32xbf16>
    %37 = tpu.transpose %36, [1, 0, 2] : vector<32x4x32xbf16> -> vector<4x32x32xbf16>
    %38 = vector.extract_strided_slice %31 {offsets = [0, 128], sizes = [32, 128], strides = [1, 1]} : vector<32x384xf32> to vector<32x128xf32>
    %39 = arith.truncf %38 : vector<32x128xf32> to vector<32x128xbf16>
    %40 = vector.shape_cast %39 : vector<32x128xbf16> to vector<32x4x32xbf16>
    %41 = tpu.transpose %40, [1, 0, 2] : vector<32x4x32xbf16> -> vector<4x32x32xbf16>
    %42 = vector.extract_strided_slice %31 {offsets = [0, 256], sizes = [32, 128], strides = [1, 1]} : vector<32x384xf32> to vector<32x128xf32>
    %43 = arith.truncf %42 : vector<32x128xf32> to vector<32x128xbf16>
    %44 = vector.shape_cast %43 : vector<32x128xbf16> to vector<32x4x32xbf16>
    %45 = tpu.transpose %44, [1, 0, 2] : vector<32x4x32xbf16> -> vector<4x32x32xbf16>
    %46 = vector.extract_strided_slice %37 {offsets = [0, 0, 0], sizes = [4, 16, 32], strides = [1, 1, 1]} : vector<4x32x32xbf16> to vector<4x16x32xbf16>
    %47 = vector.extract_strided_slice %41 {offsets = [0, 0, 0], sizes = [4, 24, 32], strides = [1, 1, 1]} : vector<4x32x32xbf16> to vector<4x24x32xbf16>
    %48 = vector.extract_strided_slice %45 {offsets = [0, 0, 0], sizes = [4, 24, 32], strides = [1, 1, 1]} : vector<4x32x32xbf16> to vector<4x24x32xbf16>
    "tpu.trace_start"() <{level = 10 : i32, message = "hqd,hkd->hqk"}> : () -> ()
    %cst_16 = arith.constant dense<0.000000e+00> : vector<4x16x24xf32>
    %49 = tpu.matmul %46, %47, %cst_16 {dimension_numbers = #tpu.dot_dimension_numbers<[2], [2], [1], [1], [0, 0, 0, 1, 1, 1], [0], [0]>} : vector<4x16x32xbf16>, vector<4x24x32xbf16>, vector<4x16x24xf32> -> vector<4x16x24xf32>
    "tpu.trace_stop"() : () -> ()
    %50 = tpu.iota {dimensions = array<i32: 0>} : vector<16x24xi32>
    %c0_i32 = arith.constant 0 : i32
    %51 = vector.broadcast %c0_i32 : i32 to vector<16x24xi32>
    %52 = arith.addi %51, %50 : vector<16x24xi32>
    %53 = tpu.iota {dimensions = array<i32: 1>} : vector<16x24xi32>
    %c0_i32_17 = arith.constant 0 : i32
    %54 = vector.broadcast %c0_i32_17 : i32 to vector<16x24xi32>
    %55 = arith.addi %54, %53 : vector<16x24xi32>
    %56 = arith.subi %52, %55 : vector<16x24xi32>
    %c4_i32 = arith.constant 4 : i32
    %57 = vector.broadcast %c4_i32 : i32 to vector<16x24xi32>
    %58 = arith.cmpi sle, %56, %57 : vector<16x24xi32>
    %c-4_i32 = arith.constant -4 : i32
    %59 = vector.broadcast %c-4_i32 : i32 to vector<16x24xi32>
    %60 = arith.cmpi sge, %56, %59 : vector<16x24xi32>
    %61 = arith.andi %58, %60 : vector<16x24xi1>
    %62 = vector.shape_cast %61 : vector<16x24xi1> to vector<1x16x24xi1>
    %cst_18 = arith.constant -1.000000e+30 : f32
    %63 = vector.shape_cast %62 : vector<1x16x24xi1> to vector<1x16x24xi1>
    %64 = vector.broadcast %63 : vector<1x16x24xi1> to vector<4x16x24xi1>
    %65 = vector.broadcast %cst_18 : f32 to vector<4x16x24xf32>
    %66 = arith.select %64, %49, %65 : vector<4x16x24xi1>, vector<4x16x24xf32>
    %cst_19 = arith.constant dense<0xFF800000> : vector<4x16xf32>
    %67 = vector.multi_reduction <maximumf>, %66, %cst_19 [2] : vector<4x16x24xf32> to vector<4x16xf32>
    %68 = vector.shape_cast %67 : vector<4x16xf32> to vector<4x16x1xf32>
    %69 = vector.broadcast %68 : vector<4x16x1xf32> to vector<4x16x24xf32>
    %70 = arith.subf %66, %69 : vector<4x16x24xf32>
    %71 = math.exp %70 : vector<4x16x24xf32>
    %cst_20 = arith.constant dense<0.000000e+00> : vector<4x16xf32>
    %72 = vector.multi_reduction <add>, %71, %cst_20 [2] : vector<4x16x24xf32> to vector<4x16xf32>
    %73 = vector.shape_cast %72 : vector<4x16xf32> to vector<4x16x1xf32>
    %74 = tpu.reciprocal %73 {approx = true} : vector<4x16x1xf32> -> vector<4x16x1xf32>
    %75 = vector.broadcast %74 : vector<4x16x1xf32> to vector<4x16x24xf32>
    %76 = arith.mulf %71, %75 : vector<4x16x24xf32>
    %77 = arith.truncf %76 : vector<4x16x24xf32> to vector<4x16x24xbf16>
    "tpu.trace_start"() <{level = 10 : i32, message = "hqk,hkd->hqd"}> : () -> ()
    %cst_21 = arith.constant dense<0.000000e+00> : vector<4x16x32xf32>
    %78 = tpu.matmul %77, %48, %cst_21 {dimension_numbers = #tpu.dot_dimension_numbers<[2], [1], [1], [2], [0, 0, 0, 1, 1, 2], [0], [0]>} : vector<4x16x24xbf16>, vector<4x24x32xbf16>, vector<4x16x32xf32> -> vector<4x16x32xf32>
    "tpu.trace_stop"() : () -> ()
    %79 = tpu.transpose %78, [1, 0, 2] : vector<4x16x32xf32> -> vector<16x4x32xf32>
    %80 = vector.shape_cast %79 : vector<16x4x32xf32> to vector<16x128xf32>
    %c0_22 = arith.constant 0 : index
    %c0_23 = arith.constant 0 : index
    %81 = vector.load %arg10[%c0_22, %c0_23] : memref<128x128xbf16, #tpu.memory_space<vmem>>, vector<128x128xbf16>
    %82 = arith.truncf %80 : vector<16x128xf32> to vector<16x128xbf16>
    %cst_24 = arith.constant dense<0.000000e+00> : vector<16x128xf32>
    %83 = tpu.matmul %82, %81, %cst_24 {dimension_numbers = #tpu.dot_dimension_numbers<[1], [1], [0], [0], [0, 0, 1, 0], [], []>} : vector<16x128xbf16>, vector<128x128xbf16>, vector<16x128xf32> -> vector<16x128xf32>
    %c0_25 = arith.constant 0 : index
    %c0_26 = arith.constant 0 : index
    %84 = vector.load %arg11[%c0_25, %c0_26] : memref<1x128xf32, #tpu.memory_space<vmem>>, vector<1x128xf32>
    %85 = vector.broadcast %84 : vector<1x128xf32> to vector<16x128xf32>
    %86 = arith.addf %83, %85 : vector<16x128xf32>
    %c0_27 = arith.constant 0 : index
    %c0_28 = arith.constant 0 : index
    %87 = vector.load %arg29[%c0_27, %c0_28] : memref<32x128xf32, #tpu.memory_space<vmem>>, vector<16x128xf32>
    tpu.vector_store %arg29[%c0_27, %c0_28], %86 {strides = array<i32>} : memref<32x128xf32, #tpu.memory_space<vmem>>, vector<16x128xf32>,
    %88 = vector.extract_strided_slice %37 {offsets = [0, 16, 0], sizes = [4, 16, 32], strides = [1, 1, 1]} : vector<4x32x32xbf16> to vector<4x16x32xbf16>
    %89 = vector.extract_strided_slice %41 {offsets = [0, 8, 0], sizes = [4, 24, 32], strides = [1, 1, 1]} : vector<4x32x32xbf16> to vector<4x24x32xbf16>
    %90 = vector.extract_strided_slice %45 {offsets = [0, 8, 0], sizes = [4, 24, 32], strides = [1, 1, 1]} : vector<4x32x32xbf16> to vector<4x24x32xbf16>
    "tpu.trace_start"() <{level = 10 : i32, message = "hqd,hkd->hqk"}> : () -> ()
    %cst_29 = arith.constant dense<0.000000e+00> : vector<4x16x24xf32>
    %91 = tpu.matmul %88, %89, %cst_29 {dimension_numbers = #tpu.dot_dimension_numbers<[2], [2], [1], [1], [0, 0, 0, 1, 1, 1], [0], [0]>} : vector<4x16x32xbf16>, vector<4x24x32xbf16>, vector<4x16x24xf32> -> vector<4x16x24xf32>
    "tpu.trace_stop"() : () -> ()
    %92 = tpu.iota {dimensions = array<i32: 0>} : vector<16x24xi32>
    %c16_i32 = arith.constant 16 : i32
    %93 = vector.broadcast %c16_i32 : i32 to vector<16x24xi32>
    %94 = arith.addi %93, %92 : vector<16x24xi32>
    %95 = tpu.iota {dimensions = array<i32: 1>} : vector<16x24xi32>
    %c8_i32 = arith.constant 8 : i32
    %96 = vector.broadcast %c8_i32 : i32 to vector<16x24xi32>
    %97 = arith.addi %96, %95 : vector<16x24xi32>
    %98 = arith.subi %94, %97 : vector<16x24xi32>
    %c4_i32_30 = arith.constant 4 : i32
    %99 = vector.broadcast %c4_i32_30 : i32 to vector<16x24xi32>
    %100 = arith.cmpi sle, %98, %99 : vector<16x24xi32>
    %c-4_i32_31 = arith.constant -4 : i32
    %101 = vector.broadcast %c-4_i32_31 : i32 to vector<16x24xi32>
    %102 = arith.cmpi sge, %98, %101 : vector<16x24xi32>
    %103 = arith.andi %100, %102 : vector<16x24xi1>
    %104 = vector.shape_cast %103 : vector<16x24xi1> to vector<1x16x24xi1>
    %cst_32 = arith.constant -1.000000e+30 : f32
    %105 = vector.shape_cast %104 : vector<1x16x24xi1> to vector<1x16x24xi1>
    %106 = vector.broadcast %105 : vector<1x16x24xi1> to vector<4x16x24xi1>
    %107 = vector.broadcast %cst_32 : f32 to vector<4x16x24xf32>
    %108 = arith.select %106, %91, %107 : vector<4x16x24xi1>, vector<4x16x24xf32>
    %cst_33 = arith.constant dense<0xFF800000> : vector<4x16xf32>
    %109 = vector.multi_reduction <maximumf>, %108, %cst_33 [2] : vector<4x16x24xf32> to vector<4x16xf32>
    %110 = vector.shape_cast %109 : vector<4x16xf32> to vector<4x16x1xf32>
    %111 = vector.broadcast %110 : vector<4x16x1xf32> to vector<4x16x24xf32>
    %112 = arith.subf %108, %111 : vector<4x16x24xf32>
    %113 = math.exp %112 : vector<4x16x24xf32>
    %cst_34 = arith.constant dense<0.000000e+00> : vector<4x16xf32>
    %114 = vector.multi_reduction <add>, %113, %cst_34 [2] : vector<4x16x24xf32> to vector<4x16xf32>
    %115 = vector.shape_cast %114 : vector<4x16xf32> to vector<4x16x1xf32>
    %116 = tpu.reciprocal %115 {approx = true} : vector<4x16x1xf32> -> vector<4x16x1xf32>
    %117 = vector.broadcast %116 : vector<4x16x1xf32> to vector<4x16x24xf32>
    %118 = arith.mulf %113, %117 : vector<4x16x24xf32>
    %119 = arith.truncf %118 : vector<4x16x24xf32> to vector<4x16x24xbf16>
    "tpu.trace_start"() <{level = 10 : i32, message = "hqk,hkd->hqd"}> : () -> ()
    %cst_35 = arith.constant dense<0.000000e+00> : vector<4x16x32xf32>
    %120 = tpu.matmul %119, %90, %cst_35 {dimension_numbers = #tpu.dot_dimension_numbers<[2], [1], [1], [2], [0, 0, 0, 1, 1, 2], [0], [0]>} : vector<4x16x24xbf16>, vector<4x24x32xbf16>, vector<4x16x32xf32> -> vector<4x16x32xf32>
    "tpu.trace_stop"() : () -> ()
    %121 = tpu.transpose %120, [1, 0, 2] : vector<4x16x32xf32> -> vector<16x4x32xf32>
    %122 = vector.shape_cast %121 : vector<16x4x32xf32> to vector<16x128xf32>
    %c0_36 = arith.constant 0 : index
    %c0_37 = arith.constant 0 : index
    %123 = vector.load %arg10[%c0_36, %c0_37] : memref<128x128xbf16, #tpu.memory_space<vmem>>, vector<128x128xbf16>
    %124 = arith.truncf %122 : vector<16x128xf32> to vector<16x128xbf16>
    %cst_38 = arith.constant dense<0.000000e+00> : vector<16x128xf32>
    %125 = tpu.matmul %124, %123, %cst_38 {dimension_numbers = #tpu.dot_dimension_numbers<[1], [1], [0], [0], [0, 0, 1, 0], [], []>} : vector<16x128xbf16>, vector<128x128xbf16>, vector<16x128xf32> -> vector<16x128xf32>
    %c0_39 = arith.constant 0 : index
    %c0_40 = arith.constant 0 : index
    %126 = vector.load %arg11[%c0_39, %c0_40] : memref<1x128xf32, #tpu.memory_space<vmem>>, vector<1x128xf32>
    %127 = vector.broadcast %126 : vector<1x128xf32> to vector<16x128xf32>
    %128 = arith.addf %125, %127 : vector<16x128xf32>
    %c16 = arith.constant 16 : index
    %c0_41 = arith.constant 0 : index
    %129 = vector.load %arg29[%c16, %c0_41] : memref<32x128xf32, #tpu.memory_space<vmem>>, vector<16x128xf32>
    tpu.vector_store %arg29[%c16, %c0_41], %128 {strides = array<i32>} : memref<32x128xf32, #tpu.memory_space<vmem>>, vector<16x128xf32>,
    %130 = arith.addf %1, %25 : vector<32x128xf32>
    %c0_42 = arith.constant 0 : index
    %c0_43 = arith.constant 0 : index
    %131 = vector.load %arg29[%c0_42, %c0_43] : memref<32x128xf32, #tpu.memory_space<vmem>>, vector<32x128xf32>
    %132 = arith.addf %130, %131 : vector<32x128xf32>
    %cst_44 = arith.constant dense<0.000000e+00> : vector<32xf32>
    %133 = vector.multi_reduction <add>, %132, %cst_44 [1] : vector<32x128xf32> to vector<32xf32>
    %134 = vector.shape_cast %133 : vector<32xf32> to vector<32x1xf32>
    %cst_45 = arith.constant 1.280000e+02 : f32
    %135 = vector.broadcast %cst_45 : f32 to vector<32x1xf32>
    %136 = arith.divf %134, %135 : vector<32x1xf32>
    %137 = vector.broadcast %136 : vector<32x1xf32> to vector<32x128xf32>
    %138 = arith.subf %132, %137 : vector<32x128xf32>
    %139 = arith.mulf %138, %138 : vector<32x128xf32>
    %cst_46 = arith.constant dense<0.000000e+00> : vector<32xf32>
    %140 = vector.multi_reduction <add>, %139, %cst_46 [1] : vector<32x128xf32> to vector<32xf32>
    %141 = vector.shape_cast %140 : vector<32xf32> to vector<32x1xf32>
    %cst_47 = arith.constant 1.280000e+02 : f32
    %142 = vector.broadcast %cst_47 : f32 to vector<32x1xf32>
    %143 = arith.divf %141, %142 : vector<32x1xf32>
    %144 = vector.broadcast %136 : vector<32x1xf32> to vector<32x128xf32>
    %145 = arith.subf %132, %144 : vector<32x128xf32>
    %cst_48 = arith.constant 9.99999974E-6 : f32
    %146 = vector.broadcast %cst_48 : f32 to vector<32x1xf32>
    %147 = arith.addf %143, %146 : vector<32x1xf32>
    %148 = math.rsqrt %147 : vector<32x1xf32>
    %149 = vector.broadcast %148 : vector<32x1xf32> to vector<32x128xf32>
    %150 = arith.mulf %145, %149 : vector<32x128xf32>
    %c0_49 = arith.constant 0 : index
    %c0_50 = arith.constant 0 : index
    %151 = vector.load %arg4[%c0_49, %c0_50] : memref<1x128xf32, #tpu.memory_space<vmem>>, vector<1x128xf32>
    %152 = vector.broadcast %151 : vector<1x128xf32> to vector<32x128xf32>
    %153 = arith.mulf %150, %152 : vector<32x128xf32>
    %c0_51 = arith.constant 0 : index
    %c0_52 = arith.constant 0 : index
    %154 = vector.load %arg5[%c0_51, %c0_52] : memref<1x128xf32, #tpu.memory_space<vmem>>, vector<1x128xf32>
    %155 = vector.broadcast %154 : vector<1x128xf32> to vector<32x128xf32>
    %156 = arith.addf %153, %155 : vector<32x128xf32>
    %c0_53 = arith.constant 0 : index
    %c0_54 = arith.constant 0 : index
    %157 = vector.load %arg15[%c0_53, %c0_54] : memref<128x128xbf16, #tpu.memory_space<vmem>>, vector<128x128xbf16>
    %158 = arith.truncf %156 : vector<32x128xf32> to vector<32x128xbf16>
    %cst_55 = arith.constant dense<0.000000e+00> : vector<32x128xf32>
    %159 = tpu.matmul %158, %157, %cst_55 {dimension_numbers = #tpu.dot_dimension_numbers<[1], [1], [0], [0], [0, 0, 1, 0], [], []>} : vector<32x128xbf16>, vector<128x128xbf16>, vector<32x128xf32> -> vector<32x128xf32>
    %c0_56 = arith.constant 0 : index
    %c0_57 = arith.constant 0 : index
    %160 = vector.load %arg16[%c0_56, %c0_57] : memref<1x128xf32, #tpu.memory_space<vmem>>, vector<1x128xf32>
    %161 = vector.broadcast %160 : vector<1x128xf32> to vector<32x128xf32>
    %162 = arith.addf %159, %161 : vector<32x128xf32>
    %163 = arith.truncf %162 : vector<32x128xf32> to vector<32x128xbf16>
    %c0_58 = arith.constant 0 : index
    %c0_59 = arith.constant 0 : index
    %164 = vector.load %arg28[%c0_58, %c0_59] : memref<32x128xbf16, #tpu.memory_space<vmem>>, vector<32x128xbf16>
    tpu.vector_store %arg28[%c0_58, %c0_59], %163 {strides = array<i32>} : memref<32x128xbf16, #tpu.memory_space<vmem>>, vector<32x128xbf16>,
    %c0_60 = arith.constant 0 : index
    %c0_61 = arith.constant 0 : index
    %165 = vector.load %arg17[%c0_60, %c0_61] : memref<128x128xbf16, #tpu.memory_space<vmem>>, vector<128x128xbf16>
    %166 = arith.truncf %156 : vector<32x128xf32> to vector<32x128xbf16>
    %cst_62 = arith.constant dense<0.000000e+00> : vector<32x128xf32>
    %167 = tpu.matmul %166, %165, %cst_62 {dimension_numbers = #tpu.dot_dimension_numbers<[1], [1], [0], [0], [0, 0, 1, 0], [], []>} : vector<32x128xbf16>, vector<128x128xbf16>, vector<32x128xf32> -> vector<32x128xf32>
    %c0_63 = arith.constant 0 : index
    %c0_64 = arith.constant 0 : index
    %168 = vector.load %arg18[%c0_63, %c0_64] : memref<1x128xf32, #tpu.memory_space<vmem>>, vector<1x128xf32>
    %169 = vector.broadcast %168 : vector<1x128xf32> to vector<32x128xf32>
    %170 = arith.addf %167, %169 : vector<32x128xf32>
    %171 = arith.truncf %170 : vector<32x128xf32> to vector<32x128xbf16>
    %c0_65 = arith.constant 0 : index
    %c0_66 = arith.constant 0 : index
    %172 = vector.load %arg26[%c0_65, %c0_66] : memref<32x128xbf16, #tpu.memory_space<vmem>>, vector<32x128xbf16>
    tpu.vector_store %arg26[%c0_65, %c0_66], %171 {strides = array<i32>} : memref<32x128xbf16, #tpu.memory_space<vmem>>, vector<32x128xbf16>,
    %c0_67 = arith.constant 0 : index
    %c0_68 = arith.constant 0 : index
    %173 = vector.load %arg19[%c0_67, %c0_68] : memref<128x128xbf16, #tpu.memory_space<vmem>>, vector<128x128xbf16>
    %174 = arith.truncf %156 : vector<32x128xf32> to vector<32x128xbf16>
    %cst_69 = arith.constant dense<0.000000e+00> : vector<32x128xf32>
    %175 = tpu.matmul %174, %173, %cst_69 {dimension_numbers = #tpu.dot_dimension_numbers<[1], [1], [0], [0], [0, 0, 1, 0], [], []>} : vector<32x128xbf16>, vector<128x128xbf16>, vector<32x128xf32> -> vector<32x128xf32>
    %c0_70 = arith.constant 0 : index
    %c0_71 = arith.constant 0 : index
    %176 = vector.load %arg20[%c0_70, %c0_71] : memref<1x128xf32, #tpu.memory_space<vmem>>, vector<1x128xf32>
    %177 = vector.broadcast %176 : vector<1x128xf32> to vector<32x128xf32>
    %178 = arith.addf %175, %177 : vector<32x128xf32>
    %179 = arith.truncf %178 : vector<32x128xf32> to vector<32x128xbf16>
    %c0_72 = arith.constant 0 : index
    %c0_73 = arith.constant 0 : index
    %180 = vector.load %arg27[%c0_72, %c0_73] : memref<32x128xbf16, #tpu.memory_space<vmem>>, vector<32x128xbf16>
    tpu.vector_store %arg27[%c0_72, %c0_73], %179 {strides = array<i32>} : memref<32x128xbf16, #tpu.memory_space<vmem>>, vector<32x128xbf16>,
    %c0_74 = arith.constant 0 : index
    %c0_75 = arith.constant 0 : index
    %181 = vector.load %arg12[%c0_74, %c0_75] : memref<256x128xf32, #tpu.memory_space<vmem>>, vector<256x128xf32>
    %c0_76 = arith.constant 0 : index
    %c0_77 = arith.constant 0 : index
    %182 = vector.load %arg30[%c0_76, %c0_77] : memref<256x128xf32, #tpu.memory_space<vmem>>, vector<256x128xf32>
    tpu.vector_store %arg30[%c0_76, %c0_77], %181 {strides = array<i32>} : memref<256x128xf32, #tpu.memory_space<vmem>>, vector<256x128xf32>,
    %c0_78 = arith.constant 0 : index
    %c0_79 = arith.constant 0 : index
    %183 = vector.load %arg13[%c0_78, %c0_79] : memref<128x256xf32, #tpu.memory_space<vmem>>, vector<128x256xf32>
    %c0_80 = arith.constant 0 : index
    %c0_81 = arith.constant 0 : index
    %184 = vector.load %arg31[%c0_80, %c0_81] : memref<128x256xf32, #tpu.memory_space<vmem>>, vector<128x256xf32>
    tpu.vector_store %arg31[%c0_80, %c0_81], %183 {strides = array<i32>} : memref<128x256xf32, #tpu.memory_space<vmem>>, vector<128x256xf32>,
    %c0_82 = arith.constant 0 : index
    %c0_83 = arith.constant 0 : index
    %185 = vector.load %arg14[%c0_82, %c0_83] : memref<256x128xf32, #tpu.memory_space<vmem>>, vector<256x128xf32>
    %c0_84 = arith.constant 0 : index
    %c0_85 = arith.constant 0 : index
    %186 = vector.load %arg32[%c0_84, %c0_85] : memref<256x128xf32, #tpu.memory_space<vmem>>, vector<256x128xf32>
    tpu.vector_store %arg32[%c0_84, %c0_85], %185 {strides = array<i32>} : memref<256x128xf32, #tpu.memory_space<vmem>>, vector<256x128xf32>,
    %cst_86 = arith.constant 0.000000e+00 : f32
    %187 = vector.broadcast %cst_86 : f32 to vector<256x128xf32>
    %c0_87 = arith.constant 0 : index
    %c0_88 = arith.constant 0 : index
    %188 = vector.load %arg33[%c0_87, %c0_88] : memref<256x128xf32, #tpu.memory_space<vmem>>, vector<256x128xf32>
    tpu.vector_store %arg33[%c0_87, %c0_88], %187 {strides = array<i32>} : memref<256x128xf32, #tpu.memory_space<vmem>>, vector<256x128xf32>,
    %cst_89 = arith.constant 0.000000e+00 : f32
    %189 = vector.broadcast %cst_89 : f32 to vector<128x256xf32>
    %c0_90 = arith.constant 0 : index
    %c0_91 = arith.constant 0 : index
    %190 = vector.load %arg34[%c0_90, %c0_91] : memref<128x256xf32, #tpu.memory_space<vmem>>, vector<128x256xf32>
    tpu.vector_store %arg34[%c0_90, %c0_91], %189 {strides = array<i32>} : memref<128x256xf32, #tpu.memory_space<vmem>>, vector<128x256xf32>,
    %cst_92 = arith.constant 0.000000e+00 : f32
    %191 = vector.broadcast %cst_92 : f32 to vector<256x128xf32>
    %c0_93 = arith.constant 0 : index
    %c0_94 = arith.constant 0 : index
    %192 = vector.load %arg35[%c0_93, %c0_94] : memref<256x128xf32, #tpu.memory_space<vmem>>, vector<256x128xf32>
    tpu.vector_store %arg35[%c0_93, %c0_94], %191 {strides = array<i32>} : memref<256x128xf32, #tpu.memory_space<vmem>>, vector<256x128xf32>,
    %c0_95 = arith.constant 0 : index
    %c0_96 = arith.constant 0 : index
    %193 = vector.load %arg12[%c0_95, %c0_96] : memref<256x128xf32, #tpu.memory_space<vmem>>, vector<256x128xf32>
    %194 = arith.truncf %193 : vector<256x128xf32> to vector<256x128xbf16>
    %c0_97 = arith.constant 0 : index
    %c0_98 = arith.constant 0 : index
    %195 = vector.load %arg36[%c0_97, %c0_98] : memref<256x128xbf16, #tpu.memory_space<vmem>>, vector<256x128xbf16>
    tpu.vector_store %arg36[%c0_97, %c0_98], %194 {strides = array<i32>} : memref<256x128xbf16, #tpu.memory_space<vmem>>, vector<256x128xbf16>,
    %c0_99 = arith.constant 0 : index
    %c0_100 = arith.constant 0 : index
    %196 = vector.load %arg13[%c0_99, %c0_100] : memref<128x256xf32, #tpu.memory_space<vmem>>, vector<128x256xf32>
    %197 = arith.truncf %196 : vector<128x256xf32> to vector<128x256xbf16>
    %c0_101 = arith.constant 0 : index
    %c0_102 = arith.constant 0 : index
    %198 = vector.load %arg37[%c0_101, %c0_102] : memref<128x256xbf16, #tpu.memory_space<vmem>>, vector<128x256xbf16>
    tpu.vector_store %arg37[%c0_101, %c0_102], %197 {strides = array<i32>} : memref<128x256xbf16, #tpu.memory_space<vmem>>, vector<128x256xbf16>,
    %c0_103 = arith.constant 0 : index
    %c0_104 = arith.constant 0 : index
    %199 = vector.load %arg14[%c0_103, %c0_104] : memref<256x128xf32, #tpu.memory_space<vmem>>, vector<256x128xf32>
    %200 = arith.truncf %199 : vector<256x128xf32> to vector<256x128xbf16>
    %c0_105 = arith.constant 0 : index
    %c0_106 = arith.constant 0 : index
    %201 = vector.load %arg38[%c0_105, %c0_106] : memref<256x128xbf16, #tpu.memory_space<vmem>>, vector<256x128xbf16>
    tpu.vector_store %arg38[%c0_105, %c0_106], %200 {strides = array<i32>} : memref<256x128xbf16, #tpu.memory_space<vmem>>, vector<256x128xbf16>,
    %c0_i32_107 = arith.constant 0 : i32
    %c2_i32 = arith.constant 2 : i32
    %202 = arith.addi %c0_i32_107, %c2_i32 : i32
    %c1_i32 = arith.constant 1 : i32
    scf.for %arg39 = %c0_i32_107 to %202 step %c1_i32  : i32 {
      %c16_i32_178 = arith.constant 16 : i32
      %347 = arith.muli %arg39, %c16_i32_178 : i32
      %348 = tpu.assume_multiple %347, 16 : i32
      %349 = arith.index_cast %348 : i32 to index
      %c0_179 = arith.constant 0 : index
      %350 = vector.load %arg26[%349, %c0_179] : memref<32x128xbf16, #tpu.memory_space<vmem>>, vector<16x128xbf16>
      %351 = arith.index_cast %348 : i32 to index
      %c0_180 = arith.constant 0 : index
      %352 = vector.load %arg27[%351, %c0_180] : memref<32x128xbf16, #tpu.memory_space<vmem>>, vector<16x128xbf16>
      %353 = arith.index_cast %348 : i32 to index
      %c0_181 = arith.constant 0 : index
      %354 = vector.load %arg28[%353, %c0_181] : memref<32x128xbf16, #tpu.memory_space<vmem>>, vector<16x128xbf16>
      %c0_182 = arith.constant 0 : index
      %c0_183 = arith.constant 0 : index
      %355 = vector.load %arg36[%c0_182, %c0_183] : memref<256x128xbf16, #tpu.memory_space<vmem>>, vector<256x128xbf16>
      %c0_184 = arith.constant 0 : index
      %c0_185 = arith.constant 0 : index
      %356 = vector.load %arg37[%c0_184, %c0_185] : memref<128x256xbf16, #tpu.memory_space<vmem>>, vector<128x256xbf16>
      %c0_186 = arith.constant 0 : index
      %c0_187 = arith.constant 0 : index
      %357 = vector.load %arg38[%c0_186, %c0_187] : memref<256x128xbf16, #tpu.memory_space<vmem>>, vector<256x128xbf16>
      %cst_188 = arith.constant dense<0.000000e+00> : vector<16x256xf32>
      %358 = tpu.matmul %350, %355, %cst_188 {dimension_numbers = #tpu.dot_dimension_numbers<[1], [1], [0], [0], [0, 0, 1, 0], [], []>} : vector<16x128xbf16>, vector<256x128xbf16>, vector<16x256xf32> -> vector<16x256xf32>
      %cst_189 = arith.constant dense<0.000000e+00> : vector<16x256xf32>
      %359 = tpu.matmul %350, %357, %cst_189 {dimension_numbers = #tpu.dot_dimension_numbers<[1], [1], [0], [0], [0, 0, 1, 0], [], []>} : vector<16x128xbf16>, vector<256x128xbf16>, vector<16x256xf32> -> vector<16x256xf32>
      %360 = arith.negf %358 : vector<16x256xf32>
      %361 = math.exp %360 : vector<16x256xf32>
      %cst_190 = arith.constant 1.000000e+00 : f32
      %362 = vector.broadcast %cst_190 : f32 to vector<16x256xf32>
      %363 = arith.addf %362, %361 : vector<16x256xf32>
      %364 = arith.divf %362, %363 : vector<16x256xf32>
      %365 = arith.mulf %364, %358 : vector<16x256xf32>
      %366 = arith.mulf %365, %359 : vector<16x256xf32>
      %cst_191 = arith.constant 0.000000e+00 : bf16
      %367 = vector.broadcast %cst_191 : bf16 to vector<16x128xbf16>
      %368 = arith.subf %367, %352 : vector<16x128xbf16>
      %369 = arith.truncf %366 : vector<16x256xf32> to vector<16x256xbf16>
      %cst_192 = arith.constant dense<0.000000e+00> : vector<128x256xf32>
      %370 = tpu.matmul %368, %369, %cst_192 {dimension_numbers = #tpu.dot_dimension_numbers<[0], [0], [1], [1], [0, 1, 1, 1], [], []>} : vector<16x128xbf16>, vector<16x256xbf16>, vector<128x256xf32> -> vector<128x256xf32>
      %cst_193 = arith.constant dense<0.000000e+00> : vector<16x256xf32>
      %371 = tpu.matmul %368, %356, %cst_193 {dimension_numbers = #tpu.dot_dimension_numbers<[1], [0], [0], [1], [0, 0, 1, 1], [], []>} : vector<16x128xbf16>, vector<128x256xbf16>, vector<16x256xf32> -> vector<16x256xf32>
      %372 = arith.mulf %371, %359 : vector<16x256xf32>
      %373 = arith.mulf %371, %365 : vector<16x256xf32>
      %cst_194 = arith.constant 1.000000e+00 : f32
      %374 = vector.broadcast %cst_194 : f32 to vector<16x256xf32>
      %375 = arith.subf %374, %364 : vector<16x256xf32>
      %376 = arith.mulf %358, %375 : vector<16x256xf32>
      %cst_195 = arith.constant 1.000000e+00 : f32
      %377 = vector.broadcast %cst_195 : f32 to vector<16x256xf32>
      %378 = arith.addf %377, %376 : vector<16x256xf32>
      %379 = arith.mulf %364, %378 : vector<16x256xf32>
      %380 = arith.mulf %372, %379 : vector<16x256xf32>
      %381 = arith.truncf %380 : vector<16x256xf32> to vector<16x256xbf16>
      %cst_196 = arith.constant dense<0.000000e+00> : vector<256x128xf32>
      %382 = tpu.matmul %381, %350, %cst_196 {dimension_numbers = #tpu.dot_dimension_numbers<[0], [0], [1], [1], [0, 1, 1, 1], [], []>} : vector<16x256xbf16>, vector<16x128xbf16>, vector<256x128xf32> -> vector<256x128xf32>
      %383 = arith.truncf %373 : vector<16x256xf32> to vector<16x256xbf16>
      %cst_197 = arith.constant dense<0.000000e+00> : vector<256x128xf32>
      %384 = tpu.matmul %383, %350, %cst_197 {dimension_numbers = #tpu.dot_dimension_numbers<[0], [0], [1], [1], [0, 1, 1, 1], [], []>} : vector<16x256xbf16>, vector<16x128xbf16>, vector<256x128xf32> -> vector<256x128xf32>
      %c0_198 = arith.constant 0 : index
      %c0_199 = arith.constant 0 : index
      %385 = vector.load %arg33[%c0_198, %c0_199] : memref<256x128xf32, #tpu.memory_space<vmem>>, vector<256x128xf32>
      %cst_200 = arith.constant 0.899999976 : f32
      %386 = vector.broadcast %cst_200 : f32 to vector<256x128xf32>
      %387 = arith.mulf %386, %385 : vector<256x128xf32>
      %388 = arith.addf %387, %382 : vector<256x128xf32>
      %c0_201 = arith.constant 0 : index
      %c0_202 = arith.constant 0 : index
      %389 = vector.load %arg34[%c0_201, %c0_202] : memref<128x256xf32, #tpu.memory_space<vmem>>, vector<128x256xf32>
      %cst_203 = arith.constant 0.899999976 : f32
      %390 = vector.broadcast %cst_203 : f32 to vector<128x256xf32>
      %391 = arith.mulf %390, %389 : vector<128x256xf32>
      %392 = arith.addf %391, %370 : vector<128x256xf32>
      %c0_204 = arith.constant 0 : index
      %c0_205 = arith.constant 0 : index
      %393 = vector.load %arg35[%c0_204, %c0_205] : memref<256x128xf32, #tpu.memory_space<vmem>>, vector<256x128xf32>
      %cst_206 = arith.constant 0.899999976 : f32
      %394 = vector.broadcast %cst_206 : f32 to vector<256x128xf32>
      %395 = arith.mulf %394, %393 : vector<256x128xf32>
      %396 = arith.addf %395, %384 : vector<256x128xf32>
      %c0_207 = arith.constant 0 : index
      %c0_208 = arith.constant 0 : index
      %397 = vector.load %arg33[%c0_207, %c0_208] : memref<256x128xf32, #tpu.memory_space<vmem>>, vector<256x128xf32>
      tpu.vector_store %arg33[%c0_207, %c0_208], %388 {strides = array<i32>} : memref<256x128xf32, #tpu.memory_space<vmem>>, vector<256x128xf32>,
      %c0_209 = arith.constant 0 : index
      %c0_210 = arith.constant 0 : index
      %398 = vector.load %arg34[%c0_209, %c0_210] : memref<128x256xf32, #tpu.memory_space<vmem>>, vector<128x256xf32>
      tpu.vector_store %arg34[%c0_209, %c0_210], %392 {strides = array<i32>} : memref<128x256xf32, #tpu.memory_space<vmem>>, vector<128x256xf32>,
      %c0_211 = arith.constant 0 : index
      %c0_212 = arith.constant 0 : index
      %399 = vector.load %arg35[%c0_211, %c0_212] : memref<256x128xf32, #tpu.memory_space<vmem>>, vector<256x128xf32>
      tpu.vector_store %arg35[%c0_211, %c0_212], %396 {strides = array<i32>} : memref<256x128xf32, #tpu.memory_space<vmem>>, vector<256x128xf32>,
      %c0_213 = arith.constant 0 : index
      %c0_214 = arith.constant 0 : index
      %400 = vector.load %arg30[%c0_213, %c0_214] : memref<256x128xf32, #tpu.memory_space<vmem>>, vector<256x128xf32>
      %cst_215 = arith.constant 1.000000e+00 : f32
      %401 = vector.broadcast %cst_215 : f32 to vector<256x128xf32>
      %402 = arith.mulf %401, %388 : vector<256x128xf32>
      %403 = arith.subf %400, %402 : vector<256x128xf32>
      %c0_216 = arith.constant 0 : index
      %c0_217 = arith.constant 0 : index
      %404 = vector.load %arg31[%c0_216, %c0_217] : memref<128x256xf32, #tpu.memory_space<vmem>>, vector<128x256xf32>
      %cst_218 = arith.constant 1.000000e+00 : f32
      %405 = vector.broadcast %cst_218 : f32 to vector<128x256xf32>
      %406 = arith.mulf %405, %392 : vector<128x256xf32>
      %407 = arith.subf %404, %406 : vector<128x256xf32>
      %c0_219 = arith.constant 0 : index
      %c0_220 = arith.constant 0 : index
      %408 = vector.load %arg32[%c0_219, %c0_220] : memref<256x128xf32, #tpu.memory_space<vmem>>, vector<256x128xf32>
      %cst_221 = arith.constant 1.000000e+00 : f32
      %409 = vector.broadcast %cst_221 : f32 to vector<256x128xf32>
      %410 = arith.mulf %409, %396 : vector<256x128xf32>
      %411 = arith.subf %408, %410 : vector<256x128xf32>
      %c0_222 = arith.constant 0 : index
      %c0_223 = arith.constant 0 : index
      %412 = vector.load %arg30[%c0_222, %c0_223] : memref<256x128xf32, #tpu.memory_space<vmem>>, vector<256x128xf32>
      tpu.vector_store %arg30[%c0_222, %c0_223], %403 {strides = array<i32>} : memref<256x128xf32, #tpu.memory_space<vmem>>, vector<256x128xf32>,
      %c0_224 = arith.constant 0 : index
      %c0_225 = arith.constant 0 : index
      %413 = vector.load %arg31[%c0_224, %c0_225] : memref<128x256xf32, #tpu.memory_space<vmem>>, vector<128x256xf32>
      tpu.vector_store %arg31[%c0_224, %c0_225], %407 {strides = array<i32>} : memref<128x256xf32, #tpu.memory_space<vmem>>, vector<128x256xf32>,
      %c0_226 = arith.constant 0 : index
      %c0_227 = arith.constant 0 : index
      %414 = vector.load %arg32[%c0_226, %c0_227] : memref<256x128xf32, #tpu.memory_space<vmem>>, vector<256x128xf32>
      tpu.vector_store %arg32[%c0_226, %c0_227], %411 {strides = array<i32>} : memref<256x128xf32, #tpu.memory_space<vmem>>, vector<256x128xf32>,
      %415 = arith.truncf %403 : vector<256x128xf32> to vector<256x128xbf16>
      %416 = arith.truncf %407 : vector<128x256xf32> to vector<128x256xbf16>
      %417 = arith.truncf %411 : vector<256x128xf32> to vector<256x128xbf16>
      %c0_228 = arith.constant 0 : index
      %c0_229 = arith.constant 0 : index
      %418 = vector.load %arg36[%c0_228, %c0_229] : memref<256x128xbf16, #tpu.memory_space<vmem>>, vector<256x128xbf16>
      tpu.vector_store %arg36[%c0_228, %c0_229], %415 {strides = array<i32>} : memref<256x128xbf16, #tpu.memory_space<vmem>>, vector<256x128xbf16>,
      %c0_230 = arith.constant 0 : index
      %c0_231 = arith.constant 0 : index
      %419 = vector.load %arg37[%c0_230, %c0_231] : memref<128x256xbf16, #tpu.memory_space<vmem>>, vector<128x256xbf16>
      tpu.vector_store %arg37[%c0_230, %c0_231], %416 {strides = array<i32>} : memref<128x256xbf16, #tpu.memory_space<vmem>>, vector<128x256xbf16>,
      %c0_232 = arith.constant 0 : index
      %c0_233 = arith.constant 0 : index
      %420 = vector.load %arg38[%c0_232, %c0_233] : memref<256x128xbf16, #tpu.memory_space<vmem>>, vector<256x128xbf16>
      tpu.vector_store %arg38[%c0_232, %c0_233], %417 {strides = array<i32>} : memref<256x128xbf16, #tpu.memory_space<vmem>>, vector<256x128xbf16>,
      %cst_234 = arith.constant dense<0.000000e+00> : vector<16x256xf32>
      %421 = tpu.matmul %354, %415, %cst_234 {dimension_numbers = #tpu.dot_dimension_numbers<[1], [1], [0], [0], [0, 0, 1, 0], [], []>} : vector<16x128xbf16>, vector<256x128xbf16>, vector<16x256xf32> -> vector<16x256xf32>
      %cst_235 = arith.constant dense<0.000000e+00> : vector<16x256xf32>
      %422 = tpu.matmul %354, %417, %cst_235 {dimension_numbers = #tpu.dot_dimension_numbers<[1], [1], [0], [0], [0, 0, 1, 0], [], []>} : vector<16x128xbf16>, vector<256x128xbf16>, vector<16x256xf32> -> vector<16x256xf32>
      %423 = arith.negf %421 : vector<16x256xf32>
      %424 = math.exp %423 : vector<16x256xf32>
      %cst_236 = arith.constant 1.000000e+00 : f32
      %425 = vector.broadcast %cst_236 : f32 to vector<16x256xf32>
      %426 = arith.addf %425, %424 : vector<16x256xf32>
      %427 = arith.divf %425, %426 : vector<16x256xf32>
      %428 = arith.mulf %421, %427 : vector<16x256xf32>
      %429 = arith.mulf %428, %422 : vector<16x256xf32>
      %430 = arith.truncf %429 : vector<16x256xf32> to vector<16x256xbf16>
      %cst_237 = arith.constant dense<0.000000e+00> : vector<16x128xf32>
      %431 = tpu.matmul %430, %416, %cst_237 {dimension_numbers = #tpu.dot_dimension_numbers<[1], [1], [0], [0], [0, 0, 1, 0], [], []>} : vector<16x256xbf16>, vector<128x256xbf16>, vector<16x128xf32> -> vector<16x128xf32>
      %432 = arith.index_cast %348 : i32 to index
      %c0_238 = arith.constant 0 : index
      %433 = vector.load %arg29[%432, %c0_238] : memref<32x128xf32, #tpu.memory_space<vmem>>, vector<16x128xf32>
      tpu.vector_store %arg29[%432, %c0_238], %431 {strides = array<i32>} : memref<32x128xf32, #tpu.memory_space<vmem>>, vector<16x128xf32>,
    }
    %c2_i32_108 = arith.constant 2 : i32
    %c0_109 = arith.constant 0 : index
    %c0_110 = arith.constant 0 : index
    %203 = vector.load %arg29[%c0_109, %c0_110] : memref<32x128xf32, #tpu.memory_space<vmem>>, vector<32x128xf32>
    %204 = arith.addf %132, %203 : vector<32x128xf32>
    %cst_111 = arith.constant dense<0.000000e+00> : vector<32xf32>
    %205 = vector.multi_reduction <add>, %204, %cst_111 [1] : vector<32x128xf32> to vector<32xf32>
    %206 = vector.shape_cast %205 : vector<32xf32> to vector<32x1xf32>
    %cst_112 = arith.constant 1.280000e+02 : f32
    %207 = vector.broadcast %cst_112 : f32 to vector<32x1xf32>
    %208 = arith.divf %206, %207 : vector<32x1xf32>
    %209 = vector.broadcast %208 : vector<32x1xf32> to vector<32x128xf32>
    %210 = arith.subf %204, %209 : vector<32x128xf32>
    %211 = arith.mulf %210, %210 : vector<32x128xf32>
    %cst_113 = arith.constant dense<0.000000e+00> : vector<32xf32>
    %212 = vector.multi_reduction <add>, %211, %cst_113 [1] : vector<32x128xf32> to vector<32xf32>
    %213 = vector.shape_cast %212 : vector<32xf32> to vector<32x1xf32>
    %cst_114 = arith.constant 1.280000e+02 : f32
    %214 = vector.broadcast %cst_114 : f32 to vector<32x1xf32>
    %215 = arith.divf %213, %214 : vector<32x1xf32>
    %216 = vector.broadcast %208 : vector<32x1xf32> to vector<32x128xf32>
    %217 = arith.subf %204, %216 : vector<32x128xf32>
    %cst_115 = arith.constant 9.99999974E-6 : f32
    %218 = vector.broadcast %cst_115 : f32 to vector<32x1xf32>
    %219 = arith.addf %215, %218 : vector<32x1xf32>
    %220 = math.rsqrt %219 : vector<32x1xf32>
    %221 = vector.broadcast %220 : vector<32x1xf32> to vector<32x128xf32>
    %222 = arith.mulf %217, %221 : vector<32x128xf32>
    %c0_116 = arith.constant 0 : index
    %c0_117 = arith.constant 0 : index
    %223 = vector.load %arg6[%c0_116, %c0_117] : memref<1x128xf32, #tpu.memory_space<vmem>>, vector<1x128xf32>
    %224 = vector.broadcast %223 : vector<1x128xf32> to vector<32x128xf32>
    %225 = arith.mulf %222, %224 : vector<32x128xf32>
    %c0_118 = arith.constant 0 : index
    %c0_119 = arith.constant 0 : index
    %226 = vector.load %arg7[%c0_118, %c0_119] : memref<1x128xf32, #tpu.memory_space<vmem>>, vector<1x128xf32>
    %227 = vector.broadcast %226 : vector<1x128xf32> to vector<32x128xf32>
    %228 = arith.addf %225, %227 : vector<32x128xf32>
    %229 = vector.extract_strided_slice %228 {offsets = [0, 0], sizes = [16, 128], strides = [1, 1]} : vector<32x128xf32> to vector<16x128xf32>
    %c0_120 = arith.constant 0 : index
    %c0_121 = arith.constant 0 : index
    %230 = vector.load %arg21[%c0_120, %c0_121] : memref<512x128xbf16, #tpu.memory_space<vmem>>, vector<512x128xbf16>
    %231 = arith.truncf %229 : vector<16x128xf32> to vector<16x128xbf16>
    %cst_122 = arith.constant dense<0.000000e+00> : vector<16x512xf32>
    %232 = tpu.matmul %231, %230, %cst_122 {dimension_numbers = #tpu.dot_dimension_numbers<[1], [1], [0], [0], [0, 0, 1, 0], [], []>} : vector<16x128xbf16>, vector<512x128xbf16>, vector<16x512xf32> -> vector<16x512xf32>
    %c0_123 = arith.constant 0 : index
    %c0_124 = arith.constant 0 : index
    %233 = vector.load %arg22[%c0_123, %c0_124] : memref<1x512xf32, #tpu.memory_space<vmem>>, vector<1x512xf32>
    %234 = vector.broadcast %233 : vector<1x512xf32> to vector<16x512xf32>
    %235 = arith.addf %232, %234 : vector<16x512xf32>
    %cst_125 = arith.constant 5.000000e-01 : f32
    %236 = vector.broadcast %cst_125 : f32 to vector<16x512xf32>
    %237 = arith.mulf %236, %235 : vector<16x512xf32>
    %cst_126 = arith.constant 0.707106769 : f32
    %238 = vector.broadcast %cst_126 : f32 to vector<16x512xf32>
    %239 = arith.mulf %235, %238 : vector<16x512xf32>
    %cst_127 = arith.constant 0.000000e+00 : f32
    %240 = vector.broadcast %cst_127 : f32 to vector<16x512xf32>
    %241 = arith.cmpf oge, %239, %240 : vector<16x512xf32>
    %cst_128 = arith.constant 1.000000e+00 : f32
    %cst_129 = arith.constant -1.000000e+00 : f32
    %242 = vector.broadcast %cst_128 : f32 to vector<16x512xf32>
    %243 = vector.broadcast %cst_129 : f32 to vector<16x512xf32>
    %244 = arith.select %241, %242, %243 : vector<16x512xi1>, vector<16x512xf32>
    %245 = math.absf %239 : vector<16x512xf32>
    %cst_130 = arith.constant 0.327591091 : f32
    %246 = vector.broadcast %cst_130 : f32 to vector<16x512xf32>
    %247 = arith.mulf %246, %245 : vector<16x512xf32>
    %cst_131 = arith.constant 1.000000e+00 : f32
    %248 = vector.broadcast %cst_131 : f32 to vector<16x512xf32>
    %249 = arith.addf %248, %247 : vector<16x512xf32>
    %cst_132 = arith.constant 1.000000e+00 : f32
    %250 = vector.broadcast %cst_132 : f32 to vector<16x512xf32>
    %251 = arith.divf %250, %249 : vector<16x512xf32>
    %cst_133 = arith.constant 1.06140542 : f32
    %252 = vector.broadcast %cst_133 : f32 to vector<16x512xf32>
    %253 = arith.mulf %252, %251 : vector<16x512xf32>
    %cst_134 = arith.constant -1.45315206 : f32
    %254 = vector.broadcast %cst_134 : f32 to vector<16x512xf32>
    %255 = arith.addf %253, %254 : vector<16x512xf32>
    %256 = arith.mulf %255, %251 : vector<16x512xf32>
    %cst_135 = arith.constant 1.42141378 : f32
    %257 = vector.broadcast %cst_135 : f32 to vector<16x512xf32>
    %258 = arith.addf %256, %257 : vector<16x512xf32>
    %259 = arith.mulf %258, %251 : vector<16x512xf32>
    %cst_136 = arith.constant -0.284496725 : f32
    %260 = vector.broadcast %cst_136 : f32 to vector<16x512xf32>
    %261 = arith.addf %259, %260 : vector<16x512xf32>
    %262 = arith.mulf %261, %251 : vector<16x512xf32>
    %cst_137 = arith.constant 0.254829586 : f32
    %263 = vector.broadcast %cst_137 : f32 to vector<16x512xf32>
    %264 = arith.addf %262, %263 : vector<16x512xf32>
    %265 = arith.mulf %264, %251 : vector<16x512xf32>
    %cst_138 = arith.constant 0.000000e+00 : f32
    %266 = vector.broadcast %cst_138 : f32 to vector<16x512xf32>
    %267 = arith.subf %266, %245 : vector<16x512xf32>
    %268 = arith.mulf %267, %245 : vector<16x512xf32>
    %269 = math.exp %268 : vector<16x512xf32>
    %270 = arith.mulf %265, %269 : vector<16x512xf32>
    %cst_139 = arith.constant 1.000000e+00 : f32
    %271 = vector.broadcast %cst_139 : f32 to vector<16x512xf32>
    %272 = arith.subf %271, %270 : vector<16x512xf32>
    %273 = arith.mulf %244, %272 : vector<16x512xf32>
    %cst_140 = arith.constant 1.000000e+00 : f32
    %274 = vector.broadcast %cst_140 : f32 to vector<16x512xf32>
    %275 = arith.addf %274, %273 : vector<16x512xf32>
    %276 = arith.mulf %237, %275 : vector<16x512xf32>
    %c0_141 = arith.constant 0 : index
    %c0_142 = arith.constant 0 : index
    %277 = vector.load %arg23[%c0_141, %c0_142] : memref<128x512xbf16, #tpu.memory_space<vmem>>, vector<128x512xbf16>
    %278 = arith.truncf %276 : vector<16x512xf32> to vector<16x512xbf16>
    %cst_143 = arith.constant dense<0.000000e+00> : vector<16x128xf32>
    %279 = tpu.matmul %278, %277, %cst_143 {dimension_numbers = #tpu.dot_dimension_numbers<[1], [1], [0], [0], [0, 0, 1, 0], [], []>} : vector<16x512xbf16>, vector<128x512xbf16>, vector<16x128xf32> -> vector<16x128xf32>
    %c0_144 = arith.constant 0 : index
    %c0_145 = arith.constant 0 : index
    %280 = vector.load %arg24[%c0_144, %c0_145] : memref<1x128xf32, #tpu.memory_space<vmem>>, vector<1x128xf32>
    %281 = vector.broadcast %280 : vector<1x128xf32> to vector<16x128xf32>
    %282 = arith.addf %279, %281 : vector<16x128xf32>
    %283 = vector.extract_strided_slice %204 {offsets = [0, 0], sizes = [16, 128], strides = [1, 1]} : vector<32x128xf32> to vector<16x128xf32>
    %284 = arith.addf %283, %282 : vector<16x128xf32>
    %c0_146 = arith.constant 0 : index
    %c0_147 = arith.constant 0 : index
    %c0_148 = arith.constant 0 : index
    %285 = vector.load %arg25[%c0_146, %c0_147, %c0_148] : memref<1x32x128xf32, #tpu.memory_space<vmem>>, vector<1x16x128xf32>
    %286 = vector.shape_cast %285 : vector<1x16x128xf32> to vector<16x128xf32>
    %287 = vector.shape_cast %284 : vector<16x128xf32> to vector<1x16x128xf32>
    tpu.vector_store %arg25[%c0_146, %c0_147, %c0_148], %287 {strides = array<i32>} : memref<1x32x128xf32, #tpu.memory_space<vmem>>, vector<1x16x128xf32>,
    %288 = vector.extract_strided_slice %228 {offsets = [16, 0], sizes = [16, 128], strides = [1, 1]} : vector<32x128xf32> to vector<16x128xf32>
    %c0_149 = arith.constant 0 : index
    %c0_150 = arith.constant 0 : index
    %289 = vector.load %arg21[%c0_149, %c0_150] : memref<512x128xbf16, #tpu.memory_space<vmem>>, vector<512x128xbf16>
    %290 = arith.truncf %288 : vector<16x128xf32> to vector<16x128xbf16>
    %cst_151 = arith.constant dense<0.000000e+00> : vector<16x512xf32>
    %291 = tpu.matmul %290, %289, %cst_151 {dimension_numbers = #tpu.dot_dimension_numbers<[1], [1], [0], [0], [0, 0, 1, 0], [], []>} : vector<16x128xbf16>, vector<512x128xbf16>, vector<16x512xf32> -> vector<16x512xf32>
    %c0_152 = arith.constant 0 : index
    %c0_153 = arith.constant 0 : index
    %292 = vector.load %arg22[%c0_152, %c0_153] : memref<1x512xf32, #tpu.memory_space<vmem>>, vector<1x512xf32>
    %293 = vector.broadcast %292 : vector<1x512xf32> to vector<16x512xf32>
    %294 = arith.addf %291, %293 : vector<16x512xf32>
    %cst_154 = arith.constant 5.000000e-01 : f32
    %295 = vector.broadcast %cst_154 : f32 to vector<16x512xf32>
    %296 = arith.mulf %295, %294 : vector<16x512xf32>
    %cst_155 = arith.constant 0.707106769 : f32
    %297 = vector.broadcast %cst_155 : f32 to vector<16x512xf32>
    %298 = arith.mulf %294, %297 : vector<16x512xf32>
    %cst_156 = arith.constant 0.000000e+00 : f32
    %299 = vector.broadcast %cst_156 : f32 to vector<16x512xf32>
    %300 = arith.cmpf oge, %298, %299 : vector<16x512xf32>
    %cst_157 = arith.constant 1.000000e+00 : f32
    %cst_158 = arith.constant -1.000000e+00 : f32
    %301 = vector.broadcast %cst_157 : f32 to vector<16x512xf32>
    %302 = vector.broadcast %cst_158 : f32 to vector<16x512xf32>
    %303 = arith.select %300, %301, %302 : vector<16x512xi1>, vector<16x512xf32>
    %304 = math.absf %298 : vector<16x512xf32>
    %cst_159 = arith.constant 0.327591091 : f32
    %305 = vector.broadcast %cst_159 : f32 to vector<16x512xf32>
    %306 = arith.mulf %305, %304 : vector<16x512xf32>
    %cst_160 = arith.constant 1.000000e+00 : f32
    %307 = vector.broadcast %cst_160 : f32 to vector<16x512xf32>
    %308 = arith.addf %307, %306 : vector<16x512xf32>
    %cst_161 = arith.constant 1.000000e+00 : f32
    %309 = vector.broadcast %cst_161 : f32 to vector<16x512xf32>
    %310 = arith.divf %309, %308 : vector<16x512xf32>
    %cst_162 = arith.constant 1.06140542 : f32
    %311 = vector.broadcast %cst_162 : f32 to vector<16x512xf32>
    %312 = arith.mulf %311, %310 : vector<16x512xf32>
    %cst_163 = arith.constant -1.45315206 : f32
    %313 = vector.broadcast %cst_163 : f32 to vector<16x512xf32>
    %314 = arith.addf %312, %313 : vector<16x512xf32>
    %315 = arith.mulf %314, %310 : vector<16x512xf32>
    %cst_164 = arith.constant 1.42141378 : f32
    %316 = vector.broadcast %cst_164 : f32 to vector<16x512xf32>
    %317 = arith.addf %315, %316 : vector<16x512xf32>
    %318 = arith.mulf %317, %310 : vector<16x512xf32>
    %cst_165 = arith.constant -0.284496725 : f32
    %319 = vector.broadcast %cst_165 : f32 to vector<16x512xf32>
    %320 = arith.addf %318, %319 : vector<16x512xf32>
    %321 = arith.mulf %320, %310 : vector<16x512xf32>
    %cst_166 = arith.constant 0.254829586 : f32
    %322 = vector.broadcast %cst_166 : f32 to vector<16x512xf32>
    %323 = arith.addf %321, %322 : vector<16x512xf32>
    %324 = arith.mulf %323, %310 : vector<16x512xf32>
    %cst_167 = arith.constant 0.000000e+00 : f32
    %325 = vector.broadcast %cst_167 : f32 to vector<16x512xf32>
    %326 = arith.subf %325, %304 : vector<16x512xf32>
    %327 = arith.mulf %326, %304 : vector<16x512xf32>
    %328 = math.exp %327 : vector<16x512xf32>
    %329 = arith.mulf %324, %328 : vector<16x512xf32>
    %cst_168 = arith.constant 1.000000e+00 : f32
    %330 = vector.broadcast %cst_168 : f32 to vector<16x512xf32>
    %331 = arith.subf %330, %329 : vector<16x512xf32>
    %332 = arith.mulf %303, %331 : vector<16x512xf32>
    %cst_169 = arith.constant 1.000000e+00 : f32
    %333 = vector.broadcast %cst_169 : f32 to vector<16x512xf32>
    %334 = arith.addf %333, %332 : vector<16x512xf32>
    %335 = arith.mulf %296, %334 : vector<16x512xf32>
    %c0_170 = arith.constant 0 : index
    %c0_171 = arith.constant 0 : index
    %336 = vector.load %arg23[%c0_170, %c0_171] : memref<128x512xbf16, #tpu.memory_space<vmem>>, vector<128x512xbf16>
    %337 = arith.truncf %335 : vector<16x512xf32> to vector<16x512xbf16>
    %cst_172 = arith.constant dense<0.000000e+00> : vector<16x128xf32>
    %338 = tpu.matmul %337, %336, %cst_172 {dimension_numbers = #tpu.dot_dimension_numbers<[1], [1], [0], [0], [0, 0, 1, 0], [], []>} : vector<16x512xbf16>, vector<128x512xbf16>, vector<16x128xf32> -> vector<16x128xf32>
    %c0_173 = arith.constant 0 : index
    %c0_174 = arith.constant 0 : index
    %339 = vector.load %arg24[%c0_173, %c0_174] : memref<1x128xf32, #tpu.memory_space<vmem>>, vector<1x128xf32>
    %340 = vector.broadcast %339 : vector<1x128xf32> to vector<16x128xf32>
    %341 = arith.addf %338, %340 : vector<16x128xf32>
    %342 = vector.extract_strided_slice %204 {offsets = [16, 0], sizes = [16, 128], strides = [1, 1]} : vector<32x128xf32> to vector<16x128xf32>
    %343 = arith.addf %342, %341 : vector<16x128xf32>
    %c0_175 = arith.constant 0 : index
    %c16_176 = arith.constant 16 : index
    %c0_177 = arith.constant 0 : index
    %344 = vector.load %arg25[%c0_175, %c16_176, %c0_177] : memref<1x32x128xf32, #tpu.memory_space<vmem>>, vector<1x16x128xf32>
    %345 = vector.shape_cast %344 : vector<1x16x128xf32> to vector<16x128xf32>
    %346 = vector.shape_cast %343 : vector<16x128xf32> to vector<1x16x128xf32>
    tpu.vector_store %arg25[%c0_175, %c16_176, %c0_177], %346 {strides = array<i32>} : memref<1x32x128xf32, #tpu.memory_space<vmem>>, vector<1x16x128xf32>,
    return
  }
  func.func @transform_0(%arg0: i32) -> (i32, i32, i32) {
    %c0_i32 = arith.constant 0 : i32
    %c0_i32_0 = arith.constant 0 : i32
    %c0_i32_1 = arith.constant 0 : i32
    return %arg0, %c0_i32, %c0_i32_0 : i32, i32, i32
  }
  func.func @transform_1(%arg0: i32) -> (i32, i32) {
    %c0_i32 = arith.constant 0 : i32
    %c0_i32_0 = arith.constant 0 : i32
    %c0_i32_1 = arith.constant 0 : i32
    return %c0_i32, %c0_i32_0 : i32, i32
  }
  func.func @transform_2(%arg0: i32) -> (i32, i32) {
    %c0_i32 = arith.constant 0 : i32
    %c0_i32_0 = arith.constant 0 : i32
    %c0_i32_1 = arith.constant 0 : i32
    return %c0_i32, %c0_i32_0 : i32, i32
  }
  func.func @transform_3(%arg0: i32) -> (i32, i32) {
    %c0_i32 = arith.constant 0 : i32
    %c0_i32_0 = arith.constant 0 : i32
    %c0_i32_1 = arith.constant 0 : i32
    return %c0_i32, %c0_i32_0 : i32, i32
  }
  func.func @transform_4(%arg0: i32) -> (i32, i32) {
    %c0_i32 = arith.constant 0 : i32
    %c0_i32_0 = arith.constant 0 : i32
    %c0_i32_1 = arith.constant 0 : i32
    return %c0_i32, %c0_i32_0 : i32, i32
  }
  func.func @transform_5(%arg0: i32) -> (i32, i32) {
    %c0_i32 = arith.constant 0 : i32
    %c0_i32_0 = arith.constant 0 : i32
    %c0_i32_1 = arith.constant 0 : i32
    return %c0_i32, %c0_i32_0 : i32, i32
  }
  func.func @transform_6(%arg0: i32) -> (i32, i32) {
    %c0_i32 = arith.constant 0 : i32
    %c0_i32_0 = arith.constant 0 : i32
    %c0_i32_1 = arith.constant 0 : i32
    return %c0_i32, %c0_i32_0 : i32, i32
  }
  func.func @transform_7(%arg0: i32) -> (i32, i32) {
    %c0_i32 = arith.constant 0 : i32
    %c0_i32_0 = arith.constant 0 : i32
    %c0_i32_1 = arith.constant 0 : i32
    return %c0_i32, %c0_i32_0 : i32, i32
  }
  func.func @transform_8(%arg0: i32) -> (i32, i32) {
    %c0_i32 = arith.constant 0 : i32
    %c0_i32_0 = arith.constant 0 : i32
    %c0_i32_1 = arith.constant 0 : i32
    return %c0_i32, %c0_i32_0 : i32, i32
  }
  func.func @transform_9(%arg0: i32) -> (i32, i32) {
    %c0_i32 = arith.constant 0 : i32
    %c0_i32_0 = arith.constant 0 : i32
    %c0_i32_1 = arith.constant 0 : i32
    return %c0_i32, %c0_i32_0 : i32, i32
  }
  func.func @transform_10(%arg0: i32) -> (i32, i32) {
    %c0_i32 = arith.constant 0 : i32
    %c0_i32_0 = arith.constant 0 : i32
    %c0_i32_1 = arith.constant 0 : i32
    return %c0_i32, %c0_i32_0 : i32, i32
  }
  func.func @transform_11(%arg0: i32) -> (i32, i32) {
    %c0_i32 = arith.constant 0 : i32
    %c0_i32_0 = arith.constant 0 : i32
    %c0_i32_1 = arith.constant 0 : i32
    return %c0_i32, %c0_i32_0 : i32, i32
  }
  func.func @transform_12(%arg0: i32) -> (i32, i32) {
    %c0_i32 = arith.constant 0 : i32
    %c0_i32_0 = arith.constant 0 : i32
    %c0_i32_1 = arith.constant 0 : i32
    return %c0_i32, %c0_i32_0 : i32, i32
  }
  func.func @transform_13(%arg0: i32) -> (i32, i32) {
    %c0_i32 = arith.constant 0 : i32
    %c0_i32_0 = arith.constant 0 : i32
    %c0_i32_1 = arith.constant 0 : i32
    return %c0_i32, %c0_i32_0 : i32, i32
  }
  func.func @transform_14(%arg0: i32) -> (i32, i32) {
    %c0_i32 = arith.constant 0 : i32
    %c0_i32_0 = arith.constant 0 : i32
    %c0_i32_1 = arith.constant 0 : i32
    return %c0_i32, %c0_i32_0 : i32, i32
  }
  func.func @transform_15(%arg0: i32) -> (i32, i32) {
    %c0_i32 = arith.constant 0 : i32
    %c0_i32_0 = arith.constant 0 : i32
    %c0_i32_1 = arith.constant 0 : i32
    return %c0_i32, %c0_i32_0 : i32, i32
  }
  func.func @transform_16(%arg0: i32) -> (i32, i32) {
    %c0_i32 = arith.constant 0 : i32
    %c0_i32_0 = arith.constant 0 : i32
    %c0_i32_1 = arith.constant 0 : i32
    return %c0_i32, %c0_i32_0 : i32, i32
  }
  func.func @transform_17(%arg0: i32) -> (i32, i32) {
    %c0_i32 = arith.constant 0 : i32
    %c0_i32_0 = arith.constant 0 : i32
    %c0_i32_1 = arith.constant 0 : i32
    return %c0_i32, %c0_i32_0 : i32, i32
  }
  func.func @transform_18(%arg0: i32) -> (i32, i32) {
    %c0_i32 = arith.constant 0 : i32
    %c0_i32_0 = arith.constant 0 : i32
    %c0_i32_1 = arith.constant 0 : i32
    return %c0_i32, %c0_i32_0 : i32, i32
  }
  func.func @transform_19(%arg0: i32) -> (i32, i32) {
    %c0_i32 = arith.constant 0 : i32
    %c0_i32_0 = arith.constant 0 : i32
    %c0_i32_1 = arith.constant 0 : i32
    return %c0_i32, %c0_i32_0 : i32, i32
  }
  func.func @transform_20(%arg0: i32) -> (i32, i32) {
    %c0_i32 = arith.constant 0 : i32
    %c0_i32_0 = arith.constant 0 : i32
    %c0_i32_1 = arith.constant 0 : i32
    return %c0_i32, %c0_i32_0 : i32, i32
  }
  func.func @transform_21(%arg0: i32) -> (i32, i32) {
    %c0_i32 = arith.constant 0 : i32
    %c0_i32_0 = arith.constant 0 : i32
    %c0_i32_1 = arith.constant 0 : i32
    return %c0_i32, %c0_i32_0 : i32, i32
  }
  func.func @transform_22(%arg0: i32) -> (i32, i32) {
    %c0_i32 = arith.constant 0 : i32
    %c0_i32_0 = arith.constant 0 : i32
    %c0_i32_1 = arith.constant 0 : i32
    return %c0_i32, %c0_i32_0 : i32, i32
  }
  func.func @transform_23(%arg0: i32) -> (i32, i32) {
    %c0_i32 = arith.constant 0 : i32
    %c0_i32_0 = arith.constant 0 : i32
    %c0_i32_1 = arith.constant 0 : i32
    return %c0_i32, %c0_i32_0 : i32, i32
  }
  func.func @transform_24(%arg0: i32) -> (i32, i32, i32) {
    %c0_i32 = arith.constant 0 : i32
    %c0_i32_0 = arith.constant 0 : i32
    %c0_i32_1 = arith.constant 0 : i32
    return %arg0, %c0_i32, %c0_i32_0 : i32, i32, i32
  }
}

</mosaic_0001>

<bundles_post_ra>
// kernel: tpu_custom_call.1
= control target key start
LH: loop header
LB: loop body
LE: loop exit
PB: predicated region body
PF: predicated region fallthrough
CT: control target
= control target key end

     0   :  { %s16101_s0 = inlined_call_operand.hbm [shape: f32[2,32,128], index: 0, kind: input, shape index: {}]   ;;  %s16102_s1 = inlined_call_operand.hbm [shape: f32[1,128], index: 1, kind: input, shape index: {}]   ;;  %s16103_s2 = inlined_call_operand.hbm [shape: f32[1,128], index: 2, kind: input, shape index: {}]   ;;  %s16104_s3 = inlined_call_operand.hbm [shape: f32[1,128], index: 3, kind: input, shape index: {}]   ;;  %s16105_s4 = inlined_call_operand.hbm [shape: f32[1,128], index: 4, kind: input, shape index: {}]   ;;  %s16106_s5 = inlined_call_operand.vmem [shape: f32[1,128], index: 5, kind: input, shape index: {}]   ;;  %s16107_s6 = inlined_call_operand.vmem [shape: f32[1,128], index: 6, kind: input, shape index: {}]   ;;  %s16108_s7 = inlined_call_operand.hbm [shape: bf16[384,128], index: 7, kind: input, shape index: {}]   ;;  %s16109_s8 = inlined_call_operand.vmem [shape: f32[1,384], index: 8, kind: input, shape index: {}]   ;;  %s16110_s9 = inlined_call_operand.hbm [shape: bf16[128,128], index: 9, kind: input, shape index: {}]   ;;  %s16111_s10 = inlined_call_operand.vmem [shape: f32[1,128], index: 10, kind: input, shape index: {}]   ;;  %s16112_s11 = inlined_call_operand.hbm [shape: f32[256,128], index: 11, kind: input, shape index: {}]   ;;  %s16113_s12 = inlined_call_operand.hbm [shape: f32[128,256], index: 12, kind: input, shape index: {}]   ;;  %s16114_s13 = inlined_call_operand.hbm [shape: f32[256,128], index: 13, kind: input, shape index: {}]   ;;  %s16115_s14 = inlined_call_operand.hbm [shape: bf16[128,128], index: 14, kind: input, shape index: {}]   ;;  %s16116_s15 = inlined_call_operand.vmem [shape: f32[1,128], index: 15, kind: input, shape index: {}]   ;;  %s16117_s16 = inlined_call_operand.hbm [shape: bf16[128,128], index: 16, kind: input, shape index: {}]   ;;  %s16118_s17 = inlined_call_operand.vmem [shape: f32[1,128], index: 17, kind: input, shape index: {}]   ;;  %s16119_s18 = inlined_call_operand.hbm [shape: bf16[128,128], index: 18, kind: input, shape index: {}]   ;;  %s16120_s19 = inlined_call_operand.vmem [shape: f32[1,128], index: 19, kind: input, shape index: {}]   ;;  %s16121_s20 = inlined_call_operand.hbm [shape: bf16[512,128], index: 20, kind: input, shape index: {}]   ;;  %s16122_s21 = inlined_call_operand.vmem [shape: f32[1,512], index: 21, kind: input, shape index: {}]   ;;  %s16123_s22 = inlined_call_operand.hbm [shape: bf16[128,512], index: 22, kind: input, shape index: {}]   ;;  %s16124_s23 = inlined_call_operand.vmem [shape: f32[1,128], index: 23, kind: input, shape index: {}]   ;;  %s16125_s24 = inlined_call_operand.hbm [shape: f32[2,32,128], index: 24, kind: output, shape index: {}]  }
   0x1   :  { %16195 = sst [smem:[#allocation93_spill]] %s16101_s0 }
   0x2   :  { %16196 = sst [smem:[#allocation94_spill]] %s16102_s1 }
   0x3   :  { %16197 = sst [smem:[#allocation95_spill]] %s16103_s2 }
   0x4   :  { %16198 = sst [smem:[#allocation96_spill]] %s16104_s3 }
   0x5   :  { %16199 = sst [smem:[#allocation97_spill]] %s16105_s4 }
   0x6   :  { %16200 = sst [smem:[#allocation98_spill]] %s16106_s5 }
   0x7   :  { %16201 = sst [smem:[#allocation99_spill]] %s16107_s6 }
   0x8   :  { %16202 = sst [smem:[#allocation100_spill]] %s16108_s7 }
   0x9   :  { %16203 = sst [smem:[#allocation101_spill]] %s16109_s8 }
   0xa   :  { %16204 = sst [smem:[#allocation102_spill]] %s16110_s9 }
   0xb   :  { %16205 = sst [smem:[#allocation103_spill]] %s16112_s11 }
   0xc   :  { %16206 = sst [smem:[#allocation104_spill]] %s16113_s12 }
   0xd   :  { %16207 = sst [smem:[#allocation105_spill]] %s16114_s13 }
   0xe   :  { %16208 = sst [smem:[#allocation106_spill]] %s16115_s14 }
   0xf   :  { %16209 = sst [smem:[#allocation107_spill]] %s16117_s16 }
  0x10   :  { %16210 = sst [smem:[#allocation108_spill]] %s16120_s19 }
  0x11   :  { %16211 = sst [smem:[#allocation109_spill]] %s16122_s21 }
  0x12   :  { %16212 = sst [smem:[#allocation110_spill]] %s16124_s23 }
  0x13   :  { %16213 = sst [smem:[#allocation111_spill]] %s16125_s24 }
  0x14   :  { %29 = vsyncpa [#allocation16], 0 }
  0x15   :  { %31 = vsyncpa [#allocation16 + $0x1], 0 }
  0x16   :  { %32 = vsyncpa [#allocation19], 0 }
  0x17   :  { %33 = vsyncpa [#allocation22], 0 }
  0x18   :  { %34 = vsyncpa [#allocation25], 0 }
  0x19   :  { %35 = vsyncpa [#allocation28], 0 }
  0x1a   :  { %36 = vsyncpa [#allocation31], 0 }
  0x1b   :  { %37 = vsyncpa [#allocation34], 0 }
  0x1c   :  { %38 = vsyncpa [#allocation37], 0 }
  0x1d   :  { %39 = vsyncpa [#allocation17], 0 }
  0x1e   :  { %41 = vsyncpa [#allocation17 + $0x1], 0  ;;  %s13793_s5 = smov 0   ;;  %s13795_s26 = smov 0  }
  0x1f   :  { %s13797_s27 = smov 0   ;;  %s13799_s28 = smov 0  }
  0x20 LB: > { %s13634_s6 = smov [#allocation18]   ;;  %s13814_s29 = sadd.s32 4294967295, %s13628_s28   ;;  %s13628_s28 = sphi %s13799_s28, %s16395_s28   ;;  %s13624_s27 = sphi %s13797_s27, %s16394_s27   ;;  %s13620_s26 = sphi %s13795_s26, %s16393_s26   ;;  %s13616_s5 = sphi %s13793_s5, %s16392_s5  }
  0x21   : > { %s600_s2 = sshll.u32 %s13634_s6, 4  ;;  %p10690_p0 = scmp.ge.s32.totalorder %s13628_s28, 1  ;;  %s601_s2 = int_to_ptr.vmem [resolvable:$true] %s600_s2 }
  0x22   : > { %p16129_p1 = scmp.eq.s32.totalorder %s13814_s29, 0  ;;  %p587_p2 = scmp.lt.s32.totalorder %s13628_s28, 3 }
  0x23   : > { %s13635_s7 = smov [#allocation21]   ;;  %s13636_s3 = smov [#allocation24]  }
  0x24   : > { %p13819_p3 = pnand %p10690_p0, %p587_p2  ;;  %s622_s30 = sshll.u32 %s13635_s7, 4  ;;  %s623_s30 = int_to_ptr.vmem [resolvable:$true] %s622_s30 }
  0x25   : > { %s649_s25 = sshll.u32 %s13636_s3, 4  ;;  %s13151_s1 = scalar_lea.vmem %s601_s2, 16  ;;  %s13832_s25 = int_to_ptr.vmem [resolvable:$true] %s649_s25 }
  0x26   : > { %s16214_s0 = scalar_select %p13819_p3, 1, 0 }
  0x27   : > { %p12526_p5 = pneg %p13819_p3  ;;  %p13152_p8 = scmp.ne.s32.totalorder %s601_s2, %s13151_s1 }
  0x28   : > { %s13158_s6 = scalar_lea.vmem %s601_s2, 32  ;;  %p13159_p11 = scmp.lt.s32.totalorder %s601_s2, %s601_s2 }
  0x29   : > { %p13828_p6 = pnand %p12526_p5, %p16129_p1  ;;  %p13160_p12 = scmp.lt.s32.totalorder %s13158_s6, %s13151_s1 }
  0x2b   : > { %p13836_p7 = pneg %p13828_p6  ;;  %p13161_p13 = por %p13160_p12, %p13159_p11 }
  0x2d   : > { %p13154_p9 = pnand %p13152_p8, %p13836_p7 }
  0x2f   : > { %p13155_p10 = pneg %p13154_p9 }
  0x31   : > { %p13162_p0 = pnand %p13161_p13, %p13155_p10 }
  0x33   : > { %13165 = shalt.err (!%p13162_p0)
}
  0x34   : > { %s16217_s24 = sld [smem:[#allocation94_spill]]  ;;  %s13177_s23 = scalar_lea.vmem %s623_s30, 16 }
  0x35   : > { %p13178_p2 = scmp.ne.s32.totalorder %s623_s30, %s13177_s23  ;;  %s13184_s21 = scalar_lea.vmem %s623_s30, 32 }
  0x36   : > { %p13185_p8 = scmp.lt.s32.totalorder %s623_s30, %s623_s30  ;;  %p13186_p9 = scmp.lt.s32.totalorder %s13184_s21, %s13177_s23 }
  0x37   : > { %p13180_p5 = pnand %p13178_p2, %p13836_p7 }
  0x38   : > { %p13187_p1 = por %p13186_p9, %p13185_p8 }
  0x39   : > { %p13181_p4 = pneg %p13180_p5 }
  0x3a   : > { %12529 = dma.hbm_to_vmem [thread:$0]  (!%p13828_p6), %s16217_s24, 16, %s601_s2, [#allocation19]  }
  0x3b   : > { %p13188_p3 = pnand %p13187_p1, %p13181_p4 }
  0x3d   : > { %13191 = shalt.err (!%p13188_p3)
}
  0x3e   : > { %s16218_s19 = sld [smem:[#allocation96_spill]]  ;;  %s13203_s24 = scalar_lea.vmem %s13832_s25, 3072 }
  0x3f   : > { %p13204_p10 = scmp.ne.s32.totalorder %s13832_s25, %s13203_s24  ;;  %p13211_p13 = scmp.lt.s32.totalorder %s13832_s25, %s13832_s25 }
  0x40   : > { %p13212_p0 = scmp.lt.s32.totalorder %s13203_s24, %s13203_s24 }
  0x41   : > { %p13206_p11 = pnand %p13204_p10, %p13836_p7 }
  0x42   : > { %p13213_p1 = por %p13212_p0, %p13211_p13 }
  0x43   : > { %p13207_p12 = pneg %p13206_p11 }
  0x44   : > { %12535 = dma.hbm_to_vmem [thread:$0]  (!%p13828_p6), %s16218_s19, 16, %s623_s30, [#allocation22]  }
  0x45   : > { %p13214_p3 = pnand %p13213_p1, %p13207_p12 }
  0x47   : > { %13217 = shalt.err (!%p13214_p3)
}
  0x48   : > { %s16131_s21 = smov 64   ;;  %s16135_s23 = smov 4  }
  0x49   : > { %s16219_s30 = sld [smem:[#allocation100_spill]]  ;;  %s13639_s7 = smov [#allocation27]  }
  0x4a   : > { %s681_s3 = sshll.u32 %s13639_s7, 4  ;;  %s682_s3 = int_to_ptr.vmem [resolvable:$true] %s681_s3 }
  0x4b   : > { %s13229_s1 = scalar_lea.vmem %s682_s3, 4096  ;;  %p13237_p8 = scmp.lt.s32.totalorder %s682_s3, %s682_s3 }
  0x4c   : > { %p13230_p4 = scmp.ne.s32.totalorder %s682_s3, %s13229_s1  ;;  %p13238_p9 = scmp.lt.s32.totalorder %s13229_s1, %s13229_s1 }
  0x4e   : > { %p13232_p2 = pnand %p13230_p4, %p13836_p7  ;;  %p13239_p10 = por %p13238_p9, %p13237_p8 }
  0x4f   : > { %12541 = dma.hbm_to_vmem [thread:$0]  (!%p13828_p6), %s16219_s30, 3072, %s13832_s25, [#allocation25], %s16131_s21, %s16131_s21, %s16135_s23  }
  0x50   : > { %p13233_p5 = pneg %p13232_p2 }
  0x52   : > { %p13240_p11 = pnand %p13239_p10, %p13233_p5 }
  0x54   : > { %13243 = shalt.err (!%p13240_p11)
}
  0x55   : > { %s16133_s6 = smov 128   ;;  %s16134_s24 = smov 8  }
  0x56   : > { %s16220_s11 = sld [smem:[#allocation103_spill]]  ;;  %s13642_s2 = smov [#allocation30]  }
  0x57   : > { %s707_s30 = sshll.u32 %s13642_s2, 4  ;;  %s13643_s7 = smov [#allocation33]   ;;  %s708_s30 = int_to_ptr.vmem [resolvable:$true] %s707_s30 }
  0x58   : > { %s736_s21 = sshll.u32 %s13643_s7, 4  ;;  %s13255_s1 = scalar_lea.vmem %s708_s30, 4096  ;;  %s737_s21 = int_to_ptr.vmem [resolvable:$true] %s736_s21 }
  0x59   : > { %p13256_p12 = scmp.ne.s32.totalorder %s708_s30, %s13255_s1  ;;  %p13263_p1 = scmp.lt.s32.totalorder %s708_s30, %s708_s30 }
  0x5a   : > { %p13264_p3 = scmp.lt.s32.totalorder %s13255_s1, %s13255_s1 }
  0x5b   : > { %p13258_p13 = pnand %p13256_p12, %p13836_p7 }
  0x5c   : > { %12547 = dma.hbm_to_vmem [thread:$0]  (!%p13828_p6), %s16220_s11, 4096, %s682_s3, [#allocation28], %s16133_s6, %s16133_s6, %s16134_s24  }
  0x5d   : > { %p13259_p0 = pneg %p13258_p13  ;;  %p13265_p4 = por %p13264_p3, %p13263_p1 }
  0x5f   : > { %p13266_p2 = pnand %p13265_p4, %p13259_p0 }
  0x61   : > { %13269 = shalt.err (!%p13266_p2)
}
  0x62   : > { %s16221_s13 = sld [smem:[#allocation105_spill]]  ;;  %s13281_s19 = scalar_lea.vmem %s737_s21, 1024 }
  0x63   : > { %p13282_p5 = scmp.ne.s32.totalorder %s737_s21, %s13281_s19  ;;  %p13289_p10 = scmp.lt.s32.totalorder %s737_s21, %s737_s21 }
  0x64   : > { %p13290_p11 = scmp.lt.s32.totalorder %s13281_s19, %s13281_s19 }
  0x65   : > { %p13284_p8 = pnand %p13282_p5, %p13836_p7 }
  0x66   : > { %p13291_p12 = por %p13290_p11, %p13289_p10 }
  0x67   : > { %p13285_p9 = pneg %p13284_p8 }
  0x68   : > { %12553 = dma.hbm_to_vmem [thread:$0]  (!%p13828_p6), %s16221_s13, 4096, %s708_s30, [#allocation31], %s16133_s6, %s16133_s6, %s16134_s24  }
  0x69   : > { %p13292_p13 = pnand %p13291_p12, %p13285_p9 }
  0x6b   : > { %13295 = shalt.err (!%p13292_p13)
}
  0x6c   : > { %s16222_s2 = smov 64   ;;  %s16223_s16 = sld [smem:[#allocation107_spill]] }
  0x6d   : > { %s13644_s30 = smov [#allocation36]   ;;  %s13645_s25 = smov [#allocation20]  }
  0x6e   : > { %s768_s3 = sshll.u32 %s13644_s30, 4  ;;  %s611_s6 = sshll.u32 %s13645_s25, 4  ;;  %s769_s3 = int_to_ptr.vmem [resolvable:$true] %s768_s3  ;;  %s612_s6 = int_to_ptr.vmem [resolvable:$true] %s611_s6 }
  0x6f   : > { %s13307_s19 = scalar_lea.vmem %s769_s3, 4096  ;;  %p13315_p4 = scmp.lt.s32.totalorder %s769_s3, %s769_s3 }
  0x70   : > { %p13308_p0 = scmp.ne.s32.totalorder %s769_s3, %s13307_s19  ;;  %p13316_p2 = scmp.lt.s32.totalorder %s13307_s19, %s13307_s19 }
  0x72   : > { %12559 = dma.hbm_to_vmem [thread:$0]  (!%p13828_p6), %s16223_s16, 1024, %s737_s21, [#allocation34], %s16222_s2, %s16222_s2, %s16135_s23  }
  0x73   : > { %p13310_p1 = pnand %p13308_p0, %p13836_p7  ;;  %p13317_p5 = por %p13316_p2, %p13315_p4 }
  0x75   : > { %p13311_p3 = pneg %p13310_p1 }
  0x77   : > { %p13318_p8 = pnand %p13317_p5, %p13311_p3 }
  0x79   : > { %13321 = shalt.err (!%p13318_p8)
}
  0x7a   : > { %12565 = dma.hbm_to_vmem [thread:$0]  (!%p13828_p6), %s16121_s20, 4096, %s769_s3, [#allocation37], %s16222_s2, %s16222_s2, %s16135_s23  }
  0x7b   : > { %s13333_s1 = scalar_lea.vmem %s612_s6, 16  ;;  %s13340_s30 = scalar_lea.vmem %s612_s6, 32 }
  0x7c   : > { %p13334_p9 = scmp.ne.s32.totalorder %s612_s6, %s13333_s1  ;;  %p13341_p12 = scmp.lt.s32.totalorder %s612_s6, %s612_s6 }
  0x7d   : > { %p13342_p13 = scmp.lt.s32.totalorder %s13340_s30, %s13333_s1 }
  0x7e   : > { %p13336_p10 = pnand %p13334_p9, %p13836_p7 }
  0x7f   : > { %p13343_p0 = por %p13342_p13, %p13341_p12 }
  0x80   : > { %p13337_p11 = pneg %p13336_p10 }
  0x82   : > { %p13344_p1 = pnand %p13343_p0, %p13337_p11 }
  0x84   : > { %13347 = shalt.err (!%p13344_p1)
}
  0x85   : > { %s16224_s24 = sld [smem:[#allocation95_spill]]  ;;  %s13646_s21 = smov [#allocation23]  }
  0x86   : > { %s633_s3 = sshll.u32 %s13646_s21, 4  ;;  %s13647_s7 = smov [#allocation26]   ;;  %s634_s3 = int_to_ptr.vmem [resolvable:$true] %s633_s3 }
  0x87   : > { %s665_s23 = sshll.u32 %s13647_s7, 4  ;;  %s13359_s11 = scalar_lea.vmem %s634_s3, 16  ;;  %s666_s23 = int_to_ptr.vmem [resolvable:$true] %s665_s23 }
  0x88   : > { %p13360_p3 = scmp.ne.s32.totalorder %s634_s3, %s13359_s11  ;;  %s13366_s1 = scalar_lea.vmem %s634_s3, 32 }
  0x89   : > { %p13367_p5 = scmp.lt.s32.totalorder %s634_s3, %s634_s3  ;;  %p13368_p8 = scmp.lt.s32.totalorder %s13366_s1, %s13359_s11 }
  0x8a   : > { %p13362_p4 = pnand %p13360_p3, %p13836_p7 }
  0x8b   : > { %12532 = dma.hbm_to_vmem [thread:$0]  (!%p13828_p6), %s16224_s24, 16, %s612_s6, [#allocation19]  }
  0x8c   : > { %p13363_p2 = pneg %p13362_p4  ;;  %p13369_p9 = por %p13368_p8, %p13367_p5 }
  0x8e   : > { %p13370_p10 = pnand %p13369_p9, %p13363_p2 }
  0x90   : > { %13373 = shalt.err (!%p13370_p10)
}
  0x91   : > { %s16225_s30 = sld [smem:[#allocation97_spill]]  ;;  %s13385_s25 = scalar_lea.vmem %s666_s23, 1024 }
  0x92   : > { %p13386_p11 = scmp.ne.s32.totalorder %s666_s23, %s13385_s25  ;;  %p13393_p0 = scmp.lt.s32.totalorder %s666_s23, %s666_s23 }
  0x93   : > { %p13394_p1 = scmp.lt.s32.totalorder %s13385_s25, %s13385_s25 }
  0x94   : > { %p13388_p12 = pnand %p13386_p11, %p13836_p7 }
  0x95   : > { %p13395_p3 = por %p13394_p1, %p13393_p0 }
  0x96   : > { %p13389_p13 = pneg %p13388_p12 }
  0x97   : > { %12538 = dma.hbm_to_vmem [thread:$0]  (!%p13828_p6), %s16225_s30, 16, %s634_s3, [#allocation22]  }
  0x98   : > { %p13396_p4 = pnand %p13395_p3, %p13389_p13 }
  0x9a   : > { %13399 = shalt.err (!%p13396_p4)
}
  0x9b   : > { %s16226_s11 = smov 4   ;;  %s16227_s9 = sld [smem:[#allocation102_spill]] }
  0x9c   : > { %s13648_s3 = smov [#allocation29]  }
  0x9d   : > { %s694_s7 = sshll.u32 %s13648_s3, 4  ;;  %s695_s7 = int_to_ptr.vmem [resolvable:$true] %s694_s7 }
  0x9e   : > { %s13411_s1 = scalar_lea.vmem %s695_s7, 4096  ;;  %p13419_p9 = scmp.lt.s32.totalorder %s695_s7, %s695_s7 }
  0x9f   : > { %p13412_p2 = scmp.ne.s32.totalorder %s695_s7, %s13411_s1  ;;  %p13420_p10 = scmp.lt.s32.totalorder %s13411_s1, %s13411_s1 }
  0xa1   : > { %12544 = dma.hbm_to_vmem [thread:$0]  (!%p13828_p6), %s16227_s9, 1024, %s666_s23, [#allocation25], %s16222_s2, %s16222_s2, %s16226_s11  }
  0xa2   : > { %p13414_p5 = pnand %p13412_p2, %p13836_p7  ;;  %p13421_p11 = por %p13420_p10, %p13419_p9 }
  0xa4   : > { %p13415_p8 = pneg %p13414_p5 }
  0xa6   : > { %p13422_p12 = pnand %p13421_p11, %p13415_p8 }
  0xa8   : > { %13425 = shalt.err (!%p13422_p12)
}
  0xa9   : > { %s13649_s6 = smov 256   ;;  %s13650_s24 = smov 16  }
  0xaa   : > { %s16228_s12 = sld [smem:[#allocation104_spill]]  ;;  %s13651_s25 = smov [#allocation32]  }
  0xab   : > { %s720_s19 = sshll.u32 %s13651_s25, 4  ;;  %s13652_s21 = smov [#allocation35]   ;;  %s721_s19 = int_to_ptr.vmem [resolvable:$true] %s720_s19 }
  0xac   : > { %s752_s3 = sshll.u32 %s13652_s21, 4  ;;  %s13437_s1 = scalar_lea.vmem %s721_s19, 1024  ;;  %s753_s3 = int_to_ptr.vmem [resolvable:$true] %s752_s3 }
  0xad   : > { %p13438_p13 = scmp.ne.s32.totalorder %s721_s19, %s13437_s1  ;;  %p13445_p3 = scmp.lt.s32.totalorder %s721_s19, %s721_s19 }
  0xae   : > { %p13446_p4 = scmp.lt.s32.totalorder %s13437_s1, %s13437_s1 }
  0xaf   : > { %p13440_p0 = pnand %p13438_p13, %p13836_p7 }
  0xb0   : > { %12550 = dma.hbm_to_vmem [thread:$0]  (!%p13828_p6), %s16228_s12, 4096, %s695_s7, [#allocation28], %s13649_s6, %s13649_s6, %s13650_s24  }
  0xb1   : > { %p13441_p1 = pneg %p13440_p0  ;;  %p13447_p2 = por %p13446_p4, %p13445_p3 }
  0xb3   : > { %p13448_p5 = pnand %p13447_p2, %p13441_p1 }
  0xb5   : > { %13451 = shalt.err (!%p13448_p5)
}
  0xb6   : > { %s16229_s14 = sld [smem:[#allocation106_spill]]  ;;  %s13463_s30 = scalar_lea.vmem %s753_s3, 1024 }
  0xb7   : > { %p13464_p8 = scmp.ne.s32.totalorder %s753_s3, %s13463_s30  ;;  %p13471_p11 = scmp.lt.s32.totalorder %s753_s3, %s753_s3 }
  0xb8   : > { %p13472_p12 = scmp.lt.s32.totalorder %s13463_s30, %s13463_s30 }
  0xb9   : > { %p13466_p9 = pnand %p13464_p8, %p13836_p7 }
  0xba   : > { %p13473_p13 = por %p13472_p12, %p13471_p11 }
  0xbb   : > { %p13467_p10 = pneg %p13466_p9 }
  0xbc   : > { %12556 = dma.hbm_to_vmem [thread:$0]  (!%p13828_p6), %s16229_s14, 1024, %s721_s19, [#allocation31], %s16222_s2, %s16222_s2, %s16226_s11  }
  0xbd   : > { %p13474_p0 = pnand %p13473_p13, %p13467_p10 }
  0xbf   : > { %13477 = shalt.err (!%p13474_p0)
}
  0xc0   : > { %12562 = dma.hbm_to_vmem [thread:$0]  (!%p13828_p6), %s16119_s18, 1024, %s753_s3, [#allocation34], %s16222_s2, %s16222_s2, %s16226_s11  }
  0xc1   : > { %s13653_s19 = smov [#allocation38]  }
  0xc2   : > { %s784_s1 = sshll.u32 %s13653_s19, 4  ;;  %s785_s1 = int_to_ptr.vmem [resolvable:$true] %s784_s1 }
  0xc3   : > { %s13489_s7 = scalar_lea.vmem %s785_s1, 4096  ;;  %p13497_p2 = scmp.lt.s32.totalorder %s785_s1, %s785_s1 }
  0xc4   : > { %p13490_p1 = scmp.ne.s32.totalorder %s785_s1, %s13489_s7  ;;  %p13498_p5 = scmp.lt.s32.totalorder %s13489_s7, %s13489_s7 }
  0xc6   : > { %p13492_p3 = pnand %p13490_p1, %p13836_p7  ;;  %p13499_p8 = por %p13498_p5, %p13497_p2 }
  0xc8   : > { %p13493_p4 = pneg %p13492_p3 }
  0xca   : > { %p13500_p9 = pnand %p13499_p8, %p13493_p4 }
  0xcc   : > { %13503 = shalt.err (!%p13500_p9)
}
  0xcd   : > { %12568 = dma.hbm_to_vmem [thread:$0]  (!%p13828_p6), %s16123_s22, 4096, %s785_s1, [#allocation37], %s13649_s6, %s13649_s6, %s13650_s24  }
  0xce   : > { %s10689_s8 = sadd.s32 4294967294, %s13628_s28   ;;  %s13975_s4 = sadd.s32 1, %s13628_s28  }
  0xcf   : > { %s51_s11 = ssub.s32 %s13628_s28, %s13975_s4  ;;  %s54_s3 = sadd.s32 1, %s13624_s27 }
  0xd0   : > { %p52_p7 = scmp.eq.s32.totalorder %s51_s11, 0  ;;  %p61_p10 = scmp.ne.s32.totalorder %s13624_s27, %s13620_s26 }
  0xd1   : > { %p62_p11 = scmp.eq.s32.totalorder %s13628_s28, 0  ;;  %p67_p12 = scmp.ne.s32.totalorder %s13620_s26, %s13616_s5 }
  0xd2   : > { %s13986_s30 = scalar_select %p52_p7, %s13624_s27, %s54_s3  }
  0xd3   : > { %p13988_p13 = por %p62_p11, %p61_p10  ;;  %p16231_p0 = scmp.eq.s32.totalorder %s13814_s29, 0 }
  0xd4   : > { %p574_p1 = scmp.eq.s32.totalorder %s13814_s29, 1  ;;  %p580_p3 = scmp.eq.s32.totalorder %s10689_s8, 1 }
  0xd5   : > { %p13994_p6 = por %p16231_p0, %p67_p12  ;;  %p12591_p4 = scmp.lt.s32.totalorder %s13628_s28, 2 }
  0xd6   : > { %s801_s24 = sand.u32 1, %s13624_s27   ;;  %p14001_p2 = por %p574_p1, %p61_p10 }
  0xd7   : > { %s16232_s6 = scalar_select %p13994_p6, 1, 0 }
  0xd8   : > { %s16233_s21 = scalar_select %p14001_p2, 1, 0 }
  0xd9   : > { %p14005_p5 = por %p580_p3, %p67_p12  ;;  %s10706_s1 = sshll.u32 %s801_s24, 5 }
  0xda   : > { %s11259_s7 = sshll.u32 %s13628_s28, 9  ;;  %s16235_s11 = sld [smem:[#allocation93_spill]] }
  0xdb   : > { %s16234_s19 = scalar_select %p14005_p5, 1, 0 }
  0xdc   : > { %s805_s8 = scalar_lea.vmem [#allocation15], %s10706_s1  ;;  %p14019_p8 = pnand %p12591_p4, %p13988_p13 }
  0xdd   : > { %s812_s9 = sshll.u32 %s805_s8, 4  ;;  %s14023_s13 = scalar_lea.sflag [#allocation16], %s801_s24  ;;  %s14015_s9 = int_to_ptr.vmem [resolvable:$true] %s812_s9 }
  0xde   : > { %p13506_p7 = pneg %p14019_p8 }
  0xe0   : > { %s14013_s3 = scalar_lea.hbm %s16235_s11, %s11259_s7  ;;  %s13509_s1 = scalar_lea.hbm %s16235_s11, 1024 }
  0xe1   : > { %s13504_s14 = scalar_lea.hbm %s14013_s3, 512  ;;  %p13510_p12 = scmp.lt.s32.totalorder %s14013_s3, %s16235_s11 }
  0xe2   : > { %p13505_p9 = scmp.ne.s32.totalorder %s14013_s3, %s13504_s14  ;;  %p13511_p13 = scmp.lt.s32.totalorder %s13509_s1, %s13504_s14 }
  0xe4   : > { %p13507_p10 = pnand %p13506_p7, %p13505_p9  ;;  %p13512_p0 = por %p13511_p13, %p13510_p12 }
  0xe6   : > { %p13508_p11 = pneg %p13507_p10 }
  0xe8   : > { %p13513_p1 = pnand %p13512_p0, %p13508_p11 }
  0xea   : > { %13516 = shalt.err (!%p13513_p1)
}
  0xeb   : > { %s13517_s25 = scalar_lea.vmem %s14015_s9, 512  ;;  %s13654_s24 = smov [#allocation15]  }
  0xec   : > { %p13518_p3 = scmp.ne.s32.totalorder %s14015_s9, %s13517_s25  ;;  %s13522_s16 = sshll.u32 %s13654_s24, 4  ;;  %s13523_s16 = int_to_ptr.vmem [resolvable:$false] %s13522_s16 }
  0xed   : > { %s13524_s7 = scalar_lea.vmem %s13523_s16, 1024  ;;  %p13525_p10 = scmp.lt.s32.totalorder %s14015_s9, %s13523_s16 }
  0xee   : > { %p13520_p4 = pnand %p13518_p3, %p13506_p7  ;;  %p13526_p5 = scmp.lt.s32.totalorder %s13524_s7, %s13517_s25 }
  0xf0   : > { %p13521_p9 = pneg %p13520_p4  ;;  %p13527_p2 = por %p13526_p5, %p13525_p10 }
  0xf2   : > { %p13528_p6 = pnand %p13527_p2, %p13521_p9 }
  0xf4   : > { %13531 = shalt.err (!%p13528_p6)
}
  0xf5   : > { %s16237_s14 = smov 8   ;;  %s16238_s23 = smov 128  }
  0xf6   : > { %12572 = dma.hbm_to_vmem [thread:$0]  (!%p14019_p8), %s14013_s3, 512, %s14015_s9, %s14023_s13, %s16238_s23, %s16238_s23, %s16237_s14  }
  0xf7   : > { %p16239_p7 = scmp.ne.s32.totalorder %s16214_s0, 0 }
  0xf9   : > { %824 = sbr.rel (%p16239_p7) target bundleno = 5926 (0x1726), region = 116 }
  0xfe   : > { %s14050_s1 = sand.u32 1, %s13620_s26   ;;  %p16240_p6 = scmp.ne.s32.totalorder %s16232_s6, 0 }
  0xff   : > { %s10710_s16 = sshll.u32 %s14050_s1, 5  ;;  %s827_s2 = scalar_lea.sflag [#allocation16], %s14050_s1 }
 0x100   : > { %s14056_s12 = scalar_lea.vmem [#allocation15], %s10710_s16 }
 0x101   : > { %13579 = dma.done.wait (%p16240_p6), %s827_s2, 512  }
 0x102   : > { %13581 = vsyncadd (%p16240_p6), %s827_s2, 4294966784  ;;  %p16241_p2 = scmp.eq.s32.totalorder %s13814_s29, 0 }
 0x104   : > { %13583 = dma.done.wait (%p16241_p2), [#allocation19], 32   ;;  %p16242_p5 = pmov %p16241_p2 }
 0x105   : > { %p16243_p8 = pmov %p16241_p2 }
 0x106   : > { %13585 = vsyncadd (%p16242_p5), [#allocation19], 4294967264 }
 0x107   : > { %13587 = dma.done.wait (%p16243_p8), [#allocation22], 32   ;;  %p16244_p11 = pmov %p16241_p2 }
 0x108   : > { %p16245_p12 = pmov %p16241_p2 }
 0x109   : > { %13589 = vsyncadd (%p16244_p11), [#allocation22], 4294967264 }
 0x10a   : > { %13591 = dma.done.wait (%p16245_p12), [#allocation25], 4096   ;;  %p16246_p13 = pmov %p16241_p2 }
 0x10b   : > { %p16247_p0 = pmov %p16241_p2 }
 0x10c   : > { %13593 = vsyncadd (%p16246_p13), [#allocation25], 4294963200 }
 0x10d   : > { %13595 = dma.done.wait (%p16247_p0), [#allocation28], 8192   ;;  %p16248_p1 = pmov %p16247_p0 }
 0x10e   : > { %p16249_p3 = pmov %p16247_p0 }
 0x10f   : > { %13597 = vsyncadd (%p16248_p1), [#allocation28], 4294959104 }
 0x110   : > { %13599 = dma.done.wait (%p16249_p3), [#allocation31], 5120   ;;  %p16250_p4 = pmov %p16247_p0 }
 0x111   : > { %p16251_p9 = pmov %p16247_p0 }
 0x112   : > { %13601 = vsyncadd (%p16250_p4), [#allocation31], 4294962176 }
 0x113   : > { %13603 = dma.done.wait (%p16251_p9), [#allocation34], 2048   ;;  %p16252_p10 = pmov %p16247_p0 }
 0x114   : > { %p16253_p7 = pmov %p16247_p0 }
 0x115   : > { %13605 = vsyncadd (%p16252_p10), [#allocation34], 4294965248 }
 0x116   : > { %13607 = dma.done.wait (%p16253_p7), [#allocation37], 8192   ;;  %p16254_p6 = pmov %p16247_p0 }
 0x117   : > { %v13655_v0 = vmov 0.0   ;;  %v5334_v1 = vld [vmem:[#allocation27] sm:$0xff]  ;;  %v5335_v2 = vld [vmem:[#allocation27 + $0x8] sm:$0xff]  ;;  %v5336_v3 = vld [vmem:[#allocation27 + $0x10] sm:$0xff]  ;;  %s16257_s0 = sld [smem:[#allocation101_spill]]  ;;  %s13656_s6 = smov 64  }
 0x118   : > { %13609 = vsyncadd (%p16254_p6), [#allocation37], 4294959104  ;;  %5526 = vst [vmem:[#allocation9 + $0x98] sm:$0xff] %v13655_v0  ;;  %v5337_v4 = vld [vmem:[#allocation27 + $0x18] sm:$0xff]  ;;  %v5338_v5 = vld [vmem:[#allocation27 + $0x20] sm:$0xff]  ;;  %v11466_v7 = vpack.c.bf16 %v5335_v2, %v5334_v1  ;;  %s13657_s3 = smov 96  }
 0x119   : > { %5527 = vst [vmem:[#allocation9 + $0x48] sm:$0xff] %v13655_v0  ;;  %5528 = vst [vmem:[#allocation9 + $0xc0] sm:$0xff] %v13655_v0  ;;  %v5339_v6 = vld [vmem:[#allocation27 + $0x28] sm:$0xff]  ;;  %v5340_v8 = vld [vmem:[#allocation27 + $0x30] sm:$0xff]  ;;  %v11471_v11 = vpack.c.bf16 %v5337_v4, %v5336_v3  ;;  %s13658_s8 = smov 32   ;;  %vm13659_vm0 = vmmov 0  }
 0x11a   : > { %5529 = vst [vmem:[#allocation9 + $0xe0] sm:$0xff] %v13655_v0  ;;  %5530 = vst [vmem:[#allocation9 + $0x38] sm:$0xff] %v13655_v0  ;;  %v5341_v9 = vld [vmem:[#allocation27 + $0x38] sm:$0xff]  ;;  %v5342_v10 = vld [vmem:[#allocation27 + $0x40] sm:$0xff]  ;;  %v11476_v12 = vpack.c.bf16 %v5339_v6, %v5338_v5  ;;  %vm2958_vm1 = vcmask 261120   ;;  %vm3280_vm2 = vcmask 1043456  }
 0x11b   : > { %5531 = vst [vmem:[#allocation9 + $0x88] sm:$0xff] %v13655_v0  ;;  %5532 = vst [vmem:[#allocation9 + $0xb8] sm:$0xff] %v13655_v0  ;;  %v5343_v13 = vld [vmem:[#allocation27 + $0x48] sm:$0xff]  ;;  %v5344_v14 = vld [vmem:[#allocation27 + $0x50] sm:$0xff]  ;;  %v11481_v16 = vpack.c.bf16 %v5341_v9, %v5340_v8  ;;  %vm3184_vm9 = vcmask 195584   ;;  %s16274_s13 = sld [smem:[#allocation108_spill]] }
 0x11c   : > { %5533 = vst [vmem:[#allocation9 + $0xb0] sm:$0xff] %v13655_v0  ;;  %5534 = vst [vmem:[#allocation9 + $0xd0] sm:$0xff] %v13655_v0  ;;  %v5345_v15 = vld [vmem:[#allocation27 + $0x58] sm:$0xff]  ;;  %v5346_v17 = vld [vmem:[#allocation27 + $0x60] sm:$0xff]  ;;  %v11486_v20 = vpack.c.bf16 %v5343_v13, %v5342_v10 }
 0x11d   : > { %5535 = vst [vmem:[#allocation9 + $0xe8] sm:$0xff] %v13655_v0  ;;  %5536 = vst [vmem:[#allocation9 + $0x50] sm:$0xff] %v13655_v0  ;;  %v5347_v18 = vld [vmem:[#allocation27 + $0x68] sm:$0xff]  ;;  %v5348_v19 = vld [vmem:[#allocation27 + $0x70] sm:$0xff]  ;;  %v11491_v21 = vpack.c.bf16 %v5345_v15, %v5344_v14 }
 0x11e   : > { %5537 = vst [vmem:[#allocation9 + $0x70] sm:$0xff] %v13655_v0  ;;  %5538 = vst [vmem:[#allocation9 + $0x78] sm:$0xff] %v13655_v0  ;;  %v5349_v22 = vld [vmem:[#allocation27 + $0x78] sm:$0xff]  ;;  %v5350_v23 = vld [vmem:[#allocation27 + $0x80] sm:$0xff]  ;;  %v11496_v25 = vpack.c.bf16 %v5347_v18, %v5346_v17 }
 0x11f   : > { %5539 = vst [vmem:[#allocation9] sm:$0xff] %v13655_v0  ;;  %5540 = vst [vmem:[#allocation9 + $0x8] sm:$0xff] %v13655_v0  ;;  %v5351_v24 = vld [vmem:[#allocation27 + $0x88] sm:$0xff]  ;;  %v5352_v26 = vld [vmem:[#allocation27 + $0x90] sm:$0xff]  ;;  %v11501_v29 = vpack.c.bf16 %v5349_v22, %v5348_v19 }
 0x120   : > { %5541 = vst [vmem:[#allocation9 + $0x40] sm:$0xff] %v13655_v0  ;;  %5542 = vst [vmem:[#allocation9 + $0x90] sm:$0xff] %v13655_v0  ;;  %v5353_v27 = vld [vmem:[#allocation27 + $0x98] sm:$0xff]  ;;  %v5354_v28 = vld [vmem:[#allocation27 + $0xa0] sm:$0xff]  ;;  %v11506_v30 = vpack.c.bf16 %v5351_v24, %v5350_v23 }
 0x121   : > { %5543 = vst [vmem:[#allocation9 + $0x18] sm:$0xff] %v13655_v0  ;;  %5544 = vst [vmem:[#allocation9 + $0xa0] sm:$0xff] %v13655_v0  ;;  %v5355_v31 = vld [vmem:[#allocation27 + $0xa8] sm:$0xff]  ;;  %v5356_v32 = vld [vmem:[#allocation27 + $0xb0] sm:$0xff]  ;;  %v11511_v34 = vpack.c.bf16 %v5353_v27, %v5352_v26 }
 0x122   : > { %5545 = vst [vmem:[#allocation9 + $0xd8] sm:$0xff] %v13655_v0  ;;  %5546 = vst [vmem:[#allocation9 + $0x28] sm:$0xff] %v13655_v0  ;;  %v5357_v33 = vld [vmem:[#allocation27 + $0xb8] sm:$0xff]  ;;  %v5358_v35 = vld [vmem:[#allocation27 + $0xc0] sm:$0xff]  ;;  %v11516_v38 = vpack.c.bf16 %v5355_v31, %v5354_v28 }
 0x123   : > { %5547 = vst [vmem:[#allocation9 + $0x30] sm:$0xff] %v13655_v0  ;;  %5548 = vst [vmem:[#allocation9 + $0x80] sm:$0xff] %v13655_v0  ;;  %v5359_v36 = vld [vmem:[#allocation27 + $0xc8] sm:$0xff]  ;;  %v5360_v37 = vld [vmem:[#allocation27 + $0xd0] sm:$0xff]  ;;  %v11521_v39 = vpack.c.bf16 %v5357_v33, %v5356_v32 }
 0x124   : > { %5549 = vst [vmem:[#allocation9 + $0xa8] sm:$0xff] %v13655_v0  ;;  %5550 = vst [vmem:[#allocation9 + $0xf8] sm:$0xff] %v13655_v0  ;;  %v5361_v40 = vld [vmem:[#allocation27 + $0xd8] sm:$0xff]  ;;  %v5362_v41 = vld [vmem:[#allocation27 + $0xe0] sm:$0xff]  ;;  %v11526_v43 = vpack.c.bf16 %v5359_v36, %v5358_v35 }
 0x125   : > { %5551 = vst [vmem:[#allocation9 + $0xf0] sm:$0xff] %v13655_v0  ;;  %5552 = vst [vmem:[#allocation9 + $0x68] sm:$0xff] %v13655_v0  ;;  %v5363_v42 = vld [vmem:[#allocation27 + $0xe8] sm:$0xff]  ;;  %v5364_v44 = vld [vmem:[#allocation27 + $0xf0] sm:$0xff]  ;;  %v11531_v47 = vpack.c.bf16 %v5361_v40, %v5360_v37 }
 0x126   : > { %5553 = vst [vmem:[#allocation9 + $0x58] sm:$0xff] %v13655_v0  ;;  %5554 = vst [vmem:[#allocation9 + $0x10] sm:$0xff] %v13655_v0  ;;  %v5365_v45 = vld [vmem:[#allocation27 + $0xf8] sm:$0xff]  ;;  %v5398_v46 = vld [vmem:[#allocation29] sm:$0xff]  ;;  %v11536_v48 = vpack.c.bf16 %v5363_v42, %v5362_v41 }
 0x127   : > { %5555 = vst [vmem:[#allocation9 + $0x20] sm:$0xff] %v13655_v0  ;;  %5556 = vst [vmem:[#allocation9 + $0x60] sm:$0xff] %v13655_v0  ;;  %v5399_v49 = vld [vmem:[#allocation29 + $0x8] sm:$0xff]  ;;  %v5400_v50 = vld [vmem:[#allocation29 + $0x10] sm:$0xff]  ;;  %v11541_v52 = vpack.c.bf16 %v5365_v45, %v5364_v44 }
 0x128   : > { %5557 = vst [vmem:[#allocation9 + $0xc8] sm:$0xff] %v13655_v0  ;;  %5558 = vst [vmem:[#allocation10 + $0xc0] sm:$0xff] %v13655_v0  ;;  %v5401_v51 = vld [vmem:[#allocation29 + $0x18] sm:$0xff]  ;;  %v5402_v53 = vld [vmem:[#allocation29 + $0x20] sm:$0xff]  ;;  %v11304_v56 = vpack.c.bf16 %v5399_v49, %v5398_v46 }
 0x129   : > { %5559 = vst [vmem:[#allocation10 + $0x38] sm:$0xff] %v13655_v0  ;;  %5560 = vst [vmem:[#allocation10] sm:$0xff] %v13655_v0  ;;  %v5403_v54 = vld [vmem:[#allocation29 + $0x28] sm:$0xff]  ;;  %v5404_v55 = vld [vmem:[#allocation29 + $0x30] sm:$0xff]  ;;  %v11305_v57 = vpack.c.bf16 %v5401_v51, %v5400_v50 }
 0x12a   : > { %5561 = vst [vmem:[#allocation10 + $0xc8] sm:$0xff] %v13655_v0  ;;  %5562 = vst [vmem:[#allocation10 + $0xd0] sm:$0xff] %v13655_v0  ;;  %v5405_v58 = vld [vmem:[#allocation29 + $0x38] sm:$0xff]  ;;  %v5406_v59 = vld [vmem:[#allocation29 + $0x40] sm:$0xff]  ;;  %v11306_v61 = vpack.c.bf16 %v5403_v54, %v5402_v53 }
 0x12b   : > { %5563 = vst [vmem:[#allocation10 + $0x60] sm:$0xff] %v13655_v0  ;;  %5564 = vst [vmem:[#allocation10 + $0xf0] sm:$0xff] %v13655_v0  ;;  %v5407_v60 = vld [vmem:[#allocation29 + $0x48] sm:$0xff]  ;;  %v5408_v62 = vld [vmem:[#allocation29 + $0x50] sm:$0xff] }
 0x12c   : > { %5565 = vst [vmem:[#allocation10 + $0xe8] sm:$0xff] %v13655_v0  ;;  %5566 = vst [vmem:[#allocation10 + $0x18] sm:$0xff] %v13655_v0  ;;  %v5409_v63 = vld [vmem:[#allocation29 + $0x58] sm:$0xff] }
 0x12d   : > { %5567 = vst [vmem:[#allocation10 + $0x68] sm:$0xff] %v13655_v0  ;;  %5568 = vst [vmem:[#allocation10 + $0x28] sm:$0xff] %v13655_v0 }
 0x12e   : > { %5569 = vst [vmem:[#allocation10 + $0x80] sm:$0xff] %v13655_v0  ;;  %5570 = vst [vmem:[#allocation10 + $0x78] sm:$0xff] %v13655_v0 }
 0x12f   : > { %5571 = vst [vmem:[#allocation10 + $0x50] sm:$0xff] %v13655_v0  ;;  %5572 = vst [vmem:[#allocation10 + $0x10] sm:$0xff] %v13655_v0 }
 0x130   : > { %5573 = vst [vmem:[#allocation10 + $0xd8] sm:$0xff] %v13655_v0  ;;  %5574 = vst [vmem:[#allocation10 + $0x40] sm:$0xff] %v13655_v0 }
 0x131   : > { %5575 = vst [vmem:[#allocation10 + $0x70] sm:$0xff] %v13655_v0  ;;  %5576 = vst [vmem:[#allocation10 + $0x98] sm:$0xff] %v13655_v0 }
 0x132   : > { %5577 = vst [vmem:[#allocation10 + $0x30] sm:$0xff] %v13655_v0  ;;  %5578 = vst [vmem:[#allocation10 + $0xb8] sm:$0xff] %v13655_v0 }
 0x133   : > { %5579 = vst [vmem:[#allocation10 + $0xb0] sm:$0xff] %v13655_v0  ;;  %5580 = vst [vmem:[#allocation10 + $0x88] sm:$0xff] %v13655_v0 }
 0x134   : > { %5581 = vst [vmem:[#allocation10 + $0xa8] sm:$0xff] %v13655_v0  ;;  %5582 = vst [vmem:[#allocation10 + $0xa0] sm:$0xff] %v13655_v0 }
 0x135   : > { %5583 = vst [vmem:[#allocation10 + $0x58] sm:$0xff] %v13655_v0  ;;  %5584 = vst [vmem:[#allocation10 + $0x90] sm:$0xff] %v13655_v0 }
 0x136   : > { %5585 = vst [vmem:[#allocation10 + $0x48] sm:$0xff] %v13655_v0  ;;  %5586 = vst [vmem:[#allocation10 + $0x8] sm:$0xff] %v13655_v0 }
 0x137   : > { %5587 = vst [vmem:[#allocation10 + $0xf8] sm:$0xff] %v13655_v0  ;;  %5588 = vst [vmem:[#allocation10 + $0xe0] sm:$0xff] %v13655_v0 }
 0x138   : > { %5589 = vst [vmem:[#allocation10 + $0x20] sm:$0xff] %v13655_v0  ;;  %5590 = vst [vmem:[#allocation11 + $0x58] sm:$0xff] %v13655_v0 }
 0x139   : > { %5591 = vst [vmem:[#allocation11 + $0x70] sm:$0xff] %v13655_v0  ;;  %5592 = vst [vmem:[#allocation11 + $0x90] sm:$0xff] %v13655_v0 }
 0x13a   : > { %5593 = vst [vmem:[#allocation11 + $0x10] sm:$0xff] %v13655_v0  ;;  %5594 = vst [vmem:[#allocation11 + $0xa0] sm:$0xff] %v13655_v0 }
 0x13b   : > { %5595 = vst [vmem:[#allocation11] sm:$0xff] %v13655_v0  ;;  %5596 = vst [vmem:[#allocation11 + $0x48] sm:$0xff] %v13655_v0 }
 0x13c   : > { %5597 = vst [vmem:[#allocation11 + $0xe0] sm:$0xff] %v13655_v0  ;;  %5598 = vst [vmem:[#allocation11 + $0xf0] sm:$0xff] %v13655_v0 }
 0x13d   : > { %5599 = vst [vmem:[#allocation11 + $0xb0] sm:$0xff] %v13655_v0  ;;  %5600 = vst [vmem:[#allocation11 + $0xe8] sm:$0xff] %v13655_v0 }
 0x13e   : > { %5601 = vst [vmem:[#allocation11 + $0xb8] sm:$0xff] %v13655_v0  ;;  %5602 = vst [vmem:[#allocation11 + $0xc0] sm:$0xff] %v13655_v0 }
 0x13f   : > { %5603 = vst [vmem:[#allocation11 + $0x98] sm:$0xff] %v13655_v0  ;;  %5604 = vst [vmem:[#allocation11 + $0x60] sm:$0xff] %v13655_v0 }
 0x140   : > { %5605 = vst [vmem:[#allocation11 + $0x50] sm:$0xff] %v13655_v0  ;;  %5606 = vst [vmem:[#allocation11 + $0x20] sm:$0xff] %v13655_v0 }
 0x141   : > { %5607 = vst [vmem:[#allocation11 + $0x80] sm:$0xff] %v13655_v0  ;;  %5608 = vst [vmem:[#allocation11 + $0x8] sm:$0xff] %v13655_v0 }
 0x142   : > { %5609 = vst [vmem:[#allocation11 + $0x40] sm:$0xff] %v13655_v0  ;;  %5610 = vst [vmem:[#allocation11 + $0xc8] sm:$0xff] %v13655_v0 }
 0x143   : > { %5611 = vst [vmem:[#allocation11 + $0xd8] sm:$0xff] %v13655_v0  ;;  %5612 = vst [vmem:[#allocation11 + $0x68] sm:$0xff] %v13655_v0 }
 0x144   : > { %5613 = vst [vmem:[#allocation11 + $0x88] sm:$0xff] %v13655_v0  ;;  %5614 = vst [vmem:[#allocation11 + $0x38] sm:$0xff] %v13655_v0 }
 0x145   : > { %5615 = vst [vmem:[#allocation11 + $0xd0] sm:$0xff] %v13655_v0  ;;  %5616 = vst [vmem:[#allocation11 + $0x78] sm:$0xff] %v13655_v0 }
 0x146   : > { %5617 = vst [vmem:[#allocation11 + $0x18] sm:$0xff] %v13655_v0  ;;  %5618 = vst [vmem:[#allocation11 + $0xf8] sm:$0xff] %v13655_v0 }
 0x147   : > { %5619 = vst [vmem:[#allocation11 + $0x28] sm:$0xff] %v13655_v0  ;;  %5620 = vst [vmem:[#allocation11 + $0x30] sm:$0xff] %v13655_v0 }
 0x148   : > { %5621 = vst [vmem:[#allocation11 + $0xa8] sm:$0xff] %v13655_v0  ;;  %5366 = vst [vmem:[#allocation6 + $0xb0] sm:$0xff] %v5334_v1  ;;  %v5410_v0 = vld [vmem:[#allocation29 + $0x60] sm:$0xff]  ;;  %v11307_v1 = vpack.c.bf16 %v5405_v58, %v5404_v55 }
 0x149   : > { %5367 = vst [vmem:[#allocation6] sm:$0xff] %v5335_v2  ;;  %5368 = vst [vmem:[#allocation6 + $0xd8] sm:$0xff] %v5336_v3  ;;  %v11308_v2 = vpack.c.bf16 %v5407_v60, %v5406_v59  ;;  %v5411_v3 = vld [vmem:[#allocation29 + $0x68] sm:$0xff] }
 0x14a   : > { %5369 = vst [vmem:[#allocation6 + $0x18] sm:$0xff] %v5337_v4  ;;  %5370 = vst [vmem:[#allocation6 + $0x50] sm:$0xff] %v5338_v5  ;;  %v5412_v4 = vld [vmem:[#allocation29 + $0x70] sm:$0xff]  ;;  %v5413_v5 = vld [vmem:[#allocation29 + $0x78] sm:$0xff] }
 0x14b   : > { %5371 = vst [vmem:[#allocation6 + $0x68] sm:$0xff] %v5339_v6  ;;  %5372 = vst [vmem:[#allocation6 + $0x30] sm:$0xff] %v5340_v8  ;;  %v11309_v6 = vpack.c.bf16 %v5409_v63, %v5408_v62  ;;  %v5415_v8 = vld [vmem:[#allocation29 + $0x88] sm:$0xff] }
 0x14c   : > { %5373 = vst [vmem:[#allocation6 + $0x48] sm:$0xff] %v5341_v9  ;;  %5374 = vst [vmem:[#allocation6 + $0x80] sm:$0xff] %v5342_v10  ;;  %v5416_v9 = vld [vmem:[#allocation29 + $0x90] sm:$0xff]  ;;  %v11310_v10 = vpack.c.bf16 %v5411_v3, %v5410_v0 }
 0x14d   : > { %11467 = vst [vmem:[#allocation12] sm:$0xff] %v11466_v7   ;;  %5375 = vst [vmem:[#allocation6 + $0x88] sm:$0xff] %v5343_v13  ;;  %v5414_v7 = vld [vmem:[#allocation29 + $0x80] sm:$0xff] }
 0x14e   : > { %5376 = vst [vmem:[#allocation6 + $0xe8] sm:$0xff] %v5344_v14  ;;  %5377 = vst [vmem:[#allocation6 + $0xb8] sm:$0xff] %v5345_v15  ;;  %v5418_v13 = vld [vmem:[#allocation29 + $0xa0] sm:$0xff]  ;;  %v5419_v14 = vld [vmem:[#allocation29 + $0xa8] sm:$0xff]  ;;  %v11312_v15 = vpack.c.bf16 %v5415_v8, %v5414_v7 }
 0x14f   : > { %11786 = vst [vmem:[#allocation12 + $0x8] sm:$0xff] %v11471_v11   ;;  %11787 = vst [vmem:[#allocation12 + $0x10] sm:$0xff] %v11476_v12   ;;  %v11311_v11 = vpack.c.bf16 %v5413_v5, %v5412_v4  ;;  %v5417_v12 = vld [vmem:[#allocation29 + $0x98] sm:$0xff] }
 0x150   : > { %5378 = vst [vmem:[#allocation6 + $0x60] sm:$0xff] %v5346_v17  ;;  %5379 = vst [vmem:[#allocation6 + $0xf0] sm:$0xff] %v5347_v18  ;;  %v5421_v17 = vld [vmem:[#allocation29 + $0xb8] sm:$0xff]  ;;  %v5422_v18 = vld [vmem:[#allocation29 + $0xc0] sm:$0xff] }
 0x151   : > { %5380 = vst [vmem:[#allocation6 + $0x8] sm:$0xff] %v5348_v19  ;;  %11788 = vst [vmem:[#allocation12 + $0x18] sm:$0xff] %v11481_v16   ;;  %v5420_v16 = vld [vmem:[#allocation29 + $0xb0] sm:$0xff]  ;;  %v11313_v19 = vpack.c.bf16 %v5417_v12, %v5416_v9 }
 0x152   : > { %5381 = vst [vmem:[#allocation6 + $0x78] sm:$0xff] %v5349_v22  ;;  %5382 = vst [vmem:[#allocation6 + $0x38] sm:$0xff] %v5350_v23  ;;  %v5424_v22 = vld [vmem:[#allocation29 + $0xd0] sm:$0xff]  ;;  %v5425_v23 = vld [vmem:[#allocation29 + $0xd8] sm:$0xff] }
 0x153   : > { %5383 = vst [vmem:[#allocation6 + $0x58] sm:$0xff] %v5351_v24  ;;  %11789 = vst [vmem:[#allocation12 + $0x20] sm:$0xff] %v11486_v20   ;;  %v11314_v20 = vpack.c.bf16 %v5419_v14, %v5418_v13  ;;  %v11315_v24 = vpack.c.bf16 %v5421_v17, %v5420_v16 }
 0x154   : > { %11790 = vst [vmem:[#allocation12 + $0x28] sm:$0xff] %v11491_v21   ;;  %5384 = vst [vmem:[#allocation6 + $0x40] sm:$0xff] %v5352_v26  ;;  %v5423_v21 = vld [vmem:[#allocation29 + $0xc8] sm:$0xff] }
 0x155   : > { %5385 = vst [vmem:[#allocation6 + $0xc8] sm:$0xff] %v5353_v27  ;;  %5386 = vst [vmem:[#allocation6 + $0xe0] sm:$0xff] %v5354_v28  ;;  %v5427_v26 = vld [vmem:[#allocation29 + $0xe8] sm:$0xff]  ;;  %v5428_v27 = vld [vmem:[#allocation29 + $0xf0] sm:$0xff]  ;;  %v11316_v28 = vpack.c.bf16 %v5423_v21, %v5422_v18 }
 0x156   : > { %11791 = vst [vmem:[#allocation12 + $0x30] sm:$0xff] %v11496_v25   ;;  %5387 = vst [vmem:[#allocation6 + $0x90] sm:$0xff] %v5355_v31  ;;  %v5426_v25 = vld [vmem:[#allocation29 + $0xe0] sm:$0xff] }
 0x157   : > { %5388 = vst [vmem:[#allocation6 + $0x70] sm:$0xff] %v5356_v32  ;;  %5389 = vst [vmem:[#allocation6 + $0xc0] sm:$0xff] %v5357_v33  ;;  %v5462_v31 = vld [vmem:[#allocation30] sm:$0xff]  ;;  %v5463_v32 = vld [vmem:[#allocation30 + $0x8] sm:$0xff]  ;;  %v11318_v33 = vpack.c.bf16 %v5427_v26, %v5426_v25 }
 0x158   : > { %11792 = vst [vmem:[#allocation12 + $0x38] sm:$0xff] %v11501_v29   ;;  %11793 = vst [vmem:[#allocation12 + $0x40] sm:$0xff] %v11506_v30   ;;  %v11317_v29 = vpack.c.bf16 %v5425_v23, %v5424_v22  ;;  %v5429_v30 = vld [vmem:[#allocation29 + $0xf8] sm:$0xff] }
 0x159   : > { %5390 = vst [vmem:[#allocation6 + $0xa8] sm:$0xff] %v5358_v35  ;;  %5391 = vst [vmem:[#allocation6 + $0xd0] sm:$0xff] %v5359_v36  ;;  %v5465_v35 = vld [vmem:[#allocation30 + $0x18] sm:$0xff]  ;;  %v5466_v36 = vld [vmem:[#allocation30 + $0x20] sm:$0xff] }
 0x15a   : > { %5392 = vst [vmem:[#allocation6 + $0x10] sm:$0xff] %v5360_v37  ;;  %11794 = vst [vmem:[#allocation12 + $0x48] sm:$0xff] %v11511_v34   ;;  %v5464_v34 = vld [vmem:[#allocation30 + $0x10] sm:$0xff]  ;;  %v11319_v37 = vpack.c.bf16 %v5429_v30, %v5428_v27 }
 0x15b   : > { %5393 = vst [vmem:[#allocation6 + $0x28] sm:$0xff] %v5361_v40  ;;  %5394 = vst [vmem:[#allocation6 + $0xa0] sm:$0xff] %v5362_v41  ;;  %v5468_v40 = vld [vmem:[#allocation30 + $0x30] sm:$0xff]  ;;  %v5469_v41 = vld [vmem:[#allocation30 + $0x38] sm:$0xff] }
 0x15c   : > { %5395 = vst [vmem:[#allocation6 + $0xf8] sm:$0xff] %v5363_v42  ;;  %11795 = vst [vmem:[#allocation12 + $0x50] sm:$0xff] %v11516_v38   ;;  %v11546_v38 = vpack.c.bf16 %v5463_v32, %v5462_v31  ;;  %v11551_v42 = vpack.c.bf16 %v5465_v35, %v5464_v34 }
 0x15d   : > { %11796 = vst [vmem:[#allocation12 + $0x58] sm:$0xff] %v11521_v39   ;;  %5396 = vst [vmem:[#allocation6 + $0x20] sm:$0xff] %v5364_v44  ;;  %v5467_v39 = vld [vmem:[#allocation30 + $0x28] sm:$0xff] }
 0x15e   : > { %5397 = vst [vmem:[#allocation6 + $0x98] sm:$0xff] %v5365_v45  ;;  %5430 = vst [vmem:[#allocation7 + $0x80] sm:$0xff] %v5398_v46  ;;  %v5471_v44 = vld [vmem:[#allocation30 + $0x48] sm:$0xff]  ;;  %v5472_v45 = vld [vmem:[#allocation30 + $0x50] sm:$0xff]  ;;  %v11556_v46 = vpack.c.bf16 %v5467_v39, %v5466_v36 }
 0x15f   : > { %11797 = vst [vmem:[#allocation12 + $0x60] sm:$0xff] %v11526_v43   ;;  %5431 = vst [vmem:[#allocation7 + $0xc8] sm:$0xff] %v5399_v49  ;;  %v5470_v43 = vld [vmem:[#allocation30 + $0x40] sm:$0xff] }
 0x160   : > { %5432 = vst [vmem:[#allocation7 + $0xe8] sm:$0xff] %v5400_v50  ;;  %5433 = vst [vmem:[#allocation7 + $0x78] sm:$0xff] %v5401_v51  ;;  %v5474_v49 = vld [vmem:[#allocation30 + $0x60] sm:$0xff]  ;;  %v5475_v50 = vld [vmem:[#allocation30 + $0x68] sm:$0xff]  ;;  %v11566_v51 = vpack.c.bf16 %v5471_v44, %v5470_v43 }
 0x161   : > { %11798 = vst [vmem:[#allocation12 + $0x68] sm:$0xff] %v11531_v47   ;;  %11799 = vst [vmem:[#allocation12 + $0x70] sm:$0xff] %v11536_v48   ;;  %v11561_v47 = vpack.c.bf16 %v5469_v41, %v5468_v40  ;;  %v5473_v48 = vld [vmem:[#allocation30 + $0x58] sm:$0xff] }
 0x162   : > { %5434 = vst [vmem:[#allocation7 + $0x8] sm:$0xff] %v5402_v53  ;;  %5435 = vst [vmem:[#allocation7 + $0x90] sm:$0xff] %v5403_v54  ;;  %v5477_v53 = vld [vmem:[#allocation30 + $0x78] sm:$0xff]  ;;  %v5478_v54 = vld [vmem:[#allocation30 + $0x80] sm:$0xff] }
 0x163   : > { %5436 = vst [vmem:[#allocation7 + $0x58] sm:$0xff] %v5404_v55  ;;  %11800 = vst [vmem:[#allocation12 + $0x78] sm:$0xff] %v11541_v52   ;;  %v5476_v52 = vld [vmem:[#allocation30 + $0x70] sm:$0xff]  ;;  %v11571_v55 = vpack.c.bf16 %v5473_v48, %v5472_v45 }
 0x164   : > { %5437 = vst [vmem:[#allocation7 + $0xa8] sm:$0xff] %v5405_v58  ;;  %5438 = vst [vmem:[#allocation7 + $0xd0] sm:$0xff] %v5406_v59  ;;  %v5480_v58 = vld [vmem:[#allocation30 + $0x90] sm:$0xff]  ;;  %v5481_v59 = vld [vmem:[#allocation30 + $0x98] sm:$0xff] }
 0x165   : > { %5439 = vst [vmem:[#allocation7 + $0xb0] sm:$0xff] %v5407_v60  ;;  %5942 = vst [vmem:[#allocation13 + $0x60] sm:$0xff] %v11304_v56  ;;  %v11576_v56 = vpack.c.bf16 %v5475_v50, %v5474_v49  ;;  %v11581_v60 = vpack.c.bf16 %v5477_v53, %v5476_v52 }
 0x166   : > { %5943 = vst [vmem:[#allocation13 + $0x8] sm:$0xff] %v11305_v57  ;;  %5440 = vst [vmem:[#allocation7 + $0x38] sm:$0xff] %v5408_v62  ;;  %v5479_v57 = vld [vmem:[#allocation30 + $0x88] sm:$0xff] }
 0x167   : > { %5441 = vst [vmem:[#allocation7 + $0x40] sm:$0xff] %v5409_v63  ;;  %5442 = vst [vmem:[#allocation7 + $0xe0] sm:$0xff] %v5410_v0  ;;  %v5483_v62 = vld [vmem:[#allocation30 + $0xa8] sm:$0xff]  ;;  %v5484_v63 = vld [vmem:[#allocation30 + $0xb0] sm:$0xff]  ;;  %v11586_v0 = vpack.c.bf16 %v5479_v57, %v5478_v54 }
 0x168   : > { %5944 = vst [vmem:[#allocation13 + $0x28] sm:$0xff] %v11306_v61  ;;  %5443 = vst [vmem:[#allocation7 + $0x60] sm:$0xff] %v5411_v3  ;;  %v5482_v61 = vld [vmem:[#allocation30 + $0xa0] sm:$0xff] }
 0x169   : > { %5444 = vst [vmem:[#allocation7 + $0x18] sm:$0xff] %v5412_v4  ;;  %5445 = vst [vmem:[#allocation7 + $0x68] sm:$0xff] %v5413_v5  ;;  %v5486_v3 = vld [vmem:[#allocation30 + $0xc0] sm:$0xff]  ;;  %v5487_v4 = vld [vmem:[#allocation30 + $0xc8] sm:$0xff]  ;;  %v11596_v5 = vpack.c.bf16 %v5483_v62, %v5482_v61 }
 0x16a   : > { %5945 = vst [vmem:[#allocation13] sm:$0xff] %v11307_v1  ;;  %5946 = vst [vmem:[#allocation13 + $0x40] sm:$0xff] %v11308_v2  ;;  %v11591_v1 = vpack.c.bf16 %v5481_v59, %v5480_v58  ;;  %v5485_v2 = vld [vmem:[#allocation30 + $0xb8] sm:$0xff] }
 0x16b   : > { %5446 = vst [vmem:[#allocation7 + $0x10] sm:$0xff] %v5414_v7  ;;  %5447 = vst [vmem:[#allocation7 + $0x70] sm:$0xff] %v5415_v8  ;;  %v5489_v7 = vld [vmem:[#allocation30 + $0xd8] sm:$0xff]  ;;  %v5490_v8 = vld [vmem:[#allocation30 + $0xe0] sm:$0xff] }
 0x16c   : > { %5448 = vst [vmem:[#allocation7 + $0x50] sm:$0xff] %v5416_v9  ;;  %5947 = vst [vmem:[#allocation13 + $0x38] sm:$0xff] %v11309_v6  ;;  %v5488_v6 = vld [vmem:[#allocation30 + $0xd0] sm:$0xff]  ;;  %v11601_v9 = vpack.c.bf16 %v5485_v2, %v5484_v63 }
 0x16d   : > { %5449 = vst [vmem:[#allocation7 + $0xa0] sm:$0xff] %v5417_v12  ;;  %5450 = vst [vmem:[#allocation7 + $0xd8] sm:$0xff] %v5418_v13  ;;  %v5492_v12 = vld [vmem:[#allocation30 + $0xf0] sm:$0xff]  ;;  %v5493_v13 = vld [vmem:[#allocation30 + $0xf8] sm:$0xff] }
 0x16e   : > { %5451 = vst [vmem:[#allocation7 + $0x30] sm:$0xff] %v5419_v14  ;;  %5948 = vst [vmem:[#allocation13 + $0x30] sm:$0xff] %v11310_v10  ;;  %v11606_v10 = vpack.c.bf16 %v5487_v4, %v5486_v3  ;;  %v11611_v14 = vpack.c.bf16 %v5489_v7, %v5488_v6 }
 0x16f   : > { %5949 = vst [vmem:[#allocation13 + $0x20] sm:$0xff] %v11311_v11  ;;  %5452 = vst [vmem:[#allocation7 + $0x20] sm:$0xff] %v5420_v16  ;;  %v5491_v11 = vld [vmem:[#allocation30 + $0xe8] sm:$0xff]  ;;  %v11621_v16 = vpack.c.bf16 %v5493_v13, %v5492_v12 }
 0x170   : > { %5453 = vst [vmem:[#allocation7 + $0xf0] sm:$0xff] %v5421_v17  ;;  %5454 = vst [vmem:[#allocation7 + $0x88] sm:$0xff] %v5422_v18  ;;  %v952_v17 = vld [vmem:[%s14056_s12] sm:$0xff]  ;;  %v954_v18 = vld [vmem:[%s14056_s12 + $0x10] sm:$0xff] }
 0x171   : > { %5950 = vst [vmem:[#allocation13 + $0x70] sm:$0xff] %v11312_v15  ;;  %5455 = vst [vmem:[#allocation7 + $0x48] sm:$0xff] %v5423_v21  ;;  %v11616_v15 = vpack.c.bf16 %v5491_v11, %v5490_v8  ;;  %956 = vadd.xlane.f32.xlu0 %v952_v17  ;;  %960 = vadd.xlane.f32.xlu1 %v954_v18  ;;  %v12709_v21 = vld [vmem:[#allocation24 + $0x78] sm:$0xff]  }
 0x172   : > { %5456 = vst [vmem:[#allocation7 + $0xf8] sm:$0xff] %v5424_v22  ;;  %5457 = vst [vmem:[#allocation7 + $0xc0] sm:$0xff] %v5425_v23  ;;  %v12710_v22 = vld [vmem:[#allocation24 + $0x38] sm:$0xff]   ;;  %11846 = vmatprep.subr.bf16.mxu0 %v12709_v21 }
 0x173   : > { %5951 = vst [vmem:[#allocation13 + $0x50] sm:$0xff] %v11313_v19  ;;  %5952 = vst [vmem:[#allocation13 + $0x78] sm:$0xff] %v11314_v20  ;;  %v953_v19 = vld [vmem:[%s14056_s12 + $0x8] sm:$0xff]  ;;  %v955_v20 = vld [vmem:[%s14056_s12 + $0x18] sm:$0xff]  ;;  %11847 = vmatpush3.bf16.xpose.msra.mxu0 %v12710_v22 }
 0x174   : > { %5458 = vst [vmem:[#allocation7 + $0xb8] sm:$0xff] %v5426_v25  ;;  %5459 = vst [vmem:[#allocation7] sm:$0xff] %v5427_v26  ;;  %v12711_v23 = vld [vmem:[#allocation24 + $0xb8] sm:$0xff]   ;;  %v12714_v25 = vld [vmem:[#allocation24 + $0xb0] sm:$0xff]  }
 0x175   : > { %5460 = vst [vmem:[#allocation7 + $0x28] sm:$0xff] %v5428_v27  ;;  %5953 = vst [vmem:[#allocation13 + $0x48] sm:$0xff] %v11315_v24  ;;  %958 = vadd.xlane.f32.xlu0 %v953_v19  ;;  %962 = vadd.xlane.f32.xlu1 %v955_v20  ;;  %v12712_v24 = vld [vmem:[#allocation24 + $0x70] sm:$0xff]   ;;  %v12715_v27 = vld [vmem:[#allocation24 + $0x68] sm:$0xff]  }
 0x176   : > { %5461 = vst [vmem:[#allocation7 + $0x98] sm:$0xff] %v5429_v30  ;;  %5494 = vst [vmem:[#allocation8 + $0xb0] sm:$0xff] %v5462_v31  ;;  %12150 = vmatprep.subr.bf16.mxu1 %v12711_v23  ;;  %11848 = vmatprep.subr.bf16.mxu0 %v12712_v24  ;;  %v12713_v26 = vld [vmem:[#allocation24 + $0x30] sm:$0xff]   ;;  %v12718_v30 = vld [vmem:[#allocation24 + $0x60] sm:$0xff]  }
 0x177   : > { %5495 = vst [vmem:[#allocation8 + $0xb8] sm:$0xff] %v5463_v32  ;;  %5954 = vst [vmem:[#allocation13 + $0x10] sm:$0xff] %v11316_v28  ;;  %12151 = vmatpush3.bf16.xpose.msra.mxu1 %v12711_v23  ;;  %v12717_v28 = vld [vmem:[#allocation24 + $0xa8] sm:$0xff]   ;;  %v12720_v31 = vld [vmem:[#allocation24 + $0xa0] sm:$0xff]  }
 0x178   : > { %5955 = vst [vmem:[#allocation13 + $0x58] sm:$0xff] %v11317_v29  ;;  %5496 = vst [vmem:[#allocation8 + $0xc0] sm:$0xff] %v5464_v34  ;;  %12152 = vmatprep.subr.bf16.mxu1 %v12714_v25  ;;  %v12716_v29 = vld [vmem:[#allocation24 + $0x28] sm:$0xff]   ;;  %v12719_v32 = vld [vmem:[#allocation24 + $0x20] sm:$0xff]  }
 0x179   : > { %5497 = vst [vmem:[#allocation8 + $0x10] sm:$0xff] %v5465_v35  ;;  %5498 = vst [vmem:[#allocation8 + $0x28] sm:$0xff] %v5466_v36 }
 0x17a   : > { %5956 = vst [vmem:[#allocation13 + $0x68] sm:$0xff] %v11318_v33  ;;  %5499 = vst [vmem:[#allocation8 + $0x30] sm:$0xff] %v5467_v39  ;;  %v12721_v33 = vld [vmem:[#allocation24 + $0x58] sm:$0xff]  }
 0x17b   : > { %5500 = vst [vmem:[#allocation8 + $0xd0] sm:$0xff] %v5468_v40  ;;  %5501 = vst [vmem:[#allocation8 + $0x68] sm:$0xff] %v5469_v41  ;;  %11849 = vmatpush3.bf16.xpose.msra.mxu0 %v12713_v26 }
 0x17c   : > { %5957 = vst [vmem:[#allocation13 + $0x18] sm:$0xff] %v11319_v37  ;;  %11547 = vst [vmem:[#allocation14] sm:$0xff] %v11546_v38   ;;  %11850 = vmatprep.subr.bf16.mxu0 %v12715_v27 }
 0x17d   : > { %5502 = vst [vmem:[#allocation8 + $0x58] sm:$0xff] %v5470_v43  ;;  %5503 = vst [vmem:[#allocation8] sm:$0xff] %v5471_v44 }
 0x17e   : > { %5504 = vst [vmem:[#allocation8 + $0x48] sm:$0xff] %v5472_v45  ;;  %11801 = vst [vmem:[#allocation14 + $0x8] sm:$0xff] %v11551_v42  }
 0x17f   : > { %5505 = vst [vmem:[#allocation8 + $0x40] sm:$0xff] %v5473_v48  ;;  %5506 = vst [vmem:[#allocation8 + $0x78] sm:$0xff] %v5474_v49  ;;  %12153 = vmatpush3.bf16.xpose.msra.mxu1 %v12714_v25 }
 0x180   : > { %5507 = vst [vmem:[#allocation8 + $0xd8] sm:$0xff] %v5475_v50  ;;  %11802 = vst [vmem:[#allocation14 + $0x10] sm:$0xff] %v11556_v46   ;;  %12154 = vmatprep.subr.bf16.mxu1 %v12717_v28  ;;  %v12722_v50 = vld [vmem:[#allocation24 + $0x18] sm:$0xff]  }
 0x181   : > { %11803 = vst [vmem:[#allocation14 + $0x18] sm:$0xff] %v11561_v47   ;;  %5508 = vst [vmem:[#allocation8 + $0xe0] sm:$0xff] %v5476_v52  ;;  %v12724_v52 = vld [vmem:[#allocation24 + $0x50] sm:$0xff]  }
 0x182   : > { %5509 = vst [vmem:[#allocation8 + $0x80] sm:$0xff] %v5477_v53  ;;  %5510 = vst [vmem:[#allocation8 + $0xa0] sm:$0xff] %v5478_v54  ;;  %v12725_v53 = vld [vmem:[#allocation24 + $0x10] sm:$0xff]  }
 0x183   : > { %11804 = vst [vmem:[#allocation14 + $0x20] sm:$0xff] %v11566_v51   ;;  %5511 = vst [vmem:[#allocation8 + $0x18] sm:$0xff] %v5479_v57  ;;  %11851 = vmatpush3.bf16.xpose.msra.mxu0 %v12716_v29  ;;  %v12723_v51 = vld [vmem:[#allocation24 + $0x98] sm:$0xff]   ;;  %v12726_v54 = vld [vmem:[#allocation24 + $0x90] sm:$0xff]  }
 0x184   : > { %5512 = vst [vmem:[#allocation8 + $0xf8] sm:$0xff] %v5480_v58  ;;  %5513 = vst [vmem:[#allocation8 + $0xe8] sm:$0xff] %v5481_v59  ;;  %11852 = vmatprep.subr.bf16.mxu0 %v12718_v30  ;;  %v12728_v57 = vld [vmem:[#allocation24 + $0x8] sm:$0xff]   ;;  %v12730_v58 = vld [vmem:[#allocation24 + $0x40] sm:$0xff]   ;;  %v1075_v30 = vlaneseq }
 0x185   : > { %11805 = vst [vmem:[#allocation14 + $0x28] sm:$0xff] %v11571_v55   ;;  %11806 = vst [vmem:[#allocation14 + $0x30] sm:$0xff] %v11576_v56   ;;  %v12727_v55 = vld [vmem:[#allocation24 + $0x48] sm:$0xff]   ;;  %v12732_v59 = vld [vmem:[#allocation24 + $0x80] sm:$0xff]  }
 0x186   : > { %5514 = vst [vmem:[#allocation8 + $0x90] sm:$0xff] %v5482_v61  ;;  %5515 = vst [vmem:[#allocation8 + $0x20] sm:$0xff] %v5483_v62  ;;  %v12729_v56 = vld [vmem:[#allocation24 + $0x88] sm:$0xff]   ;;  %v14198_v61 = vld [vmem:[#allocation9 + $0x98] sm:$0xff] }
 0x187   : > { %5516 = vst [vmem:[#allocation8 + $0x38] sm:$0xff] %v5484_v63  ;;  %11807 = vst [vmem:[#allocation14 + $0x38] sm:$0xff] %v11581_v60   ;;  %12155 = vmatpush3.bf16.xpose.msra.mxu1 %v12717_v28  ;;  %v12731_v60 = vld [vmem:[#allocation24] sm:$0xff]  }
 0x188   : > { %5517 = vst [vmem:[#allocation8 + $0x70] sm:$0xff] %v5485_v2  ;;  %5518 = vst [vmem:[#allocation8 + $0xa8] sm:$0xff] %v5486_v3  ;;  %12156 = vmatprep.subr.bf16.mxu1 %v12720_v31 }
 0x189   : > { %5519 = vst [vmem:[#allocation8 + $0xf0] sm:$0xff] %v5487_v4  ;;  %11808 = vst [vmem:[#allocation14 + $0x40] sm:$0xff] %v11586_v0  }
 0x18a   : > { %11809 = vst [vmem:[#allocation14 + $0x48] sm:$0xff] %v11591_v1   ;;  %5520 = vst [vmem:[#allocation8 + $0x50] sm:$0xff] %v5488_v6 }
 0x18b   : > { %5521 = vst [vmem:[#allocation8 + $0x88] sm:$0xff] %v5489_v7  ;;  %5522 = vst [vmem:[#allocation8 + $0xc8] sm:$0xff] %v5490_v8  ;;  %11853 = vmatpush3.bf16.xpose.msra.mxu0 %v12719_v32 }
 0x18c   : > { %11810 = vst [vmem:[#allocation14 + $0x50] sm:$0xff] %v11596_v5   ;;  %5523 = vst [vmem:[#allocation8 + $0x98] sm:$0xff] %v5491_v11  ;;  %11854 = vmatprep.subr.bf16.mxu0 %v12721_v33 }
 0x18d   : > { %5524 = vst [vmem:[#allocation8 + $0x60] sm:$0xff] %v5492_v12  ;;  %5525 = vst [vmem:[#allocation8 + $0x8] sm:$0xff] %v5493_v13  ;;  %v10726_v12 = vld [vmem:[#allocation18] ss:$0 sm:$0xff] }
 0x18e   : > { %11811 = vst [vmem:[#allocation14 + $0x58] sm:$0xff] %v11601_v9   ;;  %11812 = vst [vmem:[#allocation14 + $0x60] sm:$0xff] %v11606_v10  }
 0x18f   : > { %11813 = vst [vmem:[#allocation14 + $0x68] sm:$0xff] %v11611_v14   ;;  %11814 = vst [vmem:[#allocation14 + $0x70] sm:$0xff] %v11616_v15   ;;  %12157 = vmatpush3.bf16.xpose.msra.mxu1 %v12720_v31  ;;  %v14217_v31 = vshrl.u32 %v1075_v30, 7 }
 0x190   : > { %11815 = vst [vmem:[#allocation14 + $0x78] sm:$0xff] %v11621_v16   ;;  %12158 = vmatprep.subr.bf16.mxu1 %v12723_v51 }
 0x191   : > { %16255 = vst [vmem:[#allocation49_spill] sm:$0xff] %v14217_v31 }
 0x193   : > { %11855 = vmatpush3.bf16.xpose.msra.mxu0 %v12722_v50 }
 0x194   : > { %11856 = vmatprep.subr.bf16.mxu0 %v12724_v52 }
 0x197   : > { %12159 = vmatpush3.bf16.xpose.msra.mxu1 %v12723_v51 }
 0x198   : > { %12160 = vmatprep.subr.bf16.mxu1 %v12726_v54 }
 0x19b   : > { %11857 = vmatpush3.bf16.xpose.msra.mxu0 %v12725_v53 }
 0x19c   : > { %11858 = vmatprep.subr.bf16.mxu0 %v12727_v55 }
 0x19f   : > { %12161 = vmatpush3.bf16.xpose.msra.mxu1 %v12726_v54 }
 0x1a0   : > { %12162 = vmatprep.subr.bf16.mxu1 %v12729_v56 }
 0x1a3   : > { %11859 = vmatpush3.bf16.xpose.msra.mxu0 %v12728_v57 }
 0x1a4   : > { %11860 = vmatprep.subr.bf16.mxu0 %v12730_v58 }
 0x1a7   : > { %12163 = vmatpush3.bf16.xpose.msra.mxu1 %v12729_v56 }
 0x1a8   : > { %12164 = vmatprep.subr.bf16.mxu1 %v12732_v59 }
 0x1ab   : > { %11861 = vmatpush3.bf16.xpose.msra.mxu0 %v12731_v60 }
 0x1ac   : > { %12170 = vmatprep.subr.bf16.mxu0 %v14198_v61 }
 0x1af   : > { %12165 = vmatpush3.bf16.xpose.msra.mxu1 %v12732_v59 }
 0x1b0   : > { %12178 = vmatprep.subr.bf16.mxu1 %v14198_v61 }
 0x1fa   : > { %v957_v34 = vpop.xlane.xlu0 %956  ;;  %v961_v35 = vpop.xlane.xlu1 %960 }
 0x1fb   : > { %v965_v36 = vmul.f32 0.0078125, %v957_v34  ;;  %v967_v37 = vmul.f32 0.0078125, %v961_v35  ;;  %v14220_v34 = vsub.s32 0, %v14217_v31  ;;  %v14225_v35 = vld [vmem:[%s16257_s0] sm:$0x7]  ;;  %s15095_s0 = scalar_lea.vmem [#allocation39], %s10710_s16 }
 0x1fd   : > { %v969_v38 = vsub.f32 %v952_v17, %v965_v36  ;;  %v14190_v39 = vsub.f32 %v954_v18, %v967_v37  ;;  %v10727_v17 = vld [vmem:[#allocation20] ss:$0 sm:$0xff]  ;;  %16256 = vst [vmem:[#allocation50_spill] sm:$0xff] %v14220_v34 }
 0x1fe   : > { %v959_v40 = vpop.xlane.xlu0 %958  ;;  %v963_v41 = vpop.xlane.xlu1 %962 }
 0x1ff   : > { %v966_v42 = vmul.f32 0.0078125, %v959_v40  ;;  %v973_v43 = vmul.f32 %v969_v38, %v969_v38  ;;  %v968_v44 = vmul.f32 0.0078125, %v963_v41  ;;  %v975_v47 = vmul.f32 %v14190_v39, %v14190_v39 }
 0x200   : > { %v14230_v40 = vsub.s32 1, %v14217_v31 }
 0x201   : > { %v970_v45 = vsub.f32 %v953_v19, %v966_v42  ;;  %977 = vadd.xlane.f32.xlu0 %v973_v43  ;;  %v14192_v46 = vsub.f32 %v955_v20, %v968_v44 }
 0x202   : > { %16258 = vst [vmem:[#allocation51_spill] sm:$0xff] %v14230_v40  ;;  %v1082_v44 = vrot.slane %v14225_v35, %v14230_v40 }
 0x203   : > { %v974_v48 = vmul.f32 %v970_v45, %v970_v45  ;;  %v976_v49 = vmul.f32 %v14192_v46, %v14192_v46 }
 0x205   : > { %981 = vadd.xlane.f32.xlu0 %v975_v47  ;;  %979 = vadd.xlane.f32.xlu1 %v974_v48 }
 0x209   : > { %983 = vadd.xlane.f32.xlu1 %v976_v49 }
 0x28a   : > { %v978_v62 = vpop.xlane.xlu0 %977 }
 0x28b   : > { %v985_v63 = vmul.f32 0.0078125, %v978_v62  ;;  %v13660_v62 = vmov 1983009808  }
 0x28d   : > { %v989_v0 = vadd.f32 1e-05, %v985_v63  ;;  %v1396_v63 = vunpack.c.l.s4 %v13660_v62 }
 0x28e   : > { %v980_v1 = vpop.xlane.xlu1 %979  ;;  %v982_v2 = vpop.xlane.xlu0 %981 }
 0x28f   : > { %12773 = vrsqrt.f32 %v989_v0  ;;  %v986_v3 = vmul.f32 0.0078125, %v980_v1  ;;  %v987_v4 = vmul.f32 0.0078125, %v982_v2  ;;  %v1397_v0 = vunpack.c.0.s8 %v1396_v63 }
 0x290   : > { %v13661_v1 = vmov 1934713408  }
 0x291   : > { %v990_v5 = vadd.f32 1e-05, %v986_v3  ;;  %v991_v6 = vadd.f32 1e-05, %v987_v4  ;;  %v1427_v2 = vunpack.c.l.s4 %v13661_v1 }
 0x292   : > { %v984_v7 = vpop.xlane.xlu1 %983 }
 0x293   : > { %12775 = vrsqrt.f32 %v990_v5  ;;  %v988_v8 = vmul.f32 0.0078125, %v984_v7  ;;  %v13662_v5 = vmov 0  }
 0x294   : > { %12777 = vrsqrt.f32 %v991_v6  ;;  %v14259_v6 = vpack.i.b16 %v13662_v5, %v13662_v5 }
 0x295   : > { %v992_v9 = vadd.f32 1e-05, %v988_v8 }
 0x297   : > { %12779 = vrsqrt.f32 %v992_v9  ;;  %v14262_v9 = vsub.s32 %v1397_v0, %v14217_v31 }
 0x29c   : > { %v12774_v10 = vpop.eup %12773 }
 0x29d   : > { %v997_v11 = vmul.f32 %v12774_v10, %v969_v38  ;;  %v1078_v38 = vrot.slane %v14225_v35, %v14220_v34  ;;  %v1428_v10 = vunpack.c.0.s8 %v1427_v2 }
 0x29f   : > { %v1008_v16 = vmul.f32 %v10726_v12, %v997_v11 }
 0x2a0   : > { %v12776_v13 = vpop.eup %12775 }
 0x2a1   : > { %v12778_v14 = vpop.eup %12777  ;;  %v998_v15 = vmul.f32 %v12776_v13, %v970_v45  ;;  %v14203_v21 = vadd.f32 %v10727_v17, %v1008_v16 }
 0x2a2   : > { %v999_v18 = vmul.f32 %v12778_v14, %v14190_v39 }
 0x2a3   : > { %v1009_v19 = vmul.f32 %v10726_v12, %v998_v15 }
 0x2a4   : > { %v12780_v20 = vpop.eup %12779  ;;  %v1010_v24 = vmul.f32 %v10726_v12, %v999_v18  ;;  %v14266_v18 = vsub.s32 %v1428_v10, %v14217_v31 }
 0x2a5   : > { %v14205_v22 = vadd.f32 %v10727_v17, %v1009_v19  ;;  %v1000_v23 = vmul.f32 %v12780_v20, %v14192_v46 }
 0x2a6   : > { %v14210_v27 = vadd.f32 %v10727_v17, %v1010_v24 }
 0x2a7   : > { %v1071_v25 = vpack.c.bf16 %v14205_v22, %v14203_v21  ;;  %v1011_v26 = vmul.f32 %v10726_v12, %v1000_v23 }
 0x2a9   : > { %11862 = vmatprep.mubr.bf16.mxu0 %v1071_v25  ;;  %12166 = vmatprep.mubr.bf16.mxu1 %v1071_v25  ;;  %v14212_v28 = vadd.f32 %v10727_v17, %v1011_v26 }
 0x2aa   : > { %11863 = vmatmul.mubr.bf16.vlgmr.msra.gmra.mxu0 %v1071_v25 }
 0x2ab   : > { %v1072_v29 = vpack.c.bf16 %v14212_v28, %v14210_v27 }
 0x2ad   : > { %11864 = vmatprep.mubr.bf16.mxu0 %v1072_v29  ;;  %12167 = vmatmul.mubr.bf16.vlgmr.msra.gmra.mxu1 %v1072_v29 }
 0x2ae   : > { %12182 = vmatprep.mubr.msk.bf16.mxu1 %vm13659_vm0, %v14198_v61 }
 0x2b2   : > { %11865 = vmatmul.mubr.bf16.gmra.mxu0 %v1072_v29 }
 0x2b3   : > { %12174 = vmatprep.mubr.msk.bf16.mxu0 %vm13659_vm0, %v14198_v61 }
 0x36a   : > { %v1268_v32 = vpop.f32.mrf.mxu0 }
 0x36b   : > { %v1269_v55 = vadd.f32 %v1268_v32, %v1078_v38 }
 0x36c   : > { %v1270_v33 = vpop.f32.mrf.mxu0 }
 0x36d   : > { %v1271_v56 = vadd.f32 %v1270_v33, %v1082_v44  ;;  %v1336_v59 = vmul.f32 0.17677669, %v1269_v55 }
 0x36e   : > { %v1272_v36 = vpop.f32.mrf.mxu0 }
 0x36f   : > { %v1273_v51 = vadd.f32 %v1272_v36, %v1078_v38 }
 0x370   : > { %v1274_v37 = vpop.f32.mrf.mxu0 }
 0x371   : > { %v1275_v52 = vadd.f32 %v1274_v37, %v1082_v44  ;;  %v1337_v57 = vmul.f32 0.17677669, %v1273_v51 }
 0x372   : > { %v1278_v39 = vpop.f32.mrf.mxu0 }
 0x373   : > { %v1279_v41 = vadd.f32 %v1278_v39, %v1078_v38  ;;  %v14238_v58 = vpack.c.bf16 %v1275_v52, %v1271_v56  ;;  %v14243_v60 = vpack.c.bf16 %v1337_v57, %v1336_v59 }
 0x374   : > { %v1280_v42 = vpop.f32.mrf.mxu0 }
 0x375   : > { %v1338_v47 = vmul.f32 0.17677669, %v1279_v41  ;;  %v1281_v48 = vadd.f32 %v1280_v42, %v1082_v44  ;;  %v1902_v63 = vshrl.u32 %v14238_v58, 16 }
 0x376   : > { %v1282_v43 = vpop.f32.mrf.mxu0 }
 0x377   : > { %v1283_v45 = vadd.f32 %v1282_v43, %v1078_v38 }
 0x378   : > { %v1284_v46 = vpop.f32.mrf.mxu0 }
 0x379   : > { %v1339_v49 = vmul.f32 0.17677669, %v1283_v45  ;;  %v1285_v50 = vadd.f32 %v1284_v46, %v1082_v44 }
 0x37b   : > { %v14234_v53 = vpack.c.bf16 %v1339_v49, %v1338_v47  ;;  %v1883_v54 = vpack.c.bf16 %v1285_v50, %v1281_v48 }
 0x37d   : > { %1892 = vrot.lane.b32.xlu1 %v1883_v54, %s13656_s6  ;;  %1888 = vrot.lane.b32.xlu0 %v1883_v54, %s13657_s3  ;;  %v1918_v11 = vshrl.u32 %v1883_v54, 16 }
 0x381   : > { %1896 = vrot.lane.b32.xlu1 %v1883_v54, %s13658_s8  ;;  %1890 = vrot.lane.b32.xlu0 %v14238_v58, %s13656_s6 }
 0x385   : > { %1886 = vrot.lane.b32.xlu1 %v14238_v58, %s13657_s3  ;;  %1344 = vrot.lane.b32.xlu0 %v14243_v60, %s13657_s3 }
 0x389   : > { %1894 = vrot.lane.b32.xlu1 %v14238_v58, %s13658_s8  ;;  %1352 = vrot.lane.b32.xlu0 %v14243_v60, %s13658_s8 }
 0x38d   : > { %1348 = vrot.lane.b32.xlu1 %v14243_v60, %s13656_s6 }
 0x3ef   : > { %v1893_v3 = vpop.permute.xlu1 %1892  ;;  %v1889_v4 = vpop.permute.xlu0 %1888 }
 0x3f0   : > { %v1916_v7 = vpack.i.b16 %v1889_v4, %v1883_v54  ;;  %v1919_v8 = vshrl.u32 %v1889_v4, 16  ;;  %v1926_v15 = vshrl.u32 %v1893_v3, 16 }
 0x3f2   : > { %v2062_v13 = vcombine.high %v1916_v7, %v14259_v6  ;;  %v1920_v16 = vpack.i.b16 %v1919_v8, %v1918_v11  ;;  %v2069_v19 = vrot.slane %v1916_v7, %v14262_v9 }
 0x3f3   : > { %v1897_v12 = vpop.permute.xlu1 %1896  ;;  %v1891_v36 = vpop.permute.xlu0 %1890 }
 0x3f4   : > { %v1924_v14 = vpack.i.b16 %v1897_v12, %v1893_v3  ;;  %v1927_v17 = vshrl.u32 %v1897_v12, 16  ;;  %v2076_v26 = vrot.slane %v2062_v13, %v14262_v9  ;;  %v2128_v37 = vcombine.high %v1920_v16, %v14259_v6 }
 0x3f5   : > { %v2135_v38 = vrot.slane %v1920_v16, %v14262_v9  ;;  %v1360_v3 = vshrl.u32 %v14243_v60, 16  ;;  %v1910_v5 = vshrl.u32 %v1891_v36, 16 }
 0x3f6   : > { %v2077_v20 = vcombine.high %v1924_v14, %v14259_v6  ;;  %v2084_v23 = vrot.slane %v1924_v14, %v14262_v9  ;;  %v1928_v24 = vpack.i.b16 %v1927_v17, %v1926_v15  ;;  %v2142_v49 = vrot.slane %v2128_v37, %v14262_v9 }
 0x3f7   : > { %v1887_v25 = vpop.permute.xlu1 %1886  ;;  %v1345_v57 = vpop.permute.xlu0 %1344 }
 0x3f8   : > { %v2091_v29 = vrot.slane %v2077_v20, %v14262_v9  ;;  %v2092_v32 = vcombine.low %v2069_v19, %v2084_v23  ;;  %v2093_v33 = vcombine.high %v2069_v19, %v2084_v23  ;;  %v2143_v39 = vcombine.high %v1928_v24, %v14259_v6 }
 0x3f9   : > { %v2150_v41 = vrot.slane %v1928_v24, %v14262_v9  ;;  %v1903_v51 = vshrl.u32 %v1887_v25, 16  ;;  %v1900_v2 = vpack.i.b16 %v1887_v25, %v14238_v58  ;;  %v1358_v8 = vpack.i.b16 %v1345_v57, %v14243_v60 }
 0x3fa   : > { %v2100_v42 = vrot.slane %v2092_v32, %v14266_v18  ;;  %v2107_v43 = vrot.slane %v2093_v33, %v14266_v18  ;;  %v2108_v44 = vcombine.low %v2076_v26, %v2091_v29  ;;  %v2109_v45 = vcombine.high %v2076_v26, %v2091_v29 }
 0x3fb   : > { %v2157_v46 = vrot.slane %v2143_v39, %v14262_v9  ;;  %v2158_v47 = vcombine.low %v2135_v38, %v2150_v41  ;;  %v2159_v48 = vcombine.high %v2135_v38, %v2150_v41  ;;  %v1895_v52 = vpop.permute.xlu1 %1894  ;;  %v1904_v7 = vpack.i.b16 %v1903_v51, %v1902_v63  ;;  %v1353_v32 = vpop.permute.xlu0 %1352 }
 0x3fc   : > { %v2294_v50 = vcombine.low %v2100_v42, %v2107_v43  ;;  %v14282_v54 = vrot.slane %v2108_v44, %v14266_v18  ;;  %v14285_v55 = vrot.slane %v2109_v45, %v14266_v18  ;;  %v10764_v56 = vcombine.high %v2100_v42, %v2107_v43 }
 0x3fd   : > { %v2174_v59 = vcombine.low %v2142_v49, %v2157_v46  ;;  %v2175_v62 = vcombine.high %v2142_v49, %v2157_v46  ;;  %v14289_v0 = vrot.slane %v2158_v47, %v14266_v18  ;;  %v14292_v1 = vrot.slane %v2159_v48, %v14266_v18 }
 0x3fe   : > { %v14297_v4 = vrot.slane %v2294_v50, %v14262_v9  ;;  %v14301_v10 = vrot.slane %v10764_v56, %v14262_v9  ;;  %v2310_v11 = vcombine.low %v14282_v54, %v14285_v55  ;;  %v10765_v12 = vcombine.high %v14282_v54, %v14285_v55 }
 0x3ff   : > { %v1908_v13 = vpack.i.b16 %v1895_v52, %v1891_v36  ;;  %v14308_v58 = vrot.slane %v2174_v59, %v14266_v18  ;;  %v14311_v14 = vrot.slane %v2175_v62, %v14266_v18  ;;  %v1361_v15 = vshrl.u32 %v1345_v57, 16  ;;  %v1349_v17 = vpop.permute.xlu1 %1348 }
 0x400   : > { %v1911_v16 = vshrl.u32 %v1895_v52, 16  ;;  %v2344_v60 = vcombine.low %v14289_v0, %v14292_v1  ;;  %v1937_v19 = vrot.slane %v1900_v2, %v14262_v9  ;;  %v10766_v24 = vcombine.high %v14289_v0, %v14292_v1 }
 0x401   : > { %v1945_v20 = vcombine.high %v1908_v13, %v14259_v6  ;;  %v1952_v23 = vrot.slane %v1908_v13, %v14262_v9  ;;  %v1930_v25 = vcombine.high %v1900_v2, %v14259_v6  ;;  %v1996_v26 = vcombine.high %v1904_v7, %v14259_v6 }
 0x402   : > { %v1912_v29 = vpack.i.b16 %v1911_v16, %v1910_v5  ;;  %v1366_v37 = vpack.i.b16 %v1353_v32, %v1349_v17  ;;  %v1368_v38 = vshrl.u32 %v1349_v17, 16  ;;  %v2003_v39 = vrot.slane %v1904_v7, %v14262_v9 }
 0x403   : > { %v1960_v33 = vcombine.low %v1937_v19, %v1952_v23  ;;  %v1961_v36 = vcombine.high %v1937_v19, %v1952_v23  ;;  %v1362_v41 = vpack.i.b16 %v1361_v15, %v1360_v3  ;;  %v1959_v42 = vrot.slane %v1945_v20, %v14262_v9 }
 0x404   : > { %v2011_v43 = vcombine.high %v1912_v29, %v14259_v6  ;;  %v2360_v44 = vcombine.low %v14308_v58, %v14311_v14  ;;  %v1394_v45 = vcombine.high %v1358_v8, %v14259_v6  ;;  %v2018_v46 = vrot.slane %v1912_v29, %v14262_v9 }
 0x405   : > { %v1369_v47 = vshrl.u32 %v1353_v32, 16  ;;  %v1944_v48 = vrot.slane %v1930_v25, %v14262_v9  ;;  %v1968_v49 = vrot.slane %v1960_v33, %v14266_v18  ;;  %v1975_v50 = vrot.slane %v1961_v36, %v14266_v18 }
 0x406   : > { %v2025_v51 = vrot.slane %v2011_v43, %v14262_v9  ;;  %v10767_v52 = vcombine.high %v14308_v58, %v14311_v14  ;;  %v1409_v57 = vcombine.high %v1366_v37, %v14259_v6  ;;  %v1416_v59 = vrot.slane %v1366_v37, %v14262_v9 }
 0x407   : > { %v1370_v56 = vpack.i.b16 %v1369_v47, %v1368_v38  ;;  %v2010_v62 = vrot.slane %v1996_v26, %v14262_v9  ;;  %v1401_v63 = vrot.slane %v1358_v8, %v14262_v9  ;;  %v1460_v2 = vcombine.high %v1362_v41, %v14259_v6 }
 0x408   : > { %v1976_v3 = vcombine.low %v1944_v48, %v1959_v42  ;;  %v1408_v5 = vrot.slane %v1394_v45, %v14262_v9  ;;  %v1467_v7 = vrot.slane %v1362_v41, %v14262_v9  ;;  %v1977_v13 = vcombine.high %v1944_v48, %v1959_v42 }
 0x409   : > { %v2026_v15 = vcombine.low %v2003_v39, %v2018_v46  ;;  %v2027_v16 = vcombine.high %v2003_v39, %v2018_v46  ;;  %v2042_v17 = vcombine.low %v2010_v62, %v2025_v51  ;;  %v2043_v19 = vcombine.high %v2010_v62, %v2025_v51 }
 0x40a   : > { %v2194_v20 = vcombine.low %v1968_v49, %v1975_v50  ;;  %v1423_v23 = vrot.slane %v1409_v57, %v14262_v9  ;;  %v1424_v25 = vcombine.low %v1401_v63, %v1416_v59  ;;  %v1425_v29 = vcombine.high %v1401_v63, %v1416_v59 }
 0x40b   : > { %v1475_v26 = vcombine.high %v1370_v56, %v14259_v6  ;;  %v1474_v8 = vrot.slane %v1460_v2, %v14262_v9  ;;  %v1984_v32 = vrot.slane %v1976_v3, %v14266_v18  ;;  %v1482_v33 = vrot.slane %v1370_v56, %v14262_v9 }
 0x40c   : > { %v2317_v36 = vrot.slane %v2310_v11, %v14262_v9  ;;  %v1991_v37 = vrot.slane %v1977_v13, %v14266_v18  ;;  %v2034_v38 = vrot.slane %v2026_v15, %v14266_v18  ;;  %v10760_v39 = vcombine.high %v1968_v49, %v1975_v50 }
 0x40d   : > { %v1440_v41 = vcombine.low %v1408_v5, %v1423_v23  ;;  %v1432_v42 = vrot.slane %v1424_v25, %v14266_v18  ;;  %v1439_v43 = vrot.slane %v1425_v29, %v14266_v18  ;;  %v1441_v45 = vcombine.high %v1408_v5, %v1423_v23 }
 0x40e   : > { %v1489_v46 = vrot.slane %v1475_v26, %v14262_v9  ;;  %v2041_v47 = vrot.slane %v2027_v16, %v14266_v18  ;;  %v2050_v48 = vrot.slane %v2042_v17, %v14266_v18  ;;  %v2057_v51 = vrot.slane %v2043_v19, %v14266_v18 }
 0x40f   : > { %v2201_v11 = vrot.slane %v2194_v20, %v14262_v9  ;;  %v1490_v56 = vcombine.low %v1467_v7, %v1482_v33  ;;  %v1491_v57 = vcombine.high %v1467_v7, %v1482_v33  ;;  %v2209_v50 = vrot.slane %v10760_v39, %v14262_v9 }
 0x410   : > { %v1506_v59 = vcombine.low %v1474_v8, %v1489_v46  ;;  %v1507_v49 = vcombine.high %v1474_v8, %v1489_v46  ;;  %v2210_v62 = vcombine.low %v1984_v32, %v1991_v37  ;;  %v1448_v63 = vrot.slane %v1440_v41, %v14266_v18 }
 0x411   : > { %v2325_v2 = vrot.slane %v10765_v12, %v14262_v9  ;;  %v1455_v3 = vrot.slane %v1441_v45, %v14266_v18  ;;  %v1658_v15 = vcombine.low %v1432_v42, %v1439_v43  ;;  %v10761_v7 = vcombine.high %v1984_v32, %v1991_v37 }
 0x412   : > { %v1514_v5 = vrot.slane %v1506_v59, %v14266_v18  ;;  %v1521_v13 = vrot.slane %v1507_v49, %v14266_v18  ;;  %v2244_v16 = vcombine.low %v2034_v38, %v2041_v47  ;;  %v10762_v17 = vcombine.high %v2034_v38, %v2041_v47 }
 0x413   : > { %v2260_v19 = vcombine.low %v2050_v48, %v2057_v51  ;;  %v10763_v20 = vcombine.high %v2050_v48, %v2057_v51  ;;  %v1498_v23 = vrot.slane %v1490_v56, %v14266_v18  ;;  %v1505_v25 = vrot.slane %v1491_v57, %v14266_v18 }
 0x414   : > { %v2326_v54 = vcombine.low %v14297_v4, %v14301_v10  ;;  %v10752_v55 = vcombine.high %v1432_v42, %v1439_v43  ;;  %v1724_v12 = vcombine.low %v1514_v5, %v1521_v13  ;;  %v2334_v29 = vcombine.low %v2317_v36, %v2325_v2 }
 0x415   : > { %v2351_v26 = vrot.slane %v2344_v60, %v14262_v9  ;;  %v14375_v8 = vrot.slane %v1658_v15, %v14262_v9  ;;  %v1674_v32 = vcombine.low %v1448_v63, %v1455_v3  ;;  %v10755_v33 = vcombine.high %v1514_v5, %v1521_v13 }
 0x416   : > { %v2359_v37 = vrot.slane %v10766_v24, %v14262_v9  ;;  %v10753_v4 = vcombine.high %v1448_v63, %v1455_v3  ;;  %v2341_v10 = vrot.slane %v2334_v29, %v14266_v18  ;;  %v2367_v36 = vrot.slane %v2360_v44, %v14262_v9 }
 0x417   : > { %v2375_v60 = vrot.slane %v10767_v52, %v14262_v9  ;;  %v1708_v38 = vcombine.low %v1498_v23, %v1505_v25  ;;  %v2333_v39 = vrot.slane %v2326_v54, %v14266_v18  ;;  %v2217_v0 = vrot.slane %v2210_v62, %v14262_v9 }
 0x418   : > { %v2376_v41 = vcombine.low %v2351_v26, %v2359_v37  ;;  %v10754_v1 = vcombine.high %v1498_v23, %v1505_v25  ;;  %v1731_v24 = vrot.slane %v1724_v12, %v14262_v9  ;;  %v2225_v43 = vrot.slane %v10761_v7, %v14262_v9 }
 0x419   : > { %v2384_v42 = vcombine.low %v2367_v36, %v2375_v60  ;;  %v1739_v45 = vrot.slane %v10755_v33, %v14262_v9  ;;  %v2342_v44 = vcombine.low %v2333_v39, %v2341_v10  ;;  %v2226_v46 = vcombine.low %v2201_v11, %v2209_v50 }
 0x41a   : > { %v2251_v47 = vrot.slane %v2244_v16, %v14262_v9  ;;  %v2383_v58 = vrot.slane %v2376_v41, %v14266_v18  ;;  %v2234_v52 = vcombine.low %v2217_v0, %v2225_v43  ;;  %v2259_v48 = vrot.slane %v10762_v17, %v14262_v9 }
 0x41b   : > { %v2391_v14 = vrot.slane %v2384_v42, %v14266_v18  ;;  %v1673_v51 = vrot.slane %v10752_v55, %v14262_v9  ;;  %v1681_v56 = vrot.slane %v1674_v32, %v14262_v9  ;;  %v2267_v57 = vrot.slane %v2260_v19, %v14262_v9 }
 0x41c   : > { %v2275_v59 = vrot.slane %v10763_v20, %v14262_v9  ;;  %v1689_v49 = vrot.slane %v10753_v4, %v14262_v9  ;;  %v2241_v50 = vrot.slane %v2234_v52, %v14266_v18  ;;  %v2276_v62 = vcombine.low %v2251_v47, %v2259_v48 }
 0x41d   : > { %v2392_v11 = vcombine.low %v2383_v58, %v2391_v14  ;;  %v1715_v63 = vrot.slane %v1708_v38, %v14262_v9  ;;  %v1723_v2 = vrot.slane %v10754_v1, %v14262_v9  ;;  %v2233_v3 = vrot.slane %v2226_v46, %v14266_v18 }
 0x41e   : > { %v2284_v5 = vcombine.low %v2267_v57, %v2275_v59  ;;  %v1748_v13 = vcombine.low %v1731_v24, %v1739_v45  ;;  %v2409_v7 = vshrl.u32 %v2342_v44, 16  ;;  %v2283_v19 = vrot.slane %v2276_v62, %v14266_v18 }
 0x41f   : > { %v14408_v15 = vpack.i.b16 %v2392_v11, %v2342_v44  ;;  %v2410_v16 = vshrl.u32 %v2392_v11, 16  ;;  %v2242_v17 = vcombine.low %v2233_v3, %v2241_v50  ;;  %v2393_v23 = vcombine.high %v2383_v58, %v2391_v14 }
 0x420   : > { %v2291_v20 = vrot.slane %v2284_v5, %v14266_v18  ;;  %v1690_v25 = vcombine.low %v14375_v8, %v1673_v51  ;;  %v1698_v12 = vcombine.low %v1681_v56, %v1689_v49  ;;  %v2343_v26 = vcombine.high %v2333_v39, %v2341_v10 }
 0x421   : > { %v2966_v54 = vsel %vm2958_vm1, %v14408_v15, 0  ;;  %v14415_v55 = vpack.i.b16 %v2410_v16, %v2409_v7  ;;  %v2243_v32 = vcombine.high %v2233_v3, %v2241_v50  ;;  %v1740_v33 = vcombine.low %v1715_v63, %v1723_v2 }
 0x422   : > { %12171 = vmatpush3.bf16.xpose.msra.mxu0 %v2966_v54  ;;  %v2292_v29 = vcombine.low %v2283_v19, %v2291_v20  ;;  %v1755_v37 = vrot.slane %v1748_v13, %v14266_v18  ;;  %v2293_v8 = vcombine.high %v2283_v19, %v2291_v20  ;;  %v2397_v60 = vshrl.u32 %v2242_v17, 16 }
 0x423   : > { %v3016_v4 = vsel %vm2958_vm1, %v14415_v55, 0  ;;  %12172 = vmatprep.subr.bf16.mxu0 %v14198_v61  ;;  %v2416_v41 = vshrl.u32 %v2393_v23, 16  ;;  %v14422_v0 = vpack.i.b16 %v2393_v23, %v2343_v26  ;;  %v2403_v39 = vshrl.u32 %v2243_v32, 16 }
 0x424   : > { %12179 = vmatpush3.bf16.xpose.msra.mxu1 %v3016_v4  ;;  %v2396_v36 = vpack.i.b16 %v2292_v29, %v2242_v17  ;;  %v2398_v38 = vshrl.u32 %v2292_v29, 16  ;;  %v2402_v10 = vpack.i.b16 %v2293_v8, %v2243_v32  ;;  %v2404_v1 = vshrl.u32 %v2293_v8, 16  ;;  %v12168_v4 = vpop.f32.mrf.mxu1 }
 0x425   : > { %12180 = vmatprep.subr.bf16.mxu1 %v14198_v61  ;;  %v1705_v24 = vrot.slane %v1698_v12, %v14266_v18  ;;  %v2415_v45 = vshrl.u32 %v2343_v26, 16  ;;  %v1747_v44 = vrot.slane %v1740_v33, %v14266_v18  ;;  %v3887_v48 = vrot.slane %v14408_v15, 4 }
 0x426   : > { %v3886_v42 = vrot.slane %v2396_v36, 4  ;;  %v2399_v43 = vpack.i.b16 %v2398_v38, %v2397_v60  ;;  %v2963_v46 = vsel %vm2958_vm1, %v2396_v36, 0  ;;  %v3992_v47 = vrot.slane %v2402_v10, 4  ;;  %v1321_v60 = vpop.f32.mrf.mxu1 }
 0x427   : > { %v2405_v58 = vpack.i.b16 %v2404_v1, %v2403_v39  ;;  %v14427_v52 = vpack.i.b16 %v2416_v41, %v2415_v45  ;;  %v3940_v51 = vrot.slane %v14415_v55, 4  ;;  %v1697_v56 = vrot.slane %v1690_v25, %v14266_v18 }
 0x428   : > { %v3939_v14 = vrot.slane %v2399_v43, 4  ;;  %v3013_v57 = vsel %vm2958_vm1, %v2399_v43, 0  ;;  %v1756_v59 = vcombine.low %v1747_v44, %v1755_v37  ;;  %v3993_v49 = vrot.slane %v14422_v0, 4  ;;  %v12169_v41 = vpop.f32.mrf.mxu1 }
 0x429   : > { %v4045_v11 = vrot.slane %v2405_v58, 4  ;;  %v14437_v50 = vsel %vm3280_vm2, %v3886_v42, %v3887_v48  ;;  %v1706_v63 = vcombine.low %v1697_v56, %v1705_v24  ;;  %v4046_v3 = vrot.slane %v14427_v52, 4 }
 0x42a   : > { %12173 = vmatpush3.bf16.xpose.msra.mxu0 %v2963_v46  ;;  %v14442_v62 = vsel %vm3280_vm2, %v3939_v14, %v3940_v51  ;;  %v14448_v2 = vsel %vm3280_vm2, %v3992_v47, %v3993_v49  ;;  %v1862_v5 = vshrl.u32 %v1756_v59, 16  ;;  %v3066_v17 = vsel %vm2958_vm1, %v14422_v0, 0 }
 0x42b   : > { %12186 = vmatprep.subr.bf16.mxu0 %v14198_v61  ;;  %v14455_v13 = vsel %vm3280_vm2, %v4045_v11, %v4046_v3  ;;  %v1860_v7 = vpack.i.b16 %v1756_v59, %v1706_v63  ;;  %v1861_v16 = vshrl.u32 %v1706_v63, 16  ;;  %v3116_v20 = vsel %vm2958_vm1, %v14427_v52, 0 }
 0x42c   : > { %12181 = vmatpush3.bf16.xpose.msra.mxu1 %v3013_v57  ;;  %v3063_v23 = vsel %vm2958_vm1, %v2402_v10, 0  ;;  %v1757_v25 = vcombine.high %v1747_v44, %v1755_v37  ;;  %v3113_v54 = vsel %vm2958_vm1, %v2405_v58, 0  ;;  %v1707_v12 = vcombine.high %v1697_v56, %v1705_v24 }
 0x42d   : > { %12194 = vmatprep.subr.bf16.mxu1 %v14198_v61  ;;  %v1863_v19 = vpack.i.b16 %v1862_v5, %v1861_v16  ;;  %v14480_v37 = vand.u32 127, %v1075_v30  ;;  %v14485_v36 = vadd.s32 8, %v14217_v31  ;;  %v14512_v11 = vsub.s32 2, %v14217_v31 }
 0x42e   : > { %v1868_v29 = vshrl.u32 %v1757_v25, 16  ;;  %v1866_v26 = vpack.i.b16 %v1757_v25, %v1707_v12  ;;  %v1867_v32 = vshrl.u32 %v1707_v12, 16  ;;  %v3999_v0 = vsel %vm2958_vm1, %v14448_v2, 0 }
 0x42f   : > { %v3164_v8 = vsub.s32 %v14217_v31, %v14480_v37  ;;  %v3165_v38 = vsub.s32 %v14485_v36, %v14480_v37  ;;  %16263 = vst [vmem:[#allocation52_spill] sm:$0xff] %v14512_v11  ;;  %v1086_v63 = vrot.slane %v14225_v35, %v14512_v11 }
 0x430   : > { %v1869_v33 = vpack.i.b16 %v1868_v29, %v1867_v32 }
 0x431   : > { %12175 = vmatmul.mubr.msk.bf16.vlgmr.msra.gmra.mxu0 %vm2958_vm1, %v1860_v7  ;;  %vm3166_vm3 = vcmp.le.s32.totalorder %v3164_v8, 4  ;;  %vm3168_vm4 = vcmp.ge.s32.totalorder %v3164_v8, 4294967292  ;;  %vm3167_vm6 = vcmp.le.s32.totalorder %v3165_v38, 4  ;;  %vm3169_vm7 = vcmp.ge.s32.totalorder %v3165_v38, 4294967292 }
 0x432   : > { %12187 = vmatpush3.bf16.xpose.msra.mxu0 %v3066_v17  ;;  %12190 = vmatprep.mubr.msk.bf16.mxu0 %vm13659_vm0, %v14198_v61  ;;  %vm14489_vm5 = vmand %vm3166_vm3, %vm3168_vm4  ;;  %v1333_v5 = vadd.f32 %v12169_v41, %v1086_v63  ;;  %v1330_v17 = vadd.f32 %v12168_v4, %v1086_v63  ;;  %v1322_v41 = vadd.f32 %v1321_v60, %v1086_v63  ;;  %vm3764_vm3 = vcmask 523264  }
 0x433   : > { %12183 = vmatmul.mubr.msk.bf16.vlgmr.msra.gmra.mxu1 %vm2958_vm1, %v1863_v19  ;;  %12188 = vmatprep.subr.bf16.mxu0 %v14198_v61  ;;  %vm14497_vm8 = vmand %vm3167_vm6, %vm3169_vm7  ;;  %vm3767_vm4 = vcmask 785408  }
 0x434   : > { %12195 = vmatpush3.bf16.xpose.msra.mxu1 %v3116_v20  ;;  %12198 = vmatprep.mubr.msk.bf16.mxu1 %vm13659_vm0, %v14198_v61  ;;  %v2419_v25 = vpack.c.bf16 %v1333_v5, %v1330_v17 }
 0x435   : > { %12196 = vmatprep.subr.bf16.mxu1 %v14198_v61 }
 0x43a   : > { %12189 = vmatpush3.bf16.xpose.msra.mxu0 %v3063_v23 }
 0x43b   : > { %12202 = vmatprep.subr.bf16.mxu0 %v14198_v61 }
 0x43c   : > { %12197 = vmatpush3.bf16.xpose.msra.mxu1 %v3113_v54 }
 0x43d   : > { %12210 = vmatprep.subr.bf16.mxu1 %v14198_v61 }
 0x441   : > { %12191 = vmatmul.mubr.msk.bf16.vlgmr.msra.gmra.mxu0 %vm2958_vm1, %v1866_v26 }
 0x442   : > { %12206 = vmatprep.mubr.msk.bf16.mxu0 %vm13659_vm0, %v14198_v61 }
 0x443   : > { %12199 = vmatmul.mubr.msk.bf16.vlgmr.msra.gmra.mxu1 %vm2958_vm1, %v1869_v33 }
 0x444   : > { %12214 = vmatprep.mubr.msk.bf16.mxu1 %vm13659_vm0, %v14198_v61  ;;  %v1324_v61 = vpop.f32.mrf.mxu1 }
 0x445   : > { %v1325_v4 = vadd.f32 %v1324_v61, %v1086_v63 }
 0x447   : > { %v2418_v10 = vpack.c.bf16 %v1325_v4, %v1322_v41 }
 0x4f1   : > { %v3002_v30 = vpop.f32.mrf.mxu0 }
 0x4f2   : > { %v14495_v39 = vsel %vm14489_vm5, %v3002_v30, -1e+30 }
 0x4f3   : > { %v12176_v1 = vpop.f32.mrf.mxu0  ;;  %v3052_v24 = vpop.f32.mrf.mxu1 }
 0x4f4   : > { %v3178_v43 = vsel %vm14489_vm5, %v3052_v24, -1e+30 }
 0x4f5   : > { %v3005_v45 = vpop.f32.mrf.mxu0  ;;  %v12184_v44 = vpop.f32.mrf.mxu1  ;;  %v3191_v46 = vsel %vm3184_vm9, %v3178_v43, -inf }
 0x4f6   : > { %v14506_v47 = vsel %vm14497_vm8, %v3005_v45, -1e+30  ;;  %3192 = vmax.xlane.f32.xlu1 %v3191_v46 }
 0x4f7   : > { %v12177_v58 = vpop.f32.mrf.mxu0  ;;  %v3055_v14 = vpop.f32.mrf.mxu1 }
 0x4f8   : > { %v3179_v56 = vsel %vm14497_vm8, %v3055_v14, -1e+30 }
 0x4f9   : > { %v12185_v57 = vpop.f32.mrf.mxu1  ;;  %v3194_v59 = vsel %vm3184_vm9, %v3179_v56, -inf }
 0x4fa   : > { %3195 = vmax.xlane.f32.xlu0 %v3194_v59  ;;  %v2454_v57 = vshrl.u32 %v2419_v25, 16 }
 0x501   : > { %v3102_v7 = vpop.f32.mrf.mxu0 }
 0x502   : > { %v14518_v16 = vsel %vm14489_vm5, %v3102_v7, -1e+30 }
 0x503   : > { %v12192_v19 = vpop.f32.mrf.mxu0  ;;  %v3152_v20 = vpop.f32.mrf.mxu1 }
 0x504   : > { %v3182_v23 = vsel %vm14489_vm5, %v3152_v20, -1e+30  ;;  %v2438_v19 = vshrl.u32 %v2418_v10, 16 }
 0x505   : > { %v3105_v54 = vpop.f32.mrf.mxu0  ;;  %v12200_v12 = vpop.f32.mrf.mxu1  ;;  %v3203_v29 = vsel %vm3184_vm9, %v3182_v23, -inf }
 0x506   : > { %v14525_v35 = vsel %vm14497_vm8, %v3105_v54, -1e+30  ;;  %3204 = vmax.xlane.f32.xlu0 %v3203_v29 }
 0x507   : > { %2424 = vrot.lane.b32.xlu1 %v2419_v25, %s13657_s3  ;;  %v12193_v26 = vpop.f32.mrf.mxu0  ;;  %v3155_v32 = vpop.f32.mrf.mxu1 }
 0x508   : > { %v3183_v33 = vsel %vm14497_vm8, %v3155_v32, -1e+30 }
 0x509   : > { %v12201_v8 = vpop.f32.mrf.mxu1  ;;  %v3206_v38 = vsel %vm3184_vm9, %v3183_v33, -inf }
 0x50a   : > { %3207 = vmax.xlane.f32.xlu0 %v3206_v38 }
 0x50b   : > { %2432 = vrot.lane.b32.xlu1 %v2419_v25, %s13658_s8 }
 0x50f   : > { %2422 = vrot.lane.b32.xlu1 %v2418_v10, %s13657_s3 }
 0x513   : > { %2426 = vrot.lane.b32.xlu1 %v2418_v10, %s13656_s6 }
 0x517   : > { %1346 = vrot.lane.b32.xlu1 %v14234_v53, %s13657_s3 }
 0x520   : > { %2428 = vrot.lane.b32.xlu0 %v2419_v25, %s13656_s6 }
 0x524   : > { %2430 = vrot.lane.b32.xlu0 %v2418_v10, %s13658_s8 }
 0x57f   : > { %v3193_v61 = vpop.xlane.xlu1 %3192 }
 0x580   : > { %v3211_v30 = vsub.f32 %v3178_v43, %v3193_v61 }
 0x582   : > { %v3221_v1 = vmul.f32 1.442695, %v3211_v30 }
 0x583   : > { %v2425_v24 = vpop.permute.xlu1 %2424  ;;  %v3196_v42 = vpop.xlane.xlu0 %3195 }
 0x584   : > { %12781 = vpow2.f32 %v3221_v1  ;;  %v3212_v60 = vsub.f32 %v3179_v56, %v3196_v42  ;;  %v2455_v58 = vshrl.u32 %v2425_v24, 16  ;;  %v2452_v59 = vpack.i.b16 %v2425_v24, %v2419_v25 }
 0x586   : > { %v3223_v45 = vmul.f32 1.442695, %v3212_v60  ;;  %v2456_v17 = vpack.i.b16 %v2455_v58, %v2454_v57  ;;  %v2598_v56 = vcombine.high %v2452_v59, %v14259_v6 }
 0x587   : > { %v2433_v44 = vpop.permute.xlu1 %2432 }
 0x588   : > { %12783 = vpow2.f32 %v3223_v45  ;;  %v2664_v25 = vcombine.high %v2456_v17, %v14259_v6  ;;  %v2612_v41 = vrot.slane %v2598_v56, %v14262_v9  ;;  %v2463_v1 = vshrl.u32 %v2433_v44, 16 }
 0x58a   : > { %v2678_v60 = vrot.slane %v2664_v25, %v14262_v9 }
 0x58b   : > { %v2423_v46 = vpop.permute.xlu1 %2422 }
 0x58c   : > { %v2439_v63 = vshrl.u32 %v2423_v46, 16  ;;  %v2436_v43 = vpack.i.b16 %v2423_v46, %v2418_v10 }
 0x58e   : > { %v2440_v12 = vpack.i.b16 %v2439_v63, %v2438_v19  ;;  %v2466_v4 = vcombine.high %v2436_v43, %v14259_v6  ;;  %v2473_v45 = vrot.slane %v2436_v43, %v14262_v9 }
 0x58f   : > { %v3205_v14 = vpop.xlane.xlu0 %3204  ;;  %v2427_v61 = vpop.permute.xlu1 %2426 }
 0x590   : > { %v3215_v7 = vsub.f32 %v3182_v23, %v3205_v14  ;;  %v2605_v23 = vrot.slane %v2452_v59, %v14262_v9  ;;  %v2532_v10 = vcombine.high %v2440_v12, %v14259_v6  ;;  %v2480_v46 = vrot.slane %v2466_v4, %v14262_v9 }
 0x591   : > { %v14538_v5 = vpop.eup %12781  ;;  %v14557_v58 = vrot.slane %v2440_v12, %v14262_v9  ;;  %v2446_v14 = vshrl.u32 %v2427_v61, 16 }
 0x592   : > { %v3239_v20 = vsel %vm3184_vm9, %v14538_v5, 0.0  ;;  %v3229_v29 = vmul.f32 1.442695, %v3215_v7 }
 0x593   : > { %v3208_v54 = vpop.xlane.xlu0 %3207  ;;  %3240 = vadd.xlane.f32.xlu1 %v3239_v20 }
 0x594   : > { %v3216_v26 = vsub.f32 %v3183_v33, %v3208_v54  ;;  %12785 = vpow2.f32 %v3229_v29  ;;  %v2671_v33 = vrot.slane %v2456_v17, %v14262_v9  ;;  %v14562_v17 = vrot.slane %v2532_v10, %v14262_v9 }
 0x595   : > { %v14543_v32 = vpop.eup %12783 }
 0x596   : > { %v3242_v8 = vsel %vm3184_vm9, %v14543_v32, 0.0  ;;  %v3231_v30 = vmul.f32 1.442695, %v3216_v26 }
 0x597   : > { %v2429_v38 = vpop.permute.xlu0 %2428  ;;  %3243 = vadd.xlane.f32.xlu0 %v3242_v8 }
 0x598   : > { %v2460_v24 = vpack.i.b16 %v2433_v44, %v2429_v38  ;;  %v2462_v42 = vshrl.u32 %v2429_v38, 16  ;;  %12787 = vpow2.f32 %v3231_v30 }
 0x59a   : > { %v2464_v57 = vpack.i.b16 %v2463_v1, %v2462_v42  ;;  %v2613_v59 = vcombine.high %v2460_v24, %v14259_v6  ;;  %v2620_v63 = vrot.slane %v2460_v24, %v14262_v9 }
 0x59b   : > { %v2431_v7 = vpop.permute.xlu0 %2430 }
 0x59c   : > { %v2444_v44 = vpack.i.b16 %v2431_v7, %v2427_v61  ;;  %v2447_v19 = vshrl.u32 %v2431_v7, 16  ;;  %v2627_v43 = vrot.slane %v2613_v59, %v14262_v9  ;;  %v2628_v20 = vcombine.low %v2605_v23, %v2620_v63 }
 0x59d   : > { %v2629_v54 = vcombine.high %v2605_v23, %v2620_v63  ;;  %v2679_v56 = vcombine.high %v2464_v57, %v14259_v6  ;;  %v2686_v12 = vrot.slane %v2464_v57, %v14262_v9 }
 0x59e   : > { %v2448_v29 = vpack.i.b16 %v2447_v19, %v2446_v14  ;;  %v2481_v26 = vcombine.high %v2444_v44, %v14259_v6  ;;  %v2488_v25 = vrot.slane %v2444_v44, %v14262_v9  ;;  %v2636_v4 = vrot.slane %v2628_v20, %v14266_v18 }
 0x59f   : > { %v2643_v8 = vrot.slane %v2629_v54, %v14266_v18  ;;  %v2644_v38 = vcombine.low %v2612_v41, %v2627_v43  ;;  %v2645_v10 = vcombine.high %v2612_v41, %v2627_v43  ;;  %v2693_v61 = vrot.slane %v2679_v56, %v14262_v9 }
 0x5a0   : > { %v2694_v30 = vcombine.low %v2671_v33, %v2686_v12  ;;  %v2695_v1 = vcombine.high %v2671_v33, %v2686_v12  ;;  %v2495_v23 = vrot.slane %v2481_v26, %v14262_v9 }
 0x5a1   : > { %v2652_v24 = vrot.slane %v2644_v38, %v14266_v18  ;;  %v2659_v42 = vrot.slane %v2645_v10, %v14266_v18  ;;  %v2830_v14 = vcombine.low %v2636_v4, %v2643_v8  ;;  %v10772_v57 = vcombine.high %v2636_v4, %v2643_v8  ;;  %v14583_v26 = vpop.eup %12785 }
 0x5a2   : > { %v2702_v59 = vrot.slane %v2694_v30, %v14266_v18  ;;  %v2709_v63 = vrot.slane %v2695_v1, %v14266_v18  ;;  %v2710_v7 = vcombine.low %v2678_v60, %v2693_v61  ;;  %v2711_v44 = vcombine.high %v2678_v60, %v2693_v61 }
 0x5a3   : > { %v2837_v41 = vrot.slane %v2830_v14, %v14262_v9  ;;  %v2845_v19 = vrot.slane %v10772_v57, %v14262_v9  ;;  %v2846_v43 = vcombine.low %v2652_v24, %v2659_v42  ;;  %v10773_v33 = vcombine.high %v2652_v24, %v2659_v42 }
 0x5a4   : > { %v2718_v20 = vrot.slane %v2710_v7, %v14266_v18  ;;  %v2725_v54 = vrot.slane %v2711_v44, %v14266_v18  ;;  %v2880_v56 = vcombine.low %v2702_v59, %v2709_v63  ;;  %v10774_v12 = vcombine.high %v2702_v59, %v2709_v63  ;;  %1354 = vrot.lane.b32.xlu1 %v14234_v53, %s13658_s8 }
 0x5a5   : > { %v2496_v4 = vcombine.low %v2473_v45, %v2488_v25  ;;  %v2497_v8 = vcombine.high %v2473_v45, %v2488_v25  ;;  %v2512_v60 = vcombine.low %v2480_v46, %v2495_v23  ;;  %v2513_v38 = vcombine.high %v2480_v46, %v2495_v23  ;;  %v14596_v23 = vpop.eup %12787 }
 0x5a6   : > { %v2896_v10 = vcombine.low %v2718_v20, %v2725_v54  ;;  %v10775_v61 = vcombine.high %v2718_v20, %v2725_v54  ;;  %v2547_v30 = vcombine.high %v2448_v29, %v14259_v6  ;;  %v2554_v1 = vrot.slane %v2448_v29, %v14262_v9 }
 0x5a7   : > { %v2504_v24 = vrot.slane %v2496_v4, %v14266_v18  ;;  %v2511_v42 = vrot.slane %v2497_v8, %v14266_v18  ;;  %v2520_v14 = vrot.slane %v2512_v60, %v14266_v18  ;;  %v2527_v57 = vrot.slane %v2513_v38, %v14266_v18 }
 0x5a8   : > { %v2561_v59 = vrot.slane %v2547_v30, %v14262_v9  ;;  %v2562_v45 = vcombine.low %v14557_v58, %v2554_v1  ;;  %v2563_v46 = vcombine.high %v14557_v58, %v2554_v1  ;;  %v3251_v25 = vsel %vm3184_vm9, %v14583_v26, 0.0 }
 0x5a9   : > { %v2730_v29 = vcombine.low %v2504_v24, %v2511_v42  ;;  %v10768_v63 = vcombine.high %v2504_v24, %v2511_v42  ;;  %v2746_v7 = vcombine.low %v2520_v14, %v2527_v57  ;;  %v10769_v44 = vcombine.high %v2520_v14, %v2527_v57  ;;  %3252 = vadd.xlane.f32.xlu0 %v3251_v25 }
 0x5aa   : > { %v2570_v20 = vrot.slane %v2562_v45, %v14266_v18  ;;  %v2577_v54 = vrot.slane %v2563_v46, %v14266_v18  ;;  %v2578_v4 = vcombine.low %v14562_v17, %v2561_v59  ;;  %v2579_v8 = vcombine.high %v14562_v17, %v2561_v59 }
 0x5ab   : > { %v2737_v58 = vrot.slane %v2730_v29, %v14262_v9  ;;  %v2745_v60 = vrot.slane %v10768_v63, %v14262_v9  ;;  %v2753_v38 = vrot.slane %v2746_v7, %v14262_v9  ;;  %v2761_v30 = vrot.slane %v10769_v44, %v14262_v9 }
 0x5ac   : > { %v2586_v1 = vrot.slane %v2578_v4, %v14266_v18  ;;  %v2593_v24 = vrot.slane %v2579_v8, %v14266_v18  ;;  %v2780_v42 = vcombine.low %v2570_v20, %v2577_v54  ;;  %v10770_v14 = vcombine.high %v2570_v20, %v2577_v54 }
 0x5ad   : > { %v3254_v57 = vsel %vm3184_vm9, %v14596_v23, 0.0  ;;  %v2853_v45 = vrot.slane %v2846_v43, %v14262_v9  ;;  %v2861_v17 = vrot.slane %v10773_v33, %v14262_v9  ;;  %v2862_v59 = vcombine.low %v2837_v41, %v2845_v19 }
 0x5ae   : > { %v2787_v46 = vrot.slane %v2780_v42, %v14262_v9  ;;  %v2795_v25 = vrot.slane %v10770_v14, %v14262_v9  ;;  %v2796_v29 = vcombine.low %v2586_v1, %v2593_v24  ;;  %v10771_v63 = vcombine.high %v2586_v1, %v2593_v24  ;;  %3255 = vadd.xlane.f32.xlu0 %v3254_v57 }
 0x5af   : > { %v2869_v7 = vrot.slane %v2862_v59, %v14266_v18  ;;  %v2870_v44 = vcombine.low %v2853_v45, %v2861_v17  ;;  %v2887_v20 = vrot.slane %v2880_v56, %v14262_v9  ;;  %v2895_v54 = vrot.slane %v10774_v12, %v14262_v9 }
 0x5b0   : > { %v2903_v4 = vrot.slane %v2896_v10, %v14262_v9  ;;  %v2911_v43 = vrot.slane %v10775_v61, %v14262_v9  ;;  %v2762_v33 = vcombine.low %v2737_v58, %v2745_v60  ;;  %v2770_v41 = vcombine.low %v2753_v38, %v2761_v30 }
 0x5b1   : > { %v2877_v19 = vrot.slane %v2870_v44, %v14266_v18  ;;  %v2912_v8 = vcombine.low %v2887_v20, %v2895_v54  ;;  %v2803_v42 = vrot.slane %v2796_v29, %v14262_v9  ;;  %v2811_v1 = vrot.slane %v10771_v63, %v14262_v9 }
 0x5b2   : > { %v2920_v24 = vcombine.low %v2903_v4, %v2911_v43  ;;  %v2769_v14 = vrot.slane %v2762_v33, %v14266_v18  ;;  %v2777_v56 = vrot.slane %v2770_v41, %v14266_v18  ;;  %v2812_v57 = vcombine.low %v2787_v46, %v2795_v25 }
 0x5b3   : > { %v2878_v12 = vcombine.low %v2869_v7, %v2877_v19  ;;  %v2820_v45 = vcombine.low %v2803_v42, %v2811_v1  ;;  %v2879_v10 = vcombine.high %v2869_v7, %v2877_v19  ;;  %v2919_v61 = vrot.slane %v2912_v8, %v14266_v18 }
 0x5b4   : > { %v2927_v58 = vrot.slane %v2920_v24, %v14266_v18  ;;  %v2778_v60 = vcombine.low %v2769_v14, %v2777_v56  ;;  %v2779_v38 = vcombine.high %v2769_v14, %v2777_v56  ;;  %v2819_v30 = vrot.slane %v2812_v57, %v14266_v18 }
 0x5b5   : > { %v2827_v17 = vrot.slane %v2820_v45, %v14266_v18  ;;  %v2949_v29 = vshrl.u32 %v2878_v12, 16  ;;  %v2955_v44 = vshrl.u32 %v2879_v10, 16 }
 0x5b6   : > { %v2928_v59 = vcombine.low %v2919_v61, %v2927_v58  ;;  %v2929_v63 = vcombine.high %v2919_v61, %v2927_v58  ;;  %v2934_v54 = vshrl.u32 %v2778_v60, 16  ;;  %v2942_v25 = vshrl.u32 %v2779_v38, 16  ;;  %v14645_v61 = vld [vmem:[#allocation9 + $0x98] sm:$0xff] }
 0x5b7   : > { %v2828_v20 = vcombine.low %v2819_v30, %v2827_v17  ;;  %v2829_v46 = vcombine.high %v2819_v30, %v2827_v17  ;;  %v3185_v17 = vsel %vm3184_vm9, %v14495_v39, -inf }
 0x5b8   : > { %v14628_v4 = vpack.i.b16 %v2928_v59, %v2878_v12  ;;  %v2950_v7 = vshrl.u32 %v2928_v59, 16  ;;  %v2956_v43 = vshrl.u32 %v2929_v63, 16  ;;  %v14630_v33 = vpack.i.b16 %v2929_v63, %v2879_v10 }
 0x5b9   : > { %v2932_v41 = vpack.i.b16 %v2828_v20, %v2778_v60  ;;  %v2935_v19 = vshrl.u32 %v2828_v20, 16  ;;  %v2943_v8 = vshrl.u32 %v2829_v46, 16  ;;  %v14632_v42 = vpack.i.b16 %v2829_v46, %v2779_v38 }
 0x5ba   : > { %v3282_v1 = vsel %vm3280_vm2, %v14628_v4, 0  ;;  %v14636_v24 = vpack.i.b16 %v2950_v7, %v2949_v29  ;;  %v14638_v14 = vpack.i.b16 %v2956_v43, %v2955_v44  ;;  %v16139_v12 = vrot.slane %v14628_v4, 4  ;;  %v1347_v44 = vpop.permute.xlu1 %1346 }
 0x5bb   : > { %12203 = vmatpush3.bf16.msra.mxu0 %v3282_v1  ;;  %v2936_v56 = vpack.i.b16 %v2935_v19, %v2934_v54  ;;  %v14640_v57 = vpack.i.b16 %v2943_v8, %v2942_v25  ;;  %v4213_v45 = vrot.slane %v2932_v41, 4  ;;  %v3200_v59 = vsel %vm3184_vm9, %v14525_v35, -inf }
 0x5bc   : > { %v3329_v10 = vsel %vm3280_vm2, %v14636_v24, 0  ;;  %12204 = vmatprep.subr.bf16.mxu0 %v14645_v61  ;;  %v16140_v58 = vrot.slane %v14636_v24, 4  ;;  %v3188_v29 = vsel %vm3184_vm9, %v14506_v47, -inf  ;;  %v3197_v63 = vsel %vm3184_vm9, %v14518_v16, -inf }
 0x5bd   : > { %12211 = vmatpush3.bf16.msra.mxu1 %v3329_v10  ;;  %v4264_v60 = vrot.slane %v2936_v56, 4  ;;  %v14652_v38 = vsel %vm3280_vm2, %v4213_v45, %v16139_v12  ;;  %v3423_v8 = vsel %vm3280_vm2, %v14638_v14, 0  ;;  %v1383_v1 = vshrl.u32 %v1347_v44, 16 }
 0x5be   : > { %12212 = vmatprep.subr.bf16.mxu1 %v14645_v61 }
 0x5bf   : > { %12205 = vmatpush3.bf16.msra.mxu0 %v2932_v41  ;;  %v14658_v30 = vsel %vm3280_vm2, %v4264_v60, %v16140_v58 }
 0x5c0   : > { %12218 = vmatprep.subr.bf16.mxu0 %v14645_v61 }
 0x5c1   : > { %12213 = vmatpush3.bf16.msra.mxu1 %v2936_v56 }
 0x5c2   : > { %12226 = vmatprep.subr.bf16.mxu1 %v14645_v61 }
 0x5c4   : > { %1350 = vrot.lane.b32.xlu0 %v14234_v53, %s13656_s6 }
 0x5c8   : > { %3186 = vmax.xlane.f32.xlu1 %v3185_v17 }
 0x5cc   : > { %3201 = vmax.xlane.f32.xlu1 %v3200_v59 }
 0x5e3   : > { %3189 = vmax.xlane.f32.xlu0 %v3188_v29 }
 0x5e7   : > { %3198 = vmax.xlane.f32.xlu0 %v3197_v63 }
 0x61c   : > { %v3241_v20 = vpop.xlane.xlu1 %3240 }
 0x61d   : > { %12789 = vrcp.f32 %v3241_v20 }
 0x620   : > { %v3244_v54 = vpop.xlane.xlu0 %3243  ;;  %v1355_v45 = vpop.permute.xlu1 %1354 }
 0x621   : > { %12791 = vrcp.f32 %v3244_v54  ;;  %v1391_v59 = vshrl.u32 %v1355_v45, 16 }
 0x62a   : > { %v12790_v46 = vpop.eup %12789 }
 0x62b   : > { %v3267_v7 = vmul.f32 %v12790_v46, %v14538_v5  ;;  %v1380_v5 = vpack.i.b16 %v1347_v44, %v14234_v53 }
 0x62d   : > { %v1526_v17 = vcombine.high %v1380_v5, %v14259_v6 }
 0x62e   : > { %v12792_v25 = vpop.eup %12791 }
 0x62f   : > { %v3268_v43 = vmul.f32 %v12792_v25, %v14543_v32  ;;  %v1382_v32 = vshrl.u32 %v14234_v53, 16  ;;  %v1533_v53 = vrot.slane %v1380_v5, %v14262_v9  ;;  %v1540_v25 = vrot.slane %v1526_v17, %v14262_v9 }
 0x631   : > { %v3274_v19 = vpack.c.bf16 %v3268_v43, %v3267_v7  ;;  %v1384_v10 = vpack.i.b16 %v1383_v1, %v1382_v32 }
 0x632   : > { %v3253_v41 = vpop.xlane.xlu0 %3252 }
 0x633   : > { %12215 = vmatmul.mubr.msk.bf16.vlgmr.msra.gmra.mxu1 %vm3184_vm9, %v3274_v19  ;;  %12793 = vrcp.f32 %v3253_v41  ;;  %v1592_v46 = vcombine.high %v1384_v10, %v14259_v6  ;;  %v1599_v41 = vrot.slane %v1384_v10, %v14262_v9 }
 0x634   : > { %12227 = vmatpush3.bf16.msra.mxu1 %v3423_v8  ;;  %12230 = vmatprep.mubr.msk.bf16.mxu1 %vm13659_vm0, %v14645_v61 }
 0x635   : > { %12228 = vmatprep.subr.bf16.mxu1 %v14645_v61 }
 0x637   : > { %v3256_v56 = vpop.xlane.xlu0 %3255 }
 0x638   : > { %12795 = vrcp.f32 %v3256_v56  ;;  %12229 = vmatpush3.bf16.msra.mxu1 %v14640_v57 }
 0x639   : > { %12254 = vmatprep.subr.bf16.mxu1 %v14645_v61 }
 0x63b   : > { %v1351_v60 = vpop.permute.xlu0 %1350 }
 0x63c   : > { %v1388_v29 = vpack.i.b16 %v1355_v45, %v1351_v60  ;;  %v1390_v63 = vshrl.u32 %v1351_v60, 16  ;;  %v1606_v45 = vrot.slane %v1592_v46, %v14262_v9 }
 0x63e   : > { %v1392_v20 = vpack.i.b16 %v1391_v59, %v1390_v63  ;;  %v1541_v54 = vcombine.high %v1388_v29, %v14259_v6  ;;  %v1548_v44 = vrot.slane %v1388_v29, %v14262_v9 }
 0x640   : > { %v1555_v7 = vrot.slane %v1541_v54, %v14262_v9  ;;  %v1607_v43 = vcombine.high %v1392_v20, %v14259_v6  ;;  %v1614_v19 = vrot.slane %v1392_v20, %v14262_v9  ;;  %v1556_v8 = vcombine.low %v1533_v53, %v1548_v44  ;;  %v12794_v29 = vpop.eup %12793 }
 0x641   : > { %v1557_v1 = vcombine.high %v1533_v53, %v1548_v44 }
 0x642   : > { %v1572_v56 = vcombine.low %v1540_v25, %v1555_v7  ;;  %v1573_v32 = vcombine.high %v1540_v25, %v1555_v7  ;;  %v1621_v60 = vrot.slane %v1607_v43, %v14262_v9  ;;  %v1622_v59 = vcombine.low %v1599_v41, %v1614_v19 }
 0x643   : > { %v1623_v5 = vcombine.high %v1599_v41, %v1614_v19  ;;  %v1564_v53 = vrot.slane %v1556_v8, %v14266_v18  ;;  %v1571_v46 = vrot.slane %v1557_v1, %v14266_v18  ;;  %v3271_v41 = vmul.f32 %v12794_v29, %v14583_v26 }
 0x644   : > { %v1580_v17 = vrot.slane %v1572_v56, %v14266_v18  ;;  %v1587_v63 = vrot.slane %v1573_v32, %v14266_v18  ;;  %v1630_v10 = vrot.slane %v1622_v59, %v14266_v18  ;;  %v1638_v54 = vcombine.low %v1606_v45, %v1621_v60 }
 0x645   : > { %v12796_v6 = vpop.eup %12795  ;;  %v1637_v20 = vrot.slane %v1623_v5, %v14266_v18  ;;  %v1639_v44 = vcombine.high %v1606_v45, %v1621_v60  ;;  %v1758_v58 = vcombine.low %v1564_v53, %v1571_v46  ;;  %v10756_v45 = vcombine.high %v1564_v53, %v1571_v46 }
 0x646   : > { %v1646_v25 = vrot.slane %v1638_v54, %v14266_v18  ;;  %v1774_v43 = vcombine.low %v1580_v17, %v1587_v63  ;;  %v10757_v19 = vcombine.high %v1580_v17, %v1587_v63  ;;  %v3272_v59 = vmul.f32 %v12796_v6, %v14596_v23 }
 0x647   : > { %v1653_v7 = vrot.slane %v1639_v44, %v14266_v18  ;;  %v1808_v56 = vcombine.low %v1630_v10, %v1637_v20  ;;  %v10758_v32 = vcombine.high %v1630_v10, %v1637_v20  ;;  %v3896_v54 = vsel %vm2958_vm1, %v3887_v48, 0 }
 0x648   : > { %v3276_v60 = vpack.c.bf16 %v3272_v59, %v3271_v41  ;;  %v1781_v26 = vrot.slane %v1774_v43, %v14262_v9  ;;  %v1789_v29 = vrot.slane %v10757_v19, %v14262_v9  ;;  %v1773_v15 = vrot.slane %v10756_v45, %v14262_v9 }
 0x649   : > { %v1824_v12 = vcombine.low %v1646_v25, %v1653_v7  ;;  %v10759_v5 = vcombine.high %v1646_v25, %v1653_v7  ;;  %v1815_v17 = vrot.slane %v1808_v56, %v14262_v9  ;;  %v1823_v23 = vrot.slane %v10758_v32, %v14262_v9 }
 0x64a   : > { %12231 = vmatmul.mubr.msk.bf16.vlgmr.msra.gmra.mxu1 %vm3184_vm9, %v3276_v60  ;;  %v1798_v48 = vcombine.low %v1781_v26, %v1789_v29  ;;  %v3893_v46 = vsel %vm2958_vm1, %v14437_v50, 0  ;;  %v3949_v50 = vsel %vm2958_vm1, %v3940_v51, 0  ;;  %v3946_v32 = vsel %vm2958_vm1, %v14442_v62, 0 }
 0x64b   : > { %v1831_v8 = vrot.slane %v1824_v12, %v14262_v9  ;;  %v1839_v1 = vrot.slane %v10759_v5, %v14262_v9  ;;  %12255 = vmatpush3.bf16.xpose.msra.mxu1 %v3896_v54  ;;  %12258 = vmatprep.mubr.msk.bf16.mxu1 %vm13659_vm0, %v14645_v61  ;;  %v1765_v12 = vrot.slane %v1758_v58, %v14262_v9 }
 0x64c   : > { %12256 = vmatprep.subr.bf16.mxu1 %v14645_v61  ;;  %v1840_v6 = vcombine.low %v1815_v17, %v1823_v23  ;;  %v1805_v7 = vrot.slane %v1798_v48, %v14266_v18 }
 0x64d   : > { %v1848_v63 = vcombine.low %v1831_v8, %v1839_v1  ;;  %v1790_v20 = vcombine.low %v1765_v12, %v1773_v15  ;;  %v4002_v8 = vsel %vm2958_vm1, %v3993_v49, 0  ;;  %v4055_v12 = vsel %vm2958_vm1, %v4046_v3, 0 }
 0x64e   : > { %v1847_v58 = vrot.slane %v1840_v6, %v14266_v18  ;;  %v4052_v3 = vsel %vm2958_vm1, %v14455_v13, 0 }
 0x64f   : > { %v1855_v53 = vrot.slane %v1848_v63, %v14266_v18  ;;  %v1797_v43 = vrot.slane %v1790_v20, %v14266_v18 }
 0x651   : > { %v3187_v10 = vpop.xlane.xlu1 %3186  ;;  %v1856_v41 = vcombine.low %v1847_v58, %v1855_v53  ;;  %v1806_v19 = vcombine.low %v1797_v43, %v1805_v7  ;;  %v1857_v49 = vcombine.high %v1847_v58, %v1855_v53 }
 0x652   : > { %v3209_v44 = vsub.f32 %v14495_v39, %v3187_v10 }
 0x653   : > { %12257 = vmatpush3.bf16.xpose.msra.mxu1 %v3893_v46  ;;  %v1872_v56 = vpack.i.b16 %v1856_v41, %v1806_v19  ;;  %v1874_v5 = vshrl.u32 %v1856_v41, 16  ;;  %v1873_v51 = vshrl.u32 %v1806_v19, 16  ;;  %v1880_v6 = vshrl.u32 %v1857_v49, 16 }
 0x654   : > { %v3217_v25 = vmul.f32 1.442695, %v3209_v44  ;;  %12262 = vmatprep.subr.bf16.mxu1 %v14645_v61  ;;  %v16264_v44 = vrot.slane %v14636_v24, 4 }
 0x655   : > { %v3202_v55 = vpop.xlane.xlu1 %3201  ;;  %v1875_v45 = vpack.i.b16 %v1874_v5, %v1873_v51 }
 0x656   : > { %12797 = vpow2.f32 %v3217_v25  ;;  %v3214_v60 = vsub.f32 %v14525_v35, %v3202_v55  ;;  %v4272_v53 = vsel %vm3280_vm2, %v16264_v44, 0 }
 0x658   : > { %v3227_v54 = vmul.f32 1.442695, %v3214_v60 }
 0x65a   : > { %12259 = vmatmul.mubr.msk.bf16.vlgmr.msra.gmra.mxu1 %vm2958_vm1, %v1872_v56 }
 0x65b   : > { %12263 = vmatpush3.bf16.xpose.msra.mxu1 %v3949_v50  ;;  %12266 = vmatprep.mubr.msk.bf16.mxu1 %vm13659_vm0, %v14645_v61 }
 0x65c   : > { %12264 = vmatprep.subr.bf16.mxu1 %v14645_v61 }
 0x663   : > { %v14736_v39 = vpop.eup %12797  ;;  %12265 = vmatpush3.bf16.xpose.msra.mxu1 %v3946_v32  ;;  %v4098_v32 = vadd.s32 16, %v14217_v31 }
 0x664   : > { %v3233_v59 = vsel %vm3184_vm9, %v14736_v39, 0.0  ;;  %12270 = vmatprep.subr.bf16.mxu1 %v14645_v61 }
 0x665   : > { %3234 = vadd.xlane.f32.xlu0 %v3233_v59  ;;  %v4100_v59 = vadd.s32 8, %v14480_v37 }
 0x667   : > { %v4101_v60 = vsub.s32 %v4098_v32, %v4100_v59 }
 0x669   : > { %vm4103_vm10 = vcmp.le.s32.totalorder %v4101_v60, 4  ;;  %vm4105_vm11 = vcmp.ge.s32.totalorder %v4101_v60, 4294967292 }
 0x66a   : > { %12267 = vmatmul.mubr.msk.bf16.vlgmr.msra.gmra.mxu1 %vm2958_vm1, %v1875_v45  ;;  %vm14804_vm12 = vmand %vm4103_vm10, %vm4105_vm11 }
 0x66b   : > { %12271 = vmatpush3.bf16.xpose.msra.mxu1 %v4002_v8  ;;  %12274 = vmatprep.mubr.msk.bf16.mxu1 %vm13659_vm0, %v14645_v61  ;;  %v4099_v8 = vadd.s32 16, %v14485_v36  ;;  %v3376_v36 = vsel %vm3280_vm2, %v14630_v33, 0 }
 0x66c   : > { %v3190_v62 = vpop.xlane.xlu0 %3189  ;;  %12272 = vmatprep.subr.bf16.mxu1 %v14645_v61 }
 0x66d   : > { %v3210_v1 = vsub.f32 %v14506_v47, %v3190_v62  ;;  %v1807_v47 = vcombine.high %v1797_v43, %v1805_v7 }
 0x66f   : > { %v3219_v26 = vmul.f32 1.442695, %v3210_v1  ;;  %v1878_v23 = vpack.i.b16 %v1857_v49, %v1807_v47  ;;  %v1879_v10 = vshrl.u32 %v1807_v47, 16 }
 0x670   : > { %v3199_v29 = vpop.xlane.xlu0 %3198 }
 0x671   : > { %12799 = vpow2.f32 %v3219_v26  ;;  %v3213_v35 = vsub.f32 %v14518_v16, %v3199_v29  ;;  %v1881_v20 = vpack.i.b16 %v1880_v6, %v1879_v10 }
 0x672   : > { %12801 = vpow2.f32 %v3227_v54  ;;  %v4102_v54 = vsub.s32 %v4099_v8, %v4100_v59 }
 0x673   : > { %v3225_v17 = vmul.f32 1.442695, %v3213_v35  ;;  %12273 = vmatpush3.bf16.xpose.msra.mxu1 %v3999_v0 }
 0x674   : > { %12278 = vmatprep.subr.bf16.mxu1 %v14645_v61  ;;  %vm4104_vm13 = vcmp.le.s32.totalorder %v4102_v54, 4  ;;  %vm4106_vm14 = vcmp.ge.s32.totalorder %v4102_v54, 4294967292 }
 0x675   : > { %12803 = vpow2.f32 %v3225_v17  ;;  %vm14816_vm15 = vmand %vm4104_vm13, %vm4106_vm14 }
 0x67a   : > { %12275 = vmatmul.mubr.msk.bf16.vlgmr.msra.gmra.mxu1 %vm2958_vm1, %v1878_v23 }
 0x67b   : > { %12279 = vmatpush3.bf16.xpose.msra.mxu1 %v4055_v12  ;;  %12282 = vmatprep.mubr.msk.bf16.mxu1 %vm13659_vm0, %v14645_v61 }
 0x67c   : > { %12280 = vmatprep.subr.bf16.mxu1 %v14645_v61 }
 0x67e   : > { %v12800_v16 = vpop.eup %12799 }
 0x67f   : > { %v3236_v2 = vsel %vm3184_vm9, %v12800_v16, 0.0  ;;  %v14764_v15 = vpop.eup %12801 }
 0x680   : > { %3237 = vadd.xlane.f32.xlu1 %v3236_v2  ;;  %v3248_v52 = vsel %vm3184_vm9, %v14764_v15, 0.0 }
 0x682   : > { %v14766_v63 = vpop.eup %12803 }
 0x683   : > { %v3245_v48 = vsel %vm3184_vm9, %v14766_v63, 0.0  ;;  %12281 = vmatpush3.bf16.xpose.msra.mxu1 %v4052_v3 }
 0x684   : > { %3246 = vadd.xlane.f32.xlu0 %v3245_v48  ;;  %3249 = vadd.xlane.f32.xlu1 %v3248_v52 }
 0x685   : > { %12294 = vmatprep.subr.bf16.mxu1 %v14645_v61 }
 0x68a   : > { %12283 = vmatmul.mubr.msk.bf16.vlgmr.msra.gmra.mxu1 %vm2958_vm1, %v1881_v20 }
 0x68b   : > { %12295 = vmatpush3.bf16.msra.mxu1 %v4272_v53  ;;  %12298 = vmatprep.mubr.msk.bf16.mxu1 %vm13659_vm0, %v14645_v61 }
 0x68c   : > { %12296 = vmatprep.subr.bf16.mxu1 %v14645_v61 }
 0x68f   : > { %12297 = vmatpush3.bf16.msra.mxu1 %v14658_v30 }
 0x690   : > { %12310 = vmatprep.subr.bf16.mxu1 %v14645_v61 }
 0x6ee   : > { %v3235_v58 = vpop.xlane.xlu0 %3234 }
 0x6ef   : > { %12805 = vrcp.f32 %v3235_v58 }
 0x6f3   : > { %v14784_v13 = vpop.f32.mrf.mxu1 }
 0x6f5   : > { %v12216_v46 = vpop.f32.mrf.mxu1 }
 0x6f7   : > { %v14786_v25 = vpop.f32.mrf.mxu1 }
 0x6f9   : > { %v12217_v7 = vpop.f32.mrf.mxu1 }
 0x6fc   : > { %v12806_v62 = vpop.eup %12805 }
 0x6fd   : > { %v3265_v26 = vmul.f32 %v12806_v62, %v14736_v39 }
 0x709   : > { %v3238_v24 = vpop.xlane.xlu1 %3237 }
 0x70a   : > { %12807 = vrcp.f32 %v3238_v24  ;;  %v14788_v43 = vpop.f32.mrf.mxu1 }
 0x70b   : > { %v3482_v41 = vcombine.low %v14784_v13, %v14788_v43  ;;  %v3483_v30 = vcombine.high %v14784_v13, %v14788_v43 }
 0x70c   : > { %v12232_v50 = vpop.f32.mrf.mxu1 }
 0x70d   : > { %v3247_v19 = vpop.xlane.xlu0 %3246  ;;  %v3250_v56 = vpop.xlane.xlu1 %3249 }
 0x70e   : > { %12809 = vrcp.f32 %v3247_v19  ;;  %v14796_v5 = vpop.f32.mrf.mxu1 }
 0x70f   : > { %12811 = vrcp.f32 %v3250_v56  ;;  %v3550_v55 = vcombine.low %v14786_v25, %v14796_v5  ;;  %v3551_v51 = vcombine.high %v14786_v25, %v14796_v5 }
 0x710   : > { %v12233_v45 = vpop.f32.mrf.mxu1 }
 0x717   : > { %v12808_v1 = vpop.eup %12807 }
 0x718   : > { %v3266_v37 = vmul.f32 %v12808_v1, %v12800_v16 }
 0x71a   : > { %v3273_v35 = vpack.c.bf16 %v3266_v37, %v3265_v26  ;;  %v3932_v49 = vpop.f32.mrf.mxu1 }
 0x71b   : > { %v12810_v17 = vpop.eup %12809  ;;  %v4113_v47 = vsel %vm14804_vm12, %v3932_v49, -1e+30 }
 0x71c   : > { %v12812_v0 = vpop.eup %12811  ;;  %12207 = vmatmul.mubr.msk.bf16.vlgmr.msra.gmra.mxu0 %vm3184_vm9, %v3273_v35  ;;  %v12260_v39 = vpop.f32.mrf.mxu1  ;;  %v4121_v23 = vsel %vm3184_vm9, %v4113_v47, -inf  ;;  %v3269_v16 = vmul.f32 %v12810_v17, %v14766_v63 }
 0x71d   : > { %12219 = vmatpush3.bf16.msra.mxu0 %v3376_v36  ;;  %12222 = vmatprep.mubr.msk.bf16.mxu0 %vm13659_vm0, %v14645_v61  ;;  %v3270_v2 = vmul.f32 %v12812_v0, %v14764_v15 }
 0x71e   : > { %12220 = vmatprep.subr.bf16.mxu0 %v14645_v61  ;;  %4122 = vmax.xlane.f32.xlu0 %v4121_v23  ;;  %v3935_v48 = vpop.f32.mrf.mxu1 }
 0x71f   : > { %v4114_v52 = vsel %vm14816_vm15, %v3935_v48, -1e+30  ;;  %v3275_v10 = vpack.c.bf16 %v3270_v2, %v3269_v16 }
 0x720   : > { %v12261_v3 = vpop.f32.mrf.mxu1  ;;  %v4124_v6 = vsel %vm3184_vm9, %v4114_v52, -inf }
 0x721   : > { %12221 = vmatpush3.bf16.msra.mxu0 %v14632_v42  ;;  %4125 = vmax.xlane.f32.xlu1 %v4124_v6 }
 0x722   : > { %12234 = vmatprep.subr.bf16.mxu0 %v14645_v61 }
 0x724   : > { %12223 = vmatmul.mubr.msk.bf16.vlgmr.msra.gmra.mxu0 %vm3184_vm9, %v3275_v10 }
 0x725   : > { %12250 = vmatprep.mubr.msk.bf16.mxu0 %vm13659_vm0, %v14645_v61 }
 0x72a   : > { %v3985_v15 = vpop.f32.mrf.mxu1 }
 0x72b   : > { %v4115_v63 = vsel %vm14804_vm12, %v3985_v15, -1e+30 }
 0x72c   : > { %v12268_v20 = vpop.f32.mrf.mxu1  ;;  %v4127_v44 = vsel %vm3184_vm9, %v4115_v63, -inf }
 0x72d   : > { %4128 = vmax.xlane.f32.xlu0 %v4127_v44 }
 0x72e   : > { %v3988_v53 = vpop.f32.mrf.mxu1 }
 0x72f   : > { %v4116_v46 = vsel %vm14816_vm15, %v3988_v53, -1e+30 }
 0x730   : > { %v12269_v7 = vpop.f32.mrf.mxu1  ;;  %v4130_v58 = vsel %vm3184_vm9, %v4116_v46, -inf }
 0x731   : > { %4131 = vmax.xlane.f32.xlu1 %v4130_v58 }
 0x73a   : > { %v4038_v24 = vpop.f32.mrf.mxu1 }
 0x73b   : > { %v4117_v19 = vsel %vm14804_vm12, %v4038_v24, -1e+30 }
 0x73c   : > { %v12276_v56 = vpop.f32.mrf.mxu1  ;;  %v4133_v50 = vsel %vm3184_vm9, %v4117_v19, -inf }
 0x73d   : > { %4134 = vmax.xlane.f32.xlu0 %v4133_v50 }
 0x73e   : > { %v4041_v32 = vpop.f32.mrf.mxu1 }
 0x73f   : > { %v4118_v59 = vsel %vm14816_vm15, %v4041_v32, -1e+30 }
 0x740   : > { %v12277_v45 = vpop.f32.mrf.mxu1  ;;  %v4136_v60 = vsel %vm3184_vm9, %v4118_v59, -inf }
 0x741   : > { %4137 = vmax.xlane.f32.xlu1 %v4136_v60 }
 0x74a   : > { %v4091_v8 = vpop.f32.mrf.mxu1 }
 0x74b   : > { %v4119_v62 = vsel %vm14804_vm12, %v4091_v8, -1e+30 }
 0x74c   : > { %v12284_v1 = vpop.f32.mrf.mxu1  ;;  %v4139_v54 = vsel %vm3184_vm9, %v4119_v62, -inf }
 0x74d   : > { %4140 = vmax.xlane.f32.xlu0 %v4139_v54 }
 0x74e   : > { %v4094_v26 = vpop.f32.mrf.mxu1 }
 0x74f   : > { %v14848_v37 = vsel %vm14816_vm15, %v4094_v26, -1e+30 }
 0x750   : > { %v12285_v35 = vpop.f32.mrf.mxu1  ;;  %v4142_v17 = vsel %vm3184_vm9, %v14848_v37, -inf }
 0x751   : > { %4143 = vmax.xlane.f32.xlu1 %v4142_v17 }
 0x7a7   : > { %v4123_v0 = vpop.xlane.xlu0 %4122 }
 0x7a8   : > { %v4145_v49 = vsub.f32 %v4113_v47, %v4123_v0 }
 0x7aa   : > { %v4153_v36 = vmul.f32 1.442695, %v4145_v49  ;;  %v4126_v39 = vpop.xlane.xlu1 %4125 }
 0x7ab   : > { %v4146_v29 = vsub.f32 %v4114_v52, %v4126_v39  ;;  %v3490_v39 = vrot.slane %v3482_v41, %v14262_v9  ;;  %v3558_v41 = vrot.slane %v3550_v55, %v14262_v9 }
 0x7ac   : > { %12813 = vpow2.f32 %v4153_v36 }
 0x7ad   : > { %v4155_v23 = vmul.f32 1.442695, %v4146_v29  ;;  %v3497_v29 = vrot.slane %v3483_v30, %v14262_v9 }
 0x7af   : > { %12815 = vpow2.f32 %v4155_v23 }
 0x7b6   : > { %v4129_v16 = vpop.xlane.xlu0 %4128 }
 0x7b7   : > { %v4147_v2 = vsub.f32 %v4115_v63, %v4129_v16 }
 0x7b9   : > { %v14852_v48 = vpop.eup %12813  ;;  %v4157_v12 = vmul.f32 1.442695, %v4147_v2 }
 0x7ba   : > { %v4169_v3 = vsel %vm3184_vm9, %v14852_v48, 0.0  ;;  %v4132_v6 = vpop.xlane.xlu1 %4131 }
 0x7bb   : > { %4170 = vadd.xlane.f32.xlu0 %v4169_v3  ;;  %12817 = vpow2.f32 %v4157_v12  ;;  %v4148_v10 = vsub.f32 %v4116_v46, %v4132_v6 }
 0x7bc   : > { %v14856_v15 = vpop.eup %12815 }
 0x7bd   : > { %v4159_v47 = vmul.f32 1.442695, %v4148_v10  ;;  %v4172_v52 = vsel %vm3184_vm9, %v14856_v15, 0.0 }
 0x7be   : > { %4173 = vadd.xlane.f32.xlu1 %v4172_v52 }
 0x7bf   : > { %12819 = vpow2.f32 %v4159_v47 }
 0x7c6   : > { %v4135_v20 = vpop.xlane.xlu0 %4134 }
 0x7c7   : > { %v4149_v63 = vsub.f32 %v4117_v19, %v4135_v20 }
 0x7c8   : > { %v14860_v44 = vpop.eup %12817 }
 0x7c9   : > { %v4161_v53 = vmul.f32 1.442695, %v4149_v63  ;;  %v4175_v7 = vsel %vm3184_vm9, %v14860_v44, 0.0 }
 0x7ca   : > { %v4138_v58 = vpop.xlane.xlu1 %4137  ;;  %4176 = vadd.xlane.f32.xlu0 %v4175_v7  ;;  %v3565_v7 = vrot.slane %v3551_v51, %v14262_v9 }
 0x7cb   : > { %12821 = vpow2.f32 %v4161_v53  ;;  %v4150_v46 = vsub.f32 %v4118_v59, %v4138_v58 }
 0x7cc   : > { %v14864_v24 = vpop.eup %12819 }
 0x7cd   : > { %v4163_v56 = vmul.f32 1.442695, %v4150_v46  ;;  %v4178_v50 = vsel %vm3184_vm9, %v14864_v24, 0.0 }
 0x7ce   : > { %4179 = vadd.xlane.f32.xlu1 %v4178_v50 }
 0x7cf   : > { %12823 = vpow2.f32 %v4163_v56 }
 0x7d6   : > { %v4141_v32 = vpop.xlane.xlu0 %4140 }
 0x7d7   : > { %v4151_v19 = vsub.f32 %v4119_v62, %v4141_v32 }
 0x7d8   : > { %v14868_v45 = vpop.eup %12821 }
 0x7d9   : > { %v4165_v60 = vmul.f32 1.442695, %v4151_v19  ;;  %v4181_v8 = vsel %vm3184_vm9, %v14868_v45, 0.0 }
 0x7da   : > { %4182 = vadd.xlane.f32.xlu0 %v4181_v8 }
 0x7db   : > { %12825 = vpow2.f32 %v4165_v60 }
 0x7dc   : > { %v3318_v1 = vpop.f32.mrf.mxu0  ;;  %v14872_v59 = vpop.eup %12823 }
 0x7dd   : > { %v4184_v26 = vsel %vm3184_vm9, %v14872_v59, 0.0 }
 0x7de   : > { %v12208_v54 = vpop.f32.mrf.mxu0  ;;  %4185 = vadd.xlane.f32.xlu1 %v4184_v26 }
 0x7e0   : > { %v3321_v35 = vpop.f32.mrf.mxu0 }
 0x7e2   : > { %v12209_v17 = vpop.f32.mrf.mxu0 }
 0x7e4   : > { %v3412_v0 = vpop.f32.mrf.mxu0 }
 0x7e5   : > { %v3466_v62 = vcombine.low %v3318_v1, %v3412_v0  ;;  %v3467_v49 = vcombine.high %v3318_v1, %v3412_v0 }
 0x7e6   : > { %v12224_v36 = vpop.f32.mrf.mxu0 }
 0x7e7   : > { %v3474_v23 = vrot.slane %v3466_v62, %v14262_v9  ;;  %v3481_v16 = vrot.slane %v3467_v49, %v14262_v9 }
 0x7e8   : > { %v3415_v2 = vpop.f32.mrf.mxu0  ;;  %v14886_v47 = vpop.eup %12825 }
 0x7e9   : > { %v3498_v12 = vcombine.low %v3474_v23, %v3490_v39  ;;  %v3499_v3 = vcombine.high %v3474_v23, %v3490_v39  ;;  %v3514_v6 = vcombine.low %v3481_v16, %v3497_v29  ;;  %v3515_v10 = vcombine.high %v3481_v16, %v3497_v29 }
 0x7ea   : > { %v3534_v52 = vcombine.low %v3321_v35, %v3415_v2  ;;  %v3535_v20 = vcombine.high %v3321_v35, %v3415_v2  ;;  %v12225_v13 = vpop.f32.mrf.mxu0  ;;  %v4187_v46 = vsel %vm3184_vm9, %v14886_v47, 0.0 }
 0x7eb   : > { %v3506_v43 = vrot.slane %v3498_v12, %v14266_v18  ;;  %v3513_v30 = vrot.slane %v3499_v3, %v14266_v18  ;;  %v3522_v63 = vrot.slane %v3514_v6, %v14266_v18  ;;  %v3529_v53 = vrot.slane %v3515_v10, %v14266_v18  ;;  %4188 = vadd.xlane.f32.xlu0 %v4187_v46 }
 0x7ec   : > { %v3542_v58 = vrot.slane %v3534_v52, %v14262_v9  ;;  %v3549_v55 = vrot.slane %v3535_v20, %v14262_v9 }
 0x7ed   : > { %v3602_v56 = vcombine.low %v3506_v43, %v3513_v30  ;;  %v10784_v50 = vcombine.high %v3506_v43, %v3513_v30  ;;  %v3618_v32 = vcombine.low %v3522_v63, %v3529_v53  ;;  %v10785_v19 = vcombine.high %v3522_v63, %v3529_v53 }
 0x7ee   : > { %v3566_v60 = vcombine.low %v3542_v58, %v3558_v41  ;;  %v3567_v8 = vcombine.high %v3542_v58, %v3558_v41  ;;  %v3582_v1 = vcombine.low %v3549_v55, %v3565_v7  ;;  %v3583_v54 = vcombine.high %v3549_v55, %v3565_v7 }
 0x7ef   : > { %v3609_v26 = vrot.slane %v3602_v56, %v14262_v9  ;;  %v3617_v25 = vrot.slane %v10784_v50, %v14262_v9  ;;  %v3625_v5 = vrot.slane %v3618_v32, %v14262_v9  ;;  %v3633_v51 = vrot.slane %v10785_v19, %v14262_v9  ;;  %v12733_v50 = vld [vmem:[#allocation26 + $0x38] sm:$0xff]  }
 0x7f0   : > { %v3574_v35 = vrot.slane %v3566_v60, %v14266_v18  ;;  %v3581_v17 = vrot.slane %v3567_v8, %v14266_v18  ;;  %v3590_v0 = vrot.slane %v3582_v1, %v14266_v18  ;;  %v3597_v62 = vrot.slane %v3583_v54, %v14266_v18  ;;  %12235 = vmatpush3.bf16.xpose.msra.mxu0 %v12733_v50 }
 0x7f1   : > { %v3635_v49 = vcombine.high %v3609_v26, %v3617_v25  ;;  %v3651_v36 = vcombine.high %v3625_v5, %v3633_v51  ;;  %v3634_v39 = vcombine.low %v3609_v26, %v3617_v25  ;;  %v3650_v29 = vcombine.low %v3625_v5, %v3633_v51  ;;  %12236 = vmatprep.subr.bf16.mxu0 %v14645_v61 }
 0x7f2   : > { %v3670_v23 = vcombine.low %v3574_v35, %v3581_v17  ;;  %v10786_v16 = vcombine.high %v3574_v35, %v3581_v17  ;;  %v3686_v2 = vcombine.low %v3590_v0, %v3597_v62  ;;  %v10787_v12 = vcombine.high %v3590_v0, %v3597_v62  ;;  %v12734_v17 = vld [vmem:[#allocation26 + $0x30] sm:$0xff]   ;;  %v12735_v0 = vld [vmem:[#allocation26 + $0x28] sm:$0xff]   ;;  %v4144_v62 = vpop.xlane.xlu1 %4143 }
 0x7f3   : > { %v3649_v3 = vrot.slane %v3635_v49, %v14266_v18  ;;  %v3665_v6 = vrot.slane %v3651_v36, %v14266_v18  ;;  %v14915_v10 = vrot.slane %v3634_v39, %v14266_v18  ;;  %v14918_v41 = vrot.slane %v3650_v29, %v14266_v18  ;;  %v12736_v39 = vld [vmem:[#allocation26 + $0x20] sm:$0xff]   ;;  %v12737_v29 = vld [vmem:[#allocation26 + $0x18] sm:$0xff]  }
 0x7f4   : > { %v3677_v52 = vrot.slane %v3670_v23, %v14262_v9  ;;  %v3685_v20 = vrot.slane %v10786_v16, %v14262_v9  ;;  %v3693_v13 = vrot.slane %v3686_v2, %v14262_v9  ;;  %v3701_v43 = vrot.slane %v10787_v12, %v14262_v9  ;;  %v12738_v23 = vld [vmem:[#allocation26 + $0x10] sm:$0xff]   ;;  %v12740_v12 = vld [vmem:[#allocation26] sm:$0xff]  }
 0x7f5   : > { %v3668_v30 = vcombine.low %v3649_v3, %v3665_v6  ;;  %v3666_v63 = vcombine.low %v14915_v10, %v14918_v41  ;;  %v3667_v53 = vcombine.high %v14915_v10, %v14918_v41  ;;  %v3669_v56 = vcombine.high %v3649_v3, %v3665_v6 }
 0x7f6   : > { %v3703_v7 = vcombine.high %v3677_v52, %v3685_v20  ;;  %v3719_v58 = vcombine.high %v3693_v13, %v3701_v43  ;;  %v3702_v55 = vcombine.low %v3677_v52, %v3685_v20  ;;  %v3718_v46 = vcombine.low %v3693_v13, %v3701_v43 }
 0x7f7   : > { %v4152_v49 = vsub.f32 %v14848_v37, %v4144_v62  ;;  %v12739_v37 = vld [vmem:[#allocation26 + $0x8] sm:$0xff]   ;;  %v4367_v50 = vrot.slane %v14638_v14, 4  ;;  %v16269_v41 = vrot.slane %v14628_v4, 4 }
 0x7f8   : > { %v3717_v32 = vrot.slane %v3703_v7, %v14266_v18  ;;  %v3733_v19 = vrot.slane %v3719_v58, %v14266_v18  ;;  %v14931_v60 = vrot.slane %v3702_v55, %v14266_v18  ;;  %v14934_v8 = vrot.slane %v3718_v46, %v14266_v18  ;;  %12237 = vmatpush3.bf16.xpose.msra.mxu0 %v12734_v17 }
 0x7f9   : > { %12238 = vmatprep.subr.bf16.mxu0 %v14645_v61  ;;  %v4167_v36 = vmul.f32 1.442695, %v4152_v49 }
 0x7fa   : > { %v3736_v1 = vcombine.low %v3717_v32, %v3733_v19  ;;  %v3735_v54 = vcombine.high %v14931_v60, %v14934_v8  ;;  %v3734_v26 = vcombine.low %v14931_v60, %v14934_v8  ;;  %v3737_v25 = vcombine.high %v3717_v32, %v3733_v19 }
 0x7fb   : > { %12827 = vpow2.f32 %v4167_v36  ;;  %v4374_v19 = vsel %vm3280_vm2, %v4367_v50, 0 }
 0x7fc   : > { %v12684_v5 = vpack.i.bf16 %v3736_v1, %v3668_v30  ;;  %v12679_v51 = vpack.i.bf16 %v3735_v54, %v3667_v53  ;;  %v12689_v35 = vpack.i.bf16 %v3737_v25, %v3669_v56 }
 0x7fe   : > { %12685 = vrot.lane.b32.xlu1 %v12684_v5, %s13656_s6 }
 0x800   : > { %12239 = vmatpush3.bf16.xpose.msra.mxu0 %v12735_v0 }
 0x801   : > { %12680 = vrot.lane.b32.xlu0 %v12679_v51, %s13658_s8  ;;  %12240 = vmatprep.subr.bf16.mxu0 %v14645_v61 }
 0x808   : > { %12241 = vmatpush3.bf16.xpose.msra.mxu0 %v12736_v39  ;;  %v14948_v16 = vpop.eup %12827 }
 0x809   : > { %12242 = vmatprep.subr.bf16.mxu0 %v14645_v61  ;;  %v4190_v2 = vsel %vm3184_vm9, %v14948_v16, 0.0 }
 0x810   : > { %12243 = vmatpush3.bf16.xpose.msra.mxu0 %v12737_v29 }
 0x811   : > { %12244 = vmatprep.subr.bf16.mxu0 %v14645_v61 }
 0x818   : > { %12245 = vmatpush3.bf16.xpose.msra.mxu0 %v12738_v23 }
 0x819   : > { %12246 = vmatprep.subr.bf16.mxu0 %v14645_v61 }
 0x820   : > { %12247 = vmatpush3.bf16.xpose.msra.mxu0 %v12739_v37 }
 0x821   : > { %12248 = vmatprep.subr.bf16.mxu0 %v14645_v61 }
 0x822   : > { %4191 = vadd.xlane.f32.xlu1 %v4190_v2  ;;  %v4316_v2 = vrot.slane %v14630_v33, 4  ;;  %v12855_v33 = vld [vmem:[#allocation9 + $0x98] sm:$0xff] }
 0x828   : > { %12249 = vmatpush3.bf16.xpose.msra.mxu0 %v12740_v12 }
 0x829   : > { %12286 = vmatprep.subr.bf16.mxu0 %v14645_v61 }
 0x833   : > { %12690 = vrot.lane.b32.xlu1 %v12689_v35, %s13657_s3 }
 0x844   : > { %v4171_v3 = vpop.xlane.xlu0 %4170 }
 0x845   : > { %12829 = vrcp.f32 %v4171_v3 }
 0x847   : > { %v4174_v6 = vpop.xlane.xlu1 %4173 }
 0x848   : > { %12831 = vrcp.f32 %v4174_v6  ;;  %v4323_v6 = vsel %vm3280_vm2, %v4316_v2, 0 }
 0x852   : > { %v12830_v52 = vpop.eup %12829 }
 0x853   : > { %v4177_v20 = vpop.xlane.xlu0 %4176  ;;  %v4201_v43 = vmul.f32 %v12830_v52, %v14852_v48  ;;  %v4366_v48 = vrot.slane %v14640_v57, 4  ;;  %v4315_v52 = vrot.slane %v14632_v42, 4 }
 0x854   : > { %12833 = vrcp.f32 %v4177_v20 }
 0x855   : > { %v12832_v13 = vpop.eup %12831 }
 0x856   : > { %v4202_v30 = vmul.f32 %v12832_v13, %v14856_v15  ;;  %v4368_v15 = vsel %vm3280_vm2, %v4366_v48, %v4367_v50  ;;  %v12747_v50 = vld [vmem:[#allocation26 + $0x8] sm:$0xff]  }
 0x857   : > { %v4180_v53 = vpop.xlane.xlu1 %4179 }
 0x858   : > { %12835 = vrcp.f32 %v4180_v53  ;;  %v4209_v7 = vpack.c.bf16 %v4202_v30, %v4201_v43  ;;  %v12741_v53 = vld [vmem:[#allocation26 + $0x38] sm:$0xff]  }
 0x861   : > { %v12834_v58 = vpop.eup %12833 }
 0x862   : > { %v4203_v46 = vmul.f32 %v12834_v58, %v14860_v44  ;;  %v12745_v58 = vld [vmem:[#allocation26 + $0x18] sm:$0xff]  }
 0x863   : > { %v4183_v44 = vpop.xlane.xlu0 %4182 }
 0x865   : > { %v12836_v55 = vpop.eup %12835 }
 0x866   : > { %v4204_v56 = vmul.f32 %v12836_v55, %v14864_v24  ;;  %v12746_v55 = vld [vmem:[#allocation26 + $0x10] sm:$0xff]  }
 0x867   : > { %v4186_v1 = vpop.xlane.xlu1 %4185 }
 0x868   : > { %v4210_v32 = vpack.c.bf16 %v4204_v56, %v4203_v46  ;;  %v15006_v46 = vld [vmem:[%s16111_s10] ss:$0 sm:$0xff] }
 0x86a   : > { %12299 = vmatmul.mubr.msk.bf16.vlgmr.msra.gmra.mxu1 %vm3184_vm9, %v4210_v32 }
 0x86b   : > { %12311 = vmatpush3.bf16.msra.mxu1 %v4374_v19  ;;  %12314 = vmatprep.mubr.msk.bf16.mxu1 %vm13659_vm0, %v14645_v61  ;;  %v12856_v19 = vld [vmem:[%s14056_s12] sm:$0xff] }
 0x86c   : > { %12312 = vmatprep.subr.bf16.mxu1 %v14645_v61  ;;  %v4834_v48 = vadd.f32 %v12856_v19, %v14203_v21 }
 0x86f   : > { %12313 = vmatpush3.bf16.msra.mxu1 %v4368_v15 }
 0x870   : > { %v12686_v14 = vpop.permute.xlu1 %12685 }
 0x871   : > { %v12688_v17 = vunpack.i.h.bf16 %v12686_v14  ;;  %v12687_v0 = vunpack.i.l.bf16 %v12686_v14  ;;  %v12857_v14 = vld [vmem:[%s14056_s12 + $0x8] sm:$0xff] }
 0x874   : > { %v4189_v24 = vpop.xlane.xlu0 %4188 }
 0x875   : > { %12837 = vrcp.f32 %v4189_v24 }
 0x878   : > { %v12681_v54 = vpop.permute.xlu0 %12680 }
 0x879   : > { %v12683_v25 = vunpack.i.h.bf16 %v12681_v54  ;;  %v12682_v5 = vunpack.i.l.bf16 %v12681_v54  ;;  %v4835_v54 = vadd.f32 %v12857_v14, %v14205_v22 }
 0x87b   : > { %v3763_v57 = vsel %vm2958_vm1, %v3734_v26, %v12683_v25  ;;  %v3762_v35 = vsel %vm2958_vm1, %v3666_v63, %v12682_v5  ;;  %v4221_v63 = vsel %vm3280_vm2, %v16269_v41, 0 }
 0x87c   : > { %v3765_v39 = vsel %vm3764_vm3, %v3762_v35, %v12687_v0  ;;  %v3766_v60 = vsel %vm3764_vm3, %v3763_v57, %v12688_v17 }
 0x882   : > { %v12838_v29 = vpop.eup %12837 }
 0x883   : > { %v4207_v37 = vmul.f32 %v12838_v29, %v14886_v47 }
 0x8ab   : > { %v4192_v51 = vpop.xlane.xlu1 %4191 }
 0x8ac   : > { %12839 = vrcp.f32 %v4192_v51 }
 0x8ad   : > { %12841 = vrcp.f32 %v4186_v1 }
 0x8ae   : > { %12843 = vrcp.f32 %v4183_v44 }
 0x8af   : > { %v12691_v62 = vpop.permute.xlu1 %12690 }
 0x8b0   : > { %v12693_v49 = vunpack.i.h.bf16 %v12691_v62  ;;  %v12692_v36 = vunpack.i.l.bf16 %v12691_v62 }
 0x8b2   : > { %v3768_v8 = vsel %vm3767_vm4, %v3765_v39, %v12692_v36  ;;  %v3769_v26 = vsel %vm3767_vm4, %v3766_v60, %v12693_v49 }
 0x8b3   : > { %v3786_v10 = vpack.c.bf16 %v3769_v26, %v3768_v8 }
 0x8b5   : > { %12251 = vmatmul.mubr.bf16.vlgmr.msra.gmra.mxu0 %v3786_v10 }
 0x8b6   : > { %12287 = vmatpush3.bf16.msra.mxu0 %v4221_v63  ;;  %12290 = vmatprep.mubr.msk.bf16.mxu0 %vm13659_vm0, %v14645_v61 }
 0x8b7   : > { %12288 = vmatprep.subr.bf16.mxu0 %v14645_v61 }
 0x8b9   : > { %v12840_v23 = vpop.eup %12839 }
 0x8ba   : > { %12289 = vmatpush3.bf16.msra.mxu0 %v14652_v38  ;;  %v4208_v12 = vmul.f32 %v12840_v23, %v14948_v16  ;;  %v12842_v4 = vpop.eup %12841 }
 0x8bb   : > { %12302 = vmatprep.subr.bf16.mxu0 %v14645_v61  ;;  %v12844_v20 = vpop.eup %12843  ;;  %v4206_v38 = vmul.f32 %v12842_v4, %v14872_v59  ;;  %v4317_v61 = vsel %vm3280_vm2, %v4315_v52, %v4316_v2  ;;  %v12742_v59 = vld [vmem:[#allocation26 + $0x30] sm:$0xff]  }
 0x8bc   : > { %v4212_v3 = vpack.c.bf16 %v4208_v12, %v4207_v37  ;;  %v4205_v47 = vmul.f32 %v12844_v20, %v14868_v45  ;;  %v12744_v45 = vld [vmem:[#allocation26 + $0x20] sm:$0xff]  }
 0x8bd   : > { %12291 = vmatmul.mubr.msk.bf16.vlgmr.msra.gmra.mxu0 %vm3184_vm9, %v4209_v7  ;;  %v12743_v7 = vld [vmem:[#allocation26 + $0x28] sm:$0xff]  }
 0x8be   : > { %12303 = vmatpush3.bf16.msra.mxu0 %v4323_v6  ;;  %12315 = vmatmul.mubr.msk.bf16.vlgmr.msra.gmra.mxu1 %vm3184_vm9, %v4212_v3  ;;  %v4211_v16 = vpack.c.bf16 %v4206_v38, %v4205_v47 }
 0x8bf   : > { %12304 = vmatprep.subr.bf16.mxu0 %v12855_v33  ;;  %12306 = vmatprep.mubr.msk.bf16.mxu0 %vm13659_vm0, %v12855_v33 }
 0x8c2   : > { %12305 = vmatpush3.bf16.msra.mxu0 %v4317_v61 }
 0x8c3   : > { %12318 = vmatprep.subr.bf16.mxu0 %v12855_v33 }
 0x8c5   : > { %12307 = vmatmul.mubr.msk.bf16.vlgmr.msra.gmra.mxu0 %vm3184_vm9, %v4211_v16 }
 0x8c6   : > { %12334 = vmatprep.mubr.msk.bf16.mxu0 %vm13659_vm0, %v12855_v33  ;;  %12319 = vmatpush3.bf16.xpose.msra.mxu0 %v12741_v53 }
 0x8c7   : > { %12320 = vmatprep.subr.bf16.mxu0 %v12855_v33 }
 0x8ce   : > { %12321 = vmatpush3.bf16.xpose.msra.mxu0 %v12742_v59 }
 0x8cf   : > { %12322 = vmatprep.subr.bf16.mxu0 %v12855_v33 }
 0x8d6   : > { %12323 = vmatpush3.bf16.xpose.msra.mxu0 %v12743_v7 }
 0x8d7   : > { %12324 = vmatprep.subr.bf16.mxu0 %v12855_v33 }
 0x8de   : > { %12325 = vmatpush3.bf16.xpose.msra.mxu0 %v12744_v45 }
 0x8df   : > { %12326 = vmatprep.subr.bf16.mxu0 %v12855_v33 }
 0x8e6   : > { %12327 = vmatpush3.bf16.xpose.msra.mxu0 %v12745_v58 }
 0x8e7   : > { %12328 = vmatprep.subr.bf16.mxu0 %v12855_v33 }
 0x8ee   : > { %12329 = vmatpush3.bf16.xpose.msra.mxu0 %v12746_v55 }
 0x8ef   : > { %12330 = vmatprep.subr.bf16.mxu0 %v12855_v33 }
 0x8f6   : > { %12331 = vmatpush3.bf16.xpose.msra.mxu0 %v12747_v50 }
 0x8f7   : > { %12332 = vmatprep.subr.bf16.mxu0 %v12855_v33 }
 0x92a   : > { %v4308_v42 = vpop.f32.mrf.mxu1 }
 0x92c   : > { %v12300_v13 = vpop.f32.mrf.mxu1 }
 0x92e   : > { %v15001_v43 = vpop.f32.mrf.mxu1 }
 0x930   : > { %v12301_v30 = vpop.f32.mrf.mxu1 }
 0x975   : > { %v3876_v56 = vpop.f32.mrf.mxu0 }
 0x976   : > { %v3877_v32 = vadd.f32 %v15006_v46, %v3876_v56 }
 0x977   : > { %v12252_v15 = vpop.f32.mrf.mxu0 }
 0x978   : > { %3883 = vst [vmem:[#allocation5] sm:$0xff] %v3877_v32  ;;  %v15011_v44 = vadd.f32 %v4834_v48, %v3877_v32 }
 0x979   : > { %v3879_v24 = vpop.f32.mrf.mxu0 }
 0x97a   : > { %16270 = vst [vmem:[#allocation53_spill] sm:$0xff] %v15011_v44  ;;  %v3880_v1 = vadd.f32 %v15006_v46, %v3879_v24 }
 0x97b   : > { %v12253_v25 = vpop.f32.mrf.mxu0 }
 0x97c   : > { %3884 = vst [vmem:[#allocation5 + $0x8] sm:$0xff] %v3880_v1  ;;  %v15016_v5 = vadd.f32 %v4835_v54, %v3880_v1 }
 0x97d   : > { %v4257_v51 = vpop.f32.mrf.mxu0 }
 0x97e   : > { %16271 = vst [vmem:[#allocation54_spill] sm:$0xff] %v15016_v5  ;;  %v4410_v57 = vpop.f32.mrf.mxu1 }
 0x97f   : > { %v12292_v35 = vpop.f32.mrf.mxu0  ;;  %v4433_v49 = vcombine.low %v4308_v42, %v4410_v57  ;;  %v4434_v36 = vcombine.high %v4308_v42, %v4410_v57 }
 0x980   : > { %v12316_v21 = vpop.f32.mrf.mxu1 }
 0x981   : > { %v4260_v17 = vpop.f32.mrf.mxu0  ;;  %v4441_v22 = vrot.slane %v4433_v49, %v14262_v9  ;;  %v4448_v41 = vrot.slane %v4434_v36, %v14262_v9 }
 0x982   : > { %v4413_v0 = vpop.f32.mrf.mxu1 }
 0x983   : > { %v12293_v62 = vpop.f32.mrf.mxu0  ;;  %v4501_v23 = vcombine.low %v15001_v43, %v4413_v0  ;;  %v4502_v2 = vcombine.high %v15001_v43, %v4413_v0 }
 0x984   : > { %v12317_v39 = vpop.f32.mrf.mxu1 }
 0x985   : > { %v4359_v60 = vpop.f32.mrf.mxu0  ;;  %v4509_v42 = vrot.slane %v4501_v23, %v14262_v9  ;;  %v4516_v13 = vrot.slane %v4502_v2, %v14262_v9  ;;  %v12748_v39 = vld [vmem:[#allocation26] sm:$0xff]  }
 0x986   : > { %v4417_v8 = vcombine.low %v4257_v51, %v4359_v60  ;;  %v4418_v26 = vcombine.high %v4257_v51, %v4359_v60  ;;  %12333 = vmatpush3.bf16.xpose.msra.mxu0 %v12748_v39 }
 0x987   : > { %v12308_v10 = vpop.f32.mrf.mxu0 }
 0x988   : > { %v4425_v63 = vrot.slane %v4417_v8, %v14262_v9  ;;  %v4432_v29 = vrot.slane %v4418_v26, %v14262_v9 }
 0x989   : > { %v4362_v37 = vpop.f32.mrf.mxu0 }
 0x98a   : > { %v4449_v12 = vcombine.low %v4425_v63, %v4441_v22  ;;  %v4450_v4 = vcombine.high %v4425_v63, %v4441_v22  ;;  %v4465_v3 = vcombine.low %v4432_v29, %v4448_v41  ;;  %v4466_v6 = vcombine.high %v4432_v29, %v4448_v41 }
 0x98b   : > { %v4485_v52 = vcombine.low %v4260_v17, %v4362_v37  ;;  %v4486_v20 = vcombine.high %v4260_v17, %v4362_v37  ;;  %v12309_v33 = vpop.f32.mrf.mxu0 }
 0x98c   : > { %v4457_v38 = vrot.slane %v4449_v12, %v14266_v18  ;;  %v4464_v61 = vrot.slane %v4450_v4, %v14266_v18  ;;  %v4473_v47 = vrot.slane %v4465_v3, %v14266_v18  ;;  %v4480_v16 = vrot.slane %v4466_v6, %v14266_v18 }
 0x98d   : > { %v4493_v43 = vrot.slane %v4485_v52, %v14262_v9  ;;  %v4500_v30 = vrot.slane %v4486_v20, %v14262_v9 }
 0x98e   : > { %v4553_v53 = vcombine.low %v4457_v38, %v4464_v61  ;;  %v10805_v59 = vcombine.high %v4457_v38, %v4464_v61  ;;  %v4569_v7 = vcombine.low %v4473_v47, %v4480_v16  ;;  %v10806_v45 = vcombine.high %v4473_v47, %v4480_v16 }
 0x98f   : > { %v4517_v58 = vcombine.low %v4493_v43, %v4509_v42  ;;  %v4518_v55 = vcombine.high %v4493_v43, %v4509_v42  ;;  %v4533_v56 = vcombine.low %v4500_v30, %v4516_v13  ;;  %v4534_v50 = vcombine.high %v4500_v30, %v4516_v13 }
 0x990   : > { %v4560_v32 = vrot.slane %v4553_v53, %v14262_v9  ;;  %v4568_v19 = vrot.slane %v10805_v59, %v14262_v9  ;;  %v4576_v48 = vrot.slane %v4569_v7, %v14262_v9  ;;  %v4584_v15 = vrot.slane %v10806_v45, %v14262_v9 }
 0x991   : > { %v4525_v24 = vrot.slane %v4517_v58, %v14266_v18  ;;  %v4532_v1 = vrot.slane %v4518_v55, %v14266_v18  ;;  %v4541_v14 = vrot.slane %v4533_v56, %v14266_v18  ;;  %v4548_v54 = vrot.slane %v4534_v50, %v14266_v18 }
 0x992   : > { %v4586_v25 = vcombine.high %v4560_v32, %v4568_v19  ;;  %v4602_v51 = vcombine.high %v4576_v48, %v4584_v15  ;;  %v4585_v57 = vcombine.low %v4560_v32, %v4568_v19  ;;  %v4601_v35 = vcombine.low %v4576_v48, %v4584_v15 }
 0x993   : > { %v4621_v21 = vcombine.low %v4525_v24, %v4532_v1  ;;  %v10807_v17 = vcombine.high %v4525_v24, %v4532_v1  ;;  %v4637_v0 = vcombine.low %v4541_v14, %v4548_v54  ;;  %v10808_v62 = vcombine.high %v4541_v14, %v4548_v54 }
 0x994   : > { %v4593_v49 = vrot.slane %v4585_v57, %v14266_v18  ;;  %v4609_v36 = vrot.slane %v4601_v35, %v14266_v18  ;;  %v4600_v22 = vrot.slane %v4586_v25, %v14266_v18  ;;  %v4616_v41 = vrot.slane %v4602_v51, %v14266_v18 }
 0x995   : > { %v4628_v60 = vrot.slane %v4621_v21, %v14262_v9  ;;  %v4636_v8 = vrot.slane %v10807_v17, %v14262_v9  ;;  %v4644_v26 = vrot.slane %v4637_v0, %v14262_v9  ;;  %v4652_v10 = vrot.slane %v10808_v62, %v14262_v9  ;;  %v12858_v21 = vld [vmem:[%s14056_s12 + $0x10] sm:$0xff] }
 0x996   : > { %v4617_v63 = vcombine.low %v4593_v49, %v4609_v36  ;;  %v4619_v52 = vcombine.low %v4600_v22, %v4616_v41  ;;  %v4618_v20 = vcombine.high %v4593_v49, %v4609_v36  ;;  %v4620_v42 = vcombine.high %v4600_v22, %v4616_v41  ;;  %v12749_v41 = vld [vmem:[#allocation32 + $0x38] sm:$0xff]  }
 0x997   : > { %v4654_v29 = vcombine.high %v4628_v60, %v4636_v8  ;;  %v4670_v23 = vcombine.high %v4644_v26, %v4652_v10  ;;  %v4653_v2 = vcombine.low %v4628_v60, %v4636_v8  ;;  %v4669_v37 = vcombine.low %v4644_v26, %v4652_v10  ;;  %v12859_v60 = vld [vmem:[%s14056_s12 + $0x18] sm:$0xff]  ;;  %12338 = vmatprep.subr.bf16.mxu1 %v12749_v41 }
 0x998   : > { %v4836_v17 = vadd.f32 %v12858_v21, %v14210_v27  ;;  %v4837_v8 = vadd.f32 %v12859_v60, %v14212_v28  ;;  %12339 = vmatpush3.bf16.xpose.msra.mxu1 %v12749_v41  ;;  %v12753_v28 = vld [vmem:[#allocation32 + $0x28] sm:$0xff]  }
 0x999   : > { %v4668_v12 = vrot.slane %v4654_v29, %v14266_v18  ;;  %v4684_v4 = vrot.slane %v4670_v23, %v14266_v18  ;;  %v4661_v3 = vrot.slane %v4653_v2, %v14266_v18  ;;  %v4677_v6 = vrot.slane %v4669_v37, %v14266_v18  ;;  %v12751_v29 = vld [vmem:[#allocation32 + $0x30] sm:$0xff]   ;;  %v12755_v2 = vld [vmem:[#allocation32 + $0x20] sm:$0xff]  }
 0x99a   : > { %v12752_v23 = vld [vmem:[#allocation33 + $0x30] sm:$0xff]   ;;  %12340 = vmatprep.subr.bf16.mxu1 %v12751_v29  ;;  %v12756_v37 = vld [vmem:[#allocation33 + $0x20] sm:$0xff]  }
 0x99b   : > { %v4687_v9 = vcombine.low %v4668_v12, %v4684_v4  ;;  %v4686_v33 = vcombine.high %v4661_v3, %v4677_v6  ;;  %v4685_v38 = vcombine.low %v4661_v3, %v4677_v6  ;;  %v4688_v16 = vcombine.high %v4668_v12, %v4684_v4  ;;  %v12757_v12 = vld [vmem:[#allocation32 + $0x18] sm:$0xff]  }
 0x99c   : > { %v12758_v4 = vld [vmem:[#allocation33 + $0x18] sm:$0xff]  }
 0x99d   : > { %v12699_v61 = vpack.i.bf16 %v4687_v9, %v4619_v52  ;;  %v12694_v47 = vpack.i.bf16 %v4686_v33, %v4618_v20  ;;  %v12704_v13 = vpack.i.bf16 %v4688_v16, %v4620_v42 }
 0x99f   : > { %12700 = vrot.lane.b32.xlu0 %v12699_v61, %s13656_s6  ;;  %12695 = vrot.lane.b32.xlu1 %v12694_v47, %s13658_s8  ;;  %s15097_s6 = smov 0  }
 0x9a0   : > { %12341 = vmatpush3.bf16.xpose.msra.mxu1 %v12751_v29  ;;  %v12767_v29 = vld [vmem:[#allocation35 + $0x28] sm:$0xff]  }
 0x9a1   : > { %12342 = vmatprep.subr.bf16.mxu1 %v12753_v28 }
 0x9a3   : > { %12705 = vrot.lane.b32.xlu1 %v12704_v13, %s13657_s3 }
 0x9a8   : > { %12343 = vmatpush3.bf16.xpose.msra.mxu1 %v12753_v28  ;;  %v12769_v28 = vld [vmem:[#allocation35 + $0x18] sm:$0xff]  }
 0x9a9   : > { %12344 = vmatprep.subr.bf16.mxu1 %v12755_v2 }
 0x9b0   : > { %12345 = vmatpush3.bf16.xpose.msra.mxu1 %v12755_v2  ;;  %v12771_v2 = vld [vmem:[#allocation35 + $0x8] sm:$0xff]  }
 0x9b1   : > { %12346 = vmatprep.subr.bf16.mxu1 %v12757_v12 }
 0x9b8   : > { %12347 = vmatpush3.bf16.xpose.msra.mxu1 %v12757_v12 }
 0x9be   : > { %4846 = vadd.xlane.f32.xlu0 %v15011_v44 }
 0x9c7   : > { %4848 = vadd.xlane.f32.xlu1 %v15016_v5 }
 0xa11   : > { %v12701_v18 = vpop.permute.xlu0 %12700  ;;  %v12696_v43 = vpop.permute.xlu1 %12695 }
 0xa12   : > { %v12698_v30 = vunpack.i.h.bf16 %v12696_v43  ;;  %v12697_v53 = vunpack.i.l.bf16 %v12696_v43  ;;  %v12703_v59 = vunpack.i.h.bf16 %v12701_v18  ;;  %v12702_v7 = vunpack.i.l.bf16 %v12701_v18 }
 0xa14   : > { %v4713_v45 = vsel %vm2958_vm1, %v4617_v63, %v12697_v53  ;;  %v4714_v58 = vsel %vm2958_vm1, %v4685_v38, %v12698_v30  ;;  %v12750_v63 = vld [vmem:[#allocation33 + $0x38] sm:$0xff]  }
 0xa15   : > { %v12706_v55 = vpop.permute.xlu1 %12705  ;;  %v4715_v32 = vsel %vm3764_vm3, %v4713_v45, %v12702_v7  ;;  %v4716_v19 = vsel %vm3764_vm3, %v4714_v58, %v12703_v59  ;;  %12358 = vmatprep.subr.bf16.mxu0 %v12750_v63  ;;  %v10818_v59 = vld [vmem:[#allocation21] ss:$0 sm:$0xff]  ;;  %v12759_v7 = vld [vmem:[#allocation32 + $0x10] sm:$0xff]   ;;  %v12761_v58 = vld [vmem:[#allocation32 + $0x8] sm:$0xff]  }
 0xa16   : > { %v12708_v56 = vunpack.i.h.bf16 %v12706_v55  ;;  %v12707_v50 = vunpack.i.l.bf16 %v12706_v55  ;;  %v12760_v45 = vld [vmem:[#allocation33 + $0x10] sm:$0xff]   ;;  %12348 = vmatprep.subr.bf16.mxu1 %v12759_v7 }
 0xa17   : > { %12349 = vmatpush3.bf16.xpose.msra.mxu1 %v12759_v7 }
 0xa18   : > { %v4717_v48 = vsel %vm3767_vm4, %v4715_v32, %v12707_v50  ;;  %v4718_v15 = vsel %vm3767_vm4, %v4716_v19, %v12708_v56  ;;  %v12762_v56 = vld [vmem:[#allocation33 + $0x8] sm:$0xff]   ;;  %v10819_v19 = vld [vmem:[#allocation23] ss:$0 sm:$0xff]  ;;  %12350 = vmatprep.subr.bf16.mxu1 %v12761_v58 }
 0xa19   : > { %v4735_v24 = vpack.c.bf16 %v4718_v15, %v4717_v48 }
 0xa1b   : > { %12335 = vmatmul.mubr.bf16.vlgmr.msra.gmra.mxu0 %v4735_v24 }
 0xa1c   : > { %12359 = vmatpush3.bf16.xpose.msra.mxu0 %v12750_v63  ;;  %v12766_v63 = vld [vmem:[#allocation35 + $0x30] sm:$0xff]  }
 0xa1d   : > { %12360 = vmatprep.subr.bf16.mxu0 %v12752_v23 }
 0xa1f   : > { %12351 = vmatpush3.bf16.xpose.msra.mxu1 %v12761_v58 }
 0xa24   : > { %12361 = vmatpush3.bf16.xpose.msra.mxu0 %v12752_v23  ;;  %v12768_v23 = vld [vmem:[#allocation35 + $0x20] sm:$0xff]  }
 0xa47   : > { %v4847_v51 = vpop.xlane.xlu0 %4846 }
 0xa48   : > { %v4854_v62 = vmul.f32 0.0078125, %v4847_v51 }
 0xa4a   : > { %v4858_v10 = vsub.f32 %v15011_v44, %v4854_v62 }
 0xa4c   : > { %v4862_v27 = vmul.f32 %v4858_v10, %v4858_v10 }
 0xa50   : > { %v4849_v1 = vpop.xlane.xlu1 %4848 }
 0xa51   : > { %v4855_v14 = vmul.f32 0.0078125, %v4849_v1 }
 0xa53   : > { %v15064_v54 = vsub.f32 %v15016_v5, %v4855_v14  ;;  %v12763_v14 = vld [vmem:[#allocation32] sm:$0xff]  }
 0xa54   : > { %12352 = vmatprep.subr.bf16.mxu1 %v12763_v14 }
 0xa55   : > { %v4863_v25 = vmul.f32 %v15064_v54, %v15064_v54  ;;  %12353 = vmatpush3.bf16.xpose.msra.mxu1 %v12763_v14 }
 0xa57   : > { %4868 = vadd.xlane.f32.xlu1 %v4863_v25  ;;  %v12765_v25 = vld [vmem:[#allocation35 + $0x38] sm:$0xff]  }
 0xa58   : > { %12378 = vmatprep.subr.bf16.mxu1 %v12765_v25 }
 0xadb   : > { %v4825_v57 = vpop.f32.mrf.mxu0 }
 0xadc   : > { %v4826_v35 = vadd.f32 %v15006_v46, %v4825_v57 }
 0xadd   : > { %v12336_v0 = vpop.f32.mrf.mxu0 }
 0xade   : > { %4832 = vst [vmem:[#allocation5 + $0x10] sm:$0xff] %v4826_v35  ;;  %v15071_v49 = vadd.f32 %v4836_v17, %v4826_v35 }
 0xadf   : > { %v4828_v36 = vpop.f32.mrf.mxu0 }
 0xae0   : > { %16272 = vst [vmem:[#allocation55_spill] sm:$0xff] %v15071_v49  ;;  %v4829_v39 = vadd.f32 %v15006_v46, %v4828_v36  ;;  %4850 = vadd.xlane.f32.xlu0 %v15071_v49  ;;  %v12754_v46 = vld [vmem:[#allocation33 + $0x28] sm:$0xff]   ;;  %v4869_v3 = vpop.xlane.xlu1 %4868 }
 0xae1   : > { %v12337_v26 = vpop.f32.mrf.mxu0  ;;  %12362 = vmatprep.subr.bf16.mxu0 %v12754_v46  ;;  %v4875_v6 = vmul.f32 0.0078125, %v4869_v3  ;;  %v10820_v3 = vld [vmem:[%s16116_s15] ss:$0 sm:$0xff] }
 0xae2   : > { %4833 = vst [vmem:[#allocation5 + $0x18] sm:$0xff] %v4829_v39  ;;  %v15078_v22 = vadd.f32 %v4837_v8, %v4829_v39  ;;  %12363 = vmatpush3.bf16.xpose.msra.mxu0 %v12754_v46  ;;  %v12770_v46 = vld [vmem:[#allocation35 + $0x10] sm:$0xff]  }
 0xae3   : > { %12364 = vmatprep.subr.bf16.mxu0 %v12756_v37  ;;  %v4879_v20 = vadd.f32 1e-05, %v4875_v6  ;;  %v10833_v6 = vld [vmem:[%s16118_s17] ss:$0 sm:$0xff] }
 0xae4   : > { %16273 = vst [vmem:[#allocation56_spill] sm:$0xff] %v15078_v22  ;;  %4852 = vadd.xlane.f32.xlu0 %v15078_v22 }
 0xae5   : > { %12845 = vrsqrt.f32 %v4879_v20 }
 0xae8   : > { %4866 = vadd.xlane.f32.xlu0 %v4862_v27 }
 0xaea   : > { %12365 = vmatpush3.bf16.xpose.msra.mxu0 %v12756_v37  ;;  %v12772_v37 = vld [vmem:[#allocation35] sm:$0xff]  }
 0xaeb   : > { %12366 = vmatprep.subr.bf16.mxu0 %v12758_v4 }
 0xaf2   : > { %12367 = vmatpush3.bf16.xpose.msra.mxu0 %v12758_v4  ;;  %v12846_v30 = vpop.eup %12845 }
 0xaf3   : > { %v4887_v53 = vmul.f32 %v12846_v30, %v15064_v54  ;;  %12368 = vmatprep.subr.bf16.mxu0 %v12760_v45  ;;  %v12764_v54 = vld [vmem:[#allocation33] sm:$0xff]  }
 0xaf5   : > { %v4898_v32 = vmul.f32 %v10818_v59, %v4887_v53 }
 0xaf7   : > { %v4909_v24 = vadd.f32 %v10819_v19, %v4898_v32 }
 0xafa   : > { %12369 = vmatpush3.bf16.xpose.msra.mxu0 %v12760_v45 }
 0xafb   : > { %12370 = vmatprep.subr.bf16.mxu0 %v12762_v56 }
 0xb02   : > { %12371 = vmatpush3.bf16.xpose.msra.mxu0 %v12762_v56  ;;  %v10846_v56 = vld [vmem:[%s16274_s13] ss:$0 sm:$0xff] }
 0xb03   : > { %12372 = vmatprep.subr.bf16.mxu0 %v12764_v54 }
 0xb0a   : > { %12373 = vmatpush3.bf16.xpose.msra.mxu0 %v12764_v54 }
 0xb69   : > { %v4851_v52 = vpop.xlane.xlu0 %4850 }
 0xb6a   : > { %v4856_v9 = vmul.f32 0.0078125, %v4851_v52 }
 0xb6c   : > { %v4860_v33 = vsub.f32 %v15071_v49, %v4856_v9 }
 0xb6d   : > { %v4853_v38 = vpop.xlane.xlu0 %4852 }
 0xb6e   : > { %v4857_v61 = vmul.f32 0.0078125, %v4853_v38  ;;  %v4864_v47 = vmul.f32 %v4860_v33, %v4860_v33 }
 0xb70   : > { %v4861_v16 = vsub.f32 %v15078_v22, %v4857_v61  ;;  %4870 = vadd.xlane.f32.xlu0 %v4864_v47 }
 0xb71   : > { %v4867_v42 = vpop.xlane.xlu0 %4866 }
 0xb72   : > { %v4874_v13 = vmul.f32 0.0078125, %v4867_v42  ;;  %v4865_v18 = vmul.f32 %v4861_v16, %v4861_v16 }
 0xb74   : > { %v4878_v43 = vadd.f32 1e-05, %v4874_v13  ;;  %4872 = vadd.xlane.f32.xlu1 %v4865_v18 }
 0xb76   : > { %12847 = vrsqrt.f32 %v4878_v43 }
 0xb83   : > { %v12848_v55 = vpop.eup %12847 }
 0xb84   : > { %v4886_v50 = vmul.f32 %v12848_v55, %v4858_v10 }
 0xb86   : > { %v4897_v48 = vmul.f32 %v10818_v59, %v4886_v50 }
 0xb88   : > { %v4908_v15 = vadd.f32 %v10819_v19, %v4897_v48 }
 0xb8a   : > { %v4928_v1 = vpack.c.bf16 %v4909_v24, %v4908_v15 }
 0xb8c   : > { %12354 = vmatprep.mubr.bf16.mxu1 %v4928_v1  ;;  %12374 = vmatprep.mubr.bf16.mxu0 %v4928_v1 }
 0xbf9   : > { %v4871_v51 = vpop.xlane.xlu0 %4870 }
 0xbfa   : > { %v4876_v57 = vmul.f32 0.0078125, %v4871_v51 }
 0xbfc   : > { %v4880_v35 = vadd.f32 1e-05, %v4876_v57 }
 0xbfd   : > { %v4873_v21 = vpop.xlane.xlu1 %4872 }
 0xbfe   : > { %12849 = vrsqrt.f32 %v4880_v35  ;;  %v4877_v17 = vmul.f32 0.0078125, %v4873_v21 }
 0xc00   : > { %v4881_v0 = vadd.f32 1e-05, %v4877_v17 }
 0xc02   : > { %12851 = vrsqrt.f32 %v4881_v0 }
 0xc0b   : > { %v12850_v62 = vpop.eup %12849 }
 0xc0c   : > { %v4888_v36 = vmul.f32 %v12850_v62, %v4860_v33 }
 0xc0e   : > { %v4899_v8 = vmul.f32 %v10818_v59, %v4888_v36 }
 0xc0f   : > { %v12852_v39 = vpop.eup %12851 }
 0xc10   : > { %v4889_v60 = vmul.f32 %v12852_v39, %v4861_v16  ;;  %v4910_v10 = vadd.f32 %v10819_v19, %v4899_v8 }
 0xc12   : > { %v4900_v26 = vmul.f32 %v10818_v59, %v4889_v60 }
 0xc14   : > { %v4911_v27 = vadd.f32 %v10819_v19, %v4900_v26 }
 0xc16   : > { %v4929_v41 = vpack.c.bf16 %v4911_v27, %v4910_v10 }
 0xc18   : > { %12355 = vmatmul.mubr.bf16.vlgmr.msra.gmra.mxu1 %v4929_v41  ;;  %12375 = vmatmul.mubr.bf16.vlgmr.msra.gmra.mxu0 %v4929_v41 }
 0xc19   : > { %12379 = vmatpush3.bf16.xpose.msra.mxu1 %v12765_v25  ;;  %12394 = vmatprep.mubr.bf16.mxu1 %v4928_v1 }
 0xc1a   : > { %12380 = vmatprep.subr.bf16.mxu1 %v12766_v63 }
 0xc21   : > { %12381 = vmatpush3.bf16.xpose.msra.mxu1 %v12766_v63 }
 0xc22   : > { %12382 = vmatprep.subr.bf16.mxu1 %v12767_v29 }
 0xc29   : > { %12383 = vmatpush3.bf16.xpose.msra.mxu1 %v12767_v29 }
 0xc2a   : > { %12384 = vmatprep.subr.bf16.mxu1 %v12768_v23 }
 0xc31   : > { %12385 = vmatpush3.bf16.xpose.msra.mxu1 %v12768_v23 }
 0xc32   : > { %12386 = vmatprep.subr.bf16.mxu1 %v12769_v28 }
 0xc39   : > { %12387 = vmatpush3.bf16.xpose.msra.mxu1 %v12769_v28 }
 0xc3a   : > { %12388 = vmatprep.subr.bf16.mxu1 %v12770_v46 }
 0xc41   : > { %12389 = vmatpush3.bf16.xpose.msra.mxu1 %v12770_v46 }
 0xc42   : > { %12390 = vmatprep.subr.bf16.mxu1 %v12771_v2 }
 0xc49   : > { %12391 = vmatpush3.bf16.xpose.msra.mxu1 %v12771_v2 }
 0xc4a   : > { %12392 = vmatprep.subr.bf16.mxu1 %v12772_v37 }
 0xc51   : > { %12393 = vmatpush3.bf16.xpose.msra.mxu1 %v12772_v37 }
 0xc58   : > { %12395 = vmatmul.mubr.bf16.vlgmr.msra.gmra.mxu1 %v4929_v41 }
 0xcd8   : > { %v12356_v12 = vpop.f32.mrf.mxu1  ;;  %v12376_v4 = vpop.f32.mrf.mxu0 }
 0xcd9   : > { %v5028_v38 = vadd.f32 %v12356_v12, %v10820_v3  ;;  %v5168_v61 = vadd.f32 %v12376_v4, %v10833_v6 }
 0xcda   : > { %v5019_v52 = vpop.f32.mrf.mxu1  ;;  %v5159_v9 = vpop.f32.mrf.mxu0 }
 0xcdb   : > { %v5020_v42 = vadd.f32 %v10820_v3, %v5019_v52  ;;  %v5160_v13 = vadd.f32 %v10833_v6, %v5159_v9 }
 0xcdc   : > { %v12357_v20 = vpop.f32.mrf.mxu1  ;;  %v12377_v33 = vpop.f32.mrf.mxu0 }
 0xcdd   : > { %v5031_v47 = vadd.f32 %v12357_v20, %v10820_v3  ;;  %v5171_v16 = vadd.f32 %v12377_v33, %v10833_v6 }
 0xcde   : > { %v5022_v18 = vpop.f32.mrf.mxu1  ;;  %v5162_v43 = vpop.f32.mrf.mxu0 }
 0xcdf   : > { %v11441_v30 = vpack.c.bf16 %v5031_v47, %v5028_v38  ;;  %v11451_v53 = vpack.c.bf16 %v5171_v16, %v5168_v61  ;;  %v5023_v59 = vadd.f32 %v10820_v3, %v5022_v18  ;;  %v5163_v7 = vadd.f32 %v10833_v6, %v5162_v43 }
 0xce1   : > { %11783 = vst [vmem:[#allocation4 + $0x8] sm:$0xff] %v11441_v30   ;;  %11784 = vst [vmem:[#allocation2 + $0x8] sm:$0xff] %v11451_v53   ;;  %v11436_v45 = vpack.c.bf16 %v5023_v59, %v5020_v42  ;;  %v11446_v58 = vpack.c.bf16 %v5163_v7, %v5160_v13 }
 0xce3   : > { %11437 = vst [vmem:[#allocation4] sm:$0xff] %v11436_v45   ;;  %11447 = vst [vmem:[#allocation2] sm:$0xff] %v11446_v58  }
 0xd18   : > { %v12396_v55 = vpop.f32.mrf.mxu1 }
 0xd19   : > { %v5308_v19 = vadd.f32 %v12396_v55, %v10846_v56 }
 0xd1a   : > { %v5299_v50 = vpop.f32.mrf.mxu1 }
 0xd1b   : > { %v5300_v24 = vadd.f32 %v10846_v56, %v5299_v50 }
 0xd1c   : > { %v12397_v32 = vpop.f32.mrf.mxu1 }
 0xd1d   : > { %v5311_v48 = vadd.f32 %v12397_v32, %v10846_v56 }
 0xd1e   : > { %v5302_v15 = vpop.f32.mrf.mxu1 }
 0xd1f   : > { %v11461_v1 = vpack.c.bf16 %v5311_v48, %v5308_v19  ;;  %v5303_v14 = vadd.f32 %v10846_v56, %v5302_v15 }
 0xd21   : > { %11785 = vst [vmem:[#allocation3 + $0x8] sm:$0xff] %v11461_v1   ;;  %v11456_v54 = vpack.c.bf16 %v5303_v14, %v5300_v24 }
 0xd23   : > { %11457 = vst [vmem:[#allocation3] sm:$0xff] %v11456_v54  }
 0xd24 LB: >> { %v12860_v25 = vld [vmem:[#allocation12 + $0x78] sm:$0xff]   ;;  %v12862_v57 = vld [vmem:[#allocation12 + $0x70] sm:$0xff]   ;;  %v12864_v21 = vld [vmem:[#allocation12 + $0x68] sm:$0xff]   ;;  %s10939_s16 = sshll.u32 %s13632_s6, 4  ;;  %v13663_v43 = vmov 0   ;;  %vm6593_vm0 = vcmask 130048   ;;  %s13632_s6 = sphi %s15097_s6, %s6155_s6  }
 0xd25   : >> { %v12861_v51 = vld [vmem:[#allocation12 + $0x38] sm:$0xff]   ;;  %11972 = vmatprep.subr.bf16.mxu0 %v12860_v25  ;;  %v12863_v35 = vld [vmem:[#allocation12 + $0x30] sm:$0xff]   ;;  %v12865_v36 = vld [vmem:[#allocation12 + $0x28] sm:$0xff]   ;;  %s6157_s3 = sshra.s32 %s10939_s16, 3  ;;  %s8639_s14 = scalar_lea.vmem [#allocation5], %s10939_s16 }
 0xd26   : >> { %11973 = vmatpush3.bf16.xpose.msra.mxu0 %v12861_v51  ;;  %v12868_v17 = vld [vmem:[#allocation14 + $0x78] sm:$0xff]   ;;  %v12872_v62 = vld [vmem:[#allocation14 + $0x70] sm:$0xff]   ;;  %v12866_v39 = vld [vmem:[#allocation12 + $0x60] sm:$0xff]   ;;  %s15105_s8 = sshll.u32 %s6157_s3, 2  ;;  %s6155_s6 = sadd.s32 1, %s13632_s6  }
 0xd27   : >> { %11974 = vmatprep.subr.bf16.mxu0 %v12862_v57  ;;  %v12869_v0 = vld [vmem:[#allocation14 + $0x38] sm:$0xff]   ;;  %11990 = vmatprep.subr.bf16.mxu1 %v12868_v17  ;;  %v12873_v60 = vld [vmem:[#allocation14 + $0x30] sm:$0xff]   ;;  %v12876_v8 = vld [vmem:[#allocation14 + $0x68] sm:$0xff]   ;;  %s6160_s25 = scalar_lea.vmem [#allocation2], %s15105_s8  ;;  %s6164_s24 = scalar_lea.vmem [#allocation3], %s15105_s8 }
 0xd28   : >> { %11991 = vmatpush3.bf16.xpose.msra.mxu1 %v12869_v0  ;;  %v12867_v26 = vld [vmem:[#allocation12 + $0x20] sm:$0xff]   ;;  %v12870_v10 = vld [vmem:[#allocation12 + $0x58] sm:$0xff]   ;;  %v12877_v27 = vld [vmem:[#allocation14 + $0x28] sm:$0xff]   ;;  %s6168_s7 = scalar_lea.vmem [#allocation4], %s15105_s8  ;;  %p6152_p2 = scmp.ge.s32.totalorder %s6155_s6, 2  }
 0xd29   : >> { %11992 = vmatprep.subr.bf16.mxu1 %v12872_v62  ;;  %v12880_v41 = vld [vmem:[#allocation14 + $0x60] sm:$0xff]   ;;  %v15108_v63 = vld [vmem:[%s6160_s25] sm:$0xff]   ;;  %v12871_v29 = vld [vmem:[#allocation12 + $0x18] sm:$0xff]   ;;  %s16333_s12 = sld [smem:[#allocation98_spill]] (%p6152_p2)  ;;  %s11432_s2 = sshll.u32 (%p6152_p2), %s13814_s29, 9 }
 0xd2a   : >> { %11988 = vmatprep.mubr.bf16.mxu0 %v15108_v63  ;;  %12006 = vmatprep.mubr.bf16.mxu1 %v15108_v63  ;;  %v12874_v23 = vld [vmem:[#allocation12 + $0x50] sm:$0xff]   ;;  %v12881_v28 = vld [vmem:[#allocation14 + $0x20] sm:$0xff]   ;;  %v12884_v46 = vld [vmem:[#allocation14 + $0x58] sm:$0xff]   ;;  %s16334_s6 = sld [smem:[#allocation99_spill]] (%p6152_p2)  ;;  %s10457_s3 = scalar_lea.sflag (%p6152_p2), [#allocation17], %s14050_s1 }
 0xd2b   : >> { %v6165_v2 = vld [vmem:[%s6164_s24] sm:$0xf]  ;;  %v6166_v37 = vld [vmem:[%s6164_s24 + $0x4] sm:$0xf]  ;;  %v12885_v52 = vld [vmem:[#allocation14 + $0x18] sm:$0xff]   ;;  %s16354_s8 = sld [smem:[#allocation109_spill]] (%p6152_p2) }
 0xd2c   : >> { %v6567_v12 = vsub.bf16 0, %v6165_v2  ;;  %v6568_v4 = vsub.bf16 0, %v6166_v37  ;;  %v12875_v6 = vld [vmem:[#allocation12 + $0x10] sm:$0xff]   ;;  %v12878_v9 = vld [vmem:[#allocation12 + $0x48] sm:$0xff]   ;;  %v12882_v61 = vld [vmem:[#allocation12 + $0x40] sm:$0xff]   ;;  %p16389_p8 = scmp.ne.s32.totalorder (%p6152_p2), %s16233_s21, 0 }
 0xd2d   : >> { %v12887_v20 = vld [vmem:[#allocation14 + $0x50] sm:$0xff]   ;;  %v12879_v33 = vld [vmem:[#allocation12 + $0x8] sm:$0xff]   ;;  %v12883_v16 = vld [vmem:[#allocation12] sm:$0xff]   ;;  %s13665_s25 = smov (%p6152_p2), [#allocation39]  }
 0xd2e   : >> { %11975 = vmatpush3.bf16.xpose.msra.mxu0 %v12863_v35  ;;  %v15113_v3 = vcombine.low %v6567_v12, %v6568_v4  ;;  %v12888_v38 = vld [vmem:[#allocation14 + $0x10] sm:$0xff]   ;;  %v12889_v47 = vld [vmem:[#allocation14 + $0x48] sm:$0xff]   ;;  %v12891_v13 = vld [vmem:[#allocation14 + $0x40] sm:$0xff]   ;;  %s13536_s24 = sshll.u32 (%p6152_p2), %s13665_s25, 4  ;;  %s13537_s24 = int_to_ptr.vmem [resolvable:$false] %s13536_s24 }
 0xd2f   : >> { %11976 = vmatprep.subr.bf16.mxu0 %v12864_v21  ;;  %v12890_v42 = vld [vmem:[#allocation14 + $0x8] sm:$0xff]   ;;  %v12892_v18 = vld [vmem:[#allocation14] sm:$0xff]   ;;  %v7844_v34 = vld [vmem:[#allocation7 + $0xb8] sm:$0xff] }
 0xd30   : >> { %11993 = vmatpush3.bf16.xpose.msra.mxu1 %v12873_v60  ;;  %6577 = vxpose.xlu0.c.b16.start.end [1/1] (short) %v15113_v3, 128  ;;  %v7843_v40 = vld [vmem:[#allocation7 + $0xc0] sm:$0xff] }
 0xd31   : >> { %11994 = vmatprep.subr.bf16.mxu1 %v12876_v8  ;;  %v7494_v11 = vld [vmem:[#allocation10 + $0xe0] sm:$0xff] }
 0xd32   : >> { %v7770_v22 = vld [vmem:[#allocation6 + $0x40] sm:$0xff] }
 0xd36   : >> { %11977 = vmatpush3.bf16.xpose.msra.mxu0 %v12865_v36 }
 0xd37   : >> { %11978 = vmatprep.subr.bf16.mxu0 %v12866_v39 }
 0xd38   : >> { %11995 = vmatpush3.bf16.xpose.msra.mxu1 %v12877_v27 }
 0xd39   : >> { %11996 = vmatprep.subr.bf16.mxu1 %v12880_v41 }
 0xd3e   : >> { %11979 = vmatpush3.bf16.xpose.msra.mxu0 %v12867_v26 }
 0xd3f   : >> { %11980 = vmatprep.subr.bf16.mxu0 %v12870_v10 }
 0xd40   : >> { %11997 = vmatpush3.bf16.xpose.msra.mxu1 %v12881_v28 }
 0xd41   : >> { %11998 = vmatprep.subr.bf16.mxu1 %v12884_v46 }
 0xd46   : >> { %11981 = vmatpush3.bf16.xpose.msra.mxu0 %v12871_v29 }
 0xd47   : >> { %11982 = vmatprep.subr.bf16.mxu0 %v12874_v23 }
 0xd48   : >> { %11999 = vmatpush3.bf16.xpose.msra.mxu1 %v12885_v52 }
 0xd49   : >> { %12000 = vmatprep.subr.bf16.mxu1 %v12887_v20  ;;  %v12893_v20 = vld [vmem:[#allocation13 + $0x6c] ss:$-80 sps:$4 sm:$0xff]  }
 0xd4e   : >> { %11983 = vmatpush3.bf16.xpose.msra.mxu0 %v12875_v6 }
 0xd4f   : >> { %11984 = vmatprep.subr.bf16.mxu0 %v12878_v9 }
 0xd50   : >> { %12001 = vmatpush3.bf16.xpose.msra.mxu1 %v12888_v38 }
 0xd51   : >> { %12002 = vmatprep.subr.bf16.mxu1 %v12889_v47  ;;  %v12895_v47 = vld [vmem:[#allocation13 + $0x68] ss:$-80 sps:$4 sm:$0xff]  }
 0xd56   : >> { %11985 = vmatpush3.bf16.xpose.msra.mxu0 %v12879_v33 }
 0xd57   : >> { %11986 = vmatprep.subr.bf16.mxu0 %v12882_v61 }
 0xd58   : >> { %12003 = vmatpush3.bf16.xpose.msra.mxu1 %v12890_v42  ;;  %v12898_v42 = vld [vmem:[#allocation13 + $0x10] ss:$72 sps:$4 sm:$0xff]  }
 0xd59   : >> { %12004 = vmatprep.subr.bf16.mxu1 %v12891_v13  ;;  %v12899_v13 = vld [vmem:[#allocation13 + $0x7c] ss:$-48 sps:$4 sm:$0xff]  }
 0xd5e   : >> { %11987 = vmatpush3.bf16.xpose.msra.mxu0 %v12883_v16  ;;  %v12896_v16 = vld [vmem:[#allocation13 + $0x14] ss:$72 sps:$4 sm:$0xff]  }
 0xd60   : >> { %12005 = vmatpush3.bf16.xpose.msra.mxu1 %v12892_v18  ;;  %v6211_v18 = vld [vmem:[#allocation13 + $0x70] sm:$0xff] }
 0xd61   : >> { %12398 = vmatprep.subr.bf16.mxu1 %v15108_v63 }
 0xd65   : >> { %11989 = vmatmul.mubr.bf16.vlgmr.msra.gmra.mxu0 %v15108_v63 }
 0xd66   : >> { %6650 = vmatprep.mubr.bf16.mxu0 %v13663_v43 }
 0xd67   : >> { %12007 = vmatmul.mubr.bf16.vlgmr.msra.gmra.mxu1 %v15108_v63 }
 0xd68   : >> { %12399 = vmatpush3.bf16.msra.mxu1 %v15108_v63 }
 0xd92   : >> { %v6585_v61 = vpop.trf.xlu0 }
 0xe25   : >> { %v6387_v30 = vpop.f32.mrf.mxu0 }
 0xe26   : >> { %v10976_v53 = vmul.f32 -1.442695, %v6387_v30 }
 0xe27   : >> { %v6389_v59 = vpop.f32.mrf.mxu0  ;;  %v15124_v54 = vpop.f32.mrf.mxu1 }
 0xe28   : >> { %12915 = vpow2.f32 %v10976_v53  ;;  %v10977_v7 = vmul.f32 -1.442695, %v6389_v59  ;;  %v6586_v53 = vpop.trf.xlu0 }
 0xe29   : >> { %v6391_v45 = vpop.f32.mrf.mxu0  ;;  %v15126_v51 = vpop.f32.mrf.mxu1 }
 0xe2a   : >> { %12917 = vpow2.f32 %v10977_v7  ;;  %v10978_v58 = vmul.f32 -1.442695, %v6391_v45 }
 0xe2b   : >> { %v15121_v55 = vpop.f32.mrf.mxu0  ;;  %v15130_v36 = vpop.f32.mrf.mxu1 }
 0xe2c   : >> { %12919 = vpow2.f32 %v10978_v58  ;;  %v10979_v56 = vmul.f32 -1.442695, %v15121_v55  ;;  %v12902_v58 = vld [vmem:[#allocation13 + $0x34] ss:$-16 sps:$4 sm:$0xff]  }
 0xe2d   : >> { %v15144_v46 = vpop.f32.mrf.mxu1 }
 0xe2e   : >> { %12921 = vpow2.f32 %v10979_v56  ;;  %v6587_v56 = vpop.trf.xlu0 }
 0xe35   : >> { %v12916_v50 = vpop.eup %12915 }
 0xe36   : >> { %v6547_v32 = vadd.f32 1.0, %v12916_v50  ;;  %v12904_v50 = vld [vmem:[#allocation13 + $0x30] ss:$-16 sps:$4 sm:$0xff]  }
 0xe37   : >> { %v12918_v19 = vpop.eup %12917 }
 0xe38   : >> { %12923 = vrcp.f32 %v6547_v32  ;;  %v6548_v48 = vadd.f32 1.0, %v12918_v19  ;;  %v12905_v32 = vld [vmem:[#allocation13 + $0x44] ss:$-8 sps:$4 sm:$0xff]   ;;  %v12907_v19 = vld [vmem:[#allocation13 + $0x40] ss:$-8 sps:$4 sm:$0xff]  }
 0xe39   : >> { %v12920_v15 = vpop.eup %12919 }
 0xe3a   : >> { %12925 = vrcp.f32 %v6548_v48  ;;  %v6549_v24 = vadd.f32 1.0, %v12920_v15  ;;  %v12908_v48 = vld [vmem:[#allocation13 + $0x2c] ss:$-40 sps:$4 sm:$0xff]   ;;  %v6588_v15 = vpop.trf.xlu0 }
 0xe3b   : >> { %v12922_v1 = vpop.eup %12921 }
 0xe3c   : >> { %12927 = vrcp.f32 %v6549_v24  ;;  %v6550_v14 = vadd.f32 1.0, %v12922_v1  ;;  %v12910_v24 = vld [vmem:[#allocation13 + $0x28] ss:$-40 sps:$4 sm:$0xff]   ;;  %v12911_v1 = vld [vmem:[#allocation13 + $0x64] ss:$-88 sps:$4 sm:$0xff]  }
 0xe3e   : >> { %12929 = vrcp.f32 %v6550_v14  ;;  %v12913_v14 = vld [vmem:[#allocation13 + $0x60] ss:$-88 sps:$4 sm:$0xff]  }
 0xe45   : >> { %v12924_v25 = vpop.eup %12923 }
 0xe46   : >> { %v6862_v57 = vsub.f32 1.0, %v12924_v25  ;;  %v15136_v27 = vmul.f32 %v12924_v25, %v6387_v30 }
 0xe47   : >> { %v12926_v35 = vpop.eup %12925 }
 0xe48   : >> { %v6866_v21 = vmul.f32 %v6862_v57, %v6387_v30  ;;  %v6863_v17 = vsub.f32 1.0, %v12926_v35  ;;  %v15128_v62 = vmul.f32 %v12926_v35, %v6389_v59  ;;  %v6563_v52 = vmul.f32 %v15136_v27, %v15124_v54  ;;  %v6212_v30 = vld [vmem:[#allocation13 + $0x50] sm:$0xff] }
 0xe49   : >> { %v12928_v0 = vpop.eup %12927  ;;  %v10998_v7 = vcombine.high %v6211_v18, %v6212_v30 }
 0xe4a   : >> { %v6870_v39 = vadd.f32 1.0, %v6866_v21  ;;  %v6867_v60 = vmul.f32 %v6863_v17, %v6389_v59  ;;  %v15132_v8 = vmul.f32 %v12928_v0, %v6391_v45  ;;  %v6864_v26 = vsub.f32 1.0, %v12928_v0  ;;  %v12901_v59 = vld [vmem:[#allocation13 + $0x78] ss:$-48 sps:$4 sm:$0xff]   ;;  %v7464_v17 = vld [vmem:[#allocation10 + $0xc0] sm:$0xff] }
 0xe4b   : >> { %v15134_v10 = vpop.eup %12929  ;;  %v6564_v12 = vmul.f32 %v15128_v62, %v15126_v51 }
 0xe4c   : >> { %v6871_v41 = vadd.f32 1.0, %v6867_v60  ;;  %v6868_v29 = vmul.f32 %v6864_v26, %v6391_v45  ;;  %v15140_v23 = vmul.f32 %v15134_v10, %v15121_v55  ;;  %v6565_v28 = vmul.f32 %v15132_v8, %v15130_v36  ;;  %v7466_v60 = vld [vmem:[#allocation10] sm:$0xff] }
 0xe4d   : >> { %v15146_v2 = vmul.f32 %v12924_v25, %v6870_v39  ;;  %v10997_v45 = vcombine.low %v6211_v18, %v6212_v30  ;;  %v6589_v25 = vpop.trf.xlu0  ;;  %v7496_v39 = vmul.f32 0.9, %v7464_v17  ;;  %v7819_v18 = vld [vmem:[#allocation7 + $0x78] sm:$0xff]  ;;  %v7470_v30 = vld [vmem:[#allocation10 + $0xf0] sm:$0xff] }
 0xe4e   : >> { %v6872_v37 = vadd.f32 1.0, %v6868_v29  ;;  %v6566_v4 = vmul.f32 %v15140_v23, %v15144_v46  ;;  %v15152_v6 = vmul.f32 %v12926_v35, %v6871_v41  ;;  %v6569_v38 = vpack.c.bf16 %v6565_v28, %v6563_v52  ;;  %v7816_v29 = vld [vmem:[#allocation7 + $0x80] sm:$0xff]  ;;  %v7467_v28 = vld [vmem:[#allocation10 + $0xc8] sm:$0xff] }
 0xe4f   : >> { %v7817_v52 = vld [vmem:[#allocation7 + $0xc8] sm:$0xff] }
 0xe50   : >> { %v6570_v9 = vpack.c.bf16 %v6566_v4, %v6564_v12  ;;  %v15156_v33 = vmul.f32 %v12928_v0, %v6872_v37  ;;  %v7465_v0 = vld [vmem:[#allocation10 + $0x38] sm:$0xff]  ;;  %v7498_v12 = vmul.f32 0.9, %v7466_v60  ;;  %v7473_v60 = vld [vmem:[#allocation10 + $0x68] sm:$0xff] }
 0xe51   : >> { %v6590_v57 = vpop.trf.xlu0  ;;  %v7497_v26 = vmul.f32 0.9, %v7465_v0 }
 0xe52   : >> { %6632 = vmatprep.subr.bf16.mxu0 %v6570_v9  ;;  %v7468_v9 = vld [vmem:[#allocation10 + $0xd0] sm:$0xff] }
 0xe53   : >> { %6633 = vmatpush1.bf16.msra.mxu0 %v6569_v38 }
 0xe54   : >> { %6811 = vmatprep.subr.bf16.mxu0 %v12893_v20 }
 0xe55   : >> { %v6591_v35 = vpop.trf.xlu0 }
 0xe56   : >> { %10981 = vmatmul.mubr.msk.bf16.vlgmr.msra.gmra.mxu0 %vm6593_vm0, %v6585_v61  ;;  %v7469_v61 = vld [vmem:[#allocation10 + $0x60] sm:$0xff] }
 0xe57   : >> { %6812 = vmatpush1.bf16.msra.mxu0 %v12895_v47  ;;  %6660 = vmatprep.mubr.bf16.mxu0 %v13663_v43 }
 0xe58   : >> { %6813 = vmatprep.subr.bf16.mxu0 %v12896_v16 }
 0xe59   : >> { %v6592_v21 = vpop.trf.xlu0 }
 0xe5b   : >> { %6814 = vmatpush1.bf16.msra.mxu0 %v12898_v42  ;;  %v7500_v42 = vmul.f32 0.9, %v7468_v9 }
 0xe5c   : >> { %6815 = vmatprep.subr.bf16.mxu0 %v12899_v13 }
 0xe5e   : >> { %10982 = vmatmul.mubr.msk.bf16.gmra.mxu0 %vm6593_vm0, %v6586_v53 }
 0xe5f   : >> { %6670 = vmatprep.mubr.bf16.mxu0 %v13663_v43  ;;  %6816 = vmatpush1.bf16.msra.mxu0 %v12901_v59 }
 0xe60   : >> { %6817 = vmatprep.subr.bf16.mxu0 %v10998_v7 }
 0xe63   : >> { %6818 = vmatpush1.bf16.msra.mxu0 %v10997_v45  ;;  %v7501_v45 = vmul.f32 0.9, %v7469_v61  ;;  %v7836_v61 = vld [vmem:[#allocation7 + $0xd8] sm:$0xff] }
 0xe64   : >> { %6819 = vmatprep.subr.bf16.mxu0 %v12902_v58  ;;  %v7471_v58 = vld [vmem:[#allocation10 + $0xe8] sm:$0xff] }
 0xe66   : >> { %10983 = vmatmul.mubr.msk.bf16.gmra.mxu0 %vm6593_vm0, %v6587_v56 }
 0xe67   : >> { %6680 = vmatprep.mubr.bf16.mxu0 %v13663_v43  ;;  %6820 = vmatpush1.bf16.msra.mxu0 %v12904_v50  ;;  %v7820_v50 = vld [vmem:[#allocation7 + $0x8] sm:$0xff] }
 0xe68   : >> { %6821 = vmatprep.subr.bf16.mxu0 %v12905_v32  ;;  %v7486_v32 = vld [vmem:[#allocation10 + $0x88] sm:$0xff] }
 0xe6b   : >> { %6822 = vmatpush1.bf16.msra.mxu0 %v12907_v19 }
 0xe6c   : >> { %6823 = vmatprep.subr.bf16.mxu0 %v12908_v48 }
 0xe6e   : >> { %10984 = vmatmul.mubr.msk.bf16.gmra.mxu0 %vm6593_vm0, %v6588_v15  ;;  %v7502_v15 = vmul.f32 0.9, %v7470_v30  ;;  %v7825_v30 = vld [vmem:[#allocation7 + $0xb0] sm:$0xff] }
 0xe6f   : >> { %6690 = vmatprep.mubr.bf16.mxu0 %v13663_v43  ;;  %6824 = vmatpush1.bf16.msra.mxu0 %v12910_v24 }
 0xe70   : >> { %6825 = vmatprep.subr.bf16.mxu0 %v12911_v1  ;;  %v7821_v1 = vld [vmem:[#allocation7 + $0x90] sm:$0xff] }
 0xe73   : >> { %6826 = vmatpush1.bf16.msra.mxu0 %v12913_v14  ;;  %v7503_v14 = vmul.f32 0.9, %v7471_v58 }
 0xe74   : >> { %12432 = vmatprep.subr.bf16.mxu0 %v15108_v63 }
 0xe76   : >> { %10985 = vmatmul.mubr.msk.bf16.gmra.mxu0 %vm6593_vm0, %v6589_v25  ;;  %v7472_v25 = vld [vmem:[#allocation10 + $0x18] sm:$0xff] }
 0xe77   : >> { %6700 = vmatprep.mubr.bf16.mxu0 %v13663_v43 }
 0xe7e   : >> { %10986 = vmatmul.mubr.msk.bf16.gmra.mxu0 %vm6593_vm0, %v6590_v57 }
 0xe7f   : >> { %6710 = vmatprep.mubr.bf16.mxu0 %v13663_v43 }
 0xe86   : >> { %10987 = vmatmul.mubr.msk.bf16.gmra.mxu0 %vm6593_vm0, %v6591_v35 }
 0xe87   : >> { %6720 = vmatprep.mubr.bf16.mxu0 %v13663_v43 }
 0xe8e   : >> { %10988 = vmatmul.mubr.msk.bf16.gmra.mxu0 %vm6593_vm0, %v6592_v21 }
 0xe8f   : >> { %6843 = vmatprep.mubr.bf16.mxu0 %v13663_v43 }
 0xe96   : >> { %6844 = vmatmul.mubr.bf16.vlgmr.msra.gmra.mxu0 %v15113_v3  ;;  %v7499_v3 = vmul.f32 0.9, %v7467_v28 }
 0xe97   : >> { %12433 = vmatpush3.bf16.msra.mxu0 %v15108_v63  ;;  %v7818_v63 = vld [vmem:[#allocation7 + $0xe8] sm:$0xff] }
 0xf16   : >> { %v6652_v41 = vpop.f32.mrf.mxu0 }
 0xf17   : >> { %v7528_v37 = vadd.f32 %v7496_v39, %v6652_v41  ;;  %v7822_v39 = vld [vmem:[#allocation7 + $0x58] sm:$0xff] }
 0xf18   : >> { %v6654_v4 = vpop.f32.mrf.mxu0 }
 0xf19   : >> { %7688 = vst [vmem:[#allocation10 + $0xc0] sm:$0xff] %v7528_v37  ;;  %v15177_v20 = vsub.f32 %v7816_v29, %v7528_v37  ;;  %v7529_v43 = vadd.f32 %v7497_v26, %v6654_v4  ;;  %v7504_v29 = vmul.f32 0.9, %v7472_v25  ;;  %v7823_v37 = vld [vmem:[#allocation7 + $0xa8] sm:$0xff] }
 0xf1a   : >> { %v6656_v38 = vpop.f32.mrf.mxu0 }
 0xf1b   : >> { %16275 = vst [vmem:[#allocation57_spill] sm:$0xff] %v15177_v20  ;;  %7976 = vst [vmem:[#allocation7 + $0x80] sm:$0xff] %v15177_v20  ;;  %v15180_v47 = vsub.f32 %v7817_v52, %v7529_v43  ;;  %v7530_v16 = vadd.f32 %v7498_v12, %v6656_v38  ;;  %v7474_v12 = vld [vmem:[#allocation10 + $0x28] sm:$0xff] }
 0xf1c   : >> { %7689 = vst [vmem:[#allocation10 + $0x38] sm:$0xff] %v7529_v43  ;;  %v6658_v13 = vpop.f32.mrf.mxu0  ;;  %v7505_v43 = vmul.f32 0.9, %v7473_v60 }
 0xf1d   : >> { %16276 = vst [vmem:[#allocation58_spill] sm:$0xff] %v15180_v47  ;;  %7977 = vst [vmem:[#allocation7 + $0xc8] sm:$0xff] %v15180_v47  ;;  %v11384_v53 = vpack.c.bf16 %v15180_v47, %v15177_v20  ;;  %v15185_v59 = vsub.f32 %v7818_v63, %v7530_v16  ;;  %v7531_v7 = vadd.f32 %v7499_v3, %v6658_v13  ;;  %v7475_v3 = vld [vmem:[#allocation10 + $0x80] sm:$0xff]  ;;  %v7824_v63 = vld [vmem:[#allocation7 + $0xd0] sm:$0xff]  ;;  %v7506_v13 = vmul.f32 0.9, %v7474_v12 }
 0xf1e   : >> { %7690 = vst [vmem:[#allocation10] sm:$0xff] %v7530_v16  ;;  %v6662_v56 = vpop.f32.mrf.mxu0  ;;  %v7828_v12 = vld [vmem:[#allocation7 + $0xe0] sm:$0xff]  ;;  %v7768_v20 = vld [vmem:[#allocation6 + $0x38] sm:$0xff]  ;;  %v7883_v47 = vld [vmem:[#allocation8 + $0x10] sm:$0xff] }
 0xf1f   : >> { %16277 = vst [vmem:[#allocation59_spill] sm:$0xff] %v15185_v59  ;;  %8312 = vst [vmem:[#allocation13 + $0x60] sm:$0xff] %v11384_v53  ;;  %v15190_v19 = vsub.f32 %v7819_v18, %v7531_v7  ;;  %v7532_v48 = vadd.f32 %v7500_v42, %v6662_v56  ;;  %v7507_v53 = vmul.f32 0.9, %v7475_v3 }
 0xf20   : >> { %7978 = vst [vmem:[#allocation7 + $0xe8] sm:$0xff] %v15185_v59  ;;  %7691 = vst [vmem:[#allocation10 + $0xc8] sm:$0xff] %v7531_v7  ;;  %v6664_v24 = vpop.f32.mrf.mxu0  ;;  %v7476_v7 = vld [vmem:[#allocation10 + $0x78] sm:$0xff] }
 0xf21   : >> { %16278 = vst [vmem:[#allocation60_spill] sm:$0xff] %v15190_v19  ;;  %7979 = vst [vmem:[#allocation7 + $0x78] sm:$0xff] %v15190_v19  ;;  %v11385_v57 = vpack.c.bf16 %v15190_v19, %v15185_v59  ;;  %v15195_v35 = vsub.f32 %v7820_v50, %v7532_v48  ;;  %v7533_v21 = vadd.f32 %v7501_v45, %v6664_v24  ;;  %v7477_v24 = vld [vmem:[#allocation10 + $0x50] sm:$0xff]  ;;  %v7508_v25 = vmul.f32 0.9, %v7476_v7 }
 0xf22   : >> { %7692 = vst [vmem:[#allocation10 + $0xd0] sm:$0xff] %v7532_v48  ;;  %v6666_v0 = vpop.f32.mrf.mxu0  ;;  %v7837_v50 = vld [vmem:[#allocation7 + $0x30] sm:$0xff] }
 0xf23   : >> { %16279 = vst [vmem:[#allocation61_spill] sm:$0xff] %v15195_v35  ;;  %8313 = vst [vmem:[#allocation13 + $0x8] sm:$0xff] %v11385_v57  ;;  %v15200_v26 = vsub.f32 %v7821_v1, %v7533_v21  ;;  %v7534_v41 = vadd.f32 %v7502_v15, %v6666_v0  ;;  %v7826_v15 = vld [vmem:[#allocation7 + $0x38] sm:$0xff]  ;;  %v7478_v0 = vld [vmem:[#allocation10 + $0x10] sm:$0xff] }
 0xf24   : >> { %7980 = vst [vmem:[#allocation7 + $0x8] sm:$0xff] %v15195_v35  ;;  %7693 = vst [vmem:[#allocation10 + $0x60] sm:$0xff] %v7533_v21  ;;  %v6668_v28 = vpop.f32.mrf.mxu0  ;;  %v7827_v21 = vld [vmem:[#allocation7 + $0x40] sm:$0xff]  ;;  %v7510_v3 = vmul.f32 0.9, %v7478_v0  ;;  %v7839_v7 = vld [vmem:[#allocation7 + $0xf0] sm:$0xff] }
 0xf25   : >> { %16280 = vst [vmem:[#allocation62_spill] sm:$0xff] %v15200_v26  ;;  %7981 = vst [vmem:[#allocation7 + $0x90] sm:$0xff] %v15200_v26  ;;  %v11386_v4 = vpack.c.bf16 %v15200_v26, %v15195_v35  ;;  %v15205_v52 = vsub.f32 %v7822_v39, %v7534_v41  ;;  %v7535_v9 = vadd.f32 %v7503_v14, %v6668_v28  ;;  %v7479_v28 = vld [vmem:[#allocation10 + $0xd8] sm:$0xff]  ;;  %v7774_v19 = vld [vmem:[#allocation6 + $0x70] sm:$0xff] }
 0xf26   : >> { %7694 = vst [vmem:[#allocation10 + $0xf0] sm:$0xff] %v7534_v41  ;;  %v6672_v38 = vpop.f32.mrf.mxu0 }
 0xf27   : >> { %16281 = vst [vmem:[#allocation63_spill] sm:$0xff] %v15205_v52  ;;  %8314 = vst [vmem:[#allocation13 + $0x28] sm:$0xff] %v11386_v4  ;;  %v15210_v16 = vsub.f32 %v7823_v37, %v7535_v9  ;;  %v7536_v42 = vadd.f32 %v7504_v29, %v6672_v38  ;;  %v7509_v29 = vmul.f32 0.9, %v7477_v24 }
 0xf28   : >> { %7982 = vst [vmem:[#allocation7 + $0x58] sm:$0xff] %v15205_v52  ;;  %7695 = vst [vmem:[#allocation10 + $0xe8] sm:$0xff] %v7535_v9  ;;  %v6674_v18 = vpop.f32.mrf.mxu0 }
 0xf29   : >> { %16282 = vst [vmem:[#allocation64_spill] sm:$0xff] %v15210_v16  ;;  %7983 = vst [vmem:[#allocation7 + $0xa8] sm:$0xff] %v15210_v16  ;;  %v11387_v45 = vpack.c.bf16 %v15210_v16, %v15205_v52  ;;  %v15215_v58 = vsub.f32 %v7824_v63, %v7536_v42  ;;  %v7537_v56 = vadd.f32 %v7505_v43, %v6674_v18  ;;  %v7829_v63 = vld [vmem:[#allocation7 + $0x60] sm:$0xff] }
 0xf2a   : >> { %7696 = vst [vmem:[#allocation10 + $0x18] sm:$0xff] %v7536_v42  ;;  %v6676_v48 = vpop.f32.mrf.mxu0  ;;  %v7511_v42 = vmul.f32 0.9, %v7479_v28  ;;  %v7483_v28 = vld [vmem:[#allocation10 + $0x30] sm:$0xff] }
 0xf2b   : >> { %16283 = vst [vmem:[#allocation65_spill] sm:$0xff] %v15215_v58  ;;  %8315 = vst [vmem:[#allocation13] sm:$0xff] %v11387_v45  ;;  %v15220_v1 = vsub.f32 %v7825_v30, %v7537_v56  ;;  %v7538_v14 = vadd.f32 %v7506_v13, %v6676_v48  ;;  %v7480_v13 = vld [vmem:[#allocation10 + $0x40] sm:$0xff]  ;;  %v7481_v48 = vld [vmem:[#allocation10 + $0x70] sm:$0xff] }
 0xf2c   : >> { %7984 = vst [vmem:[#allocation7 + $0xd0] sm:$0xff] %v15215_v58  ;;  %7697 = vst [vmem:[#allocation10 + $0x68] sm:$0xff] %v7537_v56  ;;  %v6678_v57 = vpop.f32.mrf.mxu0  ;;  %v7830_v56 = vld [vmem:[#allocation7 + $0x18] sm:$0xff] }
 0xf2d   : >> { %16284 = vst [vmem:[#allocation66_spill] sm:$0xff] %v15220_v1  ;;  %7985 = vst [vmem:[#allocation7 + $0xb0] sm:$0xff] %v15220_v1  ;;  %v11388_v39 = vpack.c.bf16 %v15220_v1, %v15215_v58  ;;  %v15225_v60 = vsub.f32 %v7826_v15, %v7538_v14  ;;  %v7539_v41 = vadd.f32 %v7507_v53, %v6678_v57  ;;  %v7831_v57 = vld [vmem:[#allocation7 + $0x68] sm:$0xff] }
 0xf2e   : >> { %7698 = vst [vmem:[#allocation10 + $0x28] sm:$0xff] %v7538_v14  ;;  %v6682_v37 = vpop.f32.mrf.mxu0  ;;  %v7512_v14 = vmul.f32 0.9, %v7480_v13 }
 0xf2f   : >> { %16285 = vst [vmem:[#allocation67_spill] sm:$0xff] %v15225_v60  ;;  %8316 = vst [vmem:[#allocation13 + $0x40] sm:$0xff] %v11388_v39  ;;  %v15230_v9 = vsub.f32 %v7827_v21, %v7539_v41  ;;  %v7540_v43 = vadd.f32 %v7508_v25, %v6682_v37  ;;  %v7482_v21 = vld [vmem:[#allocation10 + $0x98] sm:$0xff] }
 0xf30   : >> { %7986 = vst [vmem:[#allocation7 + $0x38] sm:$0xff] %v15225_v60  ;;  %7699 = vst [vmem:[#allocation10 + $0x80] sm:$0xff] %v7539_v41  ;;  %v6684_v38 = vpop.f32.mrf.mxu0 }
 0xf31   : >> { %16286 = vst [vmem:[#allocation68_spill] sm:$0xff] %v15230_v9  ;;  %7987 = vst [vmem:[#allocation7 + $0x40] sm:$0xff] %v15230_v9  ;;  %v11389_v18 = vpack.c.bf16 %v15230_v9, %v15225_v60  ;;  %v15235_v30 = vsub.f32 %v7828_v12, %v7540_v43  ;;  %v7541_v53 = vadd.f32 %v7509_v29, %v6684_v38  ;;  %v7513_v29 = vmul.f32 0.9, %v7481_v48  ;;  %v7832_v12 = vld [vmem:[#allocation7 + $0x10] sm:$0xff] }
 0xf32   : >> { %7700 = vst [vmem:[#allocation10 + $0x78] sm:$0xff] %v7540_v43  ;;  %v6686_v45 = vpop.f32.mrf.mxu0  ;;  %v7490_v43 = vld [vmem:[#allocation10 + $0x90] sm:$0xff] }
 0xf33   : >> { %16287 = vst [vmem:[#allocation69_spill] sm:$0xff] %v15235_v30  ;;  %8317 = vst [vmem:[#allocation13 + $0x38] sm:$0xff] %v11389_v18  ;;  %v15240_v15 = vsub.f32 %v7829_v63, %v7541_v53  ;;  %v7542_v24 = vadd.f32 %v7510_v3, %v6686_v45  ;;  %v7514_v63 = vmul.f32 0.9, %v7482_v21  ;;  %v7833_v18 = vld [vmem:[#allocation7 + $0x70] sm:$0xff]  ;;  %v7484_v45 = vld [vmem:[#allocation10 + $0xb8] sm:$0xff] }
 0xf34   : >> { %7988 = vst [vmem:[#allocation7 + $0xe0] sm:$0xff] %v15235_v30  ;;  %7701 = vst [vmem:[#allocation10 + $0x50] sm:$0xff] %v7541_v53  ;;  %v6688_v25 = vpop.f32.mrf.mxu0  ;;  %v7515_v53 = vmul.f32 0.9, %v7483_v28 }
 0xf35   : >> { %16288 = vst [vmem:[#allocation70_spill] sm:$0xff] %v15240_v15  ;;  %7989 = vst [vmem:[#allocation7 + $0x60] sm:$0xff] %v15240_v15  ;;  %v11390_v0 = vpack.c.bf16 %v15240_v15, %v15235_v30  ;;  %v15245_v39 = vsub.f32 %v7830_v56, %v7542_v24  ;;  %v7543_v41 = vadd.f32 %v7511_v42, %v6688_v25 }
 0xf36   : >> { %7702 = vst [vmem:[#allocation10 + $0x10] sm:$0xff] %v7542_v24  ;;  %v6692_v37 = vpop.f32.mrf.mxu0 }
 0xf37   : >> { %16289 = vst [vmem:[#allocation71_spill] sm:$0xff] %v15245_v39  ;;  %8318 = vst [vmem:[#allocation13 + $0x30] sm:$0xff] %v11390_v0  ;;  %v15250_v3 = vsub.f32 %v7831_v57, %v7543_v41  ;;  %v7544_v38 = vadd.f32 %v7512_v14, %v6692_v37  ;;  %v7834_v57 = vld [vmem:[#allocation7 + $0x50] sm:$0xff]  ;;  %v7835_v37 = vld [vmem:[#allocation7 + $0xa0] sm:$0xff] }
 0xf38   : >> { %7990 = vst [vmem:[#allocation7 + $0x18] sm:$0xff] %v15245_v39  ;;  %7703 = vst [vmem:[#allocation10 + $0xd8] sm:$0xff] %v7543_v41  ;;  %v6694_v13 = vpop.f32.mrf.mxu0  ;;  %v7485_v14 = vld [vmem:[#allocation10 + $0xb0] sm:$0xff]  ;;  %v7516_v41 = vmul.f32 0.9, %v7484_v45 }
 0xf39   : >> { %16290 = vst [vmem:[#allocation72_spill] sm:$0xff] %v15250_v3  ;;  %7991 = vst [vmem:[#allocation7 + $0x68] sm:$0xff] %v15250_v3  ;;  %v11391_v42 = vpack.c.bf16 %v15250_v3, %v15245_v39  ;;  %v15255_v56 = vsub.f32 %v7832_v12, %v7544_v38  ;;  %v7545_v48 = vadd.f32 %v7513_v29, %v6694_v13  ;;  %v7517_v13 = vmul.f32 0.9, %v7485_v14 }
 0xf3a   : >> { %7704 = vst [vmem:[#allocation10 + $0x40] sm:$0xff] %v7544_v38  ;;  %v6696_v25 = vpop.f32.mrf.mxu0 }
 0xf3b   : >> { %8319 = vst [vmem:[#allocation13 + $0x20] sm:$0xff] %v11391_v42  ;;  %7992 = vst [vmem:[#allocation7 + $0x10] sm:$0xff] %v15255_v56  ;;  %v15260_v21 = vsub.f32 %v7833_v18, %v7545_v48  ;;  %v7546_v0 = vadd.f32 %v7514_v63, %v6696_v25  ;;  %v7487_v42 = vld [vmem:[#allocation10 + $0xa8] sm:$0xff] }
 0xf3c   : >> { %7705 = vst [vmem:[#allocation10 + $0x70] sm:$0xff] %v7545_v48  ;;  %v6698_v28 = vpop.f32.mrf.mxu0  ;;  %v7518_v48 = vmul.f32 0.9, %v7486_v32  ;;  %v7840_v63 = vld [vmem:[#allocation7 + $0x88] sm:$0xff] }
 0xf3d   : >> { %7993 = vst [vmem:[#allocation7 + $0x70] sm:$0xff] %v15260_v21  ;;  %v11392_v29 = vpack.c.bf16 %v15260_v21, %v15255_v56  ;;  %7706 = vst [vmem:[#allocation10 + $0x98] sm:$0xff] %v7546_v0  ;;  %v15265_v12 = vsub.f32 %v7834_v57, %v7546_v0  ;;  %v7547_v38 = vadd.f32 %v7515_v53, %v6698_v28  ;;  %v7519_v57 = vmul.f32 0.9, %v7487_v42  ;;  %v7488_v0 = vld [vmem:[#allocation10 + $0xa0] sm:$0xff] }
 0xf3e   : >> { %v6702_v17 = vpop.f32.mrf.mxu0  ;;  %v7520_v42 = vmul.f32 0.9, %v7488_v0 }
 0xf3f   : >> { %8320 = vst [vmem:[#allocation13 + $0x70] sm:$0xff] %v11392_v29  ;;  %7994 = vst [vmem:[#allocation7 + $0x50] sm:$0xff] %v15265_v12  ;;  %v15270_v18 = vsub.f32 %v7835_v37, %v7547_v38  ;;  %v7548_v45 = vadd.f32 %v7516_v41, %v6702_v17  ;;  %v7489_v17 = vld [vmem:[#allocation10 + $0x58] sm:$0xff]  ;;  %v7841_v29 = vld [vmem:[#allocation7 + $0x48] sm:$0xff] }
 0xf40   : >> { %7707 = vst [vmem:[#allocation10 + $0x30] sm:$0xff] %v7547_v38  ;;  %v6704_v25 = vpop.f32.mrf.mxu0  ;;  %v7838_v38 = vld [vmem:[#allocation7 + $0x20] sm:$0xff] }
 0xf41   : >> { %7995 = vst [vmem:[#allocation7 + $0xa0] sm:$0xff] %v15270_v18  ;;  %v11393_v53 = vpack.c.bf16 %v15270_v18, %v15265_v12  ;;  %7708 = vst [vmem:[#allocation10 + $0xb8] sm:$0xff] %v7548_v45  ;;  %v15275_v14 = vsub.f32 %v7836_v61, %v7548_v45  ;;  %v7549_v28 = vadd.f32 %v7517_v13, %v6704_v25  ;;  %v7521_v25 = vmul.f32 0.9, %v7489_v17 }
 0xf42   : >> { %v6706_v37 = vpop.f32.mrf.mxu0 }
 0xf43   : >> { %8321 = vst [vmem:[#allocation13 + $0x50] sm:$0xff] %v11393_v53  ;;  %7996 = vst [vmem:[#allocation7 + $0xd8] sm:$0xff] %v15275_v14  ;;  %v15280_v32 = vsub.f32 %v7837_v50, %v7549_v28  ;;  %v7550_v41 = vadd.f32 %v7518_v48, %v6706_v37  ;;  %v7491_v53 = vld [vmem:[#allocation10 + $0x48] sm:$0xff] }
 0xf44   : >> { %7709 = vst [vmem:[#allocation10 + $0xb0] sm:$0xff] %v7549_v28  ;;  %v6708_v4 = vpop.f32.mrf.mxu0  ;;  %v7522_v28 = vmul.f32 0.9, %v7490_v43 }
 0xf45   : >> { %7997 = vst [vmem:[#allocation7 + $0x30] sm:$0xff] %v15280_v32  ;;  %v11394_v61 = vpack.c.bf16 %v15280_v32, %v15275_v14  ;;  %7710 = vst [vmem:[#allocation10 + $0x88] sm:$0xff] %v7550_v41  ;;  %v15285_v13 = vsub.f32 %v7838_v38, %v7550_v41  ;;  %v7551_v45 = vadd.f32 %v7519_v57, %v6708_v4  ;;  %v7523_v38 = vmul.f32 0.9, %v7491_v53  ;;  %v7492_v41 = vld [vmem:[#allocation10 + $0x8] sm:$0xff] }
 0xf46   : >> { %v6712_v24 = vpop.f32.mrf.mxu0  ;;  %v7524_v53 = vmul.f32 0.9, %v7492_v41 }
 0xf47   : >> { %8322 = vst [vmem:[#allocation13 + $0x78] sm:$0xff] %v11394_v61  ;;  %7998 = vst [vmem:[#allocation7 + $0x20] sm:$0xff] %v15285_v13  ;;  %v15290_v48 = vsub.f32 %v7839_v7, %v7551_v45  ;;  %v7552_v0 = vadd.f32 %v7520_v42, %v6712_v24  ;;  %v7493_v24 = vld [vmem:[#allocation10 + $0xf8] sm:$0xff] }
 0xf48   : >> { %7711 = vst [vmem:[#allocation10 + $0xa8] sm:$0xff] %v7551_v45  ;;  %v6714_v37 = vpop.f32.mrf.mxu0  ;;  %v7842_v45 = vld [vmem:[#allocation7 + $0xf8] sm:$0xff] }
 0xf49   : >> { %7999 = vst [vmem:[#allocation7 + $0xf0] sm:$0xff] %v15290_v48  ;;  %v11395_v4 = vpack.c.bf16 %v15290_v48, %v15285_v13  ;;  %7712 = vst [vmem:[#allocation10 + $0xa0] sm:$0xff] %v7552_v0  ;;  %v15295_v57 = vsub.f32 %v7840_v63, %v7552_v0  ;;  %v7553_v17 = vadd.f32 %v7521_v25, %v6714_v37  ;;  %v7525_v37 = vmul.f32 0.9, %v7493_v24 }
 0xf4a   : >> { %v6716_v7 = vpop.f32.mrf.mxu0 }
 0xf4b   : >> { %8323 = vst [vmem:[#allocation13 + $0x48] sm:$0xff] %v11395_v4  ;;  %8000 = vst [vmem:[#allocation7 + $0x88] sm:$0xff] %v15295_v57  ;;  %v15300_v43 = vsub.f32 %v7841_v29, %v7553_v17  ;;  %v7554_v42 = vadd.f32 %v7522_v28, %v6716_v7  ;;  %v7495_v4 = vld [vmem:[#allocation10 + $0x20] sm:$0xff]  ;;  %v6865_v7 = vsub.f32 1.0, %v15134_v10  ;;  %v7847_v29 = vld [vmem:[#allocation7 + $0x98] sm:$0xff] }
 0xf4c   : >> { %7713 = vst [vmem:[#allocation10 + $0x58] sm:$0xff] %v7553_v17  ;;  %v6718_v50 = vpop.f32.mrf.mxu0  ;;  %v7526_v17 = vmul.f32 0.9, %v7494_v11 }
 0xf4d   : >> { %8001 = vst [vmem:[#allocation7 + $0x48] sm:$0xff] %v15300_v43  ;;  %v11396_v63 = vpack.c.bf16 %v15300_v43, %v15295_v57  ;;  %7714 = vst [vmem:[#allocation10 + $0x90] sm:$0xff] %v7554_v42  ;;  %v15305_v25 = vsub.f32 %v7842_v45, %v7554_v42  ;;  %v7555_v0 = vadd.f32 %v7523_v38, %v6718_v50  ;;  %v7845_v42 = vld [vmem:[#allocation7] sm:$0xff]  ;;  %v7527_v50 = vmul.f32 0.9, %v7495_v4 }
 0xf4e   : >> { %v6722_v61 = vpop.f32.mrf.mxu0  ;;  %v6869_v31 = vmul.f32 %v6865_v7, %v15121_v55 }
 0xf4f   : >> { %8324 = vst [vmem:[#allocation13 + $0x10] sm:$0xff] %v11396_v63  ;;  %8002 = vst [vmem:[#allocation7 + $0xf8] sm:$0xff] %v15305_v25  ;;  %v15310_v28 = vsub.f32 %v7843_v40, %v7555_v0  ;;  %v7556_v41 = vadd.f32 %v7524_v53, %v6722_v61  ;;  %v7846_v61 = vld [vmem:[#allocation7 + $0x28] sm:$0xff] }
 0xf50   : >> { %7715 = vst [vmem:[#allocation10 + $0x48] sm:$0xff] %v7555_v0  ;;  %v6724_v45 = vpop.f32.mrf.mxu0  ;;  %v6873_v7 = vadd.f32 1.0, %v6869_v31 }
 0xf51   : >> { %8003 = vst [vmem:[#allocation7 + $0xc0] sm:$0xff] %v15310_v28  ;;  %v11397_v38 = vpack.c.bf16 %v15310_v28, %v15305_v25  ;;  %7716 = vst [vmem:[#allocation10 + $0x8] sm:$0xff] %v7556_v41  ;;  %v15316_v24 = vsub.f32 %v7844_v34, %v7556_v41  ;;  %v7557_v63 = vadd.f32 %v7525_v37, %v6724_v45 }
 0xf52   : >> { %v6726_v0 = vpop.f32.mrf.mxu0 }
 0xf53   : >> { %8325 = vst [vmem:[#allocation13 + $0x58] sm:$0xff] %v11397_v38  ;;  %8004 = vst [vmem:[#allocation7 + $0xb8] sm:$0xff] %v15316_v24  ;;  %v15321_v11 = vsub.f32 %v7845_v42, %v7557_v63  ;;  %v7558_v53 = vadd.f32 %v7526_v17, %v6726_v0 }
 0xf54   : >> { %7717 = vst [vmem:[#allocation10 + $0xf8] sm:$0xff] %v7557_v63  ;;  %v6728_v4 = vpop.f32.mrf.mxu0 }
 0xf55   : >> { %8005 = vst [vmem:[#allocation7] sm:$0xff] %v15321_v11  ;;  %v11398_v34 = vpack.c.bf16 %v15321_v11, %v15316_v24  ;;  %7718 = vst [vmem:[#allocation10 + $0xe0] sm:$0xff] %v7558_v53  ;;  %v15327_v37 = vsub.f32 %v7846_v61, %v7558_v53  ;;  %v7559_v41 = vadd.f32 %v7527_v50, %v6728_v4 }
 0xf56   : >> { %v6845_v45 = vpop.f32.mrf.mxu0 }
 0xf57   : >> { %8326 = vst [vmem:[#allocation13 + $0x68] sm:$0xff] %v11398_v34  ;;  %8006 = vst [vmem:[#allocation7 + $0x28] sm:$0xff] %v15327_v37  ;;  %v15332_v42 = vsub.f32 %v7847_v29, %v7559_v41  ;;  %v6854_v63 = vmul.f32 %v6845_v45, %v15124_v54 }
 0xf58   : >> { %7719 = vst [vmem:[#allocation10 + $0x20] sm:$0xff] %v7559_v41  ;;  %v6847_v55 = vpop.f32.mrf.mxu0  ;;  %v6877_v41 = vmul.f32 %v15134_v10, %v6873_v7 }
 0xf59   : >> { %8007 = vst [vmem:[#allocation7 + $0x98] sm:$0xff] %v15332_v42  ;;  %v11399_v38 = vpack.c.bf16 %v15332_v42, %v15327_v37  ;;  %v6855_v61 = vmul.f32 %v6847_v55, %v15126_v51  ;;  %v6878_v31 = vmul.f32 %v15146_v2, %v6854_v63 }
 0xf5a   : >> { %v6849_v50 = vpop.f32.mrf.mxu0 }
 0xf5b   : >> { %8327 = vst [vmem:[#allocation13 + $0x18] sm:$0xff] %v11399_v38  ;;  %v6856_v53 = vmul.f32 %v6849_v50, %v15130_v36  ;;  %v6879_v54 = vmul.f32 %v15152_v6, %v6855_v61  ;;  %v6859_v36 = vmul.f32 %v6847_v55, %v15128_v62  ;;  %v6860_v38 = vmul.f32 %v6849_v50, %v15132_v8 }
 0xf5c   : >> { %v6851_v29 = vpop.f32.mrf.mxu0 }
 0xf5d   : >> { %v6857_v4 = vmul.f32 %v6851_v29, %v15144_v46  ;;  %v6880_v34 = vmul.f32 %v15156_v33, %v6856_v53  ;;  %v6861_v51 = vmul.f32 %v6851_v29, %v15140_v23  ;;  %v6858_v46 = vmul.f32 %v6845_v45, %v15136_v27 }
 0xf5f   : >> { %v6882_v40 = vpack.c.bf16 %v6880_v34, %v6878_v31  ;;  %v6881_v17 = vmul.f32 %v6877_v41, %v6857_v4  ;;  %v7126_v2 = vpack.c.bf16 %v6861_v51, %v6859_v36  ;;  %v7125_v33 = vpack.c.bf16 %v6860_v38, %v6858_v46 }
 0xf61   : >> { %6884 = vxpose.xlu0.c.b16.start.end [1/1] (short) %v6882_v40, 128  ;;  %v6883_v0 = vpack.c.bf16 %v6881_v17, %v6879_v54 }
 0xf63   : >> { %6900 = vxpose.xlu1.c.b16.start.end [1/1] (short) %v6883_v0, 128 }
 0xf7e   : >> { %7143 = vxpose.xlu0.c.b16.start.end [1/1] (short) %v7126_v2, 128 }
 0xf80   : >> { %7127 = vxpose.xlu1.c.b16.start.end [1/1] (short) %v7125_v33, 128 }
 0xfc3   : >> { %v6892_v10 = vpop.trf.xlu0 }
 0xfc4   : >> { %12400 = vmatprep.mubr.msk.bf16.mxu1 %vm6593_vm0, %v6892_v10 }
 0xfc5   : >> { %v6908_v6 = vpop.trf.xlu1 }
 0xfc7   : >> { %v6893_v7 = vpop.trf.xlu0 }
 0xfc8   : >> { %12401 = vmatmul.mubr.msk.bf16.vlgmr.msra.gmra.mxu1 %vm6593_vm0, %v6893_v7 }
 0xfc9   : >> { %v6909_v40 = vpop.trf.xlu1 }
 0xfcb   : >> { %v6894_v17 = vpop.trf.xlu0 }
 0xfcc   : >> { %12404 = vmatprep.mubr.msk.bf16.mxu1 %vm6593_vm0, %v6894_v17  ;;  %v7370_v17 = vld [vmem:[#allocation9 + $0xc0] sm:$0xff] }
 0xfcd   : >> { %v6910_v62 = vpop.trf.xlu1 }
 0xfcf   : >> { %v6895_v23 = vpop.trf.xlu0 }
 0xfd0   : >> { %12405 = vmatmul.mubr.msk.bf16.gmra.mxu1 %vm6593_vm0, %v6895_v23  ;;  %v7402_v23 = vmul.f32 0.9, %v7370_v17 }
 0xfd1   : >> { %v6911_v8 = vpop.trf.xlu1 }
 0xfd3   : >> { %v6896_v27 = vpop.trf.xlu0 }
 0xfd4   : >> { %12408 = vmatprep.mubr.msk.bf16.mxu1 %vm6593_vm0, %v6896_v27  ;;  %v7754_v27 = vld [vmem:[#allocation6 + $0xd8] sm:$0xff] }
 0xfd5   : >> { %v6912_v45 = vpop.trf.xlu1 }
 0xfd7   : >> { %v6897_v55 = vpop.trf.xlu0 }
 0xfd8   : >> { %12409 = vmatmul.mubr.msk.bf16.gmra.mxu1 %vm6593_vm0, %v6897_v55  ;;  %v7369_v55 = vld [vmem:[#allocation9 + $0x48] sm:$0xff] }
 0xfd9   : >> { %v6913_v63 = vpop.trf.xlu1 }
 0xfdb   : >> { %v6898_v50 = vpop.trf.xlu0 }
 0xfdc   : >> { %12412 = vmatprep.mubr.msk.bf16.mxu1 %vm6593_vm0, %v6898_v50  ;;  %v12914_v50 = vld [vmem:[%s6168_s7] sm:$0xff]  }
 0xfdd   : >> { %v6914_v0 = vpop.trf.xlu1 }
 0xfdf   : >> { %v6899_v61 = vpop.trf.xlu0 }
 0xfe0   : >> { %12413 = vmatmul.mubr.msk.bf16.gmra.mxu1 %vm6593_vm0, %v6899_v61 }
 0xfe1   : >> { %12416 = vmatprep.mubr.msk.bf16.mxu1 %vm6593_vm0, %v6908_v6  ;;  %v6915_v53 = vpop.trf.xlu1 }
 0xfe3   : >> { %v7151_v41 = vpop.trf.xlu0 }
 0xfe5   : >> { %v7135_v29 = vpop.trf.xlu1 }
 0xfe6   : >> { %12434 = vmatprep.mubr.msk.bf16.mxu0 %vm6593_vm0, %v7135_v29  ;;  %v7752_v29 = vld [vmem:[#allocation6 + $0xb0] sm:$0xff] }
 0xfe7   : >> { %v7152_v36 = vpop.trf.xlu0 }
 0xfe8   : >> { %12417 = vmatmul.mubr.msk.bf16.gmra.mxu1 %vm6593_vm0, %v6909_v40 }
 0xfe9   : >> { %12420 = vmatprep.mubr.msk.bf16.mxu1 %vm6593_vm0, %v6910_v62  ;;  %v7136_v4 = vpop.trf.xlu1  ;;  %v7368_v62 = vld [vmem:[#allocation9 + $0x98] sm:$0xff] }
 0xfea   : >> { %12435 = vmatmul.mubr.msk.bf16.vlgmr.msra.gmra.mxu0 %vm6593_vm0, %v7136_v4  ;;  %v7374_v4 = vld [vmem:[#allocation9 + $0xb8] sm:$0xff] }
 0xfeb   : >> { %v7153_v46 = vpop.trf.xlu0 }
 0xfed   : >> { %v7137_v31 = vpop.trf.xlu1 }
 0xfee   : >> { %12438 = vmatprep.mubr.msk.bf16.mxu0 %vm6593_vm0, %v7137_v31 }
 0xfef   : >> { %v7154_v33 = vpop.trf.xlu0 }
 0xff0   : >> { %12421 = vmatmul.mubr.msk.bf16.gmra.mxu1 %vm6593_vm0, %v6911_v8  ;;  %v7371_v8 = vld [vmem:[#allocation9 + $0xe0] sm:$0xff] }
 0xff1   : >> { %12424 = vmatprep.mubr.msk.bf16.mxu1 %vm6593_vm0, %v6912_v45  ;;  %v7138_v34 = vpop.trf.xlu1  ;;  %v7400_v45 = vmul.f32 0.9, %v7368_v62  ;;  %v7403_v61 = vmul.f32 0.9, %v7371_v8  ;;  %v7373_v8 = vld [vmem:[#allocation9 + $0x88] sm:$0xff] }
 0xff2   : >> { %12439 = vmatmul.mubr.msk.bf16.gmra.mxu0 %vm6593_vm0, %v7138_v34 }
 0xff3   : >> { %v7155_v10 = vpop.trf.xlu0 }
 0xff5   : >> { %v7139_v54 = vpop.trf.xlu1 }
 0xff6   : >> { %12442 = vmatprep.mubr.msk.bf16.mxu0 %vm6593_vm0, %v7139_v54 }
 0xff7   : >> { %v7156_v6 = vpop.trf.xlu0 }
 0xff8   : >> { %12425 = vmatmul.mubr.msk.bf16.gmra.mxu1 %vm6593_vm0, %v6913_v63 }
 0xff9   : >> { %12428 = vmatprep.mubr.msk.bf16.mxu1 %vm6593_vm0, %v6914_v0  ;;  %v7140_v51 = vpop.trf.xlu1 }
 0xffa   : >> { %12443 = vmatmul.mubr.msk.bf16.gmra.mxu0 %vm6593_vm0, %v7140_v51  ;;  %v7755_v51 = vld [vmem:[#allocation6 + $0x18] sm:$0xff] }
 0xffb   : >> { %v7157_v7 = vpop.trf.xlu0 }
 0xffd   : >> { %v7141_v38 = vpop.trf.xlu1 }
 0xffe   : >> { %12446 = vmatprep.mubr.msk.bf16.mxu0 %vm6593_vm0, %v7141_v38 }
 0xfff   : >> { %v7158_v40 = vpop.trf.xlu0 }
0x1000   : >> { %12429 = vmatmul.mubr.msk.bf16.gmra.mxu1 %vm6593_vm0, %v6915_v53 }
0x1001   : >> { %v7142_v2 = vpop.trf.xlu1  ;;  %12058 = vmatprep.mubr.bf16.mxu1 %v12914_v50 }
0x1002   : >> { %12447 = vmatmul.mubr.msk.bf16.gmra.mxu0 %vm6593_vm0, %v7142_v2  ;;  %v7406_v2 = vmul.f32 0.9, %v7374_v4 }
0x1003   : >> { %12450 = vmatprep.mubr.msk.bf16.mxu0 %vm6593_vm0, %v7151_v41  ;;  %v7401_v41 = vmul.f32 0.9, %v7369_v55 }
0x100a   : >> { %12451 = vmatmul.mubr.msk.bf16.gmra.mxu0 %vm6593_vm0, %v7152_v36  ;;  %v7372_v36 = vld [vmem:[#allocation9 + $0x38] sm:$0xff] }
0x100b   : >> { %12454 = vmatprep.mubr.msk.bf16.mxu0 %vm6593_vm0, %v7153_v46  ;;  %v7404_v17 = vmul.f32 0.9, %v7372_v36 }
0x1012   : >> { %12455 = vmatmul.mubr.msk.bf16.gmra.mxu0 %vm6593_vm0, %v7154_v33 }
0x1013   : >> { %12458 = vmatprep.mubr.msk.bf16.mxu0 %vm6593_vm0, %v7155_v10  ;;  %v7753_v10 = vld [vmem:[#allocation6] sm:$0xff] }
0x101a   : >> { %12459 = vmatmul.mubr.msk.bf16.gmra.mxu0 %vm6593_vm0, %v7156_v6  ;;  %v7375_v6 = vld [vmem:[#allocation9 + $0xb0] sm:$0xff] }
0x101b   : >> { %12462 = vmatprep.mubr.msk.bf16.mxu0 %vm6593_vm0, %v7157_v7 }
0x1022   : >> { %12463 = vmatmul.mubr.msk.bf16.gmra.mxu0 %vm6593_vm0, %v7158_v40 }
0x1023   : >> { %12076 = vmatprep.mubr.bf16.mxu0 %v12914_v50 }
0x1088   : >> { %v12402_v63 = vpop.f32.mrf.mxu1 }
0x1089   : >> { %v7434_v0 = vadd.f32 %v12402_v63, %v7402_v23  ;;  %v7758_v23 = vld [vmem:[#allocation6 + $0x30] sm:$0xff]  ;;  %v7407_v63 = vmul.f32 0.9, %v7375_v6 }
0x108a   : >> { %v6998_v53 = vpop.f32.mrf.mxu1 }
0x108b   : >> { %7658 = vst [vmem:[#allocation9 + $0xc0] sm:$0xff] %v7434_v0  ;;  %v7786_v31 = vsub.f32 %v7754_v27, %v7434_v0  ;;  %v7432_v34 = vadd.f32 %v7400_v45, %v6998_v53  ;;  %v7756_v0 = vld [vmem:[#allocation6 + $0x50] sm:$0xff] }
0x108c   : >> { %v12403_v54 = vpop.f32.mrf.mxu1 }
0x108d   : >> { %7946 = vst [vmem:[#allocation6 + $0xd8] sm:$0xff] %v7786_v31  ;;  %7656 = vst [vmem:[#allocation9 + $0x98] sm:$0xff] %v7432_v34  ;;  %v7784_v38 = vsub.f32 %v7752_v29, %v7432_v34  ;;  %v7435_v46 = vadd.f32 %v12403_v54, %v7403_v61  ;;  %v7378_v61 = vld [vmem:[#allocation9 + $0x50] sm:$0xff]  ;;  %v7405_v34 = vmul.f32 0.9, %v7373_v8  ;;  %v7759_v54 = vld [vmem:[#allocation6 + $0x48] sm:$0xff] }
0x108e   : >> { %v7001_v33 = vpop.f32.mrf.mxu1 }
0x108f   : >> { %7944 = vst [vmem:[#allocation6 + $0xb0] sm:$0xff] %v7784_v38  ;;  %7659 = vst [vmem:[#allocation9 + $0xe0] sm:$0xff] %v7435_v46  ;;  %v7787_v7 = vsub.f32 %v7755_v51, %v7435_v46  ;;  %v7433_v40 = vadd.f32 %v7401_v41, %v7001_v33  ;;  %v7376_v51 = vld [vmem:[#allocation9 + $0xd0] sm:$0xff]  ;;  %v7410_v46 = vmul.f32 0.9, %v7378_v61  ;;  %v7757_v33 = vld [vmem:[#allocation6 + $0x68] sm:$0xff] }
0x1090   : >> { %v12406_v62 = vpop.f32.mrf.mxu1 }
0x1091   : >> { %7947 = vst [vmem:[#allocation6 + $0x18] sm:$0xff] %v7787_v7  ;;  %v8041_v27 = vpack.c.bf16 %v7787_v7, %v7786_v31  ;;  %7657 = vst [vmem:[#allocation9 + $0x48] sm:$0xff] %v7433_v40  ;;  %v7785_v45 = vsub.f32 %v7753_v10, %v7433_v40  ;;  %v7438_v55 = vadd.f32 %v12406_v62, %v7406_v2  ;;  %v7379_v10 = vld [vmem:[#allocation9 + $0x70] sm:$0xff]  ;;  %v7408_v7 = vmul.f32 0.9, %v7376_v51  ;;  %v7377_v62 = vld [vmem:[#allocation9 + $0xe8] sm:$0xff] }
0x1092   : >> { %v7014_v50 = vpop.f32.mrf.mxu1 }
0x1093   : >> { %11816 = vst [vmem:[#allocation12 + $0x8] sm:$0xff] %v8041_v27   ;;  %7945 = vst [vmem:[#allocation6] sm:$0xff] %v7785_v45  ;;  %v8040_v53 = vpack.c.bf16 %v7785_v45, %v7784_v38  ;;  %v7790_v29 = vsub.f32 %v7758_v23, %v7438_v55  ;;  %v7436_v4 = vadd.f32 %v7404_v17, %v7014_v50  ;;  %v7762_v17 = vld [vmem:[#allocation6 + $0xe8] sm:$0xff]  ;;  %v7411_v45 = vmul.f32 0.9, %v7379_v10 }
0x1094   : >> { %7662 = vst [vmem:[#allocation9 + $0xb8] sm:$0xff] %v7438_v55  ;;  %v12407_v41 = vpop.f32.mrf.mxu1  ;;  %v7382_v50 = vld [vmem:[#allocation9 + $0x8] sm:$0xff] }
0x1095   : >> { %11627 = vst [vmem:[#allocation12] sm:$0xff] %v8040_v53   ;;  %7950 = vst [vmem:[#allocation6 + $0x30] sm:$0xff] %v7790_v29  ;;  %v7788_v31 = vsub.f32 %v7756_v0, %v7436_v4  ;;  %v7439_v36 = vadd.f32 %v12407_v41, %v7407_v63  ;;  %v7760_v63 = vld [vmem:[#allocation6 + $0x80] sm:$0xff]  ;;  %v7763_v41 = vld [vmem:[#allocation6 + $0xb8] sm:$0xff] }
0x1096   : >> { %7660 = vst [vmem:[#allocation9 + $0x38] sm:$0xff] %v7436_v4  ;;  %v7017_v2 = vpop.f32.mrf.mxu1  ;;  %v7409_v4 = vmul.f32 0.9, %v7377_v62 }
0x1097   : >> { %7948 = vst [vmem:[#allocation6 + $0x50] sm:$0xff] %v7788_v31  ;;  %7663 = vst [vmem:[#allocation9 + $0xb0] sm:$0xff] %v7439_v36  ;;  %v7791_v6 = vsub.f32 %v7759_v54, %v7439_v36  ;;  %v7437_v38 = vadd.f32 %v7405_v34, %v7017_v2  ;;  %v7414_v36 = vmul.f32 0.9, %v7382_v50  ;;  %v7761_v2 = vld [vmem:[#allocation6 + $0x88] sm:$0xff] }
0x1098   : >> { %v12410_v40 = vpop.f32.mrf.mxu1 }
0x1099   : >> { %7951 = vst [vmem:[#allocation6 + $0x48] sm:$0xff] %v7791_v6  ;;  %v15386_v23 = vpack.c.bf16 %v7791_v6, %v7790_v29  ;;  %7661 = vst [vmem:[#allocation9 + $0x88] sm:$0xff] %v7437_v38  ;;  %v7789_v8 = vsub.f32 %v7757_v33, %v7437_v38  ;;  %v7442_v27 = vadd.f32 %v12410_v40, %v7410_v46  ;;  %v7380_v29 = vld [vmem:[#allocation9 + $0x78] sm:$0xff]  ;;  %v7383_v33 = vld [vmem:[#allocation9 + $0x40] sm:$0xff] }
0x109a   : >> { %v7030_v55 = vpop.f32.mrf.mxu1  ;;  %v7412_v6 = vmul.f32 0.9, %v7380_v29  ;;  %v7381_v40 = vld [vmem:[#allocation9] sm:$0xff]  ;;  %v7767_v29 = vld [vmem:[#allocation6 + $0x78] sm:$0xff] }
0x109b   : >> { %11818 = vst [vmem:[#allocation12 + $0x18] sm:$0xff] %v15386_v23   ;;  %7949 = vst [vmem:[#allocation6 + $0x68] sm:$0xff] %v7789_v8  ;;  %v15389_v0 = vpack.c.bf16 %v7789_v8, %v7788_v31  ;;  %v7794_v61 = vsub.f32 %v7762_v17, %v7442_v27  ;;  %v7440_v53 = vadd.f32 %v7408_v7, %v7030_v55  ;;  %v7766_v7 = vld [vmem:[#allocation6 + $0x8] sm:$0xff]  ;;  %v7764_v55 = vld [vmem:[#allocation6 + $0x60] sm:$0xff] }
0x109c   : >> { %7666 = vst [vmem:[#allocation9 + $0x50] sm:$0xff] %v7442_v27  ;;  %v12411_v34 = vpop.f32.mrf.mxu1  ;;  %v7415_v27 = vmul.f32 0.9, %v7383_v33  ;;  %v7387_v33 = vld [vmem:[#allocation9 + $0xd8] sm:$0xff] }
0x109d   : >> { %11817 = vst [vmem:[#allocation12 + $0x10] sm:$0xff] %v15389_v0   ;;  %7954 = vst [vmem:[#allocation6 + $0xe8] sm:$0xff] %v7794_v61  ;;  %v7792_v54 = vsub.f32 %v7760_v63, %v7440_v53  ;;  %v7443_v51 = vadd.f32 %v12411_v34, %v7411_v45  ;;  %v7386_v63 = vld [vmem:[#allocation9 + $0xa0] sm:$0xff]  ;;  %v7413_v34 = vmul.f32 0.9, %v7381_v40 }
0x109e   : >> { %7664 = vst [vmem:[#allocation9 + $0xd0] sm:$0xff] %v7440_v53  ;;  %v7033_v46 = vpop.f32.mrf.mxu1  ;;  %v7419_v49 = vmul.f32 0.9, %v7387_v33 }
0x109f   : >> { %7952 = vst [vmem:[#allocation6 + $0x80] sm:$0xff] %v7792_v54  ;;  %7667 = vst [vmem:[#allocation9 + $0x70] sm:$0xff] %v7443_v51  ;;  %v7795_v31 = vsub.f32 %v7763_v41, %v7443_v51  ;;  %v7441_v10 = vadd.f32 %v7409_v4, %v7033_v46  ;;  %v7562_v51 = vld [vmem:[#allocation11 + $0x90] sm:$0xff] }
0x10a0   : >> { %v12414_v38 = vpop.f32.mrf.mxu1  ;;  %v7594_v40 = vmul.f32 0.9, %v7562_v51 }
0x10a1   : >> { %7955 = vst [vmem:[#allocation6 + $0xb8] sm:$0xff] %v7795_v31  ;;  %v15392_v17 = vpack.c.bf16 %v7795_v31, %v7794_v61  ;;  %7665 = vst [vmem:[#allocation9 + $0xe8] sm:$0xff] %v7441_v10  ;;  %v7793_v62 = vsub.f32 %v7761_v2, %v7441_v10  ;;  %v7446_v8 = vadd.f32 %v12414_v38, %v7414_v36  ;;  %v7384_v61 = vld [vmem:[#allocation9 + $0x90] sm:$0xff]  ;;  %v7418_v2 = vmul.f32 0.9, %v7386_v63 }
0x10a2   : >> { %v7046_v45 = vpop.f32.mrf.mxu1  ;;  %v7765_v10 = vld [vmem:[#allocation6 + $0xf0] sm:$0xff] }
0x10a3   : >> { %11820 = vst [vmem:[#allocation12 + $0x28] sm:$0xff] %v15392_v17   ;;  %7953 = vst [vmem:[#allocation6 + $0x88] sm:$0xff] %v7793_v62  ;;  %v15395_v50 = vpack.c.bf16 %v7793_v62, %v7792_v54  ;;  %v7798_v53 = vsub.f32 %v7766_v7, %v7446_v8  ;;  %v7444_v4 = vadd.f32 %v7412_v6, %v7046_v45  ;;  %v7560_v54 = vld [vmem:[#allocation11 + $0x58] sm:$0xff]  ;;  %v7416_v7 = vmul.f32 0.9, %v7384_v61 }
0x10a4   : >> { %7670 = vst [vmem:[#allocation9 + $0x8] sm:$0xff] %v7446_v8  ;;  %v12415_v41 = vpop.f32.mrf.mxu1  ;;  %v7385_v62 = vld [vmem:[#allocation9 + $0x18] sm:$0xff]  ;;  %v7563_v8 = vld [vmem:[#allocation11 + $0x10] sm:$0xff]  ;;  %v7592_v63 = vmul.f32 0.9, %v7560_v54  ;;  %v7771_v54 = vld [vmem:[#allocation6 + $0xc8] sm:$0xff] }
0x10a5   : >> { %11819 = vst [vmem:[#allocation12 + $0x20] sm:$0xff] %v15395_v50   ;;  %7958 = vst [vmem:[#allocation6 + $0x8] sm:$0xff] %v7798_v53  ;;  %v7796_v36 = vsub.f32 %v7764_v55, %v7444_v4  ;;  %v7447_v46 = vadd.f32 %v12415_v41, %v7415_v27  ;;  %v7561_v41 = vld [vmem:[#allocation11 + $0x70] sm:$0xff]  ;;  %v7417_v61 = vmul.f32 0.9, %v7385_v62 }
0x10a6   : >> { %7668 = vst [vmem:[#allocation9 + $0x78] sm:$0xff] %v7444_v4  ;;  %v7049_v31 = vpop.f32.mrf.mxu1  ;;  %v7390_v4 = vld [vmem:[#allocation9 + $0x80] sm:$0xff]  ;;  %v7595_v51 = vmul.f32 0.9, %v7563_v8  ;;  %v7593_v59 = vmul.f32 0.9, %v7561_v41 }
0x10a7   : >> { %7956 = vst [vmem:[#allocation6 + $0x60] sm:$0xff] %v7796_v36  ;;  %7671 = vst [vmem:[#allocation9 + $0x40] sm:$0xff] %v7447_v46  ;;  %v7799_v38 = vsub.f32 %v7767_v29, %v7447_v46  ;;  %v7445_v6 = vadd.f32 %v7413_v34, %v7049_v31  ;;  %v7882_v34 = vld [vmem:[#allocation8 + $0xc0] sm:$0xff] }
0x10a8   : >> { %v12418_v45 = vpop.f32.mrf.mxu1 }
0x10a9   : >> { %7959 = vst [vmem:[#allocation6 + $0x78] sm:$0xff] %v7799_v38  ;;  %v15398_v5 = vpack.c.bf16 %v7799_v38, %v7798_v53  ;;  %7669 = vst [vmem:[#allocation9] sm:$0xff] %v7445_v6  ;;  %v7797_v27 = vsub.f32 %v7765_v10, %v7445_v6  ;;  %v7450_v55 = vadd.f32 %v12418_v45, %v7418_v2  ;;  %v7388_v10 = vld [vmem:[#allocation9 + $0x28] sm:$0xff]  ;;  %v7880_v6 = vld [vmem:[#allocation8 + $0xb0] sm:$0xff]  ;;  %v7422_v45 = vmul.f32 0.9, %v7390_v4 }
0x10aa   : >> { %v7062_v44 = vpop.f32.mrf.mxu1  ;;  %v12436_v29 = vpop.f32.mrf.mxu0  ;;  %v7420_v4 = vmul.f32 0.9, %v7388_v10 }
0x10ab   : >> { %11822 = vst [vmem:[#allocation12 + $0x38] sm:$0xff] %v15398_v5   ;;  %7957 = vst [vmem:[#allocation6 + $0xf0] sm:$0xff] %v7797_v27  ;;  %v15401_v46 = vpack.c.bf16 %v7797_v27, %v7796_v36  ;;  %v7802_v53 = vsub.f32 %v7770_v22, %v7450_v55  ;;  %v7448_v33 = vadd.f32 %v7416_v7, %v7062_v44  ;;  %v7566_v22 = vld [vmem:[#allocation11 + $0x48] sm:$0xff]  ;;  %v7564_v7 = vld [vmem:[#allocation11 + $0xa0] sm:$0xff] }
0x10ac   : >> { %7674 = vst [vmem:[#allocation9 + $0xa0] sm:$0xff] %v7450_v55  ;;  %v7626_v31 = vadd.f32 %v12436_v29, %v7594_v40  ;;  %v12419_v2 = vpop.f32.mrf.mxu1  ;;  %v7241_v38 = vpop.f32.mrf.mxu0  ;;  %v7391_v44 = vld [vmem:[#allocation9 + $0xa8] sm:$0xff]  ;;  %v7769_v55 = vld [vmem:[#allocation6 + $0x58] sm:$0xff]  ;;  %v7598_v35 = vmul.f32 0.9, %v7566_v22 }
0x10ad   : >> { %11821 = vst [vmem:[#allocation12 + $0x30] sm:$0xff] %v15401_v46   ;;  %7962 = vst [vmem:[#allocation6 + $0x40] sm:$0xff] %v7802_v53  ;;  %v15404_v62 = vsub.f32 %v7768_v20, %v7448_v33  ;;  %v7451_v8 = vadd.f32 %v12419_v2, %v7419_v49  ;;  %v7624_v27 = vadd.f32 %v7592_v63, %v7241_v38  ;;  %v7881_v49 = vld [vmem:[#allocation8 + $0xb8] sm:$0xff]  ;;  %v7389_v63 = vld [vmem:[#allocation9 + $0x30] sm:$0xff]  ;;  %v7423_v52 = vmul.f32 0.9, %v7391_v44 }
0x10ae   : >> { %7672 = vst [vmem:[#allocation9 + $0x90] sm:$0xff] %v7448_v33  ;;  %7722 = vst [vmem:[#allocation11 + $0x90] sm:$0xff] %v7626_v31  ;;  %v7914_v36 = vsub.f32 %v7882_v34, %v7626_v31  ;;  %v7065_v40 = vpop.f32.mrf.mxu1  ;;  %v12437_v29 = vpop.f32.mrf.mxu0  ;;  %v7567_v31 = vld [vmem:[#allocation11 + $0xe0] sm:$0xff]  ;;  %v7596_v26 = vmul.f32 0.9, %v7564_v7  ;;  %v7392_v7 = vld [vmem:[#allocation9 + $0xf8] sm:$0xff] }
0x10af   : >> { %7960 = vst [vmem:[#allocation6 + $0x38] sm:$0xff] %v15404_v62  ;;  %7675 = vst [vmem:[#allocation9 + $0xd8] sm:$0xff] %v7451_v8  ;;  %v7803_v41 = vsub.f32 %v7771_v54, %v7451_v8  ;;  %v7912_v20 = vsub.f32 %v7880_v6, %v7624_v27  ;;  %v7449_v33 = vadd.f32 %v7417_v61, %v7065_v40  ;;  %v7394_v8 = vld [vmem:[#allocation9 + $0x68] sm:$0xff]  ;;  %v7565_v6 = vld [vmem:[#allocation11] sm:$0xff]  ;;  %v7421_v40 = vmul.f32 0.9, %v7389_v63 }
0x10b0   : >> { %8010 = vst [vmem:[#allocation8 + $0xc0] sm:$0xff] %v7914_v36  ;;  %7720 = vst [vmem:[#allocation11 + $0x58] sm:$0xff] %v7624_v27  ;;  %v7627_v34 = vadd.f32 %v12437_v29, %v7595_v51  ;;  %v12422_v2 = vpop.f32.mrf.mxu1  ;;  %v7244_v38 = vpop.f32.mrf.mxu0  ;;  %v7772_v51 = vld [vmem:[#allocation6 + $0xe0] sm:$0xff]  ;;  %v7599_v29 = vmul.f32 0.9, %v7567_v31  ;;  %v7884_v63 = vld [vmem:[#allocation8 + $0x28] sm:$0xff] }
0x10b1   : >> { %7963 = vst [vmem:[#allocation6 + $0xc8] sm:$0xff] %v7803_v41  ;;  %8008 = vst [vmem:[#allocation8 + $0xb0] sm:$0xff] %v7912_v20  ;;  %v7801_v10 = vsub.f32 %v7769_v55, %v7449_v33  ;;  %v7454_v58 = vadd.f32 %v12422_v2, %v7422_v45  ;;  %v7625_v54 = vadd.f32 %v7593_v59, %v7244_v38  ;;  %v7886_v59 = vld [vmem:[#allocation8 + $0xd0] sm:$0xff]  ;;  %v7426_v31 = vmul.f32 0.9, %v7394_v8  ;;  %v7887_v8 = vld [vmem:[#allocation8 + $0x68] sm:$0xff] }
0x10b2   : >> { %7673 = vst [vmem:[#allocation9 + $0x18] sm:$0xff] %v7449_v33  ;;  %7723 = vst [vmem:[#allocation11 + $0x10] sm:$0xff] %v7627_v34  ;;  %v7915_v16 = vsub.f32 %v7883_v47, %v7627_v34  ;;  %v7078_v61 = vpop.f32.mrf.mxu1  ;;  %v12440_v27 = vpop.f32.mrf.mxu0  ;;  %v15407_v60 = vpack.c.bf16 %v7803_v41, %v7802_v53  ;;  %v7775_v34 = vld [vmem:[#allocation6 + $0xc0] sm:$0xff]  ;;  %v7597_v53 = vmul.f32 0.9, %v7565_v6  ;;  %v7395_v41 = vld [vmem:[#allocation9 + $0x58] sm:$0xff] }
0x10b3   : >> { %7961 = vst [vmem:[#allocation6 + $0x58] sm:$0xff] %v7801_v10  ;;  %7678 = vst [vmem:[#allocation9 + $0x80] sm:$0xff] %v7454_v58  ;;  %v15411_v44 = vsub.f32 %v7774_v19, %v7454_v58  ;;  %v7913_v47 = vsub.f32 %v7881_v49, %v7625_v54  ;;  %v7452_v45 = vadd.f32 %v7420_v4, %v7078_v61  ;;  %v7570_v4 = vld [vmem:[#allocation11 + $0xe8] sm:$0xff]  ;;  %v7568_v49 = vld [vmem:[#allocation11 + $0xf0] sm:$0xff]  ;;  %v7424_v61 = vmul.f32 0.9, %v7392_v7 }
0x10b4   : >> { %8011 = vst [vmem:[#allocation8 + $0x10] sm:$0xff] %v7915_v16  ;;  %v15409_v22 = vpack.c.bf16 %v7915_v16, %v7914_v36  ;;  %7721 = vst [vmem:[#allocation11 + $0x70] sm:$0xff] %v7625_v54  ;;  %v7630_v55 = vadd.f32 %v12440_v27, %v7598_v35  ;;  %v12423_v33 = vpop.f32.mrf.mxu1  ;;  %v7257_v2 = vpop.f32.mrf.mxu0  ;;  %v15415_v16 = vpack.c.bf16 %v7801_v10, %v15404_v62  ;;  %v7773_v62 = vld [vmem:[#allocation6 + $0x90] sm:$0xff]  ;;  %v7427_v7 = vmul.f32 0.9, %v7395_v41 }
0x10b5   : >> { %11824 = vst [vmem:[#allocation12 + $0x48] sm:$0xff] %v15407_v60   ;;  %7966 = vst [vmem:[#allocation6 + $0x70] sm:$0xff] %v15411_v44  ;;  %v15419_v19 = vpack.c.bf16 %v7913_v47, %v7912_v20  ;;  %v15421_v35 = vsub.f32 %v7772_v51, %v7452_v45  ;;  %v7455_v58 = vadd.f32 %v12423_v33, %v7423_v52  ;;  %v7778_v6 = vld [vmem:[#allocation6 + $0x10] sm:$0xff]  ;;  %v7602_v33 = vmul.f32 0.9, %v7570_v4 }
0x10b6   : >> { %11831 = vst [vmem:[#allocation14 + $0x8] sm:$0xff] %v15409_v22   ;;  %8009 = vst [vmem:[#allocation8 + $0xb8] sm:$0xff] %v7913_v47  ;;  %v7628_v36 = vadd.f32 %v7596_v26, %v7257_v2  ;;  %v7918_v38 = vsub.f32 %v7886_v59, %v7630_v55  ;;  %v7081_v54 = vpop.f32.mrf.mxu1  ;;  %v12441_v10 = vpop.f32.mrf.mxu0  ;;  %v7885_v27 = vld [vmem:[#allocation8 + $0x30] sm:$0xff]  ;;  %v7600_v2 = vmul.f32 0.9, %v7568_v49  ;;  %v7890_v49 = vld [vmem:[#allocation8 + $0x48] sm:$0xff] }
0x10b7   : >> { %16291 = vst [vmem:[#allocation73_spill] sm:$0xff] %v15419_v19  ;;  %7676 = vst [vmem:[#allocation9 + $0x28] sm:$0xff] %v7452_v45  ;;  %v7807_v52 = vsub.f32 %v7775_v34, %v7455_v58  ;;  %v7453_v20 = vadd.f32 %v7421_v40, %v7081_v54  ;;  %v7631_v51 = vadd.f32 %v12441_v10, %v7599_v29  ;;  %v7393_v47 = vld [vmem:[#allocation9 + $0xf0] sm:$0xff]  ;;  %v7571_v45 = vld [vmem:[#allocation11 + $0xb8] sm:$0xff] }
0x10b8   : >> { %7726 = vst [vmem:[#allocation11 + $0x48] sm:$0xff] %v7630_v55  ;;  %11823 = vst [vmem:[#allocation12 + $0x40] sm:$0xff] %v15415_v16   ;;  %v7916_v26 = vsub.f32 %v7884_v63, %v7628_v36  ;;  %v12426_v59 = vpop.f32.mrf.mxu1  ;;  %v7260_v55 = vpop.f32.mrf.mxu0  ;;  %v7398_v63 = vld [vmem:[#allocation9 + $0x60] sm:$0xff]  ;;  %v7569_v40 = vld [vmem:[#allocation11 + $0xb0] sm:$0xff]  ;;  %v7425_v10 = vmul.f32 0.9, %v7393_v47 }
0x10b9   : >> { %11707 = vst [vmem:[#allocation14] sm:$0xff] %v15419_v19   ;;  %7964 = vst [vmem:[#allocation6 + $0xe0] sm:$0xff] %v15421_v35  ;;  %v7805_v1 = vsub.f32 %v7773_v62, %v7453_v20  ;;  %v7919_v9 = vsub.f32 %v7887_v8, %v7631_v51  ;;  %v7458_v34 = vadd.f32 %v12426_v59, %v7426_v31  ;;  %v7603_v30 = vmul.f32 0.9, %v7571_v45  ;;  %v7396_v62 = vld [vmem:[#allocation9 + $0x10] sm:$0xff]  ;;  %v7888_v45 = vld [vmem:[#allocation8 + $0x58] sm:$0xff] }
0x10ba   : >> { %7679 = vst [vmem:[#allocation9 + $0xa8] sm:$0xff] %v7455_v58  ;;  %7724 = vst [vmem:[#allocation11 + $0xa0] sm:$0xff] %v7628_v36  ;;  %v7629_v58 = vadd.f32 %v7597_v53, %v7260_v55  ;;  %v7094_v29 = vpop.f32.mrf.mxu1  ;;  %v7776_v36 = vld [vmem:[#allocation6 + $0xa8] sm:$0xff]  ;;  %v12444_v54 = vpop.f32.mrf.mxu0  ;;  %v15427_v39 = vpack.c.bf16 %v7807_v52, %v15411_v44  ;;  %v7430_v59 = vmul.f32 0.9, %v7398_v63  ;;  %v7891_v63 = vld [vmem:[#allocation8 + $0x40] sm:$0xff] }
0x10bb   : >> { %8014 = vst [vmem:[#allocation8 + $0xd0] sm:$0xff] %v7918_v38  ;;  %7967 = vst [vmem:[#allocation6 + $0xc0] sm:$0xff] %v7807_v52  ;;  %v15429_v4 = vpack.c.bf16 %v7919_v9, %v7918_v38  ;;  %v15431_v41 = vsub.f32 %v7778_v6, %v7458_v34  ;;  %v7456_v53 = vadd.f32 %v7424_v61, %v7094_v29  ;;  %v7601_v44 = vmul.f32 0.9, %v7569_v40  ;;  %v7399_v55 = vld [vmem:[#allocation9 + $0xc8] sm:$0xff]  ;;  %v7782_v40 = vld [vmem:[#allocation6 + $0x20] sm:$0xff] }
0x10bc   : >> { %8012 = vst [vmem:[#allocation8 + $0x28] sm:$0xff] %v7916_v26  ;;  %7677 = vst [vmem:[#allocation9 + $0x30] sm:$0xff] %v7453_v20  ;;  %v7917_v31 = vsub.f32 %v7885_v27, %v7629_v58  ;;  %v7634_v8 = vadd.f32 %v12444_v54, %v7602_v33  ;;  %v12427_v20 = vpop.f32.mrf.mxu1  ;;  %v7273_v47 = vpop.f32.mrf.mxu0  ;;  %v7574_v27 = vld [vmem:[#allocation11 + $0x60] sm:$0xff]  ;;  %v7428_v29 = vmul.f32 0.9, %v7396_v62 }
0x10bd   : >> { %7727 = vst [vmem:[#allocation11 + $0xe0] sm:$0xff] %v7631_v51  ;;  %7965 = vst [vmem:[#allocation6 + $0x90] sm:$0xff] %v7805_v1  ;;  %v7779_v51 = vld [vmem:[#allocation6 + $0x28] sm:$0xff]  ;;  %v15441_v6 = vsub.f32 %v7776_v36, %v7456_v53  ;;  %v7459_v61 = vadd.f32 %v12427_v20, %v7427_v7  ;;  %v7632_v52 = vadd.f32 %v7600_v2, %v7273_v47  ;;  %v7572_v33 = vld [vmem:[#allocation11 + $0xc0] sm:$0xff]  ;;  %v7606_v20 = vmul.f32 0.9, %v7574_v27 }
0x10be   : >> { %8015 = vst [vmem:[#allocation8 + $0x68] sm:$0xff] %v7919_v9  ;;  %7682 = vst [vmem:[#allocation9 + $0x68] sm:$0xff] %v7458_v34  ;;  %v15435_v9 = vpack.c.bf16 %v7805_v1, %v15421_v35  ;;  %v15439_v38 = vpack.c.bf16 %v7917_v31, %v7916_v26  ;;  %v7922_v34 = vsub.f32 %v7890_v49, %v7634_v8  ;;  %v7777_v1 = vld [vmem:[#allocation6 + $0xd0] sm:$0xff]  ;;  %v12445_v35 = vpop.f32.mrf.mxu0  ;;  %v7889_v54 = vld [vmem:[#allocation8] sm:$0xff]  ;;  %v7431_v62 = vmul.f32 0.9, %v7399_v55 }
0x10bf   : >> { %7725 = vst [vmem:[#allocation11] sm:$0xff] %v7629_v58  ;;  %11826 = vst [vmem:[#allocation12 + $0x58] sm:$0xff] %v15427_v39   ;;  %v7097_v58 = vpop.f32.mrf.mxu1  ;;  %v7811_v26 = vsub.f32 %v7779_v51, %v7459_v61  ;;  %v7920_v7 = vsub.f32 %v7888_v45, %v7632_v52  ;;  %v7635_v36 = vadd.f32 %v12445_v35, %v7603_v30  ;;  %v7604_v47 = vmul.f32 0.9, %v7572_v33  ;;  %v7573_v45 = vld [vmem:[#allocation11 + $0x98] sm:$0xff]  ;;  %v7780_v30 = vld [vmem:[#allocation6 + $0xa0] sm:$0xff] }
0x10c0   : >> { %11833 = vst [vmem:[#allocation14 + $0x18] sm:$0xff] %v15429_v4   ;;  %7970 = vst [vmem:[#allocation6 + $0x10] sm:$0xff] %v15431_v41  ;;  %v7457_v2 = vadd.f32 %v7425_v10, %v7097_v58 }
0x10c1   : >> { %8013 = vst [vmem:[#allocation8 + $0x30] sm:$0xff] %v7917_v31  ;;  %7680 = vst [vmem:[#allocation9 + $0xf8] sm:$0xff] %v7456_v53  ;;  %v7397_v31 = vld [vmem:[#allocation9 + $0x20] sm:$0xff]  ;;  %v7575_v53 = vld [vmem:[#allocation11 + $0x50] sm:$0xff]  ;;  %v12430_v49 = vpop.f32.mrf.mxu1  ;;  %v7923_v15 = vsub.f32 %v7891_v63, %v7635_v36  ;;  %v15447_v3 = vpack.c.bf16 %v7811_v26, %v15431_v41 }
0x10c2   : >> { %7730 = vst [vmem:[#allocation11 + $0xe8] sm:$0xff] %v7634_v8  ;;  %11825 = vst [vmem:[#allocation12 + $0x50] sm:$0xff] %v15435_v9   ;;  %v7276_v8 = vpop.f32.mrf.mxu0  ;;  %v7809_v19 = vsub.f32 %v7777_v1, %v7457_v2  ;;  %v7462_v51 = vadd.f32 %v12430_v49, %v7430_v59  ;;  %v7429_v58 = vmul.f32 0.9, %v7397_v31  ;;  %v7607_v35 = vmul.f32 0.9, %v7575_v53 }
0x10c3   : >> { %11832 = vst [vmem:[#allocation14 + $0x10] sm:$0xff] %v15439_v38   ;;  %7968 = vst [vmem:[#allocation6 + $0xa8] sm:$0xff] %v15441_v6  ;;  %v7110_v10 = vpop.f32.mrf.mxu1  ;;  %v15449_v27 = vpack.c.bf16 %v7923_v15, %v7922_v34  ;;  %v7894_v59 = vld [vmem:[#allocation8 + $0xe0] sm:$0xff]  ;;  %v7892_v31 = vld [vmem:[#allocation8 + $0x78] sm:$0xff]  ;;  %v7605_v53 = vmul.f32 0.9, %v7573_v45 }
0x10c4   : >> { %7683 = vst [vmem:[#allocation9 + $0x58] sm:$0xff] %v7459_v61  ;;  %7728 = vst [vmem:[#allocation11 + $0xf0] sm:$0xff] %v7632_v52  ;;  %v7633_v61 = vadd.f32 %v7601_v44, %v7276_v8  ;;  %v12448_v52 = vpop.f32.mrf.mxu0  ;;  %v7814_v55 = vsub.f32 %v7782_v40, %v7462_v51  ;;  %v7460_v1 = vadd.f32 %v7428_v29, %v7110_v10  ;;  %v7578_v44 = vld [vmem:[#allocation11 + $0x8] sm:$0xff] }
0x10c5   : >> { %8018 = vst [vmem:[#allocation8 + $0x48] sm:$0xff] %v7922_v34  ;;  %7971 = vst [vmem:[#allocation6 + $0x28] sm:$0xff] %v7811_v26  ;;  %v7638_v63 = vadd.f32 %v12448_v52, %v7606_v20  ;;  %v15453_v41 = vpack.c.bf16 %v7809_v19, %v15441_v6  ;;  %v7576_v26 = vld [vmem:[#allocation11 + $0x20] sm:$0xff]  ;;  %v7781_v20 = vld [vmem:[#allocation6 + $0xf8] sm:$0xff]  ;;  %v7610_v45 = vmul.f32 0.9, %v7578_v44 }
0x10c6   : >> { %8016 = vst [vmem:[#allocation8 + $0x58] sm:$0xff] %v7920_v7  ;;  %7681 = vst [vmem:[#allocation9 + $0xf0] sm:$0xff] %v7457_v2  ;;  %v7921_v33 = vsub.f32 %v7889_v54, %v7633_v61  ;;  %v12431_v2 = vpop.f32.mrf.mxu1  ;;  %v7289_v49 = vpop.f32.mrf.mxu0  ;;  %v7812_v34 = vsub.f32 %v7780_v30, %v7460_v1  ;;  %v7893_v30 = vld [vmem:[#allocation8 + $0xd8] sm:$0xff]  ;;  %v7608_v52 = vmul.f32 0.9, %v7576_v26  ;;  %v7896_v26 = vld [vmem:[#allocation8 + $0xa0] sm:$0xff] }
0x10c7   : >> { %7731 = vst [vmem:[#allocation11 + $0xb8] sm:$0xff] %v7635_v36  ;;  %7969 = vst [vmem:[#allocation6 + $0xd0] sm:$0xff] %v7809_v19  ;;  %v7783_v36 = vld [vmem:[#allocation6 + $0x98] sm:$0xff]  ;;  %v7463_v40 = vadd.f32 %v12431_v2, %v7431_v62  ;;  %v7636_v29 = vadd.f32 %v7604_v47, %v7289_v49  ;;  %v7926_v54 = vsub.f32 %v7894_v59, %v7638_v63  ;;  %v7579_v47 = vld [vmem:[#allocation11 + $0x40] sm:$0xff] }
0x10c8   : >> { %8019 = vst [vmem:[#allocation8 + $0x40] sm:$0xff] %v7923_v15  ;;  %7686 = vst [vmem:[#allocation9 + $0x60] sm:$0xff] %v7462_v51  ;;  %v15456_v15 = vpack.c.bf16 %v7921_v33, %v7920_v7  ;;  %v7113_v8 = vpop.f32.mrf.mxu1  ;;  %v12449_v51 = vpop.f32.mrf.mxu0  ;;  %v7898_v2 = vld [vmem:[#allocation8 + $0xf8] sm:$0xff]  ;;  %v7577_v49 = vld [vmem:[#allocation11 + $0x80] sm:$0xff] }
0x10c9   : >> { %7729 = vst [vmem:[#allocation11 + $0xb0] sm:$0xff] %v7633_v61  ;;  %11828 = vst [vmem:[#allocation12 + $0x68] sm:$0xff] %v15447_v3   ;;  %v7895_v61 = vld [vmem:[#allocation8 + $0x80] sm:$0xff]  ;;  %v7815_v19 = vsub.f32 %v7783_v36, %v7463_v40  ;;  %v7924_v6 = vsub.f32 %v7892_v31, %v7636_v29  ;;  %v7461_v7 = vadd.f32 %v7429_v58, %v7113_v8  ;;  %v7611_v36 = vmul.f32 0.9, %v7579_v47 }
0x10ca   : >> { %11835 = vst [vmem:[#allocation14 + $0x28] sm:$0xff] %v15449_v27   ;;  %7974 = vst [vmem:[#allocation6 + $0x20] sm:$0xff] %v7814_v55  ;;  %v7639_v62 = vadd.f32 %v12449_v51, %v7607_v35  ;;  %v7292_v10 = vpop.f32.mrf.mxu0 }
0x10cb   : >> { %8017 = vst [vmem:[#allocation8] sm:$0xff] %v7921_v33  ;;  %7684 = vst [vmem:[#allocation9 + $0x10] sm:$0xff] %v7460_v1  ;;  %v7813_v33 = vsub.f32 %v7781_v20, %v7461_v7  ;;  %v7637_v59 = vadd.f32 %v7605_v53, %v7292_v10  ;;  %v8055_v44 = vpack.c.bf16 %v7815_v19, %v7814_v55  ;;  %v7582_v53 = vld [vmem:[#allocation11 + $0x68] sm:$0xff]  ;;  %v7609_v20 = vmul.f32 0.9, %v7577_v49  ;;  %v7900_v49 = vld [vmem:[#allocation8 + $0x90] sm:$0xff] }
0x10cc   : >> { %7734 = vst [vmem:[#allocation11 + $0x60] sm:$0xff] %v7638_v63  ;;  %11827 = vst [vmem:[#allocation12 + $0x60] sm:$0xff] %v15453_v41   ;;  %v7927_v1 = vsub.f32 %v7895_v61, %v7639_v62  ;;  %v12452_v63 = vpop.f32.mrf.mxu0  ;;  %v7899_v61 = vld [vmem:[#allocation8 + $0xe8] sm:$0xff] }
0x10cd   : >> { %11834 = vst [vmem:[#allocation14 + $0x20] sm:$0xff] %v15456_v15   ;;  %7972 = vst [vmem:[#allocation6 + $0xa0] sm:$0xff] %v7812_v34  ;;  %v7925_v35 = vsub.f32 %v7893_v30, %v7637_v59  ;;  %v7642_v31 = vadd.f32 %v12452_v63, %v7610_v45  ;;  %12042 = vmatprep.subr.bf16.mxu1 %v8055_v44  ;;  %v7580_v45 = vld [vmem:[#allocation11 + $0xc8] sm:$0xff] }
0x10ce   : >> { %7687 = vst [vmem:[#allocation9 + $0xc8] sm:$0xff] %v7463_v40  ;;  %7732 = vst [vmem:[#allocation11 + $0xc0] sm:$0xff] %v7636_v29  ;;  %v15460_v58 = vpack.c.bf16 %v7927_v1, %v7926_v54  ;;  %v8054_v40 = vpack.c.bf16 %v7813_v33, %v7812_v34  ;;  %v7305_v29 = vpop.f32.mrf.mxu0  ;;  %12043 = vmatpush3.bf16.xpose.msra.mxu1 %v15398_v5  ;;  %v7612_v30 = vmul.f32 0.9, %v7580_v45  ;;  %v7901_v45 = vld [vmem:[#allocation8 + $0x20] sm:$0xff] }
0x10cf   : >> { %8022 = vst [vmem:[#allocation8 + $0xe0] sm:$0xff] %v7926_v54  ;;  %7975 = vst [vmem:[#allocation6 + $0x98] sm:$0xff] %v7815_v19  ;;  %v15464_v55 = vpack.c.bf16 %v7925_v35, %v7924_v6  ;;  %v7930_v8 = vsub.f32 %v7898_v2, %v7642_v31  ;;  %v7640_v54 = vadd.f32 %v7608_v52, %v7305_v29  ;;  %v7614_v19 = vmul.f32 0.9, %v7582_v53 }
0x10d0   : >> { %8020 = vst [vmem:[#allocation8 + $0x78] sm:$0xff] %v7924_v6  ;;  %7685 = vst [vmem:[#allocation9 + $0x20] sm:$0xff] %v7461_v7  ;;  %12044 = vmatprep.subr.bf16.mxu1 %v8054_v40  ;;  %v12453_v51 = vpop.f32.mrf.mxu0  ;;  %v7583_v6 = vld [vmem:[#allocation11 + $0x88] sm:$0xff] }
0x10d1   : >> { %7735 = vst [vmem:[#allocation11 + $0x50] sm:$0xff] %v7639_v62  ;;  %7973 = vst [vmem:[#allocation6 + $0xf8] sm:$0xff] %v7813_v33  ;;  %v7928_v5 = vsub.f32 %v7896_v26, %v7640_v54  ;;  %v7643_v34 = vadd.f32 %v12453_v51, %v7611_v36  ;;  %v7897_v62 = vld [vmem:[#allocation8 + $0x18] sm:$0xff]  ;;  %v7615_v63 = vmul.f32 0.9, %v7583_v6  ;;  %v7585_v6 = vld [vmem:[#allocation11 + $0xd0] sm:$0xff] }
0x10d2   : >> { %8023 = vst [vmem:[#allocation8 + $0x80] sm:$0xff] %v7927_v1  ;;  %7733 = vst [vmem:[#allocation11 + $0x98] sm:$0xff] %v7637_v59  ;;  %v7308_v7 = vpop.f32.mrf.mxu0  ;;  %v7902_v33 = vld [vmem:[#allocation8 + $0x38] sm:$0xff] }
0x10d3   : >> { %11830 = vst [vmem:[#allocation12 + $0x78] sm:$0xff] %v8055_v44   ;;  %11837 = vst [vmem:[#allocation14 + $0x38] sm:$0xff] %v15460_v58   ;;  %v7931_v47 = vsub.f32 %v7899_v61, %v7643_v34  ;;  %v7641_v10 = vadd.f32 %v7609_v20, %v7308_v7  ;;  %v7581_v1 = vld [vmem:[#allocation11 + $0xd8] sm:$0xff] }
0x10d4   : >> { %8021 = vst [vmem:[#allocation8 + $0xd8] sm:$0xff] %v7925_v35  ;;  %7738 = vst [vmem:[#allocation11 + $0x8] sm:$0xff] %v7642_v31  ;;  %v12456_v52 = vpop.f32.mrf.mxu0  ;;  %v7586_v35 = vld [vmem:[#allocation11 + $0x78] sm:$0xff]  ;;  %v7613_v29 = vmul.f32 0.9, %v7581_v1  ;;  %v7904_v1 = vld [vmem:[#allocation8 + $0xa8] sm:$0xff] }
0x10d5   : >> { %11829 = vst [vmem:[#allocation12 + $0x70] sm:$0xff] %v8054_v40   ;;  %11836 = vst [vmem:[#allocation14 + $0x30] sm:$0xff] %v15464_v55   ;;  %v7929_v59 = vsub.f32 %v7897_v62, %v7641_v10  ;;  %v7646_v44 = vadd.f32 %v12456_v52, %v7614_v19  ;;  %v15467_v2 = vpack.c.bf16 %v7931_v47, %v7930_v8  ;;  %v7906_v62 = vld [vmem:[#allocation8 + $0x50] sm:$0xff] }
0x10d6   : >> { %8026 = vst [vmem:[#allocation8 + $0xf8] sm:$0xff] %v7930_v8  ;;  %7736 = vst [vmem:[#allocation11 + $0x20] sm:$0xff] %v7640_v54  ;;  %v7321_v36 = vpop.f32.mrf.mxu0  ;;  %12045 = vmatpush3.bf16.xpose.msra.mxu1 %v15401_v46  ;;  %v7903_v54 = vld [vmem:[#allocation8 + $0x70] sm:$0xff]  ;;  %v7584_v8 = vld [vmem:[#allocation11 + $0x38] sm:$0xff]  ;;  %v7618_v46 = vmul.f32 0.9, %v7586_v35 }
0x10d7   : >> { %8024 = vst [vmem:[#allocation8 + $0xa0] sm:$0xff] %v7928_v5  ;;  %7739 = vst [vmem:[#allocation11 + $0x40] sm:$0xff] %v7643_v34  ;;  %v7934_v31 = vsub.f32 %v7902_v33, %v7646_v44  ;;  %v7644_v40 = vadd.f32 %v7612_v30, %v7321_v36  ;;  %12046 = vmatprep.subr.bf16.mxu1 %v15447_v3  ;;  %v15472_v26 = vpack.c.bf16 %v7929_v59, %v7928_v5  ;;  %v7587_v34 = vld [vmem:[#allocation11 + $0x18] sm:$0xff] }
0x10d8   : >> { %8027 = vst [vmem:[#allocation8 + $0xe8] sm:$0xff] %v7931_v47  ;;  %7737 = vst [vmem:[#allocation11 + $0x80] sm:$0xff] %v7641_v10  ;;  %v12457_v53 = vpop.f32.mrf.mxu0  ;;  %v7616_v7 = vmul.f32 0.9, %v7584_v8  ;;  %v7619_v30 = vmul.f32 0.9, %v7587_v34 }
0x10d9   : >> { %8025 = vst [vmem:[#allocation8 + $0x18] sm:$0xff] %v7929_v59  ;;  %7742 = vst [vmem:[#allocation11 + $0x68] sm:$0xff] %v7646_v44  ;;  %v7932_v20 = vsub.f32 %v7900_v49, %v7644_v40  ;;  %v7647_v51 = vadd.f32 %v12457_v53, %v7615_v63  ;;  %v7590_v59 = vld [vmem:[#allocation11 + $0x30] sm:$0xff]  ;;  %v7617_v36 = vmul.f32 0.9, %v7585_v6  ;;  %v7589_v34 = vld [vmem:[#allocation11 + $0x28] sm:$0xff] }
0x10da   : >> { %11839 = vst [vmem:[#allocation14 + $0x48] sm:$0xff] %v15467_v2   ;;  %8030 = vst [vmem:[#allocation8 + $0x38] sm:$0xff] %v7934_v31  ;;  %v7324_v61 = vpop.f32.mrf.mxu0  ;;  %v7905_v8 = vld [vmem:[#allocation8 + $0xf0] sm:$0xff]  ;;  %v7908_v6 = vld [vmem:[#allocation8 + $0xc8] sm:$0xff] }
0x10db   : >> { %7740 = vst [vmem:[#allocation11 + $0xc8] sm:$0xff] %v7644_v40  ;;  %11838 = vst [vmem:[#allocation14 + $0x40] sm:$0xff] %v15472_v26   ;;  %v7935_v3 = vsub.f32 %v7903_v54, %v7647_v51  ;;  %v7645_v19 = vadd.f32 %v7613_v29, %v7324_v61  ;;  %v7907_v40 = vld [vmem:[#allocation8 + $0x88] sm:$0xff] }
0x10dc   : >> { %8028 = vst [vmem:[#allocation8 + $0x90] sm:$0xff] %v7932_v20  ;;  %7743 = vst [vmem:[#allocation11 + $0x88] sm:$0xff] %v7647_v51  ;;  %v12460_v5 = vpop.f32.mrf.mxu0  ;;  %v7591_v51 = vld [vmem:[#allocation11 + $0xa8] sm:$0xff] }
0x10dd   : >> { %8031 = vst [vmem:[#allocation8 + $0x70] sm:$0xff] %v7935_v3  ;;  %7741 = vst [vmem:[#allocation11 + $0xd8] sm:$0xff] %v7645_v19  ;;  %v7933_v47 = vsub.f32 %v7901_v45, %v7645_v19  ;;  %v7650_v10 = vadd.f32 %v12460_v5, %v7618_v46  ;;  %v15475_v52 = vpack.c.bf16 %v7935_v3, %v7934_v31  ;;  %v7588_v31 = vld [vmem:[#allocation11 + $0xf8] sm:$0xff]  ;;  %v7910_v45 = vld [vmem:[#allocation8 + $0x60] sm:$0xff] }
0x10de   : >> { %v7337_v33 = vpop.f32.mrf.mxu0  ;;  %12047 = vmatpush3.bf16.xpose.msra.mxu1 %v15392_v17  ;;  %v7622_v17 = vmul.f32 0.9, %v7590_v59  ;;  %v7620_v61 = vmul.f32 0.9, %v7588_v31  ;;  %v7911_v59 = vld [vmem:[#allocation8 + $0x8] sm:$0xff] }
0x10df   : >> { %8029 = vst [vmem:[#allocation8 + $0x20] sm:$0xff] %v7933_v47  ;;  %7746 = vst [vmem:[#allocation11 + $0x78] sm:$0xff] %v7650_v10  ;;  %v7938_v44 = vsub.f32 %v7906_v62, %v7650_v10  ;;  %v7648_v63 = vadd.f32 %v7616_v7, %v7337_v33  ;;  %12048 = vmatprep.subr.bf16.mxu1 %v15453_v41  ;;  %v15480_v49 = vpack.c.bf16 %v7933_v47, %v7932_v20 }
0x10e0   : >> { %11841 = vst [vmem:[#allocation14 + $0x58] sm:$0xff] %v15475_v52   ;;  %v12461_v35 = vpop.f32.mrf.mxu0  ;;  %v7623_v7 = vmul.f32 0.9, %v7591_v51 }
0x10e1   : >> { %8034 = vst [vmem:[#allocation8 + $0x50] sm:$0xff] %v7938_v44  ;;  %7744 = vst [vmem:[#allocation11 + $0x38] sm:$0xff] %v7648_v63  ;;  %v7936_v29 = vsub.f32 %v7904_v1, %v7648_v63  ;;  %v7651_v53 = vadd.f32 %v12461_v35, %v7619_v30  ;;  %v7621_v30 = vmul.f32 0.9, %v7589_v34  ;;  %v7909_v35 = vld [vmem:[#allocation8 + $0x98] sm:$0xff] }
0x10e2   : >> { %11840 = vst [vmem:[#allocation14 + $0x50] sm:$0xff] %v15480_v49   ;;  %v7340_v54 = vpop.f32.mrf.mxu0 }
0x10e3   : >> { %8032 = vst [vmem:[#allocation8 + $0xa8] sm:$0xff] %v7936_v29  ;;  %7747 = vst [vmem:[#allocation11 + $0x18] sm:$0xff] %v7651_v53  ;;  %v7939_v41 = vsub.f32 %v7907_v40, %v7651_v53  ;;  %v7649_v46 = vadd.f32 %v7617_v36, %v7340_v54  ;;  %v12947_v53 = vld [vmem:[#allocation12 + $0x8] sm:$0xff]  ;;  %v16323_v54 = vld [vmem:[#allocation57_spill] sm:$0xff] }
0x10e4   : >> { %v12464_v20 = vpop.f32.mrf.mxu0 }
0x10e5   : >> { %8035 = vst [vmem:[#allocation8 + $0x88] sm:$0xff] %v7939_v41  ;;  %7745 = vst [vmem:[#allocation11 + $0xd0] sm:$0xff] %v7649_v46  ;;  %v7937_v3 = vsub.f32 %v7905_v8, %v7649_v46  ;;  %v7654_v19 = vadd.f32 %v12464_v20, %v7622_v17  ;;  %v8085_v5 = vpack.c.bf16 %v7939_v41, %v7938_v44  ;;  %v16322_v17 = vld [vmem:[#allocation59_spill] sm:$0xff] }
0x10e6   : >> { %v7353_v62 = vpop.f32.mrf.mxu0  ;;  %12049 = vmatpush3.bf16.xpose.msra.mxu1 %v15395_v50  ;;  %v16324_v8 = vpack.c.bf16 %v16322_v17, %v16323_v54  ;;  %v12964_v17 = vld [vmem:[#allocation36 + $0x20] sm:$0xff] (%p6152_p2)  }
0x10e7   : >> { %8033 = vst [vmem:[#allocation8 + $0xf0] sm:$0xff] %v7937_v3  ;;  %7750 = vst [vmem:[#allocation11 + $0x30] sm:$0xff] %v7654_v19  ;;  %v7942_v47 = vsub.f32 %v7910_v45, %v7654_v19  ;;  %v7652_v10 = vadd.f32 %v7620_v61, %v7353_v62  ;;  %12050 = vmatprep.subr.bf16.mxu1 %v15427_v39  ;;  %v8084_v33 = vpack.c.bf16 %v7937_v3, %v7936_v29  ;;  %v12965_v54 = vld [vmem:[#allocation36 + $0xa0] sm:$0xff] (%p6152_p2)  }
0x10e8   : >> { %11843 = vst [vmem:[#allocation14 + $0x68] sm:$0xff] %v8085_v5   ;;  %v12465_v1 = vpop.f32.mrf.mxu0 }
0x10e9   : >> { %8038 = vst [vmem:[#allocation8 + $0x60] sm:$0xff] %v7942_v47  ;;  %7748 = vst [vmem:[#allocation11 + $0xf8] sm:$0xff] %v7652_v10  ;;  %v7940_v63 = vsub.f32 %v7908_v6, %v7652_v10  ;;  %v7655_v36 = vadd.f32 %v12465_v1, %v7623_v7 }
0x10ea   : >> { %11842 = vst [vmem:[#allocation14 + $0x60] sm:$0xff] %v8084_v33   ;;  %v7356_v44 = vpop.f32.mrf.mxu0 }
0x10eb   : >> { %8036 = vst [vmem:[#allocation8 + $0xc8] sm:$0xff] %v7940_v63  ;;  %7751 = vst [vmem:[#allocation11 + $0xa8] sm:$0xff] %v7655_v36  ;;  %v7943_v50 = vsub.f32 %v7911_v59, %v7655_v36  ;;  %v7653_v40 = vadd.f32 %v7621_v30, %v7356_v44 }
0x10ed   : >> { %8039 = vst [vmem:[#allocation8 + $0x8] sm:$0xff] %v7943_v50  ;;  %7749 = vst [vmem:[#allocation11 + $0x28] sm:$0xff] %v7653_v40  ;;  %v7941_v31 = vsub.f32 %v7909_v35, %v7653_v40  ;;  %v8087_v39 = vpack.c.bf16 %v7943_v50, %v7942_v47 }
0x10ee   : >> { %12051 = vmatpush3.bf16.xpose.msra.mxu1 %v15386_v23  ;;  %v12948_v23 = vld [vmem:[#allocation12] sm:$0xff] }
0x10ef   : >> { %8037 = vst [vmem:[#allocation8 + $0x98] sm:$0xff] %v7941_v31  ;;  %12052 = vmatprep.subr.bf16.mxu1 %v15435_v9  ;;  %11845 = vst [vmem:[#allocation14 + $0x78] sm:$0xff] %v8087_v39   ;;  %12060 = vmatprep.subr.bf16.mxu0 %v8087_v39  ;;  %v8086_v29 = vpack.c.bf16 %v7941_v31, %v7940_v63  ;;  %v16292_v9 = vpack.c.bf16 %v15332_v42, %v15321_v11 }
0x10f0   : >> { %12061 = vmatpush3.bf16.xpose.msra.mxu0 %v15460_v58  ;;  %v16295_v11 = vpack.c.bf16 %v15305_v25, %v15295_v57  ;;  %v16296_v42 = vpack.c.bf16 %v15290_v48, %v15280_v32  ;;  %v16299_v32 = vpack.c.bf16 %v15265_v12, %v15255_v56  ;;  %v16300_v48 = vld [vmem:[#allocation72_spill] sm:$0xff]  ;;  %v16301_v57 = vld [vmem:[#allocation70_spill] sm:$0xff]  ;;  %v16316_v58 = vld [vmem:[#allocation63_spill] sm:$0xff] }
0x10f1   : >> { %11844 = vst [vmem:[#allocation14 + $0x70] sm:$0xff] %v8086_v29   ;;  %12062 = vmatprep.subr.bf16.mxu0 %v8086_v29  ;;  %v16302_v25 = vpack.c.bf16 %v16300_v48, %v16301_v57  ;;  %v16313_v56 = vld [vmem:[#allocation64_spill] sm:$0xff]  ;;  %v16314_v12 = vld [vmem:[#allocation62_spill] sm:$0xff] }
0x10f2   : > { %v16325_v57 = vld [vmem:[#allocation53_spill] sm:$0xff] (%p6152_p2) }
0x10f6   : >> { %12053 = vmatpush3.bf16.xpose.msra.mxu1 %v15389_v0  ;;  %v16293_v0 = vpack.c.bf16 %v15327_v37, %v15316_v24  ;;  %v16303_v24 = vld [vmem:[#allocation73_spill] sm:$0xff] }
0x10f7   : >> { %12054 = vmatprep.subr.bf16.mxu1 %v15407_v60  ;;  %v12949_v60 = vld [vmem:[%s6168_s7] sm:$0xff]   ;;  %s16372_s7 = sld [smem:[#allocation110_spill]] (%p6152_p2) }
0x10f8   : >> { %12063 = vmatpush3.bf16.xpose.msra.mxu0 %v15464_v55  ;;  %v16317_v55 = vld [vmem:[#allocation61_spill] sm:$0xff] }
0x10f9   : >> { %12064 = vmatprep.subr.bf16.mxu0 %v8085_v5 }
0x10fe   : >> { %12055 = vmatpush3.bf16.xpose.msra.mxu1 %v12947_v53 }
0x10ff   : >> { %12056 = vmatprep.subr.bf16.mxu1 %v15415_v16  ;;  %v16294_v16 = vpack.c.bf16 %v15310_v28, %v15300_v43  ;;  %v16297_v43 = vpack.c.bf16 %v15285_v13, %v15275_v14  ;;  %v16298_v28 = vpack.c.bf16 %v15270_v18, %v15260_v21  ;;  %v16304_v14 = vld [vmem:[#allocation71_spill] sm:$0xff]  ;;  %v16305_v13 = vld [vmem:[#allocation69_spill] sm:$0xff]  ;;  %v16307_v21 = vld [vmem:[#allocation68_spill] sm:$0xff] }
0x1100   : >> { %12065 = vmatpush3.bf16.xpose.msra.mxu0 %v15449_v27  ;;  %v16306_v37 = vpack.c.bf16 %v16304_v14, %v16305_v13  ;;  %v16308_v18 = vld [vmem:[#allocation66_spill] sm:$0xff] }
0x1101   : >> { %12066 = vmatprep.subr.bf16.mxu0 %v8084_v33 }
0x1106   : >> { %12057 = vmatpush3.bf16.xpose.msra.mxu1 %v12948_v23 }
0x1107   : >> { %8598 = vmatprep.subr.bf16.mxu1 %v16292_v9 }
0x1108   : >> { %12067 = vmatpush3.bf16.xpose.msra.mxu0 %v15456_v15  ;;  %v16315_v15 = vpack.c.bf16 %v16313_v56, %v16314_v12  ;;  %v12955_v56 = vld [vmem:[#allocation36 + $0xf0] sm:$0xff] (%p6152_p2)  }
0x1109   : >> { %12068 = vmatprep.subr.bf16.mxu0 %v15475_v52  ;;  %v16320_v52 = vld [vmem:[#allocation58_spill] sm:$0xff]  ;;  %v12956_v12 = vld [vmem:[#allocation36 + $0x30] sm:$0xff] (%p6152_p2)  }
0x110d   : >> { %12059 = vmatmul.mubr.bf16.vlgmr.msra.gmra.mxu1 %v12949_v60 }
0x110e   : >> { %8599 = vmatpush1.bf16.xpose.msra.mxu1 %v16293_v0 }
0x110f   : >> { %8600 = vmatprep.subr.bf16.mxu1 %v16294_v16 }
0x1110   : >> { %12069 = vmatpush3.bf16.xpose.msra.mxu0 %v15429_v4  ;;  %v16310_v4 = vld [vmem:[#allocation67_spill] sm:$0xff] }
0x1111   : >> { %12070 = vmatprep.subr.bf16.mxu0 %v15480_v49 }
0x1116   : >> { %8601 = vmatpush1.bf16.xpose.msra.mxu1 %v16295_v11 }
0x1117   : >> { %8602 = vmatprep.subr.bf16.mxu1 %v16296_v42 }
0x1118   : >> { %12071 = vmatpush3.bf16.xpose.msra.mxu0 %v15439_v38  ;;  %v16311_v38 = vld [vmem:[#allocation65_spill] sm:$0xff] }
0x1119   : >> { %12072 = vmatprep.subr.bf16.mxu0 %v15467_v2  ;;  %v16312_v27 = vpack.c.bf16 %v16310_v4, %v16311_v38  ;;  %v16318_v2 = vpack.c.bf16 %v16316_v58, %v16317_v55  ;;  %v12952_v4 = vld [vmem:[#allocation36 + $0x38] sm:$0xff] (%p6152_p2)   ;;  %v12958_v58 = vld [vmem:[#allocation36 + $0x68] sm:$0xff] (%p6152_p2)  }
0x111a   : > { %v12953_v38 = vld [vmem:[#allocation36 + $0xb8] sm:$0xff] (%p6152_p2)   ;;  %v12959_v55 = vld [vmem:[#allocation36 + $0xe8] sm:$0xff] (%p6152_p2)  }
0x111e   : >> { %8603 = vmatpush1.bf16.xpose.msra.mxu1 %v16297_v43 }
0x111f   : >> { %8604 = vmatprep.subr.bf16.mxu1 %v16298_v28 }
0x1120   : >> { %12073 = vmatpush3.bf16.xpose.msra.mxu0 %v15409_v22  ;;  %v16309_v22 = vpack.c.bf16 %v16307_v21, %v16308_v18  ;;  %v12950_v18 = vld [vmem:[#allocation36 + $0x78] sm:$0xff] (%p6152_p2)  }
0x1121   : >> { %12074 = vmatprep.subr.bf16.mxu0 %v15472_v26  ;;  %v16319_v26 = vld [vmem:[#allocation60_spill] sm:$0xff] }
0x1122   : >> { %v16321_v49 = vpack.c.bf16 %v16319_v26, %v16320_v52  ;;  %v12961_v26 = vld [vmem:[#allocation36 + $0xa8] sm:$0xff] (%p6152_p2)   ;;  %v12962_v52 = vld [vmem:[#allocation36 + $0x60] sm:$0xff] (%p6152_p2)  }
0x1126   : >> { %8605 = vmatpush1.bf16.xpose.msra.mxu1 %v16299_v32 }
0x1127   : >> { %8606 = vmatprep.subr.bf16.mxu1 %v16302_v25 }
0x1128   : >> { %12075 = vmatpush3.bf16.xpose.msra.mxu0 %v16303_v24  ;;  %v16327_v24 = vld [vmem:[#allocation54_spill] sm:$0xff] (%p6152_p2) }
0x1129   : > { %12078 = vmatprep.subr.bf16.mxu0 (%p6152_p2), %v12950_v18 }
0x112e   : >> { %8607 = vmatpush1.bf16.xpose.msra.mxu1 %v16306_v37  ;;  %v16329_v37 = vld [vmem:[#allocation55_spill] sm:$0xff] (%p6152_p2) }
0x112f   : >> { %12077 = vmatmul.mubr.bf16.vlgmr.msra.gmra.mxu0 %v12949_v60  ;;  %8608 = vmatprep.subr.bf16.mxu1 %v16309_v22  ;;  %v12951_v22 = vld [vmem:[#allocation36 + $0xf8] sm:$0xff] (%p6152_p2)  }
0x1130   : > { %12079 = vmatpush3.bf16.xpose.msra.mxu0 (%p6152_p2), %v12952_v4  ;;  %v15594_v4 = vld [vmem:[%s16334_s6] ss:$0 sm:$0xff] (%p6152_p2)  ;;  %s16387_s6 = sld [smem:[#allocation111_spill]] (%p6152_p2) }
0x1136   : >> { %8609 = vmatpush1.bf16.xpose.msra.mxu1 %v16312_v27  ;;  %v12954_v27 = vld [vmem:[#allocation36 + $0x70] sm:$0xff] (%p6152_p2)   ;;  %s16054_s16 = scalar_lea.hbm (%p6152_p2), %s16387_s6, %s11432_s2 }
0x1137   : >> { %8610 = vmatprep.subr.bf16.mxu1 %v16315_v15  ;;  %12080 = vmatprep.subr.bf16.mxu0 (%p6152_p2), %v12954_v27  ;;  %v12957_v15 = vld [vmem:[#allocation36 + $0xb0] sm:$0xff] (%p6152_p2)  }
0x1138   : > { %12081 = vmatpush3.bf16.xpose.msra.mxu0 (%p6152_p2), %v12956_v12 }
0x1139   : > { %12082 = vmatprep.subr.bf16.mxu0 (%p6152_p2), %v12958_v58  ;;  %v15601_v58 = vld [vmem:[#allocation38 + $0xe0] ss:$16 sps:$4 sm:$0xff] (%p6152_p2)  }
0x113e   : >> { %8611 = vmatpush1.bf16.xpose.msra.mxu1 %v16318_v2  ;;  %v12960_v2 = vld [vmem:[#allocation36 + $0x28] sm:$0xff] (%p6152_p2)  }
0x113f   : >> { %8612 = vmatprep.subr.bf16.mxu1 %v16321_v49  ;;  %v12963_v49 = vld [vmem:[#allocation36 + $0xe0] sm:$0xff] (%p6152_p2)  }
0x1140   : > { %12083 = vmatpush3.bf16.xpose.msra.mxu0 (%p6152_p2), %v12960_v2  ;;  %v15605_v2 = vld [vmem:[#allocation38 + $0xec] ss:$16 sps:$4 sm:$0xff] (%p6152_p2)  }
0x1141   : > { %12084 = vmatprep.subr.bf16.mxu0 (%p6152_p2), %v12962_v52  ;;  %v12993_v52 = vld [vmem:[#allocation38 + $0xcc] ss:$16 sps:$4 sm:$0xff] (%p6152_p2)  }
0x1146   : >> { %8613 = vmatpush1.bf16.xpose.msra.mxu1 %v16324_v8  ;;  %v12966_v8 = vld [vmem:[#allocation36 + $0x58] sm:$0xff] (%p6152_p2)  }
0x1147   : > { %12096 = vmatprep.subr.bf16.mxu1 (%p6152_p2), %v12951_v22 }
0x1148   : > { %12085 = vmatpush3.bf16.xpose.msra.mxu0 (%p6152_p2), %v12964_v17  ;;  %v12991_v17 = vld [vmem:[#allocation38 + $0xc8] ss:$16 sps:$4 sm:$0xff] (%p6152_p2)  }
0x1149   : > { %12086 = vmatprep.subr.bf16.mxu0 (%p6152_p2), %v12966_v8  ;;  %v15613_v8 = vld [vmem:[#allocation38 + $0xac] ss:$16 sps:$4 sm:$0xff] (%p6152_p2)  }
0x11cd   : >> { %v8512_v51 = vpop.f32.mrf.mxu1 }
0x11ce   : >> { %v11118_v41 = vmul.f32 -1.442695, %v8512_v51 }
0x11cf   : >> { %v8514_v46 = vpop.f32.mrf.mxu1 }
0x11d0   : >> { %12931 = vpow2.f32 %v11118_v41  ;;  %v11119_v61 = vmul.f32 -1.442695, %v8514_v46 }
0x11d1   : >> { %v8516_v20 = vpop.f32.mrf.mxu1 }
0x11d2   : >> { %12933 = vpow2.f32 %v11119_v61  ;;  %v11120_v45 = vmul.f32 -1.442695, %v8516_v20 }
0x11d3   : >> { %v8518_v34 = vpop.f32.mrf.mxu1 }
0x11d4   : >> { %12935 = vpow2.f32 %v11120_v45  ;;  %v11121_v3 = vmul.f32 -1.442695, %v8518_v34 }
0x11d6   : >> { %12937 = vpow2.f32 %v11121_v3 }
0x11dd   : >> { %v12932_v19 = vpop.eup %12931 }
0x11de   : >> { %v8576_v5 = vadd.f32 1.0, %v12932_v19 }
0x11df   : >> { %v12934_v7 = vpop.eup %12933 }
0x11e0   : >> { %v8577_v62 = vadd.f32 1.0, %v12934_v7 }
0x11e1   : >> { %v12936_v6 = vpop.eup %12935 }
0x11e2   : >> { %12939 = vrcp.f32 %v8577_v62  ;;  %v8578_v47 = vadd.f32 1.0, %v12936_v6  ;;  %v12968_v6 = vld [vmem:[#allocation36 + $0x18] sm:$0xff] (%p6152_p2)  }
0x11e3   : >> { %v12938_v10 = vpop.eup %12937  ;;  %12941 = vrcp.f32 %v8576_v5  ;;  %v16331_v5 = vld [vmem:[#allocation56_spill] sm:$0xff] (%p6152_p2)  ;;  %12087 = vmatpush3.bf16.xpose.msra.mxu0 (%p6152_p2), %v12968_v6 }
0x11e4   : >> { %12943 = vrcp.f32 %v8578_v47  ;;  %v8579_v30 = vadd.f32 1.0, %v12938_v10  ;;  %v12969_v47 = vld [vmem:[#allocation36 + $0x98] sm:$0xff] (%p6152_p2)   ;;  %v12970_v10 = vld [vmem:[#allocation36 + $0x50] sm:$0xff] (%p6152_p2)  }
0x11e5   : > { %12088 = vmatprep.subr.bf16.mxu0 (%p6152_p2), %v12970_v10  ;;  %v15649_v6 = vld [vmem:[#allocation38 + $0x4c] ss:$16 sps:$4 sm:$0xff] (%p6152_p2)   ;;  %v15653_v10 = vld [vmem:[#allocation38 + $0x48] ss:$16 sps:$4 sm:$0xff] (%p6152_p2)  }
0x11e6   : >> { %12945 = vrcp.f32 %v8579_v30  ;;  %v12971_v30 = vld [vmem:[#allocation36 + $0xd0] sm:$0xff] (%p6152_p2)   ;;  %16343 = vst [vmem:[#allocation82_spill] sm:$0xff] (%p6152_p2), %v15649_v6  ;;  %16345 = vst [vmem:[#allocation84_spill] sm:$0xff] (%p6152_p2), %v15653_v10 }
0x11ef   : >> { %v12940_v33 = vpop.eup %12939  ;;  %v8555_v1 = vpop.f32.mrf.mxu0 }
0x11f0   : >> { %v12942_v59 = vpop.eup %12941  ;;  %v8589_v44 = vmul.f32 %v12940_v33, %v8514_v46  ;;  %v12972_v33 = vld [vmem:[#allocation36 + $0x10] sm:$0xff] (%p6152_p2)  }
0x11f1   : >> { %v12944_v63 = vpop.eup %12943  ;;  %v8557_v36 = vpop.f32.mrf.mxu0  ;;  %v8588_v40 = vmul.f32 %v12942_v59, %v8512_v51  ;;  %v12967_v51 = vld [vmem:[#allocation36 + $0xd8] sm:$0xff] (%p6152_p2)   ;;  %12089 = vmatpush3.bf16.xpose.msra.mxu0 (%p6152_p2), %v12972_v33  ;;  %v12974_v59 = vld [vmem:[#allocation36 + $0x48] sm:$0xff] (%p6152_p2)  }
0x11f2   : >> { %v8590_v35 = vmul.f32 %v12944_v63, %v8516_v20  ;;  %v8593_v23 = vmul.f32 %v8589_v44, %v8557_v36  ;;  %v12975_v63 = vld [vmem:[#allocation36 + $0xc8] sm:$0xff] (%p6152_p2)   ;;  %12090 = vmatprep.subr.bf16.mxu0 (%p6152_p2), %v12974_v59 }
0x11f3   : >> { %v12946_v50 = vpop.eup %12945  ;;  %v8559_v31 = vpop.f32.mrf.mxu0  ;;  %v8592_v60 = vmul.f32 %v8588_v40, %v8555_v1  ;;  %v12973_v1 = vld [vmem:[#allocation36 + $0x90] sm:$0xff] (%p6152_p2)   ;;  %v15661_v33 = vld [vmem:[#allocation38 + $0x2c] ss:$16 sps:$4 sm:$0xff] (%p6152_p2)   ;;  %v15665_v59 = vld [vmem:[#allocation38 + $0x28] ss:$16 sps:$4 sm:$0xff] (%p6152_p2)  }
0x11f4   : >> { %v8591_v39 = vmul.f32 %v12946_v50, %v8518_v34  ;;  %v8594_v29 = vmul.f32 %v8590_v35, %v8559_v31  ;;  %v12976_v35 = vld [vmem:[#allocation36 + $0x8] sm:$0xff] (%p6152_p2)   ;;  %v12978_v31 = vld [vmem:[#allocation36 + $0x40] sm:$0xff] (%p6152_p2)   ;;  %16347 = vst [vmem:[#allocation86_spill] sm:$0xff] (%p6152_p2), %v15661_v33  ;;  %16349 = vst [vmem:[#allocation88_spill] sm:$0xff] (%p6152_p2), %v15665_v59 }
0x11f5   : >> { %v8561_v53 = vpop.f32.mrf.mxu0  ;;  %v12977_v50 = vld [vmem:[#allocation36 + $0x88] sm:$0xff] (%p6152_p2)  }
0x11f6   : >> { %v8595_v9 = vmul.f32 %v8591_v39, %v8561_v53  ;;  %v8596_v16 = vpack.c.bf16 %v8594_v29, %v8592_v60  ;;  %v12979_v39 = vld [vmem:[#allocation36 + $0xc0] sm:$0xff] (%p6152_p2)  }
0x11f7   : > { %v12980_v53 = vld [vmem:[#allocation36] sm:$0xff] (%p6152_p2)  }
0x11f8   : >> { %v8597_v0 = vpack.c.bf16 %v8595_v9, %v8593_v23  ;;  %v12981_v23 = vld [vmem:[#allocation36 + $0x80] sm:$0xff] (%p6152_p2)  }
0x11f9   : > { %12091 = vmatpush3.bf16.xpose.msra.mxu0 (%p6152_p2), %v12976_v35  ;;  %v15677_v35 = vld [vmem:[#allocation38 + $0x8] ss:$16 sps:$4 sm:$0xff] (%p6152_p2)  }
0x11fa   : >> { %8630 = vmatprep.mubr.bf16.mxu1 %v8597_v0  ;;  %12092 = vmatprep.subr.bf16.mxu0 (%p6152_p2), %v12978_v31  ;;  %16353 = vst [vmem:[#allocation92_spill] sm:$0xff] (%p6152_p2), %v15677_v35  ;;  %v13031_v31 = vld [vmem:[#allocation36 + $0xf8] sm:$0xff] (%p6152_p2)  }
0x11fb   : >> { %8631 = vmatmul.mubr.bf16.vlgmr.msra.gmra.mxu1 %v8596_v16 }
0x11fc   : > { %12097 = vmatpush3.bf16.xpose.msra.mxu1 (%p6152_p2), %v12953_v38 }
0x11fd   : > { %12098 = vmatprep.subr.bf16.mxu1 (%p6152_p2), %v12955_v56 }
0x1201   : > { %12093 = vmatpush3.bf16.xpose.msra.mxu0 (%p6152_p2), %v12980_v53 }
0x1204   : > { %12099 = vmatpush3.bf16.xpose.msra.mxu1 (%p6152_p2), %v12957_v15  ;;  %v15599_v15 = vld [vmem:[#allocation38 + $0xe4] ss:$16 sps:$4 sm:$0xff] (%p6152_p2)  }
0x1205   : > { %12100 = vmatprep.subr.bf16.mxu1 (%p6152_p2), %v12959_v55  ;;  %v15603_v55 = vld [vmem:[#allocation38 + $0xe8] ss:$16 sps:$4 sm:$0xff] (%p6152_p2)   ;;  %9500 = vmatprep.subr.bf16.mxu0 (%p6152_p2), %v15599_v15 }
0x120c   : > { %12101 = vmatpush3.bf16.xpose.msra.mxu1 (%p6152_p2), %v12961_v26  ;;  %v12990_v26 = vld [vmem:[#allocation38 + $0xc4] ss:$16 sps:$4 sm:$0xff] (%p6152_p2)  }
0x120d   : > { %12102 = vmatprep.subr.bf16.mxu1 (%p6152_p2), %v12963_v49  ;;  %v12988_v49 = vld [vmem:[#allocation38 + $0xc0] ss:$16 sps:$4 sm:$0xff] (%p6152_p2)  }
0x1214   : > { %12103 = vmatpush3.bf16.xpose.msra.mxu1 (%p6152_p2), %v12965_v54  ;;  %v15611_v54 = vld [vmem:[#allocation38 + $0xa4] ss:$16 sps:$4 sm:$0xff] (%p6152_p2)  }
0x1215   : > { %12104 = vmatprep.subr.bf16.mxu1 (%p6152_p2), %v12967_v51  ;;  %v15615_v51 = vld [vmem:[#allocation38 + $0xa0] ss:$16 sps:$4 sm:$0xff] (%p6152_p2)  }
0x121c   : > { %12105 = vmatpush3.bf16.xpose.msra.mxu1 (%p6152_p2), %v12969_v47  ;;  %v15651_v47 = vld [vmem:[#allocation38 + $0x40] ss:$16 sps:$4 sm:$0xff] (%p6152_p2)  }
0x121d   : > { %12106 = vmatprep.subr.bf16.mxu1 (%p6152_p2), %v12971_v30  ;;  %16344 = vst [vmem:[#allocation83_spill] sm:$0xff] (%p6152_p2), %v15651_v47  ;;  %v15659_v30 = vld [vmem:[#allocation38 + $0x24] ss:$16 sps:$4 sm:$0xff] (%p6152_p2)  }
0x121e   : > { %16346 = vst [vmem:[#allocation85_spill] sm:$0xff] (%p6152_p2), %v15659_v30 }
0x1224   : > { %12107 = vmatpush3.bf16.xpose.msra.mxu1 (%p6152_p2), %v12973_v1  ;;  %v15663_v1 = vld [vmem:[#allocation38 + $0x20] ss:$16 sps:$4 sm:$0xff] (%p6152_p2)  }
0x1225   : > { %12108 = vmatprep.subr.bf16.mxu1 (%p6152_p2), %v12975_v63  ;;  %16348 = vst [vmem:[#allocation87_spill] sm:$0xff] (%p6152_p2), %v15663_v1  ;;  %v15671_v63 = vld [vmem:[#allocation38 + $0x4] ss:$16 sps:$4 sm:$0xff] (%p6152_p2)  }
0x1226   : > { %16350 = vst [vmem:[#allocation89_spill] sm:$0xff] (%p6152_p2), %v15671_v63 }
0x122c   : > { %12109 = vmatpush3.bf16.xpose.msra.mxu1 (%p6152_p2), %v12977_v50  ;;  %v13030_v50 = vld [vmem:[#allocation36 + $0x78] sm:$0xff] (%p6152_p2)  }
0x122d   : > { %12110 = vmatprep.subr.bf16.mxu1 (%p6152_p2), %v12979_v39  ;;  %v8781_v39 = vld [vmem:[%s16354_s8] sm:$0xf] (%p6152_p2) }
0x1234   : > { %12111 = vmatpush3.bf16.xpose.msra.mxu1 (%p6152_p2), %v12981_v23  ;;  %v16356_v23 = vld [vmem:[#allocation50_spill] sm:$0xff] (%p6152_p2) }
0x1235   : > { %9541 = vmatprep.subr.bf16.mxu1 (%p6152_p2), %v15605_v2 }
0x12bb   : >> { %v8632_v11 = vpop.f32.mrf.mxu1 }
0x12bc   : >> { %8640 = vst [vmem:[%s8639_s14] sm:$0xff] %v8632_v11 }
0x12bd   : >> { %v8634_v42 = vpop.f32.mrf.mxu1  ;;  %6154 = sbr.rel (!%p6152_p2) target bundleno = 3364 (0xd24), region = 228 }
0x12bf   : >> { %v8635_v43 = vpop.f32.mrf.mxu1 }
0x12c0   : >> { %8641 = vst [vmem:[%s8639_s14 + $0x8] sm:$0xff] %v8635_v43 }
0x12c1   : >> { %v8637_v28 = vpop.f32.mrf.mxu1 }
0x12c7   : > { %v8642_v32 = vld [vmem:[#allocation5] sm:$0xff]  ;;  %v8643_v48 = vld [vmem:[#allocation5 + $0x8] sm:$0xff]  ;;  %v8644_v13 = vld [vmem:[#allocation5 + $0x10] sm:$0xff] }
0x12c8   : > { %v15558_v25 = vadd.f32 %v8642_v32, %v16325_v57  ;;  %v15562_v14 = vadd.f32 %v8643_v48, %v16327_v24  ;;  %v15566_v21 = vadd.f32 %v8644_v13, %v16329_v37  ;;  %v8645_v19 = vld [vmem:[#allocation5 + $0x18] sm:$0xff]  ;;  %v15588_v13 = vld [vmem:[%s16333_s12] ss:$0 sm:$0xff]  ;;  %s10470_s12 = sshll.u32 %s15095_s0, 4  ;;  %s16056_s12 = int_to_ptr.vmem [resolvable:$true] %s10470_s12 }
0x12c9   : > { %v15572_v62 = vadd.f32 %v8645_v19, %v16331_v5  ;;  %v15639_v19 = vld [vmem:[#allocation38 + $0x60] ss:$16 sps:$4 sm:$0xff]   ;;  %v15647_v5 = vld [vmem:[#allocation38 + $0x44] ss:$16 sps:$4 sm:$0xff]   ;;  %s13532_s29 = scalar_lea.vmem %s16056_s12, 512  ;;  %p13539_p13 = scmp.lt.s32.totalorder %s16056_s12, %s13537_s24 }
0x12ca   : > { %16326 = vst [vmem:[#allocation53_spill] sm:$0xff] %v15558_v25  ;;  %8650 = vadd.xlane.f32.xlu0 %v15558_v25  ;;  %16328 = vst [vmem:[#allocation54_spill] sm:$0xff] %v15562_v14  ;;  %p13533_p5 = scmp.ne.s32.totalorder %s16056_s12, %s13532_s29 }
0x12cb   : > { %16330 = vst [vmem:[#allocation55_spill] sm:$0xff] %v15566_v21  ;;  %16332 = vst [vmem:[#allocation56_spill] sm:$0xff] %v15572_v62 }
0x12cc   : > { %16340 = vst [vmem:[#allocation79_spill] sm:$0xff] %v15639_v19  ;;  %16342 = vst [vmem:[#allocation81_spill] sm:$0xff] %v15647_v5  ;;  %p13534_p11 = pnand %p13533_p5, %p16389_p8 }
0x12ce   : > { %8652 = vadd.xlane.f32.xlu0 %v15562_v14  ;;  %p13535_p12 = pneg %p13534_p11 }
0x12d2   : > { %8654 = vadd.xlane.f32.xlu0 %v15566_v21 }
0x1353   : > { %v8651_v41 = vpop.xlane.xlu0 %8650 }
0x1354   : > { %v8658_v46 = vmul.f32 0.0078125, %v8651_v41  ;;  %v15617_v41 = vld [vmem:[#allocation38 + $0xa8] ss:$16 sps:$4 sm:$0xff]  }
0x1356   : > { %v8662_v61 = vsub.f32 %v15558_v25, %v8658_v46  ;;  %v15623_v46 = vld [vmem:[#allocation38 + $0x84] ss:$16 sps:$4 sm:$0xff]  }
0x1357   : > { %v8653_v20 = vpop.xlane.xlu0 %8652 }
0x1358   : > { %v8659_v45 = vmul.f32 0.0078125, %v8653_v20  ;;  %v8666_v34 = vmul.f32 %v8662_v61, %v8662_v61  ;;  %v15627_v20 = vld [vmem:[#allocation38 + $0x80] ss:$16 sps:$4 sm:$0xff]  }
0x1359   : > { %16336 = vst [vmem:[#allocation75_spill] sm:$0xff] %v15627_v20 }
0x135a   : > { %v8663_v3 = vsub.f32 %v15562_v14, %v8659_v45  ;;  %8670 = vadd.xlane.f32.xlu1 %v8666_v34  ;;  %v15629_v45 = vld [vmem:[#allocation38 + $0x88] ss:$16 sps:$4 sm:$0xff]   ;;  %v15635_v34 = vld [vmem:[#allocation38 + $0x64] ss:$16 sps:$4 sm:$0xff]  }
0x135b   : > { %v8655_v36 = vpop.xlane.xlu0 %8654  ;;  %16337 = vst [vmem:[#allocation76_spill] sm:$0xff] %v15629_v45  ;;  %16338 = vst [vmem:[#allocation77_spill] sm:$0xff] %v15635_v34 }
0x135c   : > { %v8667_v7 = vmul.f32 %v8663_v3, %v8663_v3  ;;  %v8660_v44 = vmul.f32 0.0078125, %v8655_v36  ;;  %v15673_v36 = vld [vmem:[#allocation38 + $0xc] ss:$16 sps:$4 sm:$0xff]  }
0x135d   : > { %16351 = vst [vmem:[#allocation90_spill] sm:$0xff] %v15673_v36 }
0x135e   : > { %8672 = vadd.xlane.f32.xlu1 %v8667_v7  ;;  %v15576_v40 = vsub.f32 %v15566_v21, %v8660_v44  ;;  %v15641_v7 = vld [vmem:[#allocation38 + $0x68] ss:$16 sps:$4 sm:$0xff]   ;;  %v15675_v44 = vld [vmem:[#allocation38] ss:$16 sps:$4 sm:$0xff]  }
0x135f   : > { %16341 = vst [vmem:[#allocation80_spill] sm:$0xff] %v15641_v7  ;;  %16352 = vst [vmem:[#allocation91_spill] sm:$0xff] %v15675_v44 }
0x1360   : > { %v8668_v29 = vmul.f32 %v15576_v40, %v15576_v40 }
0x1362   : > { %8656 = vadd.xlane.f32.xlu1 %v15572_v62  ;;  %8674 = vadd.xlane.f32.xlu0 %v8668_v29  ;;  %v16355_v29 = vld [vmem:[#allocation49_spill] sm:$0xff] }
0x1363   : > { %v16170_v53 = vsub.s32 3, %v16355_v29 }
0x13e3   : > { %v8671_v9 = vpop.xlane.xlu1 %8670 }
0x13e4   : > { %v8678_v60 = vmul.f32 0.0078125, %v8671_v9  ;;  %v8786_v9 = vrot.slane %v8781_v39, %v16356_v23 }
0x13e6   : > { %v8682_v0 = vadd.f32 1e-05, %v8678_v60  ;;  %v16357_v60 = vld [vmem:[#allocation52_spill] sm:$0xff] }
0x13e7   : > { %v8673_v16 = vpop.xlane.xlu1 %8672 }
0x13e8   : > { %13068 = vrsqrt.f32 %v8682_v0  ;;  %v8679_v11 = vmul.f32 0.0078125, %v8673_v16  ;;  %v8794_v0 = vrot.slane %v8781_v39, %v16357_v60 }
0x13ea   : > { %v8683_v42 = vadd.f32 1e-05, %v8679_v11 }
0x13eb   : > { %v8657_v43 = vpop.xlane.xlu1 %8656 }
0x13ec   : > { %13070 = vrsqrt.f32 %v8683_v42  ;;  %v8661_v28 = vmul.f32 0.0078125, %v8657_v43  ;;  %v16358_v42 = vld [vmem:[#allocation51_spill] sm:$0xff] }
0x13ed   : > { %v8790_v43 = vrot.slane %v8781_v39, %v16358_v42 }
0x13ee   : > { %v15581_v32 = vsub.f32 %v15572_v62, %v8661_v28  ;;  %v8798_v28 = vrot.slane %v8781_v39, %v16170_v53 }
0x13f0   : > { %v8669_v48 = vmul.f32 %v15581_v32, %v15581_v32 }
0x13f2   : > { %8676 = vadd.xlane.f32.xlu1 %v8669_v48 }
0x13f5   : > { %v13069_v57 = vpop.eup %13068 }
0x13f6   : > { %v8690_v24 = vmul.f32 %v13069_v57, %v8662_v61  ;;  %v15625_v61 = vld [vmem:[#allocation38 + $0x8c] ss:$16 sps:$4 sm:$0xff]  }
0x13f7   : > { %16335 = vst [vmem:[#allocation74_spill] sm:$0xff] %v15625_v61 }
0x13f8   : > { %v8701_v22 = vmul.f32 %v15588_v13, %v8690_v24 }
0x13f9   : > { %v13071_v37 = vpop.eup %13070 }
0x13fa   : > { %v8691_v18 = vmul.f32 %v13071_v37, %v8663_v3  ;;  %v8712_v27 = vadd.f32 %v15594_v4, %v8701_v22  ;;  %v15637_v3 = vld [vmem:[#allocation38 + $0x6c] ss:$16 sps:$4 sm:$0xff]  }
0x13fb   : > { %16339 = vst [vmem:[#allocation78_spill] sm:$0xff] %v15637_v3 }
0x13fc   : > { %v8702_v38 = vmul.f32 %v15588_v13, %v8691_v18 }
0x13fe   : > { %v8713_v56 = vadd.f32 %v15594_v4, %v8702_v38 }
0x1400   : > { %v8780_v12 = vpack.c.bf16 %v8713_v56, %v8712_v27 }
0x1402   : > { %12094 = vmatprep.mubr.bf16.mxu0 %v8780_v12  ;;  %12112 = vmatprep.mubr.bf16.mxu1 %v8780_v12 }
0x1403   : > { %12095 = vmatmul.mubr.bf16.vlgmr.msra.gmra.mxu0 %v8780_v12  ;;  %12113 = vmatmul.mubr.bf16.vlgmr.msra.gmra.mxu1 %v8780_v12 }
0x1404   : > { %9501 = vmatpush1.bf16.xpose.msra.mxu0 %v15601_v58  ;;  %9542 = vmatpush1.bf16.xpose.msra.mxu1 %v15603_v55 }
0x1405   : > { %9502 = vmatprep.subr.bf16.mxu0 %v12990_v26  ;;  %9543 = vmatprep.subr.bf16.mxu1 %v12993_v52 }
0x140c   : > { %9503 = vmatpush1.bf16.xpose.msra.mxu0 %v12988_v49  ;;  %9544 = vmatpush1.bf16.xpose.msra.mxu1 %v12991_v17 }
0x140d   : > { %9504 = vmatprep.subr.bf16.mxu0 %v15611_v54  ;;  %9545 = vmatprep.subr.bf16.mxu1 %v15613_v8 }
0x1414   : > { %9505 = vmatpush1.bf16.xpose.msra.mxu0 %v15615_v51  ;;  %9546 = vmatpush1.bf16.xpose.msra.mxu1 %v15617_v41 }
0x1415   : > { %9506 = vmatprep.subr.bf16.mxu0 %v15623_v46  ;;  %9547 = vmatprep.subr.bf16.mxu1 %v15625_v61 }
0x141c   : > { %9507 = vmatpush1.bf16.xpose.msra.mxu0 %v15627_v20  ;;  %9548 = vmatpush1.bf16.xpose.msra.mxu1 %v15629_v45 }
0x141d   : > { %9508 = vmatprep.subr.bf16.mxu0 %v15635_v34  ;;  %9549 = vmatprep.subr.bf16.mxu1 %v15637_v3 }
0x1424   : > { %9509 = vmatpush1.bf16.xpose.msra.mxu0 %v15639_v19  ;;  %9550 = vmatpush1.bf16.xpose.msra.mxu1 %v15641_v7 }
0x1425   : > { %9510 = vmatprep.subr.bf16.mxu0 %v15647_v5  ;;  %9551 = vmatprep.subr.bf16.mxu1 %v15649_v6 }
0x142c   : > { %9511 = vmatpush1.bf16.xpose.msra.mxu0 %v15651_v47  ;;  %9552 = vmatpush1.bf16.xpose.msra.mxu1 %v15653_v10 }
0x142d   : > { %9512 = vmatprep.subr.bf16.mxu0 %v15659_v30  ;;  %9553 = vmatprep.subr.bf16.mxu1 %v15661_v33 }
0x1434   : > { %9513 = vmatpush1.bf16.xpose.msra.mxu0 %v15663_v1  ;;  %9554 = vmatpush1.bf16.xpose.msra.mxu1 %v15665_v59 }
0x1435   : > { %9514 = vmatprep.subr.bf16.mxu0 %v15671_v63  ;;  %9555 = vmatprep.subr.bf16.mxu1 %v15673_v36 }
0x143c   : > { %9515 = vmatpush1.bf16.xpose.msra.mxu0 %v15675_v44  ;;  %9556 = vmatpush1.bf16.xpose.msra.mxu1 %v15677_v35 }
0x143d   : > { %12114 = vmatprep.subr.bf16.mxu0 %v13030_v50  ;;  %12132 = vmatprep.subr.bf16.mxu1 %v13031_v31  ;;  %v8675_v50 = vpop.xlane.xlu0 %8674 }
0x143e   : > { %v8680_v62 = vmul.f32 0.0078125, %v8675_v50 }
0x14c3   : > { %v9029_v16 = vpop.f32.mrf.mxu0  ;;  %v9072_v11 = vpop.f32.mrf.mxu1 }
0x14c4   : > { %v15692_v48 = vadd.f32 %v9029_v16, %v8786_v9  ;;  %v15694_v57 = vadd.f32 %v9072_v11, %v8794_v0 }
0x14c5   : > { %v9031_v24 = vpop.f32.mrf.mxu0  ;;  %v9074_v37 = vpop.f32.mrf.mxu1 }
0x14c6   : > { %v15697_v18 = vmul.f32 0.70710677, %v15692_v48  ;;  %v15700_v22 = vmul.f32 0.70710677, %v15694_v57  ;;  %v15702_v38 = vadd.f32 %v9031_v24, %v8790_v43  ;;  %v15704_v27 = vadd.f32 %v9074_v37, %v8798_v28 }
0x14c7   : > { %v9033_v52 = vpop.f32.mrf.mxu0  ;;  %v9076_v37 = vpop.f32.mrf.mxu1 }
0x14c8   : > { %v9113_v56 = vand.u32 2147483647, %v15697_v18  ;;  %v15708_v12 = vand.u32 2147483647, %v15700_v22  ;;  %v15711_v26 = vmul.f32 0.70710677, %v15702_v38  ;;  %v15721_v60 = vadd.f32 %v9033_v52, %v8786_v9  ;;  %v8677_v52 = vpop.xlane.xlu1 %8676 }
0x14c9   : > { %v15716_v39 = vmul.f32 0.70710677, %v15704_v27  ;;  %v9035_v53 = vpop.f32.mrf.mxu0  ;;  %v15723_v42 = vadd.f32 %v9076_v37, %v8794_v0  ;;  %v9078_v0 = vpop.f32.mrf.mxu1  ;;  %vm9097_vm1 = vcmp.ge.f32.partialorder %v15697_v18, 0.0  ;;  %vm9099_vm5 = vcmp.ge.f32.partialorder %v15700_v22, 0.0 }
0x14ca   : > { %v9121_v49 = vmul.f32 0.3275911, %v9113_v56  ;;  %v9123_v17 = vmul.f32 0.3275911, %v15708_v12  ;;  %v9114_v31 = vand.u32 2147483647, %v15711_v26  ;;  %v15725_v23 = vadd.f32 %v9035_v53, %v8790_v43 }
0x14cb   : > { %v15719_v29 = vand.u32 2147483647, %v15716_v39  ;;  %v15740_v43 = vadd.f32 %v9078_v0, %v8798_v28  ;;  %v9225_v36 = vsub.f32 0.0, %v9113_v56  ;;  %vm9098_vm2 = vcmp.ge.f32.partialorder %v15711_v26, 0.0 }
0x14cc   : > { %v9129_v16 = vadd.f32 1.0, %v9121_v49  ;;  %v9131_v11 = vadd.f32 1.0, %v9123_v17  ;;  %v9122_v24 = vmul.f32 0.3275911, %v9114_v31  ;;  %v8684_v49 = vadd.f32 1e-05, %v8680_v62 }
0x14cd   : > { %v9124_v14 = vmul.f32 0.3275911, %v15719_v29  ;;  %v15729_v17 = vmul.f32 0.70710677, %v15721_v60  ;;  %v15736_v9 = vmul.f32 0.70710677, %v15725_v23 }
0x14ce   : > { %13072 = vrcp.f32 %v9129_v16  ;;  %v9130_v21 = vadd.f32 1.0, %v9122_v24  ;;  %v15732_v16 = vmul.f32 0.70710677, %v15723_v42  ;;  %v9226_v0 = vsub.f32 0.0, %v9114_v31 }
0x14cf   : > { %13074 = vrcp.f32 %v9131_v11  ;;  %v9132_v50 = vadd.f32 1.0, %v9124_v14  ;;  %v9117_v11 = vand.u32 2147483647, %v15729_v17  ;;  %v8681_v14 = vmul.f32 0.0078125, %v8677_v52 }
0x14d0   : > { %13076 = vrcp.f32 %v9130_v21  ;;  %v9119_v62 = vand.u32 2147483647, %v15732_v16  ;;  %v9118_v21 = vand.u32 2147483647, %v15736_v9  ;;  %v9228_v6 = vsub.f32 0.0, %v15719_v29 }
0x14d1   : > { %13078 = vrcp.f32 %v9132_v50  ;;  %v9125_v53 = vmul.f32 0.3275911, %v9117_v11  ;;  %v15745_v50 = vmul.f32 0.70710677, %v15740_v43  ;;  %v8685_v59 = vadd.f32 1e-05, %v8681_v14 }
0x14d2   : > { %13080 = vrsqrt.f32 %v8684_v49  ;;  %v9127_v37 = vmul.f32 0.3275911, %v9119_v62  ;;  %v9126_v25 = vmul.f32 0.3275911, %v9118_v21  ;;  %v9231_v19 = vsub.f32 0.0, %v9119_v62 }
0x14d3   : > { %v9133_v24 = vadd.f32 1.0, %v9125_v53  ;;  %v9229_v53 = vsub.f32 0.0, %v9117_v11  ;;  %v9230_v3 = vsub.f32 0.0, %v9118_v21  ;;  %vm9101_vm6 = vcmp.ge.f32.partialorder %v15729_v17, 0.0 }
0x14d4   : > { %v9135_v35 = vadd.f32 1.0, %v9127_v37  ;;  %v9134_v63 = vadd.f32 1.0, %v9126_v25  ;;  %v9233_v25 = vmul.f32 %v9225_v36, %v9113_v56  ;;  %vm9100_vm7 = vcmp.ge.f32.partialorder %v15716_v39, 0.0 }
0x14d5   : > { %13082 = vrcp.f32 %v9133_v24  ;;  %v15752_v24 = vand.u32 2147483647, %v15745_v50  ;;  %v9237_v56 = vmul.f32 %v9229_v53, %v9117_v11  ;;  %vm9103_vm8 = vcmp.ge.f32.partialorder %v15732_v16, 0.0 }
0x14d6   : > { %13084 = vrcp.f32 %v9135_v35  ;;  %v9234_v35 = vmul.f32 %v9226_v0, %v9114_v31  ;;  %vm9102_vm9 = vcmp.ge.f32.partialorder %v15736_v9, 0.0  ;;  %vm9104_vm10 = vcmp.ge.f32.partialorder %v15745_v50, 0.0 }
0x14d7   : > { %13086 = vrcp.f32 %v9134_v63  ;;  %v9128_v10 = vmul.f32 0.3275911, %v15752_v24 }
0x14d8   : > { %13088 = vrsqrt.f32 %v8685_v59  ;;  %v9243_v0 = vmul.f32 1.442695, %v9234_v35 }
0x14d9   : > { %v9136_v63 = vadd.f32 1.0, %v9128_v10  ;;  %v9249_v10 = vmul.f32 1.442695, %v9237_v56 }
0x14db   : > { %v15742_v44 = vpop.eup %13072  ;;  %13090 = vrcp.f32 %v9136_v63 }
0x14dc   : > { %v15747_v49 = vpop.eup %13074  ;;  %v9153_v1 = vmul.f32 1.0614054, %v15742_v44 }
0x14dd   : > { %v9155_v28 = vmul.f32 1.0614054, %v15747_v49  ;;  %v15754_v37 = vpop.eup %13076 }
0x14de   : > { %v9161_v52 = vadd.f32 -1.4531521, %v9153_v1  ;;  %v9154_v14 = vmul.f32 1.0614054, %v15754_v37  ;;  %v9227_v1 = vsub.f32 0.0, %v15708_v12  ;;  %v15762_v5 = vpop.eup %13078 }
0x14df   : > { %v9163_v33 = vadd.f32 -1.4531521, %v9155_v28  ;;  %v13081_v59 = vpop.eup %13080  ;;  %v9241_v28 = vmul.f32 1.442695, %v9233_v25 }
0x14e0   : > { %v9169_v30 = vmul.f32 %v15742_v44, %v9161_v52  ;;  %v9162_v36 = vadd.f32 -1.4531521, %v9154_v14  ;;  %v9156_v52 = vmul.f32 1.0614054, %v15762_v5  ;;  %v9235_v31 = vmul.f32 %v9227_v1, %v15708_v12 }
0x14e1   : > { %v9171_v47 = vmul.f32 %v15747_v49, %v9163_v33  ;;  %v8692_v53 = vmul.f32 %v13081_v59, %v15576_v40  ;;  %13092 = vpow2.f32 %v9241_v28 }
0x14e2   : > { %v9177_v7 = vadd.f32 1.4214138, %v9169_v30  ;;  %v9170_v45 = vmul.f32 %v15754_v37, %v9162_v36  ;;  %v9164_v20 = vadd.f32 -1.4531521, %v9156_v52  ;;  %v9236_v30 = vmul.f32 %v9228_v6, %v15719_v29  ;;  %v15770_v25 = vpop.eup %13082 }
0x14e3   : > { %v9179_v33 = vadd.f32 1.4214138, %v9171_v47  ;;  %v9238_v47 = vmul.f32 %v9230_v3, %v9118_v21  ;;  %v9157_v1 = vmul.f32 1.0614054, %v15770_v25  ;;  %v9245_v35 = vmul.f32 1.442695, %v9235_v31  ;;  %v15776_v29 = vpop.eup %13084 }
0x14e4   : > { %v9185_v34 = vmul.f32 %v15742_v44, %v9177_v7  ;;  %v9178_v11 = vadd.f32 1.4214138, %v9170_v45  ;;  %v9172_v14 = vmul.f32 %v15762_v5, %v9164_v20  ;;  %v9239_v7 = vmul.f32 %v9231_v19, %v9119_v62  ;;  %v15781_v21 = vpop.eup %13086 }
0x14e5   : > { %v9187_v36 = vmul.f32 %v15747_v49, %v9179_v33  ;;  %13094 = vpow2.f32 %v9243_v0  ;;  %v9247_v6 = vmul.f32 1.442695, %v9236_v30  ;;  %v9165_v56 = vadd.f32 -1.4531521, %v9157_v1  ;;  %v13089_v33 = vpop.eup %13088 }
0x14e6   : > { %v9193_v61 = vadd.f32 -0.28449672, %v9185_v34  ;;  %v9186_v12 = vmul.f32 %v15754_v37, %v9178_v11  ;;  %v9180_v45 = vadd.f32 1.4214138, %v9172_v14  ;;  %13096 = vpow2.f32 %v9249_v10 }
0x14e7   : > { %v9232_v20 = vsub.f32 0.0, %v15752_v24  ;;  %v9159_v34 = vmul.f32 1.0614054, %v15776_v29  ;;  %v9253_v19 = vmul.f32 1.442695, %v9239_v7  ;;  %v9173_v52 = vmul.f32 %v15770_v25, %v9165_v56 }
0x14e8   : > { %v9194_v40 = vadd.f32 -0.28449672, %v9186_v12  ;;  %v9188_v3 = vmul.f32 %v15762_v5, %v9180_v45  ;;  %v9251_v62 = vmul.f32 1.442695, %v9238_v47  ;;  %v9201_v63 = vmul.f32 %v15742_v44, %v9193_v61 }
0x14e9   : > { %v9195_v59 = vadd.f32 -0.28449672, %v9187_v36  ;;  %13098 = vpow2.f32 %v9245_v35  ;;  %v9167_v0 = vadd.f32 -1.4531521, %v9159_v34  ;;  %v9158_v30 = vmul.f32 1.0614054, %v15781_v21  ;;  %v15792_v35 = vpop.eup %13090 }
0x14ea   : > { %v9202_v28 = vmul.f32 %v15754_v37, %v9194_v40  ;;  %v9196_v31 = vadd.f32 -0.28449672, %v9188_v3  ;;  %13100 = vpow2.f32 %v9247_v6  ;;  %v9181_v11 = vadd.f32 1.4214138, %v9173_v52 }
0x14eb   : > { %v9240_v10 = vmul.f32 %v9232_v20, %v15752_v24  ;;  %v8703_v14 = vmul.f32 %v15588_v13, %v8692_v53  ;;  %v9175_v61 = vmul.f32 %v15776_v29, %v9167_v0  ;;  %13102 = vpow2.f32 %v9253_v19 }
0x14ec   : > { %v9210_v7 = vadd.f32 0.2548296, %v9202_v28  ;;  %v9166_v47 = vadd.f32 -1.4531521, %v9158_v30  ;;  %v9209_v36 = vadd.f32 0.2548296, %v9201_v63  ;;  %v9204_v12 = vmul.f32 %v15762_v5, %v9196_v31 }
0x14ed   : > { %v9189_v1 = vmul.f32 %v15770_v25, %v9181_v11  ;;  %v9203_v45 = vmul.f32 %v15747_v49, %v9195_v59  ;;  %v9183_v6 = vadd.f32 1.4214138, %v9175_v61  ;;  %13104 = vpow2.f32 %v9251_v62 }
0x14ee   : > { %v9174_v40 = vmul.f32 %v15781_v21, %v9166_v47  ;;  %v9160_v53 = vmul.f32 1.0614054, %v15792_v35  ;;  %v9255_v56 = vmul.f32 1.442695, %v9240_v10  ;;  %v15798_v20 = vadd.f32 %v15594_v4, %v8703_v14  ;;  %v13093_v63 = vpop.eup %13092 }
0x14ef   : > { %v9197_v24 = vadd.f32 -0.28449672, %v9189_v1  ;;  %v9218_v3 = vmul.f32 %v15754_v37, %v9210_v7  ;;  %v9191_v34 = vmul.f32 %v15776_v29, %v9183_v6  ;;  %v9217_v28 = vmul.f32 %v15742_v44, %v9209_v36 }
0x14f0   : > { %v9182_v19 = vadd.f32 1.4214138, %v9174_v40  ;;  %v9212_v59 = vadd.f32 0.2548296, %v9204_v12  ;;  %v9168_v31 = vadd.f32 -1.4531521, %v9160_v53  ;;  %v8693_v11 = vmul.f32 %v13089_v33, %v15581_v32 }
0x14f1   : > { %v9205_v52 = vmul.f32 %v15770_v25, %v9197_v24  ;;  %v9211_v62 = vadd.f32 0.2548296, %v9203_v45  ;;  %v9199_v0 = vadd.f32 -0.28449672, %v9191_v34  ;;  %13106 = vpow2.f32 %v9255_v56 }
0x14f2   : > { %v9190_v30 = vmul.f32 %v15781_v21, %v9182_v19  ;;  %v13095_v10 = vpop.eup %13094  ;;  %v9176_v14 = vmul.f32 %v15792_v35, %v9168_v31  ;;  %v9257_v36 = vmul.f32 %v13093_v63, %v9217_v28  ;;  %v9220_v12 = vmul.f32 %v15762_v5, %v9212_v59 }
0x14f3   : > { %v9213_v37 = vadd.f32 0.2548296, %v9205_v52  ;;  %v13097_v7 = vpop.eup %13096  ;;  %v9258_v44 = vmul.f32 %v13095_v10, %v9218_v3  ;;  %v9207_v61 = vmul.f32 %v15776_v29, %v9199_v0  ;;  %v9219_v33 = vmul.f32 %v15747_v49, %v9211_v62 }
0x14f4   : > { %v9198_v47 = vadd.f32 -0.28449672, %v9190_v30  ;;  %v9184_v32 = vadd.f32 1.4214138, %v9176_v14  ;;  %v13664_v24 = vmov -1.0   ;;  %v9265_v28 = vsub.f32 1.0, %v9257_v36 }
0x14f5   : > { %v9221_v1 = vmul.f32 %v15770_v25, %v9213_v37  ;;  %v9215_v45 = vadd.f32 0.2548296, %v9207_v61  ;;  %v9105_v53 = vsel %vm9097_vm1, 1.0, %v13664_v24  ;;  %v9106_v3 = vsel %vm9098_vm2, 1.0, %v13664_v24 }
0x14f6   : > { %v9206_v6 = vmul.f32 %v15781_v21, %v9198_v47  ;;  %v13099_v40 = vpop.eup %13098  ;;  %v9192_v5 = vmul.f32 %v15792_v35, %v9184_v32  ;;  %v9266_v49 = vsub.f32 1.0, %v9258_v44  ;;  %v9109_v17 = vsel %vm9101_vm6, 1.0, %v13664_v24 }
0x14f7   : > { %v9261_v56 = vmul.f32 %v13097_v7, %v9221_v1  ;;  %v13101_v25 = vpop.eup %13100  ;;  %v9223_v34 = vmul.f32 %v15776_v29, %v9215_v45  ;;  %v9259_v31 = vmul.f32 %v13099_v40, %v9219_v33  ;;  %v9273_v7 = vmul.f32 %v9265_v28, %v9105_v53 }
0x14f8   : > { %v9214_v19 = vadd.f32 0.2548296, %v9206_v6  ;;  %v13103_v63 = vpop.eup %13102  ;;  %v9260_v59 = vmul.f32 %v13101_v25, %v9220_v12  ;;  %v9200_v18 = vadd.f32 -0.28449672, %v9192_v5  ;;  %v9274_v10 = vmul.f32 %v9266_v49, %v9106_v3 }
0x14f9   : > { %v9269_v52 = vsub.f32 1.0, %v9261_v56  ;;  %v9263_v62 = vmul.f32 %v13103_v63, %v9223_v34  ;;  %v8704_v47 = vmul.f32 %v15588_v13, %v8693_v11  ;;  %v9267_v39 = vsub.f32 1.0, %v9259_v31 }
0x14fa   : > { %v9222_v0 = vmul.f32 %v15781_v21, %v9214_v19  ;;  %v13105_v30 = vpop.eup %13104  ;;  %v9208_v29 = vmul.f32 %v15792_v35, %v9200_v18  ;;  %v9268_v44 = vsub.f32 1.0, %v9260_v59  ;;  %v9107_v21 = vsel %vm9099_vm5, 1.0, %v13664_v24 }
0x14fb   : > { %v9277_v26 = vmul.f32 %v9269_v52, %v9109_v17  ;;  %v9271_v37 = vsub.f32 1.0, %v9263_v62  ;;  %v9108_v36 = vsel %vm9100_vm7, 1.0, %v13664_v24  ;;  %v9111_v1 = vsel %vm9103_vm8, 1.0, %v13664_v24 }
0x14fc   : > { %v9262_v14 = vmul.f32 %v13105_v30, %v9222_v0  ;;  %v9216_v61 = vadd.f32 0.2548296, %v9208_v29  ;;  %v9110_v32 = vsel %vm9102_vm9, 1.0, %v13664_v24  ;;  %v9282_v45 = vadd.f32 1.0, %v9274_v10 }
0x14fd   : > { %v9285_v12 = vadd.f32 1.0, %v9277_v26  ;;  %v9085_v6 = vmul.f32 0.5, %v15721_v60  ;;  %v9279_v13 = vmul.f32 %v9271_v37, %v9111_v1  ;;  %v9281_v40 = vadd.f32 1.0, %v9273_v7  ;;  %v13033_v7 = vld [vmem:[#allocation36 + $0xb8] sm:$0xff]  }
0x14fe   : > { %v9270_v16 = vsub.f32 1.0, %v9262_v14  ;;  %v9224_v9 = vmul.f32 %v15792_v35, %v9216_v61  ;;  %v13107_v33 = vpop.eup %13106  ;;  %v9276_v22 = vmul.f32 %v9268_v44, %v9108_v36  ;;  %v9275_v56 = vmul.f32 %v9267_v39, %v9107_v21  ;;  %v13035_v44 = vld [vmem:[#allocation36 + $0xf0] sm:$0xff]   ;;  %v13040_v21 = vld [vmem:[#allocation36 + $0x28] sm:$0xff]   ;;  %v13042_v39 = vld [vmem:[#allocation36 + $0x60] sm:$0xff]  }
0x14ff   : > { %v9082_v5 = vmul.f32 0.5, %v15702_v38  ;;  %v9086_v25 = vmul.f32 0.5, %v15725_v23  ;;  %v9081_v49 = vmul.f32 0.5, %v15692_v48  ;;  %v9293_v35 = vmul.f32 %v9285_v12, %v9085_v6  ;;  %v13032_v23 = vld [vmem:[#allocation36 + $0x38] sm:$0xff]   ;;  %v13037_v61 = vld [vmem:[#allocation36 + $0xb0] sm:$0xff]   ;;  %v13041_v36 = vld [vmem:[#allocation36 + $0xa8] sm:$0xff]  }
0x1500   : > { %v9278_v11 = vmul.f32 %v9270_v16, %v9110_v32  ;;  %v9264_v53 = vmul.f32 %v13107_v33, %v9224_v9  ;;  %v8715_v19 = vadd.f32 %v15594_v4, %v8704_v47  ;;  %v9287_v63 = vadd.f32 1.0, %v9279_v13  ;;  %v13034_v4 = vld [vmem:[#allocation36 + $0x70] sm:$0xff]   ;;  %v13039_v47 = vld [vmem:[#allocation36 + $0xe8] sm:$0xff]   ;;  %v13043_v16 = vld [vmem:[#allocation36 + $0xe0] sm:$0xff]  }
0x1501   : > { %v9290_v60 = vmul.f32 %v9282_v45, %v9082_v5  ;;  %v9112_v59 = vsel %vm9104_vm10, 1.0, %v13664_v24  ;;  %v9289_v52 = vmul.f32 %v9281_v40, %v9081_v49  ;;  %v9284_v50 = vadd.f32 1.0, %v9276_v22  ;;  %v13044_v12 = vld [vmem:[#allocation36 + $0x20] sm:$0xff]   ;;  %v13046_v1 = vld [vmem:[#allocation36 + $0x58] sm:$0xff]   ;;  %v13050_v45 = vld [vmem:[#allocation36 + $0x50] sm:$0xff]  }
0x1502   : > { %v9286_v3 = vadd.f32 1.0, %v9278_v11  ;;  %v9272_v34 = vsub.f32 1.0, %v9264_v53  ;;  %v9283_v31 = vadd.f32 1.0, %v9275_v56  ;;  %v9087_v38 = vmul.f32 0.5, %v15723_v42  ;;  %v13045_v32 = vld [vmem:[#allocation36 + $0xa0] sm:$0xff]   ;;  %v13047_v9 = vld [vmem:[#allocation36 + $0xd8] sm:$0xff]  }
0x1503   : > { %v9084_v62 = vmul.f32 0.5, %v15704_v27  ;;  %v9329_v48 = vpack.c.bf16 %v9293_v35, %v9289_v52  ;;  %v9088_v0 = vmul.f32 0.5, %v15740_v43  ;;  %v9083_v26 = vmul.f32 0.5, %v15694_v57  ;;  %v13036_v57 = vld [vmem:[#allocation36 + $0x30] sm:$0xff]   ;;  %v13048_v33 = vld [vmem:[#allocation36 + $0x18] sm:$0xff]   ;;  %v13054_v40 = vld [vmem:[#allocation36 + $0x48] sm:$0xff]  }
0x1504   : > { %v9294_v28 = vmul.f32 %v9286_v3, %v9086_v25  ;;  %v9280_v18 = vmul.f32 %v9272_v34, %v9112_v59  ;;  %v9295_v29 = vmul.f32 %v9287_v63, %v9087_v38  ;;  %v15850_v10 = vpack.c.bf16 %v8715_v19, %v15798_v20  ;;  %v13038_v20 = vld [vmem:[#allocation36 + $0x68] sm:$0xff]   ;;  %v13049_v6 = vld [vmem:[#allocation36 + $0x98] sm:$0xff]   ;;  %v13051_v13 = vld [vmem:[#allocation36 + $0xd0] sm:$0xff]  }
0x1505   : > { %v9292_v37 = vmul.f32 %v9284_v50, %v9084_v62  ;;  %v9291_v42 = vmul.f32 %v9283_v31, %v9083_v26  ;;  %v13052_v11 = vld [vmem:[#allocation36 + $0x10] sm:$0xff]   ;;  %v13055_v53 = vld [vmem:[#allocation36 + $0xc8] sm:$0xff]   ;;  %v13058_v5 = vld [vmem:[#allocation36 + $0x40] sm:$0xff]  }
0x1506   : > { %v9330_v17 = vpack.c.bf16 %v9294_v28, %v9290_v60  ;;  %v9288_v30 = vadd.f32 1.0, %v9280_v18  ;;  %v13053_v22 = vld [vmem:[#allocation36 + $0x90] sm:$0xff]   ;;  %v13056_v56 = vld [vmem:[#allocation36 + $0x8] sm:$0xff]   ;;  %v13059_v3 = vld [vmem:[#allocation36 + $0xc0] sm:$0xff]  }
0x1507   : > { %v9331_v43 = vpack.c.bf16 %v9295_v29, %v9291_v42  ;;  %v13057_v25 = vld [vmem:[#allocation36 + $0x88] sm:$0xff]   ;;  %v13060_v49 = vld [vmem:[#allocation36] sm:$0xff]   ;;  %v16370_v52 = vld [vmem:[#allocation85_spill] sm:$0xff] }
0x1508   : > { %9532 = vmatprep.mubr.bf16.mxu0 %v9330_v17  ;;  %v9296_v14 = vmul.f32 %v9288_v30, %v9088_v0  ;;  %v13061_v35 = vld [vmem:[#allocation36 + $0x80] sm:$0xff]   ;;  %v13067_v19 = vld [vmem:[#allocation38 + $0xcc] ss:$16 sps:$4 sm:$0xff]   ;;  %v13065_v63 = vld [vmem:[#allocation38 + $0xc8] ss:$16 sps:$4 sm:$0xff]  }
0x1509   : > { %9533 = vmatmul.mubr.bf16.vlgmr.msra.gmra.mxu0 %v9329_v48  ;;  %v13064_v34 = vld [vmem:[#allocation38 + $0xc4] ss:$16 sps:$4 sm:$0xff]   ;;  %v13062_v60 = vld [vmem:[#allocation38 + $0xc0] ss:$16 sps:$4 sm:$0xff]   ;;  %v16364_v59 = vld [vmem:[#allocation79_spill] sm:$0xff] }
0x150a   : > { %12115 = vmatpush3.bf16.xpose.msra.mxu0 %v13032_v23  ;;  %12130 = vmatprep.mubr.bf16.mxu0 %v15850_v10  ;;  %v9332_v27 = vpack.c.bf16 %v9296_v14, %v9292_v37  ;;  %v16363_v28 = vld [vmem:[#allocation78_spill] sm:$0xff]  ;;  %v15881_v18 = vld [vmem:[%s16372_s7] ss:$0 sm:$0xff]  ;;  %v16374_v38 = vld [vmem:[#allocation88_spill] sm:$0xff]  ;;  %s13538_s7 = scalar_lea.vmem %s13537_s24, 1024 }
0x150b   : > { %12116 = vmatprep.subr.bf16.mxu0 %v13034_v4  ;;  %v16371_v50 = vld [vmem:[#allocation86_spill] sm:$0xff]  ;;  %v16373_v31 = vld [vmem:[#allocation87_spill] sm:$0xff]  ;;  %v16375_v23 = vld [vmem:[#allocation89_spill] sm:$0xff]  ;;  %p13540_p0 = scmp.lt.s32.totalorder %s13538_s7, %s13532_s29 }
0x150c   : > { %9573 = vmatprep.mubr.bf16.mxu1 %v9332_v27  ;;  %v16376_v62 = vld [vmem:[#allocation90_spill] sm:$0xff]  ;;  %v16377_v14 = vld [vmem:[#allocation91_spill] sm:$0xff]  ;;  %v16378_v42 = vld [vmem:[#allocation92_spill] sm:$0xff] }
0x150d   : > { %9574 = vmatmul.mubr.bf16.vlgmr.msra.gmra.mxu1 %v9331_v43  ;;  %v16379_v27 = vld [vmem:[#allocation53_spill] sm:$0xff]  ;;  %p13541_p1 = por %p13540_p0, %p13539_p13 }
0x150e   : > { %12133 = vmatpush3.bf16.xpose.msra.mxu1 %v13033_v7  ;;  %12148 = vmatprep.mubr.bf16.mxu1 %v15850_v10 }
0x150f   : > { %12134 = vmatprep.subr.bf16.mxu1 %v13035_v44  ;;  %p13542_p3 = pnand %p13541_p1, %p13535_p12 }
0x1512   : > { %12117 = vmatpush3.bf16.xpose.msra.mxu0 %v13036_v57 }
0x1513   : > { %12118 = vmatprep.subr.bf16.mxu0 %v13038_v20  ;;  %v16380_v20 = vld [vmem:[#allocation54_spill] sm:$0xff] }
0x1516   : > { %12135 = vmatpush3.bf16.xpose.msra.mxu1 %v13037_v61 }
0x1517   : > { %12136 = vmatprep.subr.bf16.mxu1 %v13039_v47  ;;  %v9651_v47 = vld [vmem:[%s16354_s8] sm:$0xf] }
0x151a   : > { %12119 = vmatpush3.bf16.xpose.msra.mxu0 %v13040_v21  ;;  %v16381_v21 = vld [vmem:[#allocation50_spill] sm:$0xff] }
0x151b   : > { %12120 = vmatprep.subr.bf16.mxu0 %v13042_v39  ;;  %v9656_v39 = vrot.slane %v9651_v47, %v16381_v21 }
0x151e   : > { %12137 = vmatpush3.bf16.xpose.msra.mxu1 %v13041_v36  ;;  %v16382_v36 = vld [vmem:[#allocation51_spill] sm:$0xff] }
0x151f   : > { %12138 = vmatprep.subr.bf16.mxu1 %v13043_v16  ;;  %v9660_v16 = vrot.slane %v9651_v47, %v16382_v36 }
0x1522   : > { %12121 = vmatpush3.bf16.xpose.msra.mxu0 %v13044_v12 }
0x1523   : > { %12122 = vmatprep.subr.bf16.mxu0 %v13046_v1 }
0x1526   : > { %12139 = vmatpush3.bf16.xpose.msra.mxu1 %v13045_v32  ;;  %v16383_v32 = vld [vmem:[#allocation52_spill] sm:$0xff] }
0x1527   : > { %12140 = vmatprep.subr.bf16.mxu1 %v13047_v9  ;;  %v9664_v9 = vrot.slane %v9651_v47, %v16383_v32 }
0x152a   : > { %12123 = vmatpush3.bf16.xpose.msra.mxu0 %v13048_v33 }
0x152b   : > { %12124 = vmatprep.subr.bf16.mxu0 %v13050_v45 }
0x152e   : > { %12141 = vmatpush3.bf16.xpose.msra.mxu1 %v13049_v6 }
0x152f   : > { %12142 = vmatprep.subr.bf16.mxu1 %v13051_v13  ;;  %v16384_v13 = vld [vmem:[#allocation49_spill] sm:$0xff] }
0x1532   : > { %12125 = vmatpush3.bf16.xpose.msra.mxu0 %v13052_v11  ;;  %v16385_v11 = vsub.s32 3, %v16384_v13 }
0x1533   : > { %12126 = vmatprep.subr.bf16.mxu0 %v13054_v40 }
0x1534   : > { %v9668_v40 = vrot.slane %v9651_v47, %v16385_v11 }
0x1536   : > { %12143 = vmatpush3.bf16.xpose.msra.mxu1 %v13053_v22 }
0x1537   : > { %12144 = vmatprep.subr.bf16.mxu1 %v13055_v53 }
0x153a   : > { %12127 = vmatpush3.bf16.xpose.msra.mxu0 %v13056_v56 }
0x153b   : > { %12128 = vmatprep.subr.bf16.mxu0 %v13058_v5 }
0x153e   : > { %12145 = vmatpush3.bf16.xpose.msra.mxu1 %v13057_v25 }
0x153f   : > { %12146 = vmatprep.subr.bf16.mxu1 %v13059_v3 }
0x1542   : > { %12129 = vmatpush3.bf16.xpose.msra.mxu0 %v13060_v49 }
0x1543   : > { %10370 = vmatprep.subr.bf16.mxu0 %v15599_v15  ;;  %v16359_v15 = vld [vmem:[#allocation74_spill] sm:$0xff] }
0x1546   : > { %12147 = vmatpush3.bf16.xpose.msra.mxu1 %v13061_v35 }
0x1547   : > { %10411 = vmatprep.subr.bf16.mxu1 %v15605_v2  ;;  %v16362_v2 = vld [vmem:[#allocation77_spill] sm:$0xff] }
0x1549   : > { %12131 = vmatmul.mubr.bf16.vlgmr.msra.gmra.mxu0 %v15850_v10 }
0x154a   : > { %10371 = vmatpush1.bf16.xpose.msra.mxu0 %v15601_v58  ;;  %v16360_v58 = vld [vmem:[#allocation75_spill] sm:$0xff] }
0x154b   : > { %10372 = vmatprep.subr.bf16.mxu0 %v13064_v34 }
0x154d   : > { %12149 = vmatmul.mubr.bf16.vlgmr.msra.gmra.mxu1 %v15850_v10 }
0x154e   : > { %10412 = vmatpush1.bf16.xpose.msra.mxu1 %v15603_v55  ;;  %v16361_v55 = vld [vmem:[#allocation76_spill] sm:$0xff] }
0x154f   : > { %10413 = vmatprep.subr.bf16.mxu1 %v13067_v19 }
0x1552   : > { %10373 = vmatpush1.bf16.xpose.msra.mxu0 %v13062_v60 }
0x1553   : > { %10374 = vmatprep.subr.bf16.mxu0 %v15611_v54  ;;  %v16365_v54 = vld [vmem:[#allocation80_spill] sm:$0xff] }
0x1556   : > { %10414 = vmatpush1.bf16.xpose.msra.mxu1 %v13065_v63 }
0x1557   : > { %10415 = vmatprep.subr.bf16.mxu1 %v15613_v8  ;;  %v16366_v8 = vld [vmem:[#allocation81_spill] sm:$0xff] }
0x155a   : > { %10375 = vmatpush1.bf16.xpose.msra.mxu0 %v15615_v51  ;;  %v16367_v51 = vld [vmem:[#allocation82_spill] sm:$0xff] }
0x155b   : > { %10376 = vmatprep.subr.bf16.mxu0 %v15623_v46  ;;  %v16369_v46 = vld [vmem:[#allocation84_spill] sm:$0xff] }
0x155e   : > { %10416 = vmatpush1.bf16.xpose.msra.mxu1 %v15617_v41  ;;  %v16368_v41 = vld [vmem:[#allocation83_spill] sm:$0xff] }
0x155f   : > { %10417 = vmatprep.subr.bf16.mxu1 %v16359_v15 }
0x1562   : > { %10377 = vmatpush1.bf16.xpose.msra.mxu0 %v16360_v58 }
0x1563   : > { %10378 = vmatprep.subr.bf16.mxu0 %v16362_v2 }
0x1566   : > { %10418 = vmatpush1.bf16.xpose.msra.mxu1 %v16361_v55 }
0x1567   : > { %10419 = vmatprep.subr.bf16.mxu1 %v16363_v28 }
0x156a   : > { %10379 = vmatpush1.bf16.xpose.msra.mxu0 %v16364_v59 }
0x156b   : > { %10380 = vmatprep.subr.bf16.mxu0 %v16366_v8 }
0x156e   : > { %10420 = vmatpush1.bf16.xpose.msra.mxu1 %v16365_v54 }
0x156f   : > { %10421 = vmatprep.subr.bf16.mxu1 %v16367_v51 }
0x1572   : > { %10381 = vmatpush1.bf16.xpose.msra.mxu0 %v16368_v41 }
0x1573   : > { %10382 = vmatprep.subr.bf16.mxu0 %v16370_v52 }
0x1576   : > { %10422 = vmatpush1.bf16.xpose.msra.mxu1 %v16369_v46 }
0x1577   : > { %10423 = vmatprep.subr.bf16.mxu1 %v16371_v50 }
0x157a   : > { %10383 = vmatpush1.bf16.xpose.msra.mxu0 %v16373_v31 }
0x157b   : > { %10384 = vmatprep.subr.bf16.mxu0 %v16375_v23 }
0x157e   : > { %10424 = vmatpush1.bf16.xpose.msra.mxu1 %v16374_v38 }
0x157f   : > { %10425 = vmatprep.subr.bf16.mxu1 %v16376_v62 }
0x1582   : > { %10385 = vmatpush1.bf16.xpose.msra.mxu0 %v16377_v14 }
0x1586   : > { %10426 = vmatpush1.bf16.xpose.msra.mxu1 %v16378_v42 }
0x15c9   : > { %v9534_v17 = vpop.f32.mrf.mxu0 }
0x15ca   : > { %v9535_v48 = vadd.f32 %v15881_v18, %v9534_v17 }
0x15cb   : > { %v9536_v0 = vpop.f32.mrf.mxu0 }
0x15cd   : > { %v9537_v30 = vpop.f32.mrf.mxu0  ;;  %v9575_v4 = vpop.f32.mrf.mxu1 }
0x15ce   : > { %v9576_v26 = vadd.f32 %v9575_v4, %v9535_v48  ;;  %v9538_v29 = vadd.f32 %v15881_v18, %v9537_v30 }
0x15cf   : > { %v9539_v10 = vpop.f32.mrf.mxu0  ;;  %v9577_v37 = vpop.f32.mrf.mxu1 }
0x15d0   : > { %v9582_v7 = vadd.f32 %v9576_v26, %v16379_v27 }
0x15d1   : > { %v9578_v43 = vpop.f32.mrf.mxu1 }
0x15d2   : > { %9584 = vst [vmem:[%s15095_s0] sm:$0xff] %v9582_v7  ;;  %v9579_v44 = vadd.f32 %v9578_v43, %v9538_v29 }
0x15d3   : > { %v9580_v57 = vpop.f32.mrf.mxu1 }
0x15d4   : > { %v9583_v61 = vadd.f32 %v9579_v44, %v16380_v20 }
0x15d6   : > { %9585 = vst [vmem:[%s15095_s0 + $0x8] sm:$0xff] %v9583_v61 }
0x1609   : > { %v9899_v12 = vpop.f32.mrf.mxu0 }
0x160a   : > { %v15900_v1 = vadd.f32 %v9899_v12, %v9656_v39 }
0x160b   : > { %v9901_v33 = vpop.f32.mrf.mxu0 }
0x160c   : > { %v15904_v45 = vmul.f32 0.70710677, %v15900_v1  ;;  %v15906_v6 = vadd.f32 %v9901_v33, %v9660_v16 }
0x160d   : > { %v9942_v53 = vpop.f32.mrf.mxu1  ;;  %v9903_v19 = vpop.f32.mrf.mxu0 }
0x160e   : > { %v9983_v22 = vand.u32 2147483647, %v15904_v45  ;;  %v15912_v56 = vmul.f32 0.70710677, %v15906_v6  ;;  %v15914_v5 = vadd.f32 %v9942_v53, %v9664_v9  ;;  %v15926_v28 = vadd.f32 %v9903_v19, %v9656_v39 }
0x160f   : > { %v9944_v49 = vpop.f32.mrf.mxu1  ;;  %v9905_v8 = vpop.f32.mrf.mxu0  ;;  %vm9967_vm11 = vcmp.ge.f32.partialorder %v15904_v45, 0.0 }
0x1610   : > { %v9991_v25 = vmul.f32 0.3275911, %v9983_v22  ;;  %v9984_v3 = vand.u32 2147483647, %v15912_v56  ;;  %v15918_v35 = vmul.f32 0.70710677, %v15914_v5  ;;  %v15920_v34 = vadd.f32 %v9944_v49, %v9668_v40 }
0x1611   : > { %v9946_v55 = vpop.f32.mrf.mxu1  ;;  %v15930_v52 = vmul.f32 0.70710677, %v15926_v28  ;;  %v15934_v31 = vadd.f32 %v9905_v8, %v9660_v16  ;;  %v10095_v26 = vsub.f32 0.0, %v9983_v22  ;;  %vm9968_vm12 = vcmp.ge.f32.partialorder %v15912_v56, 0.0 }
0x1612   : > { %v9999_v60 = vadd.f32 1.0, %v9991_v25  ;;  %v9992_v63 = vmul.f32 0.3275911, %v9984_v3  ;;  %v9985_v15 = vand.u32 2147483647, %v15918_v35  ;;  %v15932_v50 = vadd.f32 %v9946_v55, %v9664_v9 }
0x1613   : > { %v15924_v58 = vmul.f32 0.70710677, %v15920_v34  ;;  %v9948_v41 = vpop.f32.mrf.mxu1  ;;  %v9987_v23 = vand.u32 2147483647, %v15930_v52  ;;  %v15943_v0 = vmul.f32 0.70710677, %v15934_v31  ;;  %v10103_v44 = vmul.f32 %v10095_v26, %v9983_v22 }
0x1614   : > { %13108 = vrcp.f32 %v9999_v60  ;;  %v10000_v2 = vadd.f32 1.0, %v9992_v63  ;;  %v9993_v59 = vmul.f32 0.3275911, %v9985_v15  ;;  %v15936_v17 = vadd.f32 %v9948_v41, %v9668_v40 }
0x1615   : > { %v9986_v54 = vand.u32 2147483647, %v15924_v58  ;;  %v15940_v62 = vmul.f32 0.70710677, %v15932_v50  ;;  %v9995_v48 = vmul.f32 0.3275911, %v9987_v23 }
0x1616   : > { %v10001_v51 = vadd.f32 1.0, %v9993_v59  ;;  %13110 = vrcp.f32 %v10000_v2  ;;  %v15947_v4 = vmul.f32 0.70710677, %v15936_v17  ;;  %v15950_v37 = vand.u32 2147483647, %v15943_v0 }
0x1617   : > { %v9994_v46 = vmul.f32 0.3275911, %v9986_v54  ;;  %v9989_v30 = vand.u32 2147483647, %v15940_v62  ;;  %v10003_v29 = vadd.f32 1.0, %v9995_v48  ;;  %v10096_v47 = vsub.f32 0.0, %v9984_v3 }
0x1618   : > { %13112 = vrcp.f32 %v10001_v51  ;;  %v15955_v42 = vand.u32 2147483647, %v15947_v4  ;;  %v9996_v43 = vmul.f32 0.3275911, %v15950_v37  ;;  %v10097_v39 = vsub.f32 0.0, %v9985_v15 }
0x1619   : > { %v10002_v38 = vadd.f32 1.0, %v9994_v46  ;;  %v9997_v10 = vmul.f32 0.3275911, %v9989_v30  ;;  %v10098_v9 = vsub.f32 0.0, %v9986_v54  ;;  %v10099_v33 = vsub.f32 0.0, %v9987_v23 }
0x161a   : > { %v9998_v57 = vmul.f32 0.3275911, %v15955_v42  ;;  %v10004_v21 = vadd.f32 1.0, %v9996_v43  ;;  %v10111_v13 = vmul.f32 1.442695, %v10103_v44  ;;  %v10104_v53 = vmul.f32 %v10096_v47, %v9984_v3 }
0x161b   : > { %13114 = vrcp.f32 %v10002_v38  ;;  %v10005_v7 = vadd.f32 1.0, %v9997_v10  ;;  %v10101_v25 = vsub.f32 0.0, %v9989_v30  ;;  %v10105_v60 = vmul.f32 %v10097_v39, %v9985_v15 }
0x161c   : > { %13116 = vrcp.f32 %v10003_v29  ;;  %v10006_v16 = vadd.f32 1.0, %v9998_v57  ;;  %v10106_v2 = vmul.f32 %v10098_v9, %v9986_v54  ;;  %v10107_v59 = vmul.f32 %v10099_v33, %v9987_v23 }
0x161d   : > { %13118 = vrcp.f32 %v10005_v7  ;;  %v10113_v46 = vmul.f32 1.442695, %v10104_v53  ;;  %v10109_v38 = vmul.f32 %v10101_v25, %v9989_v30  ;;  %v10115_v26 = vmul.f32 1.442695, %v10105_v60 }
0x161e   : > { %13120 = vrcp.f32 %v10004_v21  ;;  %v10100_v15 = vsub.f32 0.0, %v15950_v37  ;;  %v10117_v23 = vmul.f32 1.442695, %v10106_v2  ;;  %v10102_v7 = vsub.f32 0.0, %v15955_v42 }
0x161f   : > { %13122 = vrcp.f32 %v10006_v16  ;;  %v10123_v47 = vmul.f32 1.442695, %v10109_v38  ;;  %vm9969_vm13 = vcmp.ge.f32.partialorder %v15918_v35, 0.0  ;;  %vm9970_vm14 = vcmp.ge.f32.partialorder %v15924_v58, 0.0 }
0x1620   : > { %13124 = vpow2.f32 %v10111_v13  ;;  %v10108_v16 = vmul.f32 %v10100_v15, %v15950_v37  ;;  %v10110_v33 = vmul.f32 %v10102_v7, %v15955_v42  ;;  %v9977_v35 = vsel %vm9969_vm13, 1.0, %v13664_v24 }
0x1621   : > { %v15952_v14 = vpop.eup %13108  ;;  %13126 = vpow2.f32 %v10113_v46  ;;  %vm9971_vm15 = vcmp.ge.f32.partialorder %v15930_v52, 0.0  ;;  %vm9973_vm3 = vcmp.ge.f32.partialorder %v15940_v62, 0.0  ;;  %vm9972_vm4 = vcmp.ge.f32.partialorder %v15943_v0, 0.0 }
0x1622   : > { %v10023_v27 = vmul.f32 1.0614054, %v15952_v14  ;;  %13128 = vpow2.f32 %v10115_v26  ;;  %v10121_v42 = vmul.f32 1.442695, %v10108_v16  ;;  %v9979_v58 = vsel %vm9971_vm15, 1.0, %v13664_v24 }
0x1623   : > { %v15960_v20 = vpop.eup %13110  ;;  %13130 = vpow2.f32 %v10117_v23  ;;  %vm9974_vm0 = vcmp.ge.f32.partialorder %v15947_v4, 0.0 }
0x1624   : > { %v10031_v61 = vadd.f32 -1.4531521, %v10023_v27  ;;  %v10024_v36 = vmul.f32 1.0614054, %v15960_v20  ;;  %v10119_v27 = vmul.f32 1.442695, %v10107_v59 }
0x1625   : > { %v15963_v12 = vpop.eup %13112 }
0x1626   : > { %v10039_v32 = vmul.f32 %v15952_v14, %v10031_v61  ;;  %v10025_v11 = vmul.f32 1.0614054, %v15963_v12  ;;  %v10032_v40 = vadd.f32 -1.4531521, %v10024_v36  ;;  %13132 = vpow2.f32 %v10119_v27 }
0x1627   : > { %13134 = vpow2.f32 %v10123_v47 }
0x1628   : > { %v10047_v22 = vadd.f32 1.4214138, %v10039_v32  ;;  %v15967_v49 = vpop.eup %13114  ;;  %v10033_v19 = vadd.f32 -1.4531521, %v10025_v11  ;;  %v10040_v63 = vmul.f32 %v15960_v20, %v10032_v40  ;;  %13136 = vpow2.f32 %v10121_v42 }
0x1629   : > { %v10026_v55 = vmul.f32 1.0614054, %v15967_v49  ;;  %v15975_v10 = vpop.eup %13116 }
0x162a   : > { %v10055_v8 = vmul.f32 %v15952_v14, %v10047_v22  ;;  %v10041_v51 = vmul.f32 %v15963_v12, %v10033_v19  ;;  %v10048_v41 = vadd.f32 1.4214138, %v10040_v63  ;;  %v10027_v30 = vmul.f32 1.0614054, %v15975_v10  ;;  %v15981_v21 = vpop.eup %13118 }
0x162b   : > { %v10034_v3 = vadd.f32 -1.4531521, %v10026_v55  ;;  %v10029_v9 = vmul.f32 1.0614054, %v15981_v21  ;;  %v15990_v22 = vpop.eup %13120 }
0x162c   : > { %v10049_v48 = vadd.f32 1.4214138, %v10041_v51  ;;  %v10056_v29 = vmul.f32 %v15960_v20, %v10048_v41  ;;  %v10063_v43 = vadd.f32 -0.28449672, %v10055_v8  ;;  %v10035_v36 = vadd.f32 -1.4531521, %v10027_v30  ;;  %v15992_v37 = vpop.eup %13122 }
0x162d   : > { %v10042_v54 = vmul.f32 %v15967_v49, %v10034_v3  ;;  %v10037_v25 = vadd.f32 -1.4531521, %v10029_v9  ;;  %v10028_v63 = vmul.f32 1.0614054, %v15990_v22  ;;  %v10030_v59 = vmul.f32 1.0614054, %v15992_v37 }
0x162e   : > { %v10057_v44 = vmul.f32 %v15963_v12, %v10049_v48  ;;  %v10064_v57 = vadd.f32 -0.28449672, %v10056_v29  ;;  %v10071_v13 = vmul.f32 %v15952_v14, %v10063_v43  ;;  %v10043_v40 = vmul.f32 %v15975_v10, %v10035_v36  ;;  %v13125_v29 = vpop.eup %13124 }
0x162f   : > { %v10050_v61 = vadd.f32 1.4214138, %v10042_v54  ;;  %v10045_v2 = vmul.f32 %v15981_v21, %v10037_v25  ;;  %v10125_v8 = vmul.f32 1.442695, %v10110_v33  ;;  %v10036_v3 = vadd.f32 -1.4531521, %v10028_v63  ;;  %v13127_v36 = vpop.eup %13126 }
0x1630   : > { %v10065_v39 = vadd.f32 -0.28449672, %v10057_v44  ;;  %v10072_v11 = vmul.f32 %v15960_v20, %v10064_v57  ;;  %v10051_v60 = vadd.f32 1.4214138, %v10043_v40  ;;  %v10079_v51 = vadd.f32 0.2548296, %v10071_v13  ;;  %v13129_v33 = vpop.eup %13128 }
0x1631   : > { %v10058_v32 = vmul.f32 %v15967_v49, %v10050_v61  ;;  %v10053_v48 = vadd.f32 1.4214138, %v10045_v2  ;;  %v10038_v26 = vadd.f32 -1.4531521, %v10030_v59  ;;  %v10044_v23 = vmul.f32 %v15990_v22, %v10036_v3 }
0x1632   : > { %v10073_v19 = vmul.f32 %v15963_v12, %v10065_v39  ;;  %v10080_v41 = vadd.f32 0.2548296, %v10072_v11  ;;  %v10059_v46 = vmul.f32 %v15975_v10, %v10051_v60  ;;  %13138 = vpow2.f32 %v10125_v8 }
0x1633   : > { %v10066_v53 = vadd.f32 -0.28449672, %v10058_v32  ;;  %v10061_v27 = vmul.f32 %v15981_v21, %v10053_v48  ;;  %v10046_v7 = vmul.f32 %v15992_v37, %v10038_v26  ;;  %v10052_v57 = vadd.f32 1.4214138, %v10044_v23 }
0x1634   : > { %v10081_v15 = vadd.f32 0.2548296, %v10073_v19  ;;  %v10067_v54 = vadd.f32 -0.28449672, %v10059_v46  ;;  %v10088_v43 = vmul.f32 %v15960_v20, %v10080_v41  ;;  %v10087_v30 = vmul.f32 %v15952_v14, %v10079_v51 }
0x1635   : > { %v10074_v55 = vmul.f32 %v15967_v49, %v10066_v53  ;;  %v10069_v47 = vadd.f32 -0.28449672, %v10061_v27  ;;  %v10054_v39 = vadd.f32 1.4214138, %v10046_v7  ;;  %v10060_v9 = vmul.f32 %v15990_v22, %v10052_v57 }
0x1636   : > { %v10075_v44 = vmul.f32 %v15975_v10, %v10067_v54  ;;  %v10089_v16 = vmul.f32 %v15963_v12, %v10081_v15  ;;  %v9975_v20 = vsel %vm9967_vm11, 1.0, %v13664_v24  ;;  %v9976_v11 = vsel %vm9968_vm12, 1.0, %v13664_v24 }
0x1637   : > { %v10082_v38 = vadd.f32 0.2548296, %v10074_v55  ;;  %v10077_v13 = vmul.f32 %v15981_v21, %v10069_v47  ;;  %v10062_v14 = vmul.f32 %v15992_v37, %v10054_v39  ;;  %v10128_v12 = vmul.f32 %v13127_v36, %v10088_v43 }
0x1638   : > { %v10083_v32 = vadd.f32 0.2548296, %v10075_v44  ;;  %v10068_v53 = vadd.f32 -0.28449672, %v10060_v9  ;;  %v10127_v19 = vmul.f32 %v13125_v29, %v10087_v30  ;;  %v10129_v55 = vmul.f32 %v13129_v33, %v10089_v16 }
0x1639   : > { %v10090_v61 = vmul.f32 %v15967_v49, %v10082_v38  ;;  %v13131_v49 = vpop.eup %13130  ;;  %v10085_v45 = vadd.f32 0.2548296, %v10077_v13  ;;  %v10070_v63 = vadd.f32 -0.28449672, %v10062_v14  ;;  %v10136_v8 = vsub.f32 1.0, %v10128_v12 }
0x163a   : > { %v10091_v40 = vmul.f32 %v15975_v10, %v10083_v32  ;;  %v13133_v25 = vpop.eup %13132  ;;  %v10076_v59 = vmul.f32 %v15990_v22, %v10068_v53  ;;  %v10135_v46 = vsub.f32 1.0, %v10127_v19  ;;  %v10137_v26 = vsub.f32 1.0, %v10129_v55 }
0x163b   : > { %v10130_v60 = vmul.f32 %v13131_v49, %v10090_v61  ;;  %v13135_v42 = vpop.eup %13134  ;;  %v10093_v56 = vmul.f32 %v15981_v21, %v10085_v45  ;;  %v10078_v10 = vmul.f32 %v15992_v37, %v10070_v63  ;;  %v9978_v29 = vsel %vm9970_vm14, 1.0, %v13664_v24 }
0x163c   : > { %v10131_v2 = vmul.f32 %v13133_v25, %v10091_v40  ;;  %v10084_v41 = vadd.f32 0.2548296, %v10076_v59  ;;  %v13137_v15 = vpop.eup %13136  ;;  %v9981_v54 = vsel %vm9973_vm3, 1.0, %v13664_v24  ;;  %v10144_v7 = vmul.f32 %v10136_v8, %v9976_v11 }
0x163d   : > { %v10138_v3 = vsub.f32 1.0, %v10130_v60  ;;  %v10133_v38 = vmul.f32 %v13135_v42, %v10093_v56  ;;  %v10086_v48 = vadd.f32 0.2548296, %v10078_v10  ;;  %v10143_v44 = vmul.f32 %v10135_v46, %v9975_v20 }
0x163e   : > { %v10139_v51 = vsub.f32 1.0, %v10131_v2  ;;  %v10092_v52 = vmul.f32 %v15990_v22, %v10084_v41  ;;  %v9951_v22 = vmul.f32 0.5, %v15900_v1  ;;  %v10145_v47 = vmul.f32 %v10137_v26, %v9977_v35  ;;  %v16386_v41 = vld [vmem:[#allocation55_spill] sm:$0xff] }
0x163f   : > { %v10141_v23 = vsub.f32 1.0, %v10133_v38  ;;  %v10094_v27 = vmul.f32 %v15992_v37, %v10086_v48  ;;  %v13139_v62 = vpop.eup %13138  ;;  %v10146_v57 = vmul.f32 %v10138_v3, %v9978_v29  ;;  %v9952_v36 = vmul.f32 0.5, %v15906_v6 }
0x1640   : > { %v10147_v21 = vmul.f32 %v10139_v51, %v9979_v58  ;;  %v10132_v43 = vmul.f32 %v13137_v15, %v10092_v52  ;;  %v9980_v37 = vsel %vm9972_vm4, 1.0, %v13664_v24  ;;  %v10152_v9 = vadd.f32 1.0, %v10144_v7  ;;  %v16388_v58 = vld [vmem:[#allocation56_spill] sm:$0xff] }
0x1641   : > { %v10149_v30 = vmul.f32 %v10141_v23, %v9981_v54  ;;  %v10134_v61 = vmul.f32 %v13139_v62, %v10094_v27  ;;  %v9982_v13 = vsel %vm9974_vm0, 1.0, %v13664_v24  ;;  %v10151_v4 = vadd.f32 1.0, %v10143_v44 }
0x1642   : > { %v10140_v39 = vsub.f32 1.0, %v10132_v43  ;;  %v10155_v16 = vadd.f32 1.0, %v10147_v21  ;;  %v10154_v20 = vadd.f32 1.0, %v10146_v57  ;;  %v9955_v14 = vmul.f32 0.5, %v15926_v28 }
0x1643   : > { %v10142_v32 = vsub.f32 1.0, %v10134_v61  ;;  %v10157_v33 = vadd.f32 1.0, %v10149_v30  ;;  %v10153_v11 = vadd.f32 1.0, %v10145_v47  ;;  %v9957_v1 = vmul.f32 0.5, %v15932_v50 }
0x1644   : > { %v10148_v0 = vmul.f32 %v10140_v39, %v9980_v37  ;;  %v9956_v12 = vmul.f32 0.5, %v15934_v31  ;;  %v9954_v40 = vmul.f32 0.5, %v15920_v34  ;;  %v10163_v53 = vmul.f32 %v10155_v16, %v9955_v14 }
0x1645   : > { %v10150_v49 = vmul.f32 %v10142_v32, %v9982_v13  ;;  %v9958_v25 = vmul.f32 0.5, %v15936_v17  ;;  %v9953_v60 = vmul.f32 0.5, %v15914_v5  ;;  %v10160_v24 = vmul.f32 %v10152_v9, %v9952_v36 }
0x1646   : > { %v10156_v6 = vadd.f32 1.0, %v10148_v0  ;;  %v10165_v45 = vmul.f32 %v10157_v33, %v9957_v1  ;;  %v10159_v42 = vmul.f32 %v10151_v4, %v9951_v22  ;;  %v10162_v28 = vmul.f32 %v10154_v20, %v9954_v40 }
0x1647   : > { %v10158_v19 = vadd.f32 1.0, %v10150_v49  ;;  %v10161_v55 = vmul.f32 %v10153_v11, %v9953_v60 }
0x1648   : > { %v10164_v63 = vmul.f32 %v10156_v6, %v9956_v12  ;;  %v10199_v50 = vpack.c.bf16 %v10163_v53, %v10159_v42 }
0x1649   : > { %v10166_v35 = vmul.f32 %v10158_v19, %v9958_v25  ;;  %v10201_v31 = vpack.c.bf16 %v10165_v45, %v10161_v55 }
0x164a   : > { %v10200_v2 = vpack.c.bf16 %v10164_v63, %v10160_v24 }
0x164b   : > { %v10202_v59 = vpack.c.bf16 %v10166_v35, %v10162_v28 }
0x164c   : > { %10402 = vmatprep.mubr.bf16.mxu0 %v10200_v2 }
0x164d   : > { %10443 = vmatprep.mubr.bf16.mxu1 %v10202_v59  ;;  %10403 = vmatmul.mubr.bf16.vlgmr.msra.gmra.mxu0 %v10199_v50 }
0x164e   : > { %10444 = vmatmul.mubr.bf16.vlgmr.msra.gmra.mxu1 %v10201_v31 }
0x170d   : > { %v10404_v34 = vpop.f32.mrf.mxu0 }
0x170e   : > { %v10405_v5 = vadd.f32 %v15881_v18, %v10404_v34  ;;  %v10445_v17 = vpop.f32.mrf.mxu1 }
0x170f   : > { %v10406_v56 = vpop.f32.mrf.mxu0 }
0x1710   : > { %v10446_v10 = vadd.f32 %v10445_v17, %v10405_v5  ;;  %v10447_v8 = vpop.f32.mrf.mxu1 }
0x1711   : > { %v10407_v51 = vpop.f32.mrf.mxu0 }
0x1712   : > { %v10452_v46 = vadd.f32 %v10446_v10, %v16386_v41  ;;  %v10408_v3 = vadd.f32 %v15881_v18, %v10407_v51  ;;  %v10448_v38 = vpop.f32.mrf.mxu1 }
0x1713   : > { %v10409_v48 = vpop.f32.mrf.mxu0 }
0x1714   : > { %10454 = vst [vmem:[%s15095_s0 + $0x10] sm:$0xff] %v10452_v46  ;;  %v10449_v26 = vadd.f32 %v10448_v38, %v10408_v3  ;;  %v10450_v29 = vpop.f32.mrf.mxu1 }
0x1716   : > { %v10453_v52 = vadd.f32 %v10449_v26, %v16388_v58 }
0x1718   : > { %10455 = vst [vmem:[%s15095_s0 + $0x18] sm:$0xff] %v10453_v52 }
0x1719   : > { %13545 = shalt.err (!%p13542_p3)
}
0x171a   : > { %s13546_s0 = scalar_lea.hbm %s16054_s16, 512  ;;  %s13550_s2 = scalar_lea.hbm %s16387_s6, 1024 }
0x171b   : > { %p13547_p4 = scmp.ne.s32.totalorder %s16054_s16, %s13546_s0  ;;  %p13551_p7 = scmp.lt.s32.totalorder %s16054_s16, %s16387_s6 }
0x171c   : > { %p13552_p6 = scmp.lt.s32.totalorder %s13550_s2, %s13546_s0 }
0x171d   : > { %p13548_p9 = pnand %p13547_p4, %p16389_p8 }
0x171e   : > { %p13553_p2 = por %p13552_p6, %p13551_p7 }
0x171f   : > { %p13549_p10 = pneg %p13548_p9 }
0x1721   : > { %p13554_p5 = pnand %p13553_p2, %p13549_p10 }
0x1723   : > { %13557 = shalt.err (!%p13554_p5)
}
0x1724   : > { %s13666_s29 = smov 128   ;;  %s13667_s25 = smov 8  }
0x1725   : > { %12524 = dma.vmem_to_hbm [thread:$0]  (%p16389_p8), %s16056_s12, 512, %s16054_s16, %s10457_s3, %s13666_s29, %s13666_s29, %s13667_s25  }
0x1726 PF: > { %s10485_s24 = sand.u32 1, %s13616_s5   ;;  %p16390_p11 = scmp.ne.s32.totalorder %s16234_s19, 0 }
0x1727   : > { %p16391_p12 = scmp.ge.s32.totalorder %s13628_s28, 2  ;;  %s10486_s7 = scalar_lea.sflag [#allocation17], %s10485_s24 }
0x1729   : > { %p12574_p13 = pnand %p16391_p12, %p16390_p11 }
0x172b   : > { %p12575_p0 = pneg %p12574_p13 }
0x172d   : > { %13611 = dma.done.wait (%p12575_p0), %s10486_s7, 512  }
0x172e   : > { %13613 = vsyncadd (%p12575_p0), %s10486_s7, 4294966784  ;;  %p44_p1 = scmp.ge.s32.totalorder %s13975_s4, 4   ;;  %s16392_s5 = smov %s13620_s26 }
0x172f   : > { %s16393_s26 = smov %s13624_s27  ;;  %s16394_s27 = smov %s13986_s30 }
0x1730   : > { %s16395_s28 = smov %s13975_s4  ;;  %46 = sbr.rel (!%p44_p1) target bundleno = 32 (0x20), region = 239 }
0x1735   :  { %10491 = vsyncpa [#allocation16], 1 }
0x1736   :  { %10493 = vsyncpa [#allocation16 + $0x1], 1 }
0x1737   :  { %10494 = vsyncpa [#allocation19], 1 }
0x1738   :  { %10495 = vsyncpa [#allocation22], 1 }
0x1739   :  { %10496 = vsyncpa [#allocation25], 1 }
0x173a   :  { %10497 = vsyncpa [#allocation28], 1 }
0x173b   :  { %10498 = vsyncpa [#allocation31], 1 }
0x173c   :  { %10499 = vsyncpa [#allocation34], 1 }
0x173d   :  { %10500 = vsyncpa [#allocation37], 1 }
0x173e   :  { %10501 = vsyncpa [#allocation17], 1 }
0x173f   :  { %10503 = vsyncpa [#allocation17 + $0x1], 1 }

</bundles_post_ra>
